<compile_context>
chip_gen: v7x
topology: tpu7x:2x2x1
jax: 0.10.0
libtpu: 0.0.40
codegen_flags: <defaults>
</compile_context>

<pallas_src>
import math
from functools import partial

import jax
import jax.numpy as jnp
from jax.experimental import pallas as pl
from jax.experimental.pallas import tpu as pltpu


def mha_kernel(lengths_ref, x_ref, wqkv_ref, wp_ref, bp_ref, o_ref,
               *, num_heads, head_size, block_b):
    # lengths_ref: SMEM (B,) int32 scalar-prefetch -- valid key length per batch.
    # x_ref:    (block_b, T, C)  f32   (cast to bf16 in-kernel)
    # wqkv_ref: (C, 3D)          bf16, fused [Wq | Wk | Wv]
    # wp_ref:   (D, C)           bf16
    # bp_ref:   (1, C)           f32
    # o_ref:    (block_b, T, C)
    Bt, T, C = x_ref.shape
    D = num_heads * head_size
    scale = 1.0 / math.sqrt(head_size)
    neg = jnp.float32(-1e30)                       # stand-in for -inf bias (keep f32)
    b0 = pl.program_id(0) * block_b

    # Fused QKV projection with batch folded into the MXU M dimension.
    # f32 -> bf16 cast happens here on the VPU (no extra HBM pass in wrapper).
    x2 = x_ref[...].reshape(Bt * T, C).astype(jnp.bfloat16)
    qkv = jnp.dot(x2, wqkv_ref[...], preferred_element_type=jnp.float32)  # (Bt*T, 3D)
    qkv = qkv.astype(jnp.bfloat16)                 # single cast; sliced bf16 below

    # Key-padding mask built once per grid step (reused by every head).
    iota_k = jax.lax.broadcasted_iota(jnp.int32, (1, 1, T), 2)
    keep = jnp.concatenate(
        [(iota_k < lengths_ref[b0 + i]).astype(jnp.float32) for i in range(Bt)],
        axis=0)                                    # (Bt, 1, T): 1.0 keep / 0.0 mask

    # Output projection fused per head into a lane-dense (Bt*T, C) accumulator.
    proj = jnp.broadcast_to(bp_ref[...], (Bt * T, C)).astype(jnp.float32)

    for h in range(num_heads):                     # short static loop over heads
        s = h * head_size
        qh = qkv[:, 0 * D + s: 0 * D + s + head_size].reshape(Bt, T, head_size)
        kh = qkv[:, 1 * D + s: 1 * D + s + head_size].reshape(Bt, T, head_size)
        vh = qkv[:, 2 * D + s: 2 * D + s + head_size].reshape(Bt, T, head_size)

        # Batched over the batch dim (single leading dot_general batch dim).
        scores = jnp.einsum("bqd,bkd->bqk", qh, kh,
                            preferred_element_type=jnp.float32) * scale   # (Bt,T,T)
        scores = jnp.where(keep > 0.0, scores, neg)    # key-padding mask semantics
        m = jnp.max(scores, axis=-1, keepdims=True)
        p = jnp.exp(scores - m)
        denom = jnp.sum(p, axis=-1, keepdims=True)
        attn = p * pl.reciprocal(denom, approx=True)
        # TODO(synk): attention-dropout / output-dropout omitted (eval mode).
        out_h = jnp.einsum("bqk,bkd->bqd", attn.astype(jnp.bfloat16), vh,
                           preferred_element_type=jnp.float32)            # (Bt,T,hs)

        # Fused projection: head h contributes rows [s, s+hs) of Wp.  This keeps
        # stores C-wide (lane-dense) and removes the f32 att slab + extra pass.
        proj += jnp.dot(out_h.reshape(Bt * T, head_size).astype(jnp.bfloat16),
                        wp_ref[s:s + head_size, :],
                        preferred_element_type=jnp.float32)

    o_ref[...] = proj.reshape(Bt, T, C).astype(o_ref.dtype)


def _tpu_vmem_and_cores():
    """(physical VMEM bytes per TensorCore, TensorCores per chip)."""
    kind = ""
    try:
        kind = (jax.devices()[0].device_kind or "").lower()
    except Exception:
        pass
    if "v7" in kind or "tpu7" in kind:
        return 64 * 1024 * 1024, 2          # v7x: 64 MiB / TC, 2 TCs
    return 128 * 1024 * 1024, 1             # v5e / v6e: 128 MiB, 1 TC


def _step_vmem_bytes(block_b, T, C, D, weight_bufs):
    """Rough per-grid-step VMEM footprint estimate."""
    m = block_b * T
    io = 2 * (2 * m * C * 4)                          # x + out blocks, double-buffered f32
    wts = weight_bufs * (C * 3 * D * 2 + D * C * 2 + C * 4)
    tmp = m * 3 * D * 2                               # bf16 qkv
    tmp += m * C * 4                                  # f32 projection accumulator
    tmp += 3 * block_b * T * T * 4                    # scores / p / attn (per head, live)
    tmp += 2 * m * max(C, 3 * D) * 4                  # cast / reshape headroom
    return io + wts + tmp


def multi_head_attention(x, lengths, wq, wk, wv, wp, bp,
                         *, num_heads, head_size, block_b=None):
    """x: (B, T, C) f32; lengths: (B,) int32 valid key lengths (key-padding mask)."""
    B, T, C = x.shape
    D = num_heads * head_size
    assert C == D == wq.shape[0]

    vmem_bytes, num_tc = _tpu_vmem_and_cores()
    budget = int(vmem_bytes * 0.45)

    if block_b is None:
        # Largest block that fits the VMEM budget -> a single grid step on
        # single-TC chips (v5e/v6e), which maximizes the MXU M dimension.
        block_b = 1
        for cand in range(B, 0, -1):
            if B % cand == 0 and _step_vmem_bytes(cand, T, C, D, 1) <= budget:
                block_b = cand
                break
        # On 2-TC chips (v7x), split into two "parallel" steps only when each
        # half still feeds the MXU with >= 256 rows AND fits VMEM on its own.
        if (num_tc >= 2 and block_b == B and B % 2 == 0
                and (B // 2) * T >= 256
                and _step_vmem_bytes(B // 2, T, C, D, 1) <= budget):
            block_b = B // 2
    while B % block_b:
        block_b -= 1
    grid_b = B // block_b

    est = _step_vmem_bytes(block_b, T, C, D, 2)       # conservative (double-buf fallback)
    vmem_limit = int(min(max(2 * est, 32 * 1024 * 1024), 0.9 * vmem_bytes))

    # Fuse QKV weights wrapper-side; matmul weights in bf16, x stays f32 (cast in-kernel).
    wqkv = jnp.concatenate([wq, wk, wv], axis=1).astype(jnp.bfloat16)   # (C, 3D)
    wp_b = wp.astype(jnp.bfloat16)
    bp2 = bp.reshape(1, C).astype(jnp.float32)
    lengths = lengths.astype(jnp.int32)

    kernel = partial(mha_kernel, num_heads=num_heads, head_size=head_size,
                     block_b=block_b)

    def _call(single_buffer_weights):
        wkw = {"pipeline_mode": pl.Buffered(1)} if single_buffer_weights else {}
        grid_spec = pltpu.PrefetchScalarGridSpec(
            num_scalar_prefetch=1,
            grid=(grid_b,),
            in_specs=[
                pl.BlockSpec((block_b, T, C), lambda g, lens: (g, 0, 0)),       # x
                pl.BlockSpec((C, 3 * D), lambda g, lens: (0, 0), **wkw),        # Wqkv
                pl.BlockSpec((D, C), lambda g, lens: (0, 0), **wkw),            # Wproj
                pl.BlockSpec((1, C), lambda g, lens: (0, 0), **wkw),            # bproj
            ],
            out_specs=pl.BlockSpec((block_b, T, C), lambda g, lens: (g, 0, 0)),
        )
        return pl.pallas_call(
            kernel,
            out_shape=jax.ShapeDtypeStruct((B, T, C), x.dtype),
            grid_spec=grid_spec,
            compiler_params=pltpu.CompilerParams(
                dimension_semantics=("parallel",),
                vmem_limit_bytes=vmem_limit),
        )(lengths, x, wqkv, wp_b, bp2)

    try:
        # Grid-invariant weights: single-buffered (they are fetched once).
        return _call(True)
    except Exception:
        # pipeline_mode / Buffered(1) not supported on this jax build -> default.
        return _call(False)


def reference(x, mask, wq, wk, wv, wp, bp, num_heads, head_size):
    """Pure-JAX f32 reference mirroring the PyTorch forward (eval mode)."""
    B, T, C = x.shape
    q = x @ wq
    k = x @ wk
    v = x @ wv
    qh = q.reshape(B, T, num_heads, head_size)
    kh = k.reshape(B, T, num_heads, head_size)
    vh = v.reshape(B, T, num_heads, head_size)
    scores = jnp.einsum("bthd,bshd->bhts", qh, kh) / math.sqrt(head_size)
    key_keep = mask.astype(bool)[:, None, None, :]            # (B,1,1,T)
    scores = jnp.where(key_keep, scores, jnp.float32(-1e30))
    attn = jax.nn.softmax(scores, axis=-1)
    out = jnp.einsum("bhts,bshd->bthd", attn, vh).reshape(B, T, C)
    return out @ wp + bp


if __name__ == "__main__":
    # Small shapes consistent with the module: C = num_heads * head_size = n_embd = 384.
    B, T = 2, 16
    num_heads, head_size = 6, 64
    C = num_heads * head_size

    key = jax.random.PRNGKey(0)
    kx, kq, kk, kv, kp, kb = jax.random.split(key, 6)

    x = jax.random.normal(kx, (B, T, C), dtype=jnp.float32)
    # key-position mask: batch 0 attends to all 16 keys, batch 1 only first 12
    lengths = jnp.array([T, 12], dtype=jnp.int32)
    mask = (jnp.arange(T)[None, :] < lengths[:, None])

    scale = 0.05
    wq = scale * jax.random.normal(kq, (C, C), dtype=jnp.float32)
    wk = scale * jax.random.normal(kk, (C, C), dtype=jnp.float32)
    wv = scale * jax.random.normal(kv, (C, C), dtype=jnp.float32)
    wp = scale * jax.random.normal(kp, (C, C), dtype=jnp.float32)
    bp = scale * jax.random.normal(kb, (C,), dtype=jnp.float32)

    out = multi_head_attention(x, lengths, wq, wk, wv, wp, bp,
                               num_heads=num_heads, head_size=head_size)
    out = jax.block_until_ready(out)

    ref = reference(x, mask, wq, wk, wv, wp, bp, num_heads, head_size)
    err = float(jnp.max(jnp.abs(out - ref)))
    assert out.shape == (B, T, C)
    assert bool(jnp.all(jnp.isfinite(out)))
    # bf16 matmul operands + approx reciprocal -> loosened tolerance vs f32 ref.
    assert err < 5e-2, err

    print("KERNEL_OK")
</pallas_src>

<mosaic_0001>
module attributes {stable_mosaic.version = 11 : i64} {
  func.func @mha_kernel(%arg0: i32, %arg1: memref<2xi32, #tpu.memory_space<smem>>, %arg2: memref<2x16x384xf32, #tpu.memory_space<vmem>>, %arg3: memref<384x1152xbf16, #tpu.memory_space<vmem>>, %arg4: memref<384x384xbf16, #tpu.memory_space<vmem>>, %arg5: memref<1x384xf32, #tpu.memory_space<vmem>>, %arg6: memref<2x16x384xf32, #tpu.memory_space<vmem>>) attributes {dimension_semantics = [#tpu.dimension_semantics<parallel>], iteration_bounds = array<i64: 1>, scalar_prefetch = 1 : i64, scratch_operands = 0 : i64, tpu.core_type = #tpu.core_type<tc>, window_params = [{transform_indices = @transform_0, window_bounds = array<i64: 2, 16, 384>}, {pipeline_mode = #tpu.pipeline_mode<synchronous>, transform_indices = @transform_1, window_bounds = array<i64: 384, 1152>}, {pipeline_mode = #tpu.pipeline_mode<synchronous>, transform_indices = @transform_2, window_bounds = array<i64: 384, 384>}, {pipeline_mode = #tpu.pipeline_mode<synchronous>, transform_indices = @transform_3, window_bounds = array<i64: 1, 384>}, {transform_indices = @transform_4, window_bounds = array<i64: 2, 16, 384>}]} {
    %c2_i32 = arith.constant 2 : i32
    %0 = arith.muli %arg0, %c2_i32 : i32
    %c0 = arith.constant 0 : index
    %c0_0 = arith.constant 0 : index
    %c0_1 = arith.constant 0 : index
    %1 = vector.load %arg2[%c0, %c0_0, %c0_1] : memref<2x16x384xf32, #tpu.memory_space<vmem>>, vector<2x16x384xf32>
    %2 = vector.shape_cast %1 : vector<2x16x384xf32> to vector<32x384xf32>
    %3 = arith.truncf %2 : vector<32x384xf32> to vector<32x384xbf16>
    %c0_2 = arith.constant 0 : index
    %c0_3 = arith.constant 0 : index
    %4 = vector.load %arg3[%c0_2, %c0_3] : memref<384x1152xbf16, #tpu.memory_space<vmem>>, vector<384x1152xbf16>
    %cst = arith.constant dense<0.000000e+00> : vector<32x1152xf32>
    %5 = tpu.matmul %3, %4, %cst {dimension_numbers = #tpu.dot_dimension_numbers<[1], [0], [0], [1], [0, 0, 1, 1], [], []>} : vector<32x384xbf16>, vector<384x1152xbf16>, vector<32x1152xf32> -> vector<32x1152xf32>
    %6 = arith.truncf %5 : vector<32x1152xf32> to vector<32x1152xbf16>
    %7 = tpu.iota {dimensions = array<i32: 2>} : vector<1x1x16xi32>
    %c0_i32 = arith.constant 0 : i32
    %8 = arith.addi %0, %c0_i32 : i32
    %9 = arith.index_cast %8 : i32 to index
    %10 = memref.load %arg1[%9] : memref<2xi32, #tpu.memory_space<smem>>
    %11 = vector.broadcast %10 : i32 to vector<1x1x16xi32>
    %12 = arith.cmpi slt, %7, %11 : vector<1x1x16xi32>
    %13 = arith.extui %12 : vector<1x1x16xi1> to vector<1x1x16xi32>
    %14 = arith.sitofp %13 : vector<1x1x16xi32> to vector<1x1x16xf32>
    %c1_i32 = arith.constant 1 : i32
    %15 = arith.addi %0, %c1_i32 : i32
    %16 = arith.index_cast %15 : i32 to index
    %17 = memref.load %arg1[%16] : memref<2xi32, #tpu.memory_space<smem>>
    %18 = vector.broadcast %17 : i32 to vector<1x1x16xi32>
    %19 = arith.cmpi slt, %7, %18 : vector<1x1x16xi32>
    %20 = arith.extui %19 : vector<1x1x16xi1> to vector<1x1x16xi32>
    %21 = arith.sitofp %20 : vector<1x1x16xi32> to vector<1x1x16xf32>
    %22 = tpu.concatenate %14, %21 in 0 : vector<1x1x16xf32>, vector<1x1x16xf32> -> vector<2x1x16xf32>
    %c0_4 = arith.constant 0 : index
    %c0_5 = arith.constant 0 : index
    %23 = vector.load %arg5[%c0_4, %c0_5] : memref<1x384xf32, #tpu.memory_space<vmem>>, vector<1x384xf32>
    %24 = vector.shape_cast %23 : vector<1x384xf32> to vector<1x384xf32>
    %25 = vector.broadcast %24 : vector<1x384xf32> to vector<32x384xf32>
    %26 = vector.extract_strided_slice %6 {offsets = [0, 0], sizes = [32, 64], strides = [1, 1]} : vector<32x1152xbf16> to vector<32x64xbf16>
    %27 = vector.shape_cast %26 : vector<32x64xbf16> to vector<2x16x64xbf16>
    %28 = vector.extract_strided_slice %6 {offsets = [0, 384], sizes = [32, 64], strides = [1, 1]} : vector<32x1152xbf16> to vector<32x64xbf16>
    %29 = vector.shape_cast %28 : vector<32x64xbf16> to vector<2x16x64xbf16>
    %30 = vector.extract_strided_slice %6 {offsets = [0, 768], sizes = [32, 64], strides = [1, 1]} : vector<32x1152xbf16> to vector<32x64xbf16>
    %31 = vector.shape_cast %30 : vector<32x64xbf16> to vector<2x16x64xbf16>
    "tpu.trace_start"() <{level = 10 : i32, message = "bqd,bkd->bqk"}> : () -> ()
    %cst_6 = arith.constant dense<0.000000e+00> : vector<2x16x16xf32>
    %32 = tpu.matmul %27, %29, %cst_6 {dimension_numbers = #tpu.dot_dimension_numbers<[2], [2], [1], [1], [0, 0, 0, 1, 1, 1], [0], [0]>} : vector<2x16x64xbf16>, vector<2x16x64xbf16>, vector<2x16x16xf32> -> vector<2x16x16xf32>
    "tpu.trace_stop"() : () -> ()
    %cst_7 = arith.constant 1.250000e-01 : f32
    %33 = vector.broadcast %cst_7 : f32 to vector<2x16x16xf32>
    %34 = arith.mulf %32, %33 : vector<2x16x16xf32>
    %cst_8 = arith.constant 0.000000e+00 : f32
    %35 = vector.broadcast %cst_8 : f32 to vector<2x1x16xf32>
    %36 = arith.cmpf ogt, %22, %35 : vector<2x1x16xf32>
    %cst_9 = arith.constant -1.000000e+30 : f32
    %37 = vector.shape_cast %36 : vector<2x1x16xi1> to vector<2x1x16xi1>
    %38 = vector.broadcast %37 : vector<2x1x16xi1> to vector<2x16x16xi1>
    %39 = vector.broadcast %cst_9 : f32 to vector<2x16x16xf32>
    %40 = arith.select %38, %34, %39 : vector<2x16x16xi1>, vector<2x16x16xf32>
    %cst_10 = arith.constant dense<0xFF800000> : vector<2x16xf32>
    %41 = vector.multi_reduction <maximumf>, %40, %cst_10 [2] : vector<2x16x16xf32> to vector<2x16xf32>
    %42 = vector.shape_cast %41 : vector<2x16xf32> to vector<2x16x1xf32>
    %43 = vector.broadcast %42 : vector<2x16x1xf32> to vector<2x16x16xf32>
    %44 = arith.subf %40, %43 : vector<2x16x16xf32>
    %45 = math.exp %44 : vector<2x16x16xf32>
    %cst_11 = arith.constant dense<0.000000e+00> : vector<2x16xf32>
    %46 = vector.multi_reduction <add>, %45, %cst_11 [2] : vector<2x16x16xf32> to vector<2x16xf32>
    %47 = vector.shape_cast %46 : vector<2x16xf32> to vector<2x16x1xf32>
    %48 = tpu.reciprocal %47 {approx = true} : vector<2x16x1xf32> -> vector<2x16x1xf32>
    %49 = vector.broadcast %48 : vector<2x16x1xf32> to vector<2x16x16xf32>
    %50 = arith.mulf %45, %49 : vector<2x16x16xf32>
    %51 = arith.truncf %50 : vector<2x16x16xf32> to vector<2x16x16xbf16>
    "tpu.trace_start"() <{level = 10 : i32, message = "bqk,bkd->bqd"}> : () -> ()
    %cst_12 = arith.constant dense<0.000000e+00> : vector<2x16x64xf32>
    %52 = tpu.matmul %51, %31, %cst_12 {dimension_numbers = #tpu.dot_dimension_numbers<[2], [1], [1], [2], [0, 0, 0, 1, 1, 2], [0], [0]>} : vector<2x16x16xbf16>, vector<2x16x64xbf16>, vector<2x16x64xf32> -> vector<2x16x64xf32>
    "tpu.trace_stop"() : () -> ()
    %53 = vector.shape_cast %52 : vector<2x16x64xf32> to vector<32x64xf32>
    %54 = arith.truncf %53 : vector<32x64xf32> to vector<32x64xbf16>
    %c0_13 = arith.constant 0 : index
    %c0_14 = arith.constant 0 : index
    %55 = vector.load %arg4[%c0_13, %c0_14] : memref<384x384xbf16, #tpu.memory_space<vmem>>, vector<64x384xbf16>
    %cst_15 = arith.constant dense<0.000000e+00> : vector<32x384xf32>
    %56 = tpu.matmul %54, %55, %cst_15 {dimension_numbers = #tpu.dot_dimension_numbers<[1], [0], [0], [1], [0, 0, 1, 1], [], []>} : vector<32x64xbf16>, vector<64x384xbf16>, vector<32x384xf32> -> vector<32x384xf32>
    %57 = arith.addf %25, %56 : vector<32x384xf32>
    %58 = vector.extract_strided_slice %6 {offsets = [0, 64], sizes = [32, 64], strides = [1, 1]} : vector<32x1152xbf16> to vector<32x64xbf16>
    %59 = vector.shape_cast %58 : vector<32x64xbf16> to vector<2x16x64xbf16>
    %60 = vector.extract_strided_slice %6 {offsets = [0, 448], sizes = [32, 64], strides = [1, 1]} : vector<32x1152xbf16> to vector<32x64xbf16>
    %61 = vector.shape_cast %60 : vector<32x64xbf16> to vector<2x16x64xbf16>
    %62 = vector.extract_strided_slice %6 {offsets = [0, 832], sizes = [32, 64], strides = [1, 1]} : vector<32x1152xbf16> to vector<32x64xbf16>
    %63 = vector.shape_cast %62 : vector<32x64xbf16> to vector<2x16x64xbf16>
    "tpu.trace_start"() <{level = 10 : i32, message = "bqd,bkd->bqk"}> : () -> ()
    %cst_16 = arith.constant dense<0.000000e+00> : vector<2x16x16xf32>
    %64 = tpu.matmul %59, %61, %cst_16 {dimension_numbers = #tpu.dot_dimension_numbers<[2], [2], [1], [1], [0, 0, 0, 1, 1, 1], [0], [0]>} : vector<2x16x64xbf16>, vector<2x16x64xbf16>, vector<2x16x16xf32> -> vector<2x16x16xf32>
    "tpu.trace_stop"() : () -> ()
    %cst_17 = arith.constant 1.250000e-01 : f32
    %65 = vector.broadcast %cst_17 : f32 to vector<2x16x16xf32>
    %66 = arith.mulf %64, %65 : vector<2x16x16xf32>
    %cst_18 = arith.constant 0.000000e+00 : f32
    %67 = vector.broadcast %cst_18 : f32 to vector<2x1x16xf32>
    %68 = arith.cmpf ogt, %22, %67 : vector<2x1x16xf32>
    %cst_19 = arith.constant -1.000000e+30 : f32
    %69 = vector.shape_cast %68 : vector<2x1x16xi1> to vector<2x1x16xi1>
    %70 = vector.broadcast %69 : vector<2x1x16xi1> to vector<2x16x16xi1>
    %71 = vector.broadcast %cst_19 : f32 to vector<2x16x16xf32>
    %72 = arith.select %70, %66, %71 : vector<2x16x16xi1>, vector<2x16x16xf32>
    %cst_20 = arith.constant dense<0xFF800000> : vector<2x16xf32>
    %73 = vector.multi_reduction <maximumf>, %72, %cst_20 [2] : vector<2x16x16xf32> to vector<2x16xf32>
    %74 = vector.shape_cast %73 : vector<2x16xf32> to vector<2x16x1xf32>
    %75 = vector.broadcast %74 : vector<2x16x1xf32> to vector<2x16x16xf32>
    %76 = arith.subf %72, %75 : vector<2x16x16xf32>
    %77 = math.exp %76 : vector<2x16x16xf32>
    %cst_21 = arith.constant dense<0.000000e+00> : vector<2x16xf32>
    %78 = vector.multi_reduction <add>, %77, %cst_21 [2] : vector<2x16x16xf32> to vector<2x16xf32>
    %79 = vector.shape_cast %78 : vector<2x16xf32> to vector<2x16x1xf32>
    %80 = tpu.reciprocal %79 {approx = true} : vector<2x16x1xf32> -> vector<2x16x1xf32>
    %81 = vector.broadcast %80 : vector<2x16x1xf32> to vector<2x16x16xf32>
    %82 = arith.mulf %77, %81 : vector<2x16x16xf32>
    %83 = arith.truncf %82 : vector<2x16x16xf32> to vector<2x16x16xbf16>
    "tpu.trace_start"() <{level = 10 : i32, message = "bqk,bkd->bqd"}> : () -> ()
    %cst_22 = arith.constant dense<0.000000e+00> : vector<2x16x64xf32>
    %84 = tpu.matmul %83, %63, %cst_22 {dimension_numbers = #tpu.dot_dimension_numbers<[2], [1], [1], [2], [0, 0, 0, 1, 1, 2], [0], [0]>} : vector<2x16x16xbf16>, vector<2x16x64xbf16>, vector<2x16x64xf32> -> vector<2x16x64xf32>
    "tpu.trace_stop"() : () -> ()
    %85 = vector.shape_cast %84 : vector<2x16x64xf32> to vector<32x64xf32>
    %86 = arith.truncf %85 : vector<32x64xf32> to vector<32x64xbf16>
    %c64 = arith.constant 64 : index
    %c0_23 = arith.constant 0 : index
    %87 = vector.load %arg4[%c64, %c0_23] : memref<384x384xbf16, #tpu.memory_space<vmem>>, vector<64x384xbf16>
    %cst_24 = arith.constant dense<0.000000e+00> : vector<32x384xf32>
    %88 = tpu.matmul %86, %87, %cst_24 {dimension_numbers = #tpu.dot_dimension_numbers<[1], [0], [0], [1], [0, 0, 1, 1], [], []>} : vector<32x64xbf16>, vector<64x384xbf16>, vector<32x384xf32> -> vector<32x384xf32>
    %89 = arith.addf %57, %88 : vector<32x384xf32>
    %90 = vector.extract_strided_slice %6 {offsets = [0, 128], sizes = [32, 64], strides = [1, 1]} : vector<32x1152xbf16> to vector<32x64xbf16>
    %91 = vector.shape_cast %90 : vector<32x64xbf16> to vector<2x16x64xbf16>
    %92 = vector.extract_strided_slice %6 {offsets = [0, 512], sizes = [32, 64], strides = [1, 1]} : vector<32x1152xbf16> to vector<32x64xbf16>
    %93 = vector.shape_cast %92 : vector<32x64xbf16> to vector<2x16x64xbf16>
    %94 = vector.extract_strided_slice %6 {offsets = [0, 896], sizes = [32, 64], strides = [1, 1]} : vector<32x1152xbf16> to vector<32x64xbf16>
    %95 = vector.shape_cast %94 : vector<32x64xbf16> to vector<2x16x64xbf16>
    "tpu.trace_start"() <{level = 10 : i32, message = "bqd,bkd->bqk"}> : () -> ()
    %cst_25 = arith.constant dense<0.000000e+00> : vector<2x16x16xf32>
    %96 = tpu.matmul %91, %93, %cst_25 {dimension_numbers = #tpu.dot_dimension_numbers<[2], [2], [1], [1], [0, 0, 0, 1, 1, 1], [0], [0]>} : vector<2x16x64xbf16>, vector<2x16x64xbf16>, vector<2x16x16xf32> -> vector<2x16x16xf32>
    "tpu.trace_stop"() : () -> ()
    %cst_26 = arith.constant 1.250000e-01 : f32
    %97 = vector.broadcast %cst_26 : f32 to vector<2x16x16xf32>
    %98 = arith.mulf %96, %97 : vector<2x16x16xf32>
    %cst_27 = arith.constant 0.000000e+00 : f32
    %99 = vector.broadcast %cst_27 : f32 to vector<2x1x16xf32>
    %100 = arith.cmpf ogt, %22, %99 : vector<2x1x16xf32>
    %cst_28 = arith.constant -1.000000e+30 : f32
    %101 = vector.shape_cast %100 : vector<2x1x16xi1> to vector<2x1x16xi1>
    %102 = vector.broadcast %101 : vector<2x1x16xi1> to vector<2x16x16xi1>
    %103 = vector.broadcast %cst_28 : f32 to vector<2x16x16xf32>
    %104 = arith.select %102, %98, %103 : vector<2x16x16xi1>, vector<2x16x16xf32>
    %cst_29 = arith.constant dense<0xFF800000> : vector<2x16xf32>
    %105 = vector.multi_reduction <maximumf>, %104, %cst_29 [2] : vector<2x16x16xf32> to vector<2x16xf32>
    %106 = vector.shape_cast %105 : vector<2x16xf32> to vector<2x16x1xf32>
    %107 = vector.broadcast %106 : vector<2x16x1xf32> to vector<2x16x16xf32>
    %108 = arith.subf %104, %107 : vector<2x16x16xf32>
    %109 = math.exp %108 : vector<2x16x16xf32>
    %cst_30 = arith.constant dense<0.000000e+00> : vector<2x16xf32>
    %110 = vector.multi_reduction <add>, %109, %cst_30 [2] : vector<2x16x16xf32> to vector<2x16xf32>
    %111 = vector.shape_cast %110 : vector<2x16xf32> to vector<2x16x1xf32>
    %112 = tpu.reciprocal %111 {approx = true} : vector<2x16x1xf32> -> vector<2x16x1xf32>
    %113 = vector.broadcast %112 : vector<2x16x1xf32> to vector<2x16x16xf32>
    %114 = arith.mulf %109, %113 : vector<2x16x16xf32>
    %115 = arith.truncf %114 : vector<2x16x16xf32> to vector<2x16x16xbf16>
    "tpu.trace_start"() <{level = 10 : i32, message = "bqk,bkd->bqd"}> : () -> ()
    %cst_31 = arith.constant dense<0.000000e+00> : vector<2x16x64xf32>
    %116 = tpu.matmul %115, %95, %cst_31 {dimension_numbers = #tpu.dot_dimension_numbers<[2], [1], [1], [2], [0, 0, 0, 1, 1, 2], [0], [0]>} : vector<2x16x16xbf16>, vector<2x16x64xbf16>, vector<2x16x64xf32> -> vector<2x16x64xf32>
    "tpu.trace_stop"() : () -> ()
    %117 = vector.shape_cast %116 : vector<2x16x64xf32> to vector<32x64xf32>
    %118 = arith.truncf %117 : vector<32x64xf32> to vector<32x64xbf16>
    %c128 = arith.constant 128 : index
    %c0_32 = arith.constant 0 : index
    %119 = vector.load %arg4[%c128, %c0_32] : memref<384x384xbf16, #tpu.memory_space<vmem>>, vector<64x384xbf16>
    %cst_33 = arith.constant dense<0.000000e+00> : vector<32x384xf32>
    %120 = tpu.matmul %118, %119, %cst_33 {dimension_numbers = #tpu.dot_dimension_numbers<[1], [0], [0], [1], [0, 0, 1, 1], [], []>} : vector<32x64xbf16>, vector<64x384xbf16>, vector<32x384xf32> -> vector<32x384xf32>
    %121 = arith.addf %89, %120 : vector<32x384xf32>
    %122 = vector.extract_strided_slice %6 {offsets = [0, 192], sizes = [32, 64], strides = [1, 1]} : vector<32x1152xbf16> to vector<32x64xbf16>
    %123 = vector.shape_cast %122 : vector<32x64xbf16> to vector<2x16x64xbf16>
    %124 = vector.extract_strided_slice %6 {offsets = [0, 576], sizes = [32, 64], strides = [1, 1]} : vector<32x1152xbf16> to vector<32x64xbf16>
    %125 = vector.shape_cast %124 : vector<32x64xbf16> to vector<2x16x64xbf16>
    %126 = vector.extract_strided_slice %6 {offsets = [0, 960], sizes = [32, 64], strides = [1, 1]} : vector<32x1152xbf16> to vector<32x64xbf16>
    %127 = vector.shape_cast %126 : vector<32x64xbf16> to vector<2x16x64xbf16>
    "tpu.trace_start"() <{level = 10 : i32, message = "bqd,bkd->bqk"}> : () -> ()
    %cst_34 = arith.constant dense<0.000000e+00> : vector<2x16x16xf32>
    %128 = tpu.matmul %123, %125, %cst_34 {dimension_numbers = #tpu.dot_dimension_numbers<[2], [2], [1], [1], [0, 0, 0, 1, 1, 1], [0], [0]>} : vector<2x16x64xbf16>, vector<2x16x64xbf16>, vector<2x16x16xf32> -> vector<2x16x16xf32>
    "tpu.trace_stop"() : () -> ()
    %cst_35 = arith.constant 1.250000e-01 : f32
    %129 = vector.broadcast %cst_35 : f32 to vector<2x16x16xf32>
    %130 = arith.mulf %128, %129 : vector<2x16x16xf32>
    %cst_36 = arith.constant 0.000000e+00 : f32
    %131 = vector.broadcast %cst_36 : f32 to vector<2x1x16xf32>
    %132 = arith.cmpf ogt, %22, %131 : vector<2x1x16xf32>
    %cst_37 = arith.constant -1.000000e+30 : f32
    %133 = vector.shape_cast %132 : vector<2x1x16xi1> to vector<2x1x16xi1>
    %134 = vector.broadcast %133 : vector<2x1x16xi1> to vector<2x16x16xi1>
    %135 = vector.broadcast %cst_37 : f32 to vector<2x16x16xf32>
    %136 = arith.select %134, %130, %135 : vector<2x16x16xi1>, vector<2x16x16xf32>
    %cst_38 = arith.constant dense<0xFF800000> : vector<2x16xf32>
    %137 = vector.multi_reduction <maximumf>, %136, %cst_38 [2] : vector<2x16x16xf32> to vector<2x16xf32>
    %138 = vector.shape_cast %137 : vector<2x16xf32> to vector<2x16x1xf32>
    %139 = vector.broadcast %138 : vector<2x16x1xf32> to vector<2x16x16xf32>
    %140 = arith.subf %136, %139 : vector<2x16x16xf32>
    %141 = math.exp %140 : vector<2x16x16xf32>
    %cst_39 = arith.constant dense<0.000000e+00> : vector<2x16xf32>
    %142 = vector.multi_reduction <add>, %141, %cst_39 [2] : vector<2x16x16xf32> to vector<2x16xf32>
    %143 = vector.shape_cast %142 : vector<2x16xf32> to vector<2x16x1xf32>
    %144 = tpu.reciprocal %143 {approx = true} : vector<2x16x1xf32> -> vector<2x16x1xf32>
    %145 = vector.broadcast %144 : vector<2x16x1xf32> to vector<2x16x16xf32>
    %146 = arith.mulf %141, %145 : vector<2x16x16xf32>
    %147 = arith.truncf %146 : vector<2x16x16xf32> to vector<2x16x16xbf16>
    "tpu.trace_start"() <{level = 10 : i32, message = "bqk,bkd->bqd"}> : () -> ()
    %cst_40 = arith.constant dense<0.000000e+00> : vector<2x16x64xf32>
    %148 = tpu.matmul %147, %127, %cst_40 {dimension_numbers = #tpu.dot_dimension_numbers<[2], [1], [1], [2], [0, 0, 0, 1, 1, 2], [0], [0]>} : vector<2x16x16xbf16>, vector<2x16x64xbf16>, vector<2x16x64xf32> -> vector<2x16x64xf32>
    "tpu.trace_stop"() : () -> ()
    %149 = vector.shape_cast %148 : vector<2x16x64xf32> to vector<32x64xf32>
    %150 = arith.truncf %149 : vector<32x64xf32> to vector<32x64xbf16>
    %c192 = arith.constant 192 : index
    %c0_41 = arith.constant 0 : index
    %151 = vector.load %arg4[%c192, %c0_41] : memref<384x384xbf16, #tpu.memory_space<vmem>>, vector<64x384xbf16>
    %cst_42 = arith.constant dense<0.000000e+00> : vector<32x384xf32>
    %152 = tpu.matmul %150, %151, %cst_42 {dimension_numbers = #tpu.dot_dimension_numbers<[1], [0], [0], [1], [0, 0, 1, 1], [], []>} : vector<32x64xbf16>, vector<64x384xbf16>, vector<32x384xf32> -> vector<32x384xf32>
    %153 = arith.addf %121, %152 : vector<32x384xf32>
    %154 = vector.extract_strided_slice %6 {offsets = [0, 256], sizes = [32, 64], strides = [1, 1]} : vector<32x1152xbf16> to vector<32x64xbf16>
    %155 = vector.shape_cast %154 : vector<32x64xbf16> to vector<2x16x64xbf16>
    %156 = vector.extract_strided_slice %6 {offsets = [0, 640], sizes = [32, 64], strides = [1, 1]} : vector<32x1152xbf16> to vector<32x64xbf16>
    %157 = vector.shape_cast %156 : vector<32x64xbf16> to vector<2x16x64xbf16>
    %158 = vector.extract_strided_slice %6 {offsets = [0, 1024], sizes = [32, 64], strides = [1, 1]} : vector<32x1152xbf16> to vector<32x64xbf16>
    %159 = vector.shape_cast %158 : vector<32x64xbf16> to vector<2x16x64xbf16>
    "tpu.trace_start"() <{level = 10 : i32, message = "bqd,bkd->bqk"}> : () -> ()
    %cst_43 = arith.constant dense<0.000000e+00> : vector<2x16x16xf32>
    %160 = tpu.matmul %155, %157, %cst_43 {dimension_numbers = #tpu.dot_dimension_numbers<[2], [2], [1], [1], [0, 0, 0, 1, 1, 1], [0], [0]>} : vector<2x16x64xbf16>, vector<2x16x64xbf16>, vector<2x16x16xf32> -> vector<2x16x16xf32>
    "tpu.trace_stop"() : () -> ()
    %cst_44 = arith.constant 1.250000e-01 : f32
    %161 = vector.broadcast %cst_44 : f32 to vector<2x16x16xf32>
    %162 = arith.mulf %160, %161 : vector<2x16x16xf32>
    %cst_45 = arith.constant 0.000000e+00 : f32
    %163 = vector.broadcast %cst_45 : f32 to vector<2x1x16xf32>
    %164 = arith.cmpf ogt, %22, %163 : vector<2x1x16xf32>
    %cst_46 = arith.constant -1.000000e+30 : f32
    %165 = vector.shape_cast %164 : vector<2x1x16xi1> to vector<2x1x16xi1>
    %166 = vector.broadcast %165 : vector<2x1x16xi1> to vector<2x16x16xi1>
    %167 = vector.broadcast %cst_46 : f32 to vector<2x16x16xf32>
    %168 = arith.select %166, %162, %167 : vector<2x16x16xi1>, vector<2x16x16xf32>
    %cst_47 = arith.constant dense<0xFF800000> : vector<2x16xf32>
    %169 = vector.multi_reduction <maximumf>, %168, %cst_47 [2] : vector<2x16x16xf32> to vector<2x16xf32>
    %170 = vector.shape_cast %169 : vector<2x16xf32> to vector<2x16x1xf32>
    %171 = vector.broadcast %170 : vector<2x16x1xf32> to vector<2x16x16xf32>
    %172 = arith.subf %168, %171 : vector<2x16x16xf32>
    %173 = math.exp %172 : vector<2x16x16xf32>
    %cst_48 = arith.constant dense<0.000000e+00> : vector<2x16xf32>
    %174 = vector.multi_reduction <add>, %173, %cst_48 [2] : vector<2x16x16xf32> to vector<2x16xf32>
    %175 = vector.shape_cast %174 : vector<2x16xf32> to vector<2x16x1xf32>
    %176 = tpu.reciprocal %175 {approx = true} : vector<2x16x1xf32> -> vector<2x16x1xf32>
    %177 = vector.broadcast %176 : vector<2x16x1xf32> to vector<2x16x16xf32>
    %178 = arith.mulf %173, %177 : vector<2x16x16xf32>
    %179 = arith.truncf %178 : vector<2x16x16xf32> to vector<2x16x16xbf16>
    "tpu.trace_start"() <{level = 10 : i32, message = "bqk,bkd->bqd"}> : () -> ()
    %cst_49 = arith.constant dense<0.000000e+00> : vector<2x16x64xf32>
    %180 = tpu.matmul %179, %159, %cst_49 {dimension_numbers = #tpu.dot_dimension_numbers<[2], [1], [1], [2], [0, 0, 0, 1, 1, 2], [0], [0]>} : vector<2x16x16xbf16>, vector<2x16x64xbf16>, vector<2x16x64xf32> -> vector<2x16x64xf32>
    "tpu.trace_stop"() : () -> ()
    %181 = vector.shape_cast %180 : vector<2x16x64xf32> to vector<32x64xf32>
    %182 = arith.truncf %181 : vector<32x64xf32> to vector<32x64xbf16>
    %c256 = arith.constant 256 : index
    %c0_50 = arith.constant 0 : index
    %183 = vector.load %arg4[%c256, %c0_50] : memref<384x384xbf16, #tpu.memory_space<vmem>>, vector<64x384xbf16>
    %cst_51 = arith.constant dense<0.000000e+00> : vector<32x384xf32>
    %184 = tpu.matmul %182, %183, %cst_51 {dimension_numbers = #tpu.dot_dimension_numbers<[1], [0], [0], [1], [0, 0, 1, 1], [], []>} : vector<32x64xbf16>, vector<64x384xbf16>, vector<32x384xf32> -> vector<32x384xf32>
    %185 = arith.addf %153, %184 : vector<32x384xf32>
    %186 = vector.extract_strided_slice %6 {offsets = [0, 320], sizes = [32, 64], strides = [1, 1]} : vector<32x1152xbf16> to vector<32x64xbf16>
    %187 = vector.shape_cast %186 : vector<32x64xbf16> to vector<2x16x64xbf16>
    %188 = vector.extract_strided_slice %6 {offsets = [0, 704], sizes = [32, 64], strides = [1, 1]} : vector<32x1152xbf16> to vector<32x64xbf16>
    %189 = vector.shape_cast %188 : vector<32x64xbf16> to vector<2x16x64xbf16>
    %190 = vector.extract_strided_slice %6 {offsets = [0, 1088], sizes = [32, 64], strides = [1, 1]} : vector<32x1152xbf16> to vector<32x64xbf16>
    %191 = vector.shape_cast %190 : vector<32x64xbf16> to vector<2x16x64xbf16>
    "tpu.trace_start"() <{level = 10 : i32, message = "bqd,bkd->bqk"}> : () -> ()
    %cst_52 = arith.constant dense<0.000000e+00> : vector<2x16x16xf32>
    %192 = tpu.matmul %187, %189, %cst_52 {dimension_numbers = #tpu.dot_dimension_numbers<[2], [2], [1], [1], [0, 0, 0, 1, 1, 1], [0], [0]>} : vector<2x16x64xbf16>, vector<2x16x64xbf16>, vector<2x16x16xf32> -> vector<2x16x16xf32>
    "tpu.trace_stop"() : () -> ()
    %cst_53 = arith.constant 1.250000e-01 : f32
    %193 = vector.broadcast %cst_53 : f32 to vector<2x16x16xf32>
    %194 = arith.mulf %192, %193 : vector<2x16x16xf32>
    %cst_54 = arith.constant 0.000000e+00 : f32
    %195 = vector.broadcast %cst_54 : f32 to vector<2x1x16xf32>
    %196 = arith.cmpf ogt, %22, %195 : vector<2x1x16xf32>
    %cst_55 = arith.constant -1.000000e+30 : f32
    %197 = vector.shape_cast %196 : vector<2x1x16xi1> to vector<2x1x16xi1>
    %198 = vector.broadcast %197 : vector<2x1x16xi1> to vector<2x16x16xi1>
    %199 = vector.broadcast %cst_55 : f32 to vector<2x16x16xf32>
    %200 = arith.select %198, %194, %199 : vector<2x16x16xi1>, vector<2x16x16xf32>
    %cst_56 = arith.constant dense<0xFF800000> : vector<2x16xf32>
    %201 = vector.multi_reduction <maximumf>, %200, %cst_56 [2] : vector<2x16x16xf32> to vector<2x16xf32>
    %202 = vector.shape_cast %201 : vector<2x16xf32> to vector<2x16x1xf32>
    %203 = vector.broadcast %202 : vector<2x16x1xf32> to vector<2x16x16xf32>
    %204 = arith.subf %200, %203 : vector<2x16x16xf32>
    %205 = math.exp %204 : vector<2x16x16xf32>
    %cst_57 = arith.constant dense<0.000000e+00> : vector<2x16xf32>
    %206 = vector.multi_reduction <add>, %205, %cst_57 [2] : vector<2x16x16xf32> to vector<2x16xf32>
    %207 = vector.shape_cast %206 : vector<2x16xf32> to vector<2x16x1xf32>
    %208 = tpu.reciprocal %207 {approx = true} : vector<2x16x1xf32> -> vector<2x16x1xf32>
    %209 = vector.broadcast %208 : vector<2x16x1xf32> to vector<2x16x16xf32>
    %210 = arith.mulf %205, %209 : vector<2x16x16xf32>
    %211 = arith.truncf %210 : vector<2x16x16xf32> to vector<2x16x16xbf16>
    "tpu.trace_start"() <{level = 10 : i32, message = "bqk,bkd->bqd"}> : () -> ()
    %cst_58 = arith.constant dense<0.000000e+00> : vector<2x16x64xf32>
    %212 = tpu.matmul %211, %191, %cst_58 {dimension_numbers = #tpu.dot_dimension_numbers<[2], [1], [1], [2], [0, 0, 0, 1, 1, 2], [0], [0]>} : vector<2x16x16xbf16>, vector<2x16x64xbf16>, vector<2x16x64xf32> -> vector<2x16x64xf32>
    "tpu.trace_stop"() : () -> ()
    %213 = vector.shape_cast %212 : vector<2x16x64xf32> to vector<32x64xf32>
    %214 = arith.truncf %213 : vector<32x64xf32> to vector<32x64xbf16>
    %c320 = arith.constant 320 : index
    %c0_59 = arith.constant 0 : index
    %215 = vector.load %arg4[%c320, %c0_59] : memref<384x384xbf16, #tpu.memory_space<vmem>>, vector<64x384xbf16>
    %cst_60 = arith.constant dense<0.000000e+00> : vector<32x384xf32>
    %216 = tpu.matmul %214, %215, %cst_60 {dimension_numbers = #tpu.dot_dimension_numbers<[1], [0], [0], [1], [0, 0, 1, 1], [], []>} : vector<32x64xbf16>, vector<64x384xbf16>, vector<32x384xf32> -> vector<32x384xf32>
    %217 = arith.addf %185, %216 : vector<32x384xf32>
    %218 = vector.shape_cast %217 : vector<32x384xf32> to vector<2x16x384xf32>
    %c0_61 = arith.constant 0 : index
    %c0_62 = arith.constant 0 : index
    %c0_63 = arith.constant 0 : index
    %219 = vector.load %arg6[%c0_61, %c0_62, %c0_63] : memref<2x16x384xf32, #tpu.memory_space<vmem>>, vector<2x16x384xf32>
    tpu.vector_store %arg6[%c0_61, %c0_62, %c0_63], %218 {strides = array<i32>} : memref<2x16x384xf32, #tpu.memory_space<vmem>>, vector<2x16x384xf32>,
    return
  }
  func.func @transform_0(%arg0: i32, %arg1: memref<2xi32, #tpu.memory_space<smem>>) -> (i32, i32, i32) {
    %c0_i32 = arith.constant 0 : i32
    %c0_i32_0 = arith.constant 0 : i32
    %c0_i32_1 = arith.constant 0 : i32
    return %arg0, %c0_i32, %c0_i32_0 : i32, i32, i32
  }
  func.func @transform_1(%arg0: i32, %arg1: memref<2xi32, #tpu.memory_space<smem>>) -> (i32, i32) {
    %c0_i32 = arith.constant 0 : i32
    %c0_i32_0 = arith.constant 0 : i32
    %c0_i32_1 = arith.constant 0 : i32
    return %c0_i32, %c0_i32_0 : i32, i32
  }
  func.func @transform_2(%arg0: i32, %arg1: memref<2xi32, #tpu.memory_space<smem>>) -> (i32, i32) {
    %c0_i32 = arith.constant 0 : i32
    %c0_i32_0 = arith.constant 0 : i32
    %c0_i32_1 = arith.constant 0 : i32
    return %c0_i32, %c0_i32_0 : i32, i32
  }
  func.func @transform_3(%arg0: i32, %arg1: memref<2xi32, #tpu.memory_space<smem>>) -> (i32, i32) {
    %c0_i32 = arith.constant 0 : i32
    %c0_i32_0 = arith.constant 0 : i32
    %c0_i32_1 = arith.constant 0 : i32
    return %c0_i32, %c0_i32_0 : i32, i32
  }
  func.func @transform_4(%arg0: i32, %arg1: memref<2xi32, #tpu.memory_space<smem>>) -> (i32, i32, i32) {
    %c0_i32 = arith.constant 0 : i32
    %c0_i32_0 = arith.constant 0 : i32
    %c0_i32_1 = arith.constant 0 : i32
    return %arg0, %c0_i32, %c0_i32_0 : i32, i32, i32
  }
}

module attributes {stable_mosaic.version = 11 : i64} {
  func.func @mha_kernel(%arg0: i32, %arg1: memref<2xi32, #tpu.memory_space<smem>>, %arg2: memref<2x16x384xf32, #tpu.memory_space<vmem>>, %arg3: memref<384x1152xbf16, #tpu.memory_space<vmem>>, %arg4: memref<384x384xbf16, #tpu.memory_space<vmem>>, %arg5: memref<1x384xf32, #tpu.memory_space<vmem>>, %arg6: memref<2x16x384xf32, #tpu.memory_space<vmem>>) attributes {dimension_semantics = [#tpu.dimension_semantics<parallel>], iteration_bounds = array<i64: 1>, scalar_prefetch = 1 : i64, scratch_operands = 0 : i64, tpu.core_type = #tpu.core_type<tc>, window_params = [{transform_indices = @transform_0, window_bounds = array<i64: 2, 16, 384>}, {pipeline_mode = #tpu.pipeline_mode<synchronous>, transform_indices = @transform_1, window_bounds = array<i64: 384, 1152>}, {pipeline_mode = #tpu.pipeline_mode<synchronous>, transform_indices = @transform_2, window_bounds = array<i64: 384, 384>}, {pipeline_mode = #tpu.pipeline_mode<synchronous>, transform_indices = @transform_3, window_bounds = array<i64: 1, 384>}, {transform_indices = @transform_4, window_bounds = array<i64: 2, 16, 384>}]} {
    %c2_i32 = arith.constant 2 : i32
    %0 = arith.muli %arg0, %c2_i32 : i32
    %c0 = arith.constant 0 : index
    %c0_0 = arith.constant 0 : index
    %c0_1 = arith.constant 0 : index
    %1 = vector.load %arg2[%c0, %c0_0, %c0_1] : memref<2x16x384xf32, #tpu.memory_space<vmem>>, vector<2x16x384xf32>
    %2 = vector.shape_cast %1 : vector<2x16x384xf32> to vector<32x384xf32>
    %3 = arith.truncf %2 : vector<32x384xf32> to vector<32x384xbf16>
    %c0_2 = arith.constant 0 : index
    %c0_3 = arith.constant 0 : index
    %4 = vector.load %arg3[%c0_2, %c0_3] : memref<384x1152xbf16, #tpu.memory_space<vmem>>, vector<384x1152xbf16>
    %cst = arith.constant dense<0.000000e+00> : vector<32x1152xf32>
    %5 = tpu.matmul %3, %4, %cst {dimension_numbers = #tpu.dot_dimension_numbers<[1], [0], [0], [1], [0, 0, 1, 1], [], []>} : vector<32x384xbf16>, vector<384x1152xbf16>, vector<32x1152xf32> -> vector<32x1152xf32>
    %6 = arith.truncf %5 : vector<32x1152xf32> to vector<32x1152xbf16>
    %7 = tpu.iota {dimensions = array<i32: 2>} : vector<1x1x16xi32>
    %c0_i32 = arith.constant 0 : i32
    %8 = arith.addi %0, %c0_i32 : i32
    %9 = arith.index_cast %8 : i32 to index
    %10 = memref.load %arg1[%9] : memref<2xi32, #tpu.memory_space<smem>>
    %11 = vector.broadcast %10 : i32 to vector<1x1x16xi32>
    %12 = arith.cmpi slt, %7, %11 : vector<1x1x16xi32>
    %13 = arith.extui %12 : vector<1x1x16xi1> to vector<1x1x16xi32>
    %14 = arith.sitofp %13 : vector<1x1x16xi32> to vector<1x1x16xf32>
    %c1_i32 = arith.constant 1 : i32
    %15 = arith.addi %0, %c1_i32 : i32
    %16 = arith.index_cast %15 : i32 to index
    %17 = memref.load %arg1[%16] : memref<2xi32, #tpu.memory_space<smem>>
    %18 = vector.broadcast %17 : i32 to vector<1x1x16xi32>
    %19 = arith.cmpi slt, %7, %18 : vector<1x1x16xi32>
    %20 = arith.extui %19 : vector<1x1x16xi1> to vector<1x1x16xi32>
    %21 = arith.sitofp %20 : vector<1x1x16xi32> to vector<1x1x16xf32>
    %22 = tpu.concatenate %14, %21 in 0 : vector<1x1x16xf32>, vector<1x1x16xf32> -> vector<2x1x16xf32>
    %c0_4 = arith.constant 0 : index
    %c0_5 = arith.constant 0 : index
    %23 = vector.load %arg5[%c0_4, %c0_5] : memref<1x384xf32, #tpu.memory_space<vmem>>, vector<1x384xf32>
    %24 = vector.shape_cast %23 : vector<1x384xf32> to vector<1x384xf32>
    %25 = vector.broadcast %24 : vector<1x384xf32> to vector<32x384xf32>
    %26 = vector.extract_strided_slice %6 {offsets = [0, 0], sizes = [32, 64], strides = [1, 1]} : vector<32x1152xbf16> to vector<32x64xbf16>
    %27 = vector.shape_cast %26 : vector<32x64xbf16> to vector<2x16x64xbf16>
    %28 = vector.extract_strided_slice %6 {offsets = [0, 384], sizes = [32, 64], strides = [1, 1]} : vector<32x1152xbf16> to vector<32x64xbf16>
    %29 = vector.shape_cast %28 : vector<32x64xbf16> to vector<2x16x64xbf16>
    %30 = vector.extract_strided_slice %6 {offsets = [0, 768], sizes = [32, 64], strides = [1, 1]} : vector<32x1152xbf16> to vector<32x64xbf16>
    %31 = vector.shape_cast %30 : vector<32x64xbf16> to vector<2x16x64xbf16>
    "tpu.trace_start"() <{level = 10 : i32, message = "bqd,bkd->bqk"}> : () -> ()
    %cst_6 = arith.constant dense<0.000000e+00> : vector<2x16x16xf32>
    %32 = tpu.matmul %27, %29, %cst_6 {dimension_numbers = #tpu.dot_dimension_numbers<[2], [2], [1], [1], [0, 0, 0, 1, 1, 1], [0], [0]>} : vector<2x16x64xbf16>, vector<2x16x64xbf16>, vector<2x16x16xf32> -> vector<2x16x16xf32>
    "tpu.trace_stop"() : () -> ()
    %cst_7 = arith.constant 1.250000e-01 : f32
    %33 = vector.broadcast %cst_7 : f32 to vector<2x16x16xf32>
    %34 = arith.mulf %32, %33 : vector<2x16x16xf32>
    %cst_8 = arith.constant 0.000000e+00 : f32
    %35 = vector.broadcast %cst_8 : f32 to vector<2x1x16xf32>
    %36 = arith.cmpf ogt, %22, %35 : vector<2x1x16xf32>
    %cst_9 = arith.constant -1.000000e+30 : f32
    %37 = vector.shape_cast %36 : vector<2x1x16xi1> to vector<2x1x16xi1>
    %38 = vector.broadcast %37 : vector<2x1x16xi1> to vector<2x16x16xi1>
    %39 = vector.broadcast %cst_9 : f32 to vector<2x16x16xf32>
    %40 = arith.select %38, %34, %39 : vector<2x16x16xi1>, vector<2x16x16xf32>
    %cst_10 = arith.constant dense<0xFF800000> : vector<2x16xf32>
    %41 = vector.multi_reduction <maximumf>, %40, %cst_10 [2] : vector<2x16x16xf32> to vector<2x16xf32>
    %42 = vector.shape_cast %41 : vector<2x16xf32> to vector<2x16x1xf32>
    %43 = vector.broadcast %42 : vector<2x16x1xf32> to vector<2x16x16xf32>
    %44 = arith.subf %40, %43 : vector<2x16x16xf32>
    %45 = math.exp %44 : vector<2x16x16xf32>
    %cst_11 = arith.constant dense<0.000000e+00> : vector<2x16xf32>
    %46 = vector.multi_reduction <add>, %45, %cst_11 [2] : vector<2x16x16xf32> to vector<2x16xf32>
    %47 = vector.shape_cast %46 : vector<2x16xf32> to vector<2x16x1xf32>
    %48 = tpu.reciprocal %47 {approx = true} : vector<2x16x1xf32> -> vector<2x16x1xf32>
    %49 = vector.broadcast %48 : vector<2x16x1xf32> to vector<2x16x16xf32>
    %50 = arith.mulf %45, %49 : vector<2x16x16xf32>
    %51 = arith.truncf %50 : vector<2x16x16xf32> to vector<2x16x16xbf16>
    "tpu.trace_start"() <{level = 10 : i32, message = "bqk,bkd->bqd"}> : () -> ()
    %cst_12 = arith.constant dense<0.000000e+00> : vector<2x16x64xf32>
    %52 = tpu.matmul %51, %31, %cst_12 {dimension_numbers = #tpu.dot_dimension_numbers<[2], [1], [1], [2], [0, 0, 0, 1, 1, 2], [0], [0]>} : vector<2x16x16xbf16>, vector<2x16x64xbf16>, vector<2x16x64xf32> -> vector<2x16x64xf32>
    "tpu.trace_stop"() : () -> ()
    %53 = vector.shape_cast %52 : vector<2x16x64xf32> to vector<32x64xf32>
    %54 = arith.truncf %53 : vector<32x64xf32> to vector<32x64xbf16>
    %c0_13 = arith.constant 0 : index
    %c0_14 = arith.constant 0 : index
    %55 = vector.load %arg4[%c0_13, %c0_14] : memref<384x384xbf16, #tpu.memory_space<vmem>>, vector<64x384xbf16>
    %cst_15 = arith.constant dense<0.000000e+00> : vector<32x384xf32>
    %56 = tpu.matmul %54, %55, %cst_15 {dimension_numbers = #tpu.dot_dimension_numbers<[1], [0], [0], [1], [0, 0, 1, 1], [], []>} : vector<32x64xbf16>, vector<64x384xbf16>, vector<32x384xf32> -> vector<32x384xf32>
    %57 = arith.addf %25, %56 : vector<32x384xf32>
    %58 = vector.extract_strided_slice %6 {offsets = [0, 64], sizes = [32, 64], strides = [1, 1]} : vector<32x1152xbf16> to vector<32x64xbf16>
    %59 = vector.shape_cast %58 : vector<32x64xbf16> to vector<2x16x64xbf16>
    %60 = vector.extract_strided_slice %6 {offsets = [0, 448], sizes = [32, 64], strides = [1, 1]} : vector<32x1152xbf16> to vector<32x64xbf16>
    %61 = vector.shape_cast %60 : vector<32x64xbf16> to vector<2x16x64xbf16>
    %62 = vector.extract_strided_slice %6 {offsets = [0, 832], sizes = [32, 64], strides = [1, 1]} : vector<32x1152xbf16> to vector<32x64xbf16>
    %63 = vector.shape_cast %62 : vector<32x64xbf16> to vector<2x16x64xbf16>
    "tpu.trace_start"() <{level = 10 : i32, message = "bqd,bkd->bqk"}> : () -> ()
    %cst_16 = arith.constant dense<0.000000e+00> : vector<2x16x16xf32>
    %64 = tpu.matmul %59, %61, %cst_16 {dimension_numbers = #tpu.dot_dimension_numbers<[2], [2], [1], [1], [0, 0, 0, 1, 1, 1], [0], [0]>} : vector<2x16x64xbf16>, vector<2x16x64xbf16>, vector<2x16x16xf32> -> vector<2x16x16xf32>
    "tpu.trace_stop"() : () -> ()
    %cst_17 = arith.constant 1.250000e-01 : f32
    %65 = vector.broadcast %cst_17 : f32 to vector<2x16x16xf32>
    %66 = arith.mulf %64, %65 : vector<2x16x16xf32>
    %cst_18 = arith.constant 0.000000e+00 : f32
    %67 = vector.broadcast %cst_18 : f32 to vector<2x1x16xf32>
    %68 = arith.cmpf ogt, %22, %67 : vector<2x1x16xf32>
    %cst_19 = arith.constant -1.000000e+30 : f32
    %69 = vector.shape_cast %68 : vector<2x1x16xi1> to vector<2x1x16xi1>
    %70 = vector.broadcast %69 : vector<2x1x16xi1> to vector<2x16x16xi1>
    %71 = vector.broadcast %cst_19 : f32 to vector<2x16x16xf32>
    %72 = arith.select %70, %66, %71 : vector<2x16x16xi1>, vector<2x16x16xf32>
    %cst_20 = arith.constant dense<0xFF800000> : vector<2x16xf32>
    %73 = vector.multi_reduction <maximumf>, %72, %cst_20 [2] : vector<2x16x16xf32> to vector<2x16xf32>
    %74 = vector.shape_cast %73 : vector<2x16xf32> to vector<2x16x1xf32>
    %75 = vector.broadcast %74 : vector<2x16x1xf32> to vector<2x16x16xf32>
    %76 = arith.subf %72, %75 : vector<2x16x16xf32>
    %77 = math.exp %76 : vector<2x16x16xf32>
    %cst_21 = arith.constant dense<0.000000e+00> : vector<2x16xf32>
    %78 = vector.multi_reduction <add>, %77, %cst_21 [2] : vector<2x16x16xf32> to vector<2x16xf32>
    %79 = vector.shape_cast %78 : vector<2x16xf32> to vector<2x16x1xf32>
    %80 = tpu.reciprocal %79 {approx = true} : vector<2x16x1xf32> -> vector<2x16x1xf32>
    %81 = vector.broadcast %80 : vector<2x16x1xf32> to vector<2x16x16xf32>
    %82 = arith.mulf %77, %81 : vector<2x16x16xf32>
    %83 = arith.truncf %82 : vector<2x16x16xf32> to vector<2x16x16xbf16>
    "tpu.trace_start"() <{level = 10 : i32, message = "bqk,bkd->bqd"}> : () -> ()
    %cst_22 = arith.constant dense<0.000000e+00> : vector<2x16x64xf32>
    %84 = tpu.matmul %83, %63, %cst_22 {dimension_numbers = #tpu.dot_dimension_numbers<[2], [1], [1], [2], [0, 0, 0, 1, 1, 2], [0], [0]>} : vector<2x16x16xbf16>, vector<2x16x64xbf16>, vector<2x16x64xf32> -> vector<2x16x64xf32>
    "tpu.trace_stop"() : () -> ()
    %85 = vector.shape_cast %84 : vector<2x16x64xf32> to vector<32x64xf32>
    %86 = arith.truncf %85 : vector<32x64xf32> to vector<32x64xbf16>
    %c64 = arith.constant 64 : index
    %c0_23 = arith.constant 0 : index
    %87 = vector.load %arg4[%c64, %c0_23] : memref<384x384xbf16, #tpu.memory_space<vmem>>, vector<64x384xbf16>
    %cst_24 = arith.constant dense<0.000000e+00> : vector<32x384xf32>
    %88 = tpu.matmul %86, %87, %cst_24 {dimension_numbers = #tpu.dot_dimension_numbers<[1], [0], [0], [1], [0, 0, 1, 1], [], []>} : vector<32x64xbf16>, vector<64x384xbf16>, vector<32x384xf32> -> vector<32x384xf32>
    %89 = arith.addf %57, %88 : vector<32x384xf32>
    %90 = vector.extract_strided_slice %6 {offsets = [0, 128], sizes = [32, 64], strides = [1, 1]} : vector<32x1152xbf16> to vector<32x64xbf16>
    %91 = vector.shape_cast %90 : vector<32x64xbf16> to vector<2x16x64xbf16>
    %92 = vector.extract_strided_slice %6 {offsets = [0, 512], sizes = [32, 64], strides = [1, 1]} : vector<32x1152xbf16> to vector<32x64xbf16>
    %93 = vector.shape_cast %92 : vector<32x64xbf16> to vector<2x16x64xbf16>
    %94 = vector.extract_strided_slice %6 {offsets = [0, 896], sizes = [32, 64], strides = [1, 1]} : vector<32x1152xbf16> to vector<32x64xbf16>
    %95 = vector.shape_cast %94 : vector<32x64xbf16> to vector<2x16x64xbf16>
    "tpu.trace_start"() <{level = 10 : i32, message = "bqd,bkd->bqk"}> : () -> ()
    %cst_25 = arith.constant dense<0.000000e+00> : vector<2x16x16xf32>
    %96 = tpu.matmul %91, %93, %cst_25 {dimension_numbers = #tpu.dot_dimension_numbers<[2], [2], [1], [1], [0, 0, 0, 1, 1, 1], [0], [0]>} : vector<2x16x64xbf16>, vector<2x16x64xbf16>, vector<2x16x16xf32> -> vector<2x16x16xf32>
    "tpu.trace_stop"() : () -> ()
    %cst_26 = arith.constant 1.250000e-01 : f32
    %97 = vector.broadcast %cst_26 : f32 to vector<2x16x16xf32>
    %98 = arith.mulf %96, %97 : vector<2x16x16xf32>
    %cst_27 = arith.constant 0.000000e+00 : f32
    %99 = vector.broadcast %cst_27 : f32 to vector<2x1x16xf32>
    %100 = arith.cmpf ogt, %22, %99 : vector<2x1x16xf32>
    %cst_28 = arith.constant -1.000000e+30 : f32
    %101 = vector.shape_cast %100 : vector<2x1x16xi1> to vector<2x1x16xi1>
    %102 = vector.broadcast %101 : vector<2x1x16xi1> to vector<2x16x16xi1>
    %103 = vector.broadcast %cst_28 : f32 to vector<2x16x16xf32>
    %104 = arith.select %102, %98, %103 : vector<2x16x16xi1>, vector<2x16x16xf32>
    %cst_29 = arith.constant dense<0xFF800000> : vector<2x16xf32>
    %105 = vector.multi_reduction <maximumf>, %104, %cst_29 [2] : vector<2x16x16xf32> to vector<2x16xf32>
    %106 = vector.shape_cast %105 : vector<2x16xf32> to vector<2x16x1xf32>
    %107 = vector.broadcast %106 : vector<2x16x1xf32> to vector<2x16x16xf32>
    %108 = arith.subf %104, %107 : vector<2x16x16xf32>
    %109 = math.exp %108 : vector<2x16x16xf32>
    %cst_30 = arith.constant dense<0.000000e+00> : vector<2x16xf32>
    %110 = vector.multi_reduction <add>, %109, %cst_30 [2] : vector<2x16x16xf32> to vector<2x16xf32>
    %111 = vector.shape_cast %110 : vector<2x16xf32> to vector<2x16x1xf32>
    %112 = tpu.reciprocal %111 {approx = true} : vector<2x16x1xf32> -> vector<2x16x1xf32>
    %113 = vector.broadcast %112 : vector<2x16x1xf32> to vector<2x16x16xf32>
    %114 = arith.mulf %109, %113 : vector<2x16x16xf32>
    %115 = arith.truncf %114 : vector<2x16x16xf32> to vector<2x16x16xbf16>
    "tpu.trace_start"() <{level = 10 : i32, message = "bqk,bkd->bqd"}> : () -> ()
    %cst_31 = arith.constant dense<0.000000e+00> : vector<2x16x64xf32>
    %116 = tpu.matmul %115, %95, %cst_31 {dimension_numbers = #tpu.dot_dimension_numbers<[2], [1], [1], [2], [0, 0, 0, 1, 1, 2], [0], [0]>} : vector<2x16x16xbf16>, vector<2x16x64xbf16>, vector<2x16x64xf32> -> vector<2x16x64xf32>
    "tpu.trace_stop"() : () -> ()
    %117 = vector.shape_cast %116 : vector<2x16x64xf32> to vector<32x64xf32>
    %118 = arith.truncf %117 : vector<32x64xf32> to vector<32x64xbf16>
    %c128 = arith.constant 128 : index
    %c0_32 = arith.constant 0 : index
    %119 = vector.load %arg4[%c128, %c0_32] : memref<384x384xbf16, #tpu.memory_space<vmem>>, vector<64x384xbf16>
    %cst_33 = arith.constant dense<0.000000e+00> : vector<32x384xf32>
    %120 = tpu.matmul %118, %119, %cst_33 {dimension_numbers = #tpu.dot_dimension_numbers<[1], [0], [0], [1], [0, 0, 1, 1], [], []>} : vector<32x64xbf16>, vector<64x384xbf16>, vector<32x384xf32> -> vector<32x384xf32>
    %121 = arith.addf %89, %120 : vector<32x384xf32>
    %122 = vector.extract_strided_slice %6 {offsets = [0, 192], sizes = [32, 64], strides = [1, 1]} : vector<32x1152xbf16> to vector<32x64xbf16>
    %123 = vector.shape_cast %122 : vector<32x64xbf16> to vector<2x16x64xbf16>
    %124 = vector.extract_strided_slice %6 {offsets = [0, 576], sizes = [32, 64], strides = [1, 1]} : vector<32x1152xbf16> to vector<32x64xbf16>
    %125 = vector.shape_cast %124 : vector<32x64xbf16> to vector<2x16x64xbf16>
    %126 = vector.extract_strided_slice %6 {offsets = [0, 960], sizes = [32, 64], strides = [1, 1]} : vector<32x1152xbf16> to vector<32x64xbf16>
    %127 = vector.shape_cast %126 : vector<32x64xbf16> to vector<2x16x64xbf16>
    "tpu.trace_start"() <{level = 10 : i32, message = "bqd,bkd->bqk"}> : () -> ()
    %cst_34 = arith.constant dense<0.000000e+00> : vector<2x16x16xf32>
    %128 = tpu.matmul %123, %125, %cst_34 {dimension_numbers = #tpu.dot_dimension_numbers<[2], [2], [1], [1], [0, 0, 0, 1, 1, 1], [0], [0]>} : vector<2x16x64xbf16>, vector<2x16x64xbf16>, vector<2x16x16xf32> -> vector<2x16x16xf32>
    "tpu.trace_stop"() : () -> ()
    %cst_35 = arith.constant 1.250000e-01 : f32
    %129 = vector.broadcast %cst_35 : f32 to vector<2x16x16xf32>
    %130 = arith.mulf %128, %129 : vector<2x16x16xf32>
    %cst_36 = arith.constant 0.000000e+00 : f32
    %131 = vector.broadcast %cst_36 : f32 to vector<2x1x16xf32>
    %132 = arith.cmpf ogt, %22, %131 : vector<2x1x16xf32>
    %cst_37 = arith.constant -1.000000e+30 : f32
    %133 = vector.shape_cast %132 : vector<2x1x16xi1> to vector<2x1x16xi1>
    %134 = vector.broadcast %133 : vector<2x1x16xi1> to vector<2x16x16xi1>
    %135 = vector.broadcast %cst_37 : f32 to vector<2x16x16xf32>
    %136 = arith.select %134, %130, %135 : vector<2x16x16xi1>, vector<2x16x16xf32>
    %cst_38 = arith.constant dense<0xFF800000> : vector<2x16xf32>
    %137 = vector.multi_reduction <maximumf>, %136, %cst_38 [2] : vector<2x16x16xf32> to vector<2x16xf32>
    %138 = vector.shape_cast %137 : vector<2x16xf32> to vector<2x16x1xf32>
    %139 = vector.broadcast %138 : vector<2x16x1xf32> to vector<2x16x16xf32>
    %140 = arith.subf %136, %139 : vector<2x16x16xf32>
    %141 = math.exp %140 : vector<2x16x16xf32>
    %cst_39 = arith.constant dense<0.000000e+00> : vector<2x16xf32>
    %142 = vector.multi_reduction <add>, %141, %cst_39 [2] : vector<2x16x16xf32> to vector<2x16xf32>
    %143 = vector.shape_cast %142 : vector<2x16xf32> to vector<2x16x1xf32>
    %144 = tpu.reciprocal %143 {approx = true} : vector<2x16x1xf32> -> vector<2x16x1xf32>
    %145 = vector.broadcast %144 : vector<2x16x1xf32> to vector<2x16x16xf32>
    %146 = arith.mulf %141, %145 : vector<2x16x16xf32>
    %147 = arith.truncf %146 : vector<2x16x16xf32> to vector<2x16x16xbf16>
    "tpu.trace_start"() <{level = 10 : i32, message = "bqk,bkd->bqd"}> : () -> ()
    %cst_40 = arith.constant dense<0.000000e+00> : vector<2x16x64xf32>
    %148 = tpu.matmul %147, %127, %cst_40 {dimension_numbers = #tpu.dot_dimension_numbers<[2], [1], [1], [2], [0, 0, 0, 1, 1, 2], [0], [0]>} : vector<2x16x16xbf16>, vector<2x16x64xbf16>, vector<2x16x64xf32> -> vector<2x16x64xf32>
    "tpu.trace_stop"() : () -> ()
    %149 = vector.shape_cast %148 : vector<2x16x64xf32> to vector<32x64xf32>
    %150 = arith.truncf %149 : vector<32x64xf32> to vector<32x64xbf16>
    %c192 = arith.constant 192 : index
    %c0_41 = arith.constant 0 : index
    %151 = vector.load %arg4[%c192, %c0_41] : memref<384x384xbf16, #tpu.memory_space<vmem>>, vector<64x384xbf16>
    %cst_42 = arith.constant dense<0.000000e+00> : vector<32x384xf32>
    %152 = tpu.matmul %150, %151, %cst_42 {dimension_numbers = #tpu.dot_dimension_numbers<[1], [0], [0], [1], [0, 0, 1, 1], [], []>} : vector<32x64xbf16>, vector<64x384xbf16>, vector<32x384xf32> -> vector<32x384xf32>
    %153 = arith.addf %121, %152 : vector<32x384xf32>
    %154 = vector.extract_strided_slice %6 {offsets = [0, 256], sizes = [32, 64], strides = [1, 1]} : vector<32x1152xbf16> to vector<32x64xbf16>
    %155 = vector.shape_cast %154 : vector<32x64xbf16> to vector<2x16x64xbf16>
    %156 = vector.extract_strided_slice %6 {offsets = [0, 640], sizes = [32, 64], strides = [1, 1]} : vector<32x1152xbf16> to vector<32x64xbf16>
    %157 = vector.shape_cast %156 : vector<32x64xbf16> to vector<2x16x64xbf16>
    %158 = vector.extract_strided_slice %6 {offsets = [0, 1024], sizes = [32, 64], strides = [1, 1]} : vector<32x1152xbf16> to vector<32x64xbf16>
    %159 = vector.shape_cast %158 : vector<32x64xbf16> to vector<2x16x64xbf16>
    "tpu.trace_start"() <{level = 10 : i32, message = "bqd,bkd->bqk"}> : () -> ()
    %cst_43 = arith.constant dense<0.000000e+00> : vector<2x16x16xf32>
    %160 = tpu.matmul %155, %157, %cst_43 {dimension_numbers = #tpu.dot_dimension_numbers<[2], [2], [1], [1], [0, 0, 0, 1, 1, 1], [0], [0]>} : vector<2x16x64xbf16>, vector<2x16x64xbf16>, vector<2x16x16xf32> -> vector<2x16x16xf32>
    "tpu.trace_stop"() : () -> ()
    %cst_44 = arith.constant 1.250000e-01 : f32
    %161 = vector.broadcast %cst_44 : f32 to vector<2x16x16xf32>
    %162 = arith.mulf %160, %161 : vector<2x16x16xf32>
    %cst_45 = arith.constant 0.000000e+00 : f32
    %163 = vector.broadcast %cst_45 : f32 to vector<2x1x16xf32>
    %164 = arith.cmpf ogt, %22, %163 : vector<2x1x16xf32>
    %cst_46 = arith.constant -1.000000e+30 : f32
    %165 = vector.shape_cast %164 : vector<2x1x16xi1> to vector<2x1x16xi1>
    %166 = vector.broadcast %165 : vector<2x1x16xi1> to vector<2x16x16xi1>
    %167 = vector.broadcast %cst_46 : f32 to vector<2x16x16xf32>
    %168 = arith.select %166, %162, %167 : vector<2x16x16xi1>, vector<2x16x16xf32>
    %cst_47 = arith.constant dense<0xFF800000> : vector<2x16xf32>
    %169 = vector.multi_reduction <maximumf>, %168, %cst_47 [2] : vector<2x16x16xf32> to vector<2x16xf32>
    %170 = vector.shape_cast %169 : vector<2x16xf32> to vector<2x16x1xf32>
    %171 = vector.broadcast %170 : vector<2x16x1xf32> to vector<2x16x16xf32>
    %172 = arith.subf %168, %171 : vector<2x16x16xf32>
    %173 = math.exp %172 : vector<2x16x16xf32>
    %cst_48 = arith.constant dense<0.000000e+00> : vector<2x16xf32>
    %174 = vector.multi_reduction <add>, %173, %cst_48 [2] : vector<2x16x16xf32> to vector<2x16xf32>
    %175 = vector.shape_cast %174 : vector<2x16xf32> to vector<2x16x1xf32>
    %176 = tpu.reciprocal %175 {approx = true} : vector<2x16x1xf32> -> vector<2x16x1xf32>
    %177 = vector.broadcast %176 : vector<2x16x1xf32> to vector<2x16x16xf32>
    %178 = arith.mulf %173, %177 : vector<2x16x16xf32>
    %179 = arith.truncf %178 : vector<2x16x16xf32> to vector<2x16x16xbf16>
    "tpu.trace_start"() <{level = 10 : i32, message = "bqk,bkd->bqd"}> : () -> ()
    %cst_49 = arith.constant dense<0.000000e+00> : vector<2x16x64xf32>
    %180 = tpu.matmul %179, %159, %cst_49 {dimension_numbers = #tpu.dot_dimension_numbers<[2], [1], [1], [2], [0, 0, 0, 1, 1, 2], [0], [0]>} : vector<2x16x16xbf16>, vector<2x16x64xbf16>, vector<2x16x64xf32> -> vector<2x16x64xf32>
    "tpu.trace_stop"() : () -> ()
    %181 = vector.shape_cast %180 : vector<2x16x64xf32> to vector<32x64xf32>
    %182 = arith.truncf %181 : vector<32x64xf32> to vector<32x64xbf16>
    %c256 = arith.constant 256 : index
    %c0_50 = arith.constant 0 : index
    %183 = vector.load %arg4[%c256, %c0_50] : memref<384x384xbf16, #tpu.memory_space<vmem>>, vector<64x384xbf16>
    %cst_51 = arith.constant dense<0.000000e+00> : vector<32x384xf32>
    %184 = tpu.matmul %182, %183, %cst_51 {dimension_numbers = #tpu.dot_dimension_numbers<[1], [0], [0], [1], [0, 0, 1, 1], [], []>} : vector<32x64xbf16>, vector<64x384xbf16>, vector<32x384xf32> -> vector<32x384xf32>
    %185 = arith.addf %153, %184 : vector<32x384xf32>
    %186 = vector.extract_strided_slice %6 {offsets = [0, 320], sizes = [32, 64], strides = [1, 1]} : vector<32x1152xbf16> to vector<32x64xbf16>
    %187 = vector.shape_cast %186 : vector<32x64xbf16> to vector<2x16x64xbf16>
    %188 = vector.extract_strided_slice %6 {offsets = [0, 704], sizes = [32, 64], strides = [1, 1]} : vector<32x1152xbf16> to vector<32x64xbf16>
    %189 = vector.shape_cast %188 : vector<32x64xbf16> to vector<2x16x64xbf16>
    %190 = vector.extract_strided_slice %6 {offsets = [0, 1088], sizes = [32, 64], strides = [1, 1]} : vector<32x1152xbf16> to vector<32x64xbf16>
    %191 = vector.shape_cast %190 : vector<32x64xbf16> to vector<2x16x64xbf16>
    "tpu.trace_start"() <{level = 10 : i32, message = "bqd,bkd->bqk"}> : () -> ()
    %cst_52 = arith.constant dense<0.000000e+00> : vector<2x16x16xf32>
    %192 = tpu.matmul %187, %189, %cst_52 {dimension_numbers = #tpu.dot_dimension_numbers<[2], [2], [1], [1], [0, 0, 0, 1, 1, 1], [0], [0]>} : vector<2x16x64xbf16>, vector<2x16x64xbf16>, vector<2x16x16xf32> -> vector<2x16x16xf32>
    "tpu.trace_stop"() : () -> ()
    %cst_53 = arith.constant 1.250000e-01 : f32
    %193 = vector.broadcast %cst_53 : f32 to vector<2x16x16xf32>
    %194 = arith.mulf %192, %193 : vector<2x16x16xf32>
    %cst_54 = arith.constant 0.000000e+00 : f32
    %195 = vector.broadcast %cst_54 : f32 to vector<2x1x16xf32>
    %196 = arith.cmpf ogt, %22, %195 : vector<2x1x16xf32>
    %cst_55 = arith.constant -1.000000e+30 : f32
    %197 = vector.shape_cast %196 : vector<2x1x16xi1> to vector<2x1x16xi1>
    %198 = vector.broadcast %197 : vector<2x1x16xi1> to vector<2x16x16xi1>
    %199 = vector.broadcast %cst_55 : f32 to vector<2x16x16xf32>
    %200 = arith.select %198, %194, %199 : vector<2x16x16xi1>, vector<2x16x16xf32>
    %cst_56 = arith.constant dense<0xFF800000> : vector<2x16xf32>
    %201 = vector.multi_reduction <maximumf>, %200, %cst_56 [2] : vector<2x16x16xf32> to vector<2x16xf32>
    %202 = vector.shape_cast %201 : vector<2x16xf32> to vector<2x16x1xf32>
    %203 = vector.broadcast %202 : vector<2x16x1xf32> to vector<2x16x16xf32>
    %204 = arith.subf %200, %203 : vector<2x16x16xf32>
    %205 = math.exp %204 : vector<2x16x16xf32>
    %cst_57 = arith.constant dense<0.000000e+00> : vector<2x16xf32>
    %206 = vector.multi_reduction <add>, %205, %cst_57 [2] : vector<2x16x16xf32> to vector<2x16xf32>
    %207 = vector.shape_cast %206 : vector<2x16xf32> to vector<2x16x1xf32>
    %208 = tpu.reciprocal %207 {approx = true} : vector<2x16x1xf32> -> vector<2x16x1xf32>
    %209 = vector.broadcast %208 : vector<2x16x1xf32> to vector<2x16x16xf32>
    %210 = arith.mulf %205, %209 : vector<2x16x16xf32>
    %211 = arith.truncf %210 : vector<2x16x16xf32> to vector<2x16x16xbf16>
    "tpu.trace_start"() <{level = 10 : i32, message = "bqk,bkd->bqd"}> : () -> ()
    %cst_58 = arith.constant dense<0.000000e+00> : vector<2x16x64xf32>
    %212 = tpu.matmul %211, %191, %cst_58 {dimension_numbers = #tpu.dot_dimension_numbers<[2], [1], [1], [2], [0, 0, 0, 1, 1, 2], [0], [0]>} : vector<2x16x16xbf16>, vector<2x16x64xbf16>, vector<2x16x64xf32> -> vector<2x16x64xf32>
    "tpu.trace_stop"() : () -> ()
    %213 = vector.shape_cast %212 : vector<2x16x64xf32> to vector<32x64xf32>
    %214 = arith.truncf %213 : vector<32x64xf32> to vector<32x64xbf16>
    %c320 = arith.constant 320 : index
    %c0_59 = arith.constant 0 : index
    %215 = vector.load %arg4[%c320, %c0_59] : memref<384x384xbf16, #tpu.memory_space<vmem>>, vector<64x384xbf16>
    %cst_60 = arith.constant dense<0.000000e+00> : vector<32x384xf32>
    %216 = tpu.matmul %214, %215, %cst_60 {dimension_numbers = #tpu.dot_dimension_numbers<[1], [0], [0], [1], [0, 0, 1, 1], [], []>} : vector<32x64xbf16>, vector<64x384xbf16>, vector<32x384xf32> -> vector<32x384xf32>
    %217 = arith.addf %185, %216 : vector<32x384xf32>
    %218 = vector.shape_cast %217 : vector<32x384xf32> to vector<2x16x384xf32>
    %c0_61 = arith.constant 0 : index
    %c0_62 = arith.constant 0 : index
    %c0_63 = arith.constant 0 : index
    %219 = vector.load %arg6[%c0_61, %c0_62, %c0_63] : memref<2x16x384xf32, #tpu.memory_space<vmem>>, vector<2x16x384xf32>
    tpu.vector_store %arg6[%c0_61, %c0_62, %c0_63], %218 {strides = array<i32>} : memref<2x16x384xf32, #tpu.memory_space<vmem>>, vector<2x16x384xf32>,
    return
  }
  func.func @transform_0(%arg0: i32, %arg1: memref<2xi32, #tpu.memory_space<smem>>) -> (i32, i32, i32) {
    %c0_i32 = arith.constant 0 : i32
    %c0_i32_0 = arith.constant 0 : i32
    %c0_i32_1 = arith.constant 0 : i32
    return %arg0, %c0_i32, %c0_i32_0 : i32, i32, i32
  }
  func.func @transform_1(%arg0: i32, %arg1: memref<2xi32, #tpu.memory_space<smem>>) -> (i32, i32) {
    %c0_i32 = arith.constant 0 : i32
    %c0_i32_0 = arith.constant 0 : i32
    %c0_i32_1 = arith.constant 0 : i32
    return %c0_i32, %c0_i32_0 : i32, i32
  }
  func.func @transform_2(%arg0: i32, %arg1: memref<2xi32, #tpu.memory_space<smem>>) -> (i32, i32) {
    %c0_i32 = arith.constant 0 : i32
    %c0_i32_0 = arith.constant 0 : i32
    %c0_i32_1 = arith.constant 0 : i32
    return %c0_i32, %c0_i32_0 : i32, i32
  }
  func.func @transform_3(%arg0: i32, %arg1: memref<2xi32, #tpu.memory_space<smem>>) -> (i32, i32) {
    %c0_i32 = arith.constant 0 : i32
    %c0_i32_0 = arith.constant 0 : i32
    %c0_i32_1 = arith.constant 0 : i32
    return %c0_i32, %c0_i32_0 : i32, i32
  }
  func.func @transform_4(%arg0: i32, %arg1: memref<2xi32, #tpu.memory_space<smem>>) -> (i32, i32, i32) {
    %c0_i32 = arith.constant 0 : i32
    %c0_i32_0 = arith.constant 0 : i32
    %c0_i32_1 = arith.constant 0 : i32
    return %arg0, %c0_i32, %c0_i32_0 : i32, i32, i32
  }
}

</mosaic_0001>

<bundles_post_ra>
// kernel: tpu_custom_call.1
= control target key start
LH: loop header
LB: loop body
LE: loop exit
PB: predicated region body
PF: predicated region fallthrough
CT: control target
= control target key end

     0   :  { %s6674_s0 = inlined_call_operand.hbm [shape: s32[2], index: 0, kind: input, shape index: {}]   ;;  %s6675_s1 = inlined_call_operand.hbm [shape: f32[2,16,384], index: 1, kind: input, shape index: {}]   ;;  %s6676_s2 = inlined_call_operand.hbm [shape: bf16[384,1152], index: 2, kind: input, shape index: {}]   ;;  %s6677_s3 = inlined_call_operand.hbm [shape: bf16[384,384], index: 3, kind: input, shape index: {}]   ;;  %s6678_s4 = inlined_call_operand.vmem [shape: f32[1,384], index: 4, kind: input, shape index: {}]   ;;  %s6679_s5 = inlined_call_operand.hbm [shape: f32[2,16,384], index: 5, kind: output, shape index: {}]  }
   0x1   :  { %s6052_s20 = scalar_lea.hbm %s6674_s0, 16 }
   0x2   :  { %p6053_p0 = scmp.ne.s32.totalorder %s6674_s0, %s6052_s20  ;;  %p6056_p1 = scmp.lt.u32.totalorder %s6052_s20, %s6674_s0 }
   0x4   :  { %p6058_p2 = pnand %p6056_p1, %p6053_p0 }
   0x6   :  { %6061 = shalt.err (!%p6058_p2)  }
   0x7   :  { %s6158_s25 = smov [#allocation3]  }
   0x8   :  { %11 = dma.hbm_to_smem %s6674_s0, 16, %s6158_s25, [#allocation2] }
   0x9   :  { %6150 = dma.done.wait [#allocation2], 16 }
   0xa   :  { %6151 = vsyncadd [#allocation2], 4294967280 }
   0xb   :  { %13 = sfence }
   0xc   :  { %14 = vsyncpa [#allocation5], 0 }
   0xd   :  { %15 = vsyncpa [#allocation8], 0 }
   0xe   :  { %16 = vsyncpa [#allocation6], 0  ;;  %s6159_s28 = smov [#allocation7]   ;;  %s6062_s7 = scalar_lea.hbm %s6676_s2, 27648 }
   0xf   :  { %s34_s29 = sshll.u32 %s6159_s28, 4  ;;  %p6063_p3 = scmp.ne.s32.totalorder %s6676_s2, %s6062_s7  ;;  %s35_s29 = int_to_ptr.vmem [resolvable:$true] %s34_s29 }
  0x10   :  { %p6066_p4 = scmp.lt.u32.totalorder %s6062_s7, %s6676_s2 }
  0x12   :  { %p6068_p5 = pnand %p6066_p4, %p6063_p3 }
  0x14   :  { %6071 = shalt.err (!%p6068_p5)
}
  0x15   :  { %s6072_s0 = scalar_lea.vmem %s35_s29, 27648  ;;  %p6077_p7 = scmp.lt.s32.totalorder %s35_s29, %s35_s29 }
  0x16   :  { %p6073_p6 = scmp.ne.s32.totalorder %s35_s29, %s6072_s0  ;;  %p6078_p8 = scmp.lt.s32.totalorder %s6072_s0, %s6072_s0 }
  0x18   :  { %p6079_p9 = por %p6078_p8, %p6077_p7 }
  0x1a   :  { %p6080_p10 = pnand %p6079_p9, %p6073_p6 }
  0x1c   :  { %6083 = shalt.err (!%p6080_p10)
}
  0x1d   :  { %s6160_s12 = smov 576   ;;  %s6161_s13 = smov 36  }
  0x1e   :  { %40 = dma.hbm_to_vmem [thread:$0]  %s6676_s2, 27648, %s35_s29, [#allocation8], %s6160_s12, %s6160_s12, %s6161_s13  }
  0x1f   :  { %s6162_s16 = smov [#allocation4]   ;;  %s6084_s20 = scalar_lea.hbm %s6675_s1, 1536 }
  0x20   :  { %s22_s17 = sshll.u32 %s6162_s16, 4  ;;  %p6085_p11 = scmp.ne.s32.totalorder %s6675_s1, %s6084_s20  ;;  %s23_s17 = int_to_ptr.vmem [resolvable:$true] %s22_s17 }
  0x21   :  { %p6088_p12 = scmp.lt.u32.totalorder %s6084_s20, %s6675_s1 }
  0x23   :  { %p6090_p13 = pnand %p6088_p12, %p6085_p11 }
  0x25   :  { %6093 = shalt.err (!%p6090_p13)
}
  0x26   :  { %s6094_s25 = scalar_lea.vmem %s23_s17, 1536  ;;  %p6099_p1 = scmp.lt.s32.totalorder %s23_s17, %s23_s17 }
  0x27   :  { %p6095_p0 = scmp.ne.s32.totalorder %s23_s17, %s6094_s25  ;;  %p6100_p2 = scmp.lt.s32.totalorder %s6094_s25, %s6094_s25 }
  0x29   :  { %p6101_p3 = por %p6100_p2, %p6099_p1 }
  0x2b   :  { %p6102_p4 = pnand %p6101_p3, %p6095_p0 }
  0x2d   :  { %6105 = shalt.err (!%p6102_p4)
}
  0x2e   :  { %s6163_s2 = smov 384   ;;  %s6164_s26 = smov 24  }
  0x2f   :  { %28 = dma.hbm_to_vmem [thread:$0]  %s6675_s1, 1536, %s23_s17, [#allocation5], %s6163_s2, %s6163_s2, %s6164_s26  }
  0x30   :  { %s6165_s29 = smov [#allocation9]   ;;  %s6106_s8 = scalar_lea.hbm %s6677_s3, 9216 }
  0x31   :  { %s46_s30 = sshll.u32 %s6165_s29, 4  ;;  %p6107_p5 = scmp.ne.s32.totalorder %s6677_s3, %s6106_s8  ;;  %s47_s30 = int_to_ptr.vmem [resolvable:$true] %s46_s30 }
  0x32   :  { %p6110_p6 = scmp.lt.u32.totalorder %s6106_s8, %s6677_s3 }
  0x34   :  { %p6112_p7 = pnand %p6110_p6, %p6107_p5 }
  0x36   :  { %6115 = shalt.err (!%p6112_p7)
}
  0x37   :  { %s6116_s12 = scalar_lea.vmem %s47_s30, 9216  ;;  %p6121_p9 = scmp.lt.s32.totalorder %s47_s30, %s47_s30 }
  0x38   :  { %p6117_p8 = scmp.ne.s32.totalorder %s47_s30, %s6116_s12  ;;  %p6122_p10 = scmp.lt.s32.totalorder %s6116_s12, %s6116_s12 }
  0x3a   :  { %p6123_p11 = por %p6122_p10, %p6121_p9 }
  0x3c   :  { %p6124_p12 = pnand %p6123_p11, %p6117_p8 }
  0x3e   :  { %6127 = shalt.err (!%p6124_p12)
}
  0x3f   :  { %s6166_s1 = smov 192   ;;  %s6167_s13 = smov 12  }
  0x40   :  { %52 = dma.hbm_to_vmem [thread:$0]  %s6677_s3, 9216, %s47_s30, [#allocation8], %s6166_s1, %s6166_s1, %s6167_s13  }
  0x41   :  { %6152 = dma.done.wait [#allocation5], 1536  }
  0x42   :  { %6153 = vsyncadd [#allocation5], 4294965760 }
  0x43   :  { %6154 = dma.done.wait [#allocation8], 36864  }
  0x44   :  { %6155 = vsyncadd [#allocation8], 4294930432  ;;  %v5548_v0 = vld [vmem:[#allocation7 + $0x4] ss:$36 sps:$4 sm:$0xff]   ;;  %v5550_v1 = vld [vmem:[#allocation7 + $0xc] ss:$36 sps:$4 sm:$0xff]  }
  0x45   :  { %1428 = vmatprep.subr.bf16.mxu0 %v5548_v0  ;;  %v5552_v2 = vld [vmem:[#allocation7] ss:$36 sps:$4 sm:$0xff]   ;;  %v5553_v3 = vld [vmem:[#allocation7 + $0x8] ss:$36 sps:$4 sm:$0xff]   ;;  %1534 = vmatprep.subr.bf16.mxu1 %v5550_v1  ;;  %v5556_v5 = vld [vmem:[#allocation7 + $0x54] ss:$36 sps:$4 sm:$0xff]  }
  0x46   :  { %v5554_v4 = vld [vmem:[#allocation7 + $0x4c] ss:$36 sps:$4 sm:$0xff]   ;;  %1429 = vmatpush1.bf16.msra.mxu0 %v5552_v2  ;;  %1535 = vmatpush1.bf16.msra.mxu1 %v5553_v3  ;;  %v5560_v8 = vld [vmem:[#allocation7 + $0x94] ss:$36 sps:$4 sm:$0xff]   ;;  %v5562_v9 = vld [vmem:[#allocation7 + $0x9c] ss:$36 sps:$4 sm:$0xff]  }
  0x47   :  { %v5558_v6 = vld [vmem:[#allocation7 + $0x48] ss:$36 sps:$4 sm:$0xff]   ;;  %1430 = vmatprep.subr.bf16.mxu0 %v5554_v4  ;;  %v5559_v7 = vld [vmem:[#allocation7 + $0x50] ss:$36 sps:$4 sm:$0xff]   ;;  %1536 = vmatprep.subr.bf16.mxu1 %v5556_v5  ;;  %v5565_v11 = vld [vmem:[#allocation7 + $0x98] ss:$36 sps:$4 sm:$0xff]  }
  0x48   :  { %v5564_v10 = vld [vmem:[#allocation7 + $0x90] ss:$36 sps:$4 sm:$0xff]   ;;  %v5566_v12 = vld [vmem:[#allocation7 + $0xdc] ss:$36 sps:$4 sm:$0xff]   ;;  %v5568_v13 = vld [vmem:[#allocation7 + $0xe4] ss:$36 sps:$4 sm:$0xff]  }
  0x49   :  { %v5570_v14 = vld [vmem:[#allocation7 + $0xd8] ss:$36 sps:$4 sm:$0xff]   ;;  %v5571_v15 = vld [vmem:[#allocation7 + $0xe0] ss:$36 sps:$4 sm:$0xff]   ;;  %v5574_v17 = vld [vmem:[#allocation7 + $0x12c] ss:$36 sps:$4 sm:$0xff]  }
  0x4a   :  { %1431 = vmatpush1.bf16.msra.mxu0 %v5558_v6  ;;  %1537 = vmatpush1.bf16.msra.mxu1 %v5559_v7  ;;  %v5572_v16 = vld [vmem:[#allocation7 + $0x124] ss:$36 sps:$4 sm:$0xff]   ;;  %v5578_v20 = vld [vmem:[#allocation7 + $0x16c] ss:$36 sps:$4 sm:$0xff]   ;;  %v5580_v21 = vld [vmem:[#allocation7 + $0x174] ss:$36 sps:$4 sm:$0xff]  }
  0x4b   :  { %1432 = vmatprep.subr.bf16.mxu0 %v5560_v8  ;;  %1538 = vmatprep.subr.bf16.mxu1 %v5562_v9  ;;  %v5576_v18 = vld [vmem:[#allocation7 + $0x120] ss:$36 sps:$4 sm:$0xff]   ;;  %v5577_v19 = vld [vmem:[#allocation7 + $0x128] ss:$36 sps:$4 sm:$0xff]   ;;  %v5583_v23 = vld [vmem:[#allocation7 + $0x170] ss:$36 sps:$4 sm:$0xff]  }
  0x4c   :  { %v5582_v22 = vld [vmem:[#allocation7 + $0x168] ss:$36 sps:$4 sm:$0xff]   ;;  %v5584_v24 = vld [vmem:[#allocation7 + $0x1b4] ss:$36 sps:$4 sm:$0xff]   ;;  %v5586_v25 = vld [vmem:[#allocation7 + $0x1bc] ss:$36 sps:$4 sm:$0xff]  }
  0x4d   :  { %v5588_v26 = vld [vmem:[#allocation7 + $0x1b0] ss:$36 sps:$4 sm:$0xff]   ;;  %v5589_v27 = vld [vmem:[#allocation7 + $0x1b8] ss:$36 sps:$4 sm:$0xff]   ;;  %v5592_v29 = vld [vmem:[#allocation7 + $0x204] ss:$36 sps:$4 sm:$0xff]  }
  0x4e   :  { %1433 = vmatpush1.bf16.msra.mxu0 %v5564_v10  ;;  %1539 = vmatpush1.bf16.msra.mxu1 %v5565_v11  ;;  %v5590_v28 = vld [vmem:[#allocation7 + $0x1fc] ss:$36 sps:$4 sm:$0xff]   ;;  %v5596_v32 = vld [vmem:[#allocation7 + $0x244] ss:$36 sps:$4 sm:$0xff]   ;;  %v5598_v33 = vld [vmem:[#allocation7 + $0x24c] ss:$36 sps:$4 sm:$0xff]  }
  0x4f   :  { %1434 = vmatprep.subr.bf16.mxu0 %v5566_v12  ;;  %1540 = vmatprep.subr.bf16.mxu1 %v5568_v13  ;;  %v5594_v30 = vld [vmem:[#allocation7 + $0x1f8] ss:$36 sps:$4 sm:$0xff]   ;;  %v5595_v31 = vld [vmem:[#allocation7 + $0x200] ss:$36 sps:$4 sm:$0xff]   ;;  %v5601_v35 = vld [vmem:[#allocation7 + $0x248] ss:$36 sps:$4 sm:$0xff]  }
  0x50   :  { %v5600_v34 = vld [vmem:[#allocation7 + $0x240] ss:$36 sps:$4 sm:$0xff]   ;;  %v5602_v36 = vld [vmem:[#allocation7 + $0x28c] ss:$36 sps:$4 sm:$0xff]   ;;  %v5604_v37 = vld [vmem:[#allocation7 + $0x294] ss:$36 sps:$4 sm:$0xff]  }
  0x51   :  { %v5606_v38 = vld [vmem:[#allocation7 + $0x288] ss:$36 sps:$4 sm:$0xff]   ;;  %v5607_v39 = vld [vmem:[#allocation7 + $0x290] ss:$36 sps:$4 sm:$0xff]   ;;  %v5610_v41 = vld [vmem:[#allocation7 + $0x2dc] ss:$36 sps:$4 sm:$0xff]  }
  0x52   :  { %1435 = vmatpush1.bf16.msra.mxu0 %v5570_v14  ;;  %1541 = vmatpush1.bf16.msra.mxu1 %v5571_v15  ;;  %v5608_v40 = vld [vmem:[#allocation7 + $0x2d4] ss:$36 sps:$4 sm:$0xff]   ;;  %v5614_v44 = vld [vmem:[#allocation7 + $0x31c] ss:$36 sps:$4 sm:$0xff]   ;;  %v5616_v45 = vld [vmem:[#allocation7 + $0x324] ss:$36 sps:$4 sm:$0xff]  }
  0x53   :  { %1436 = vmatprep.subr.bf16.mxu0 %v5572_v16  ;;  %1542 = vmatprep.subr.bf16.mxu1 %v5574_v17  ;;  %v5612_v42 = vld [vmem:[#allocation7 + $0x2d0] ss:$36 sps:$4 sm:$0xff]   ;;  %v5613_v43 = vld [vmem:[#allocation7 + $0x2d8] ss:$36 sps:$4 sm:$0xff]   ;;  %v67_v46 = vld [vmem:[#allocation4 + $0x8] sm:$0xff]  ;;  %vm6170_vm0 = vmmov 0  }
  0x54   :  { %v70_v47 = vld [vmem:[#allocation4 + $0x20] sm:$0xff]  ;;  %v5618_v48 = vld [vmem:[#allocation7 + $0x318] ss:$36 sps:$4 sm:$0xff]   ;;  %v5622_v52 = vld [vmem:[#allocation7 + $0x36c] ss:$36 sps:$4 sm:$0xff]   ;;  %vm1998_vm1 = vcmask 523264  }
  0x55   :  { %v5619_v49 = vld [vmem:[#allocation7 + $0x320] ss:$36 sps:$4 sm:$0xff]   ;;  %v6254_v50 = vpack.c.bf16 %v70_v47, %v67_v46  ;;  %v5625_v54 = vld [vmem:[#allocation7 + $0x368] ss:$36 sps:$4 sm:$0xff]   ;;  %v5628_v56 = vld [vmem:[#allocation7 + $0x3b4] ss:$36 sps:$4 sm:$0xff]  }
  0x56   :  { %1437 = vmatpush1.bf16.msra.mxu0 %v5576_v18  ;;  %1543 = vmatpush1.bf16.msra.mxu1 %v5577_v19  ;;  %v5620_v51 = vld [vmem:[#allocation7 + $0x364] ss:$36 sps:$4 sm:$0xff]   ;;  %v5626_v55 = vld [vmem:[#allocation7 + $0x3ac] ss:$36 sps:$4 sm:$0xff]   ;;  %v5632_v59 = vld [vmem:[#allocation7 + $0x3f4] ss:$36 sps:$4 sm:$0xff]  }
  0x57   :  { %1438 = vmatprep.subr.bf16.mxu0 %v5578_v20  ;;  %1544 = vmatprep.subr.bf16.mxu1 %v5580_v21  ;;  %v5624_v53 = vld [vmem:[#allocation7 + $0x360] ss:$36 sps:$4 sm:$0xff]   ;;  %v5630_v57 = vld [vmem:[#allocation7 + $0x3a8] ss:$36 sps:$4 sm:$0xff]   ;;  %v5631_v58 = vld [vmem:[#allocation7 + $0x3b0] ss:$36 sps:$4 sm:$0xff]  }
  0x58   :  { %1460 = vmatprep.mubr.bf16.mxu0 %v6254_v50  ;;  %1566 = vmatprep.mubr.bf16.mxu1 %v6254_v50  ;;  %v5634_v60 = vld [vmem:[#allocation7 + $0x3fc] ss:$36 sps:$4 sm:$0xff]   ;;  %v5636_v61 = vld [vmem:[#allocation7 + $0x3f0] ss:$36 sps:$4 sm:$0xff]   ;;  %v5640_v0 = vld [vmem:[#allocation7 + $0x444] ss:$36 sps:$4 sm:$0xff]  }
  0x59   :  { %v5637_v62 = vld [vmem:[#allocation7 + $0x3f8] ss:$36 sps:$4 sm:$0xff]   ;;  %v5643_v2 = vld [vmem:[#allocation7 + $0x440] ss:$36 sps:$4 sm:$0xff]   ;;  %v5649_v6 = vld [vmem:[#allocation7 + $0x48c] ss:$36 sps:$4 sm:$0xff]  }
  0x5a   :  { %1439 = vmatpush1.bf16.msra.mxu0 %v5582_v22  ;;  %1545 = vmatpush1.bf16.msra.mxu1 %v5583_v23  ;;  %v5638_v63 = vld [vmem:[#allocation7 + $0x43c] ss:$36 sps:$4 sm:$0xff]   ;;  %v5646_v3 = vld [vmem:[#allocation7 + $0x484] ss:$36 sps:$4 sm:$0xff]   ;;  %v76_v11 = vld [vmem:[#allocation4 + $0x50] sm:$0xff]  ;;  %s1970_s3 = sld [smem:[#allocation3]] }
  0x5b   :  { %1440 = vmatprep.subr.bf16.mxu0 %v5584_v24  ;;  %1546 = vmatprep.subr.bf16.mxu1 %v5586_v25  ;;  %v5642_v1 = vld [vmem:[#allocation7 + $0x438] ss:$36 sps:$4 sm:$0xff]   ;;  %v66_v4 = vld [vmem:[#allocation4] sm:$0xff]  ;;  %v5647_v8 = vld [vmem:[#allocation7 + $0x488] ss:$36 sps:$4 sm:$0xff]   ;;  %s4949_s16 = sld [smem:[#allocation3 + $0x1]] }
  0x5c   :  { %v69_v5 = vld [vmem:[#allocation4 + $0x18] sm:$0xff]  ;;  %v5644_v7 = vld [vmem:[#allocation7 + $0x480] ss:$36 sps:$4 sm:$0xff]   ;;  %v5652_v12 = vld [vmem:[#allocation7 + $0x4cc] ss:$36 sps:$4 sm:$0xff]   ;;  %vm2115_vm7 = vcmask 130048  }
  0x5d   :  { %v6258_v9 = vpack.c.bf16 %v69_v5, %v66_v4  ;;  %v73_v10 = vld [vmem:[#allocation4 + $0x38] sm:$0xff]  ;;  %v5650_v14 = vld [vmem:[#allocation7 + $0x4c8] ss:$36 sps:$4 sm:$0xff]   ;;  %v5653_v16 = vld [vmem:[#allocation7 + $0x4d0] ss:$36 sps:$4 sm:$0xff]   ;;  %s6171_s17 = smov 64  }
  0x5e   :  { %1441 = vmatpush1.bf16.msra.mxu0 %v5588_v26  ;;  %1547 = vmatpush1.bf16.msra.mxu1 %v5589_v27  ;;  %v5655_v13 = vld [vmem:[#allocation7 + $0x4d4] ss:$36 sps:$4 sm:$0xff]   ;;  %v6260_v15 = vpack.c.bf16 %v76_v11, %v73_v10  ;;  %v75_v19 = vld [vmem:[#allocation4 + $0x48] sm:$0xff]  ;;  %v5661_v20 = vld [vmem:[#allocation7 + $0x51c] ss:$36 sps:$4 sm:$0xff]  }
  0x5f   :  { %1442 = vmatprep.subr.bf16.mxu0 %v5590_v28  ;;  %1548 = vmatprep.subr.bf16.mxu1 %v5592_v29  ;;  %v5658_v17 = vld [vmem:[#allocation7 + $0x514] ss:$36 sps:$4 sm:$0xff]   ;;  %v5664_v24 = vld [vmem:[#allocation7 + $0x55c] ss:$36 sps:$4 sm:$0xff]   ;;  %v5667_v25 = vld [vmem:[#allocation7 + $0x564] ss:$36 sps:$4 sm:$0xff]  }
  0x60   :  { %v72_v18 = vld [vmem:[#allocation4 + $0x30] sm:$0xff]  ;;  %v5659_v22 = vld [vmem:[#allocation7 + $0x518] ss:$36 sps:$4 sm:$0xff]   ;;  %v5665_v27 = vld [vmem:[#allocation7 + $0x560] ss:$36 sps:$4 sm:$0xff]  }
  0x61   :  { %v5656_v21 = vld [vmem:[#allocation7 + $0x510] ss:$36 sps:$4 sm:$0xff]   ;;  %v6266_v23 = vpack.c.bf16 %v75_v19, %v72_v18  ;;  %v5662_v26 = vld [vmem:[#allocation7 + $0x558] ss:$36 sps:$4 sm:$0xff]   ;;  %v5670_v28 = vld [vmem:[#allocation7 + $0x5a4] ss:$36 sps:$4 sm:$0xff]  }
  0x62   :  { %1443 = vmatpush1.bf16.msra.mxu0 %v5594_v30  ;;  %1549 = vmatpush1.bf16.msra.mxu1 %v5595_v31  ;;  %v5673_v29 = vld [vmem:[#allocation7 + $0x5ac] ss:$36 sps:$4 sm:$0xff]   ;;  %v6168_v30 = vmov 0   ;;  %v5668_v31 = vld [vmem:[#allocation7 + $0x5a0] ss:$36 sps:$4 sm:$0xff]  }
  0x63   :  { %1444 = vmatprep.subr.bf16.mxu0 %v5596_v32  ;;  %1550 = vmatprep.subr.bf16.mxu1 %v5598_v33  ;;  %v5671_v32 = vld [vmem:[#allocation7 + $0x5a8] ss:$36 sps:$4 sm:$0xff]   ;;  %v5694_v47 = vld [vmem:[#allocation7 + $0x14] ss:$36 sps:$4 sm:$0xff]   ;;  %v5724_v5 = vld [vmem:[#allocation7 + $0x13c] ss:$36 sps:$4 sm:$0xff]  }
  0x64   :  { %v5676_v33 = vld [vmem:[#allocation7 + $0x5ec] ss:$36 sps:$4 sm:$0xff]   ;;  %v5715_v4 = vld [vmem:[#allocation7 + $0x134] ss:$36 sps:$4 sm:$0xff]   ;;  %v5730_v10 = vld [vmem:[#allocation7 + $0x184] ss:$36 sps:$4 sm:$0xff]  }
  0x65   :  { %v71_v46 = vld [vmem:[#allocation4 + $0x28] sm:$0xff]  ;;  %v5719_v11 = vld [vmem:[#allocation7 + $0x178] ss:$36 sps:$4 sm:$0xff]  }
  0x66   :  { %1445 = vmatpush1.bf16.msra.mxu0 %v5600_v34  ;;  %1551 = vmatpush1.bf16.msra.mxu1 %v5601_v35  ;;  %v5679_v34 = vld [vmem:[#allocation7 + $0x5f4] ss:$36 sps:$4 sm:$0xff]   ;;  %v5674_v35 = vld [vmem:[#allocation7 + $0x5e8] ss:$36 sps:$4 sm:$0xff]  }
  0x67   :  { %1446 = vmatprep.subr.bf16.mxu0 %v5602_v36  ;;  %1552 = vmatprep.subr.bf16.mxu1 %v5604_v37  ;;  %v5677_v36 = vld [vmem:[#allocation7 + $0x5f0] ss:$36 sps:$4 sm:$0xff]  }
  0x68   :  { %v5682_v37 = vld [vmem:[#allocation7 + $0x634] ss:$36 sps:$4 sm:$0xff]   ;;  %v5733_v18 = vld [vmem:[#allocation7 + $0x20c] ss:$36 sps:$4 sm:$0xff]  }
  0x69   :  { %v5742_v19 = vld [vmem:[#allocation7 + $0x214] ss:$36 sps:$4 sm:$0xff]  }
  0x6a   :  { %1447 = vmatpush1.bf16.msra.mxu0 %v5606_v38  ;;  %1553 = vmatpush1.bf16.msra.mxu1 %v5607_v39  ;;  %v5685_v38 = vld [vmem:[#allocation7 + $0x63c] ss:$36 sps:$4 sm:$0xff]   ;;  %v5680_v39 = vld [vmem:[#allocation7 + $0x630] ss:$36 sps:$4 sm:$0xff]  }
  0x6b   :  { %1448 = vmatprep.subr.bf16.mxu0 %v5608_v40  ;;  %1554 = vmatprep.subr.bf16.mxu1 %v5610_v41  ;;  %v5683_v40 = vld [vmem:[#allocation7 + $0x638] ss:$36 sps:$4 sm:$0xff]  }
  0x6c   :  { %v5688_v41 = vld [vmem:[#allocation7 + $0x67c] ss:$36 sps:$4 sm:$0xff]  }
  0x6e   :  { %1449 = vmatpush1.bf16.msra.mxu0 %v5612_v42  ;;  %1555 = vmatpush1.bf16.msra.mxu1 %v5613_v43  ;;  %v5691_v42 = vld [vmem:[#allocation7 + $0x684] ss:$36 sps:$4 sm:$0xff]   ;;  %v5686_v43 = vld [vmem:[#allocation7 + $0x678] ss:$36 sps:$4 sm:$0xff]  }
  0x6f   :  { %1450 = vmatprep.subr.bf16.mxu0 %v5614_v44  ;;  %1556 = vmatprep.subr.bf16.mxu1 %v5616_v45  ;;  %v5689_v44 = vld [vmem:[#allocation7 + $0x680] ss:$36 sps:$4 sm:$0xff]   ;;  %v68_v45 = vld [vmem:[#allocation4 + $0x10] sm:$0xff] }
  0x72   :  { %1451 = vmatpush1.bf16.msra.mxu0 %v5618_v48  ;;  %1557 = vmatpush1.bf16.msra.mxu1 %v5619_v49  ;;  %v5700_v48 = vld [vmem:[#allocation7 + $0x1c] ss:$36 sps:$4 sm:$0xff]   ;;  %v6272_v49 = vpack.c.bf16 %v71_v46, %v68_v45  ;;  %v5778_v45 = vld [vmem:[#allocation7 + $0x3c4] ss:$36 sps:$4 sm:$0xff]  }
  0x73   :  { %1452 = vmatprep.subr.bf16.mxu0 %v5620_v51  ;;  %1558 = vmatprep.subr.bf16.mxu1 %v5622_v52  ;;  %v5692_v51 = vld [vmem:[#allocation7 + $0x10] ss:$36 sps:$4 sm:$0xff]   ;;  %v5698_v52 = vld [vmem:[#allocation7 + $0x18] ss:$36 sps:$4 sm:$0xff]  }
  0x74   :  { %v5767_v46 = vld [vmem:[#allocation7 + $0x3b8] ss:$36 sps:$4 sm:$0xff]  }
  0x76   :  { %1453 = vmatpush1.bf16.msra.mxu0 %v5624_v53  ;;  %1559 = vmatpush1.bf16.msra.mxu1 %v5625_v54  ;;  %v5697_v53 = vld [vmem:[#allocation7 + $0x5c] ss:$36 sps:$4 sm:$0xff]   ;;  %v5706_v54 = vld [vmem:[#allocation7 + $0x64] ss:$36 sps:$4 sm:$0xff]  }
  0x77   :  { %1454 = vmatprep.subr.bf16.mxu0 %v5626_v55  ;;  %1560 = vmatprep.subr.bf16.mxu1 %v5628_v56  ;;  %v74_v55 = vld [vmem:[#allocation4 + $0x40] sm:$0xff]  ;;  %v77_v56 = vld [vmem:[#allocation4 + $0x58] sm:$0xff] }
  0x7a   :  { %1455 = vmatpush1.bf16.msra.mxu0 %v5630_v57  ;;  %1561 = vmatpush1.bf16.msra.mxu1 %v5631_v58  ;;  %v5695_v57 = vld [vmem:[#allocation7 + $0x58] ss:$36 sps:$4 sm:$0xff]   ;;  %v5704_v58 = vld [vmem:[#allocation7 + $0x60] ss:$36 sps:$4 sm:$0xff]  }
  0x7b   :  { %1456 = vmatprep.subr.bf16.mxu0 %v5632_v59  ;;  %1562 = vmatprep.subr.bf16.mxu1 %v5634_v60  ;;  %v5703_v59 = vld [vmem:[#allocation7 + $0xa4] ss:$36 sps:$4 sm:$0xff]   ;;  %v5712_v60 = vld [vmem:[#allocation7 + $0xac] ss:$36 sps:$4 sm:$0xff]  }
  0x7e   :  { %1457 = vmatpush1.bf16.msra.mxu0 %v5636_v61  ;;  %1563 = vmatpush1.bf16.msra.mxu1 %v5637_v62  ;;  %v6278_v61 = vpack.c.bf16 %v77_v56, %v74_v55  ;;  %v5701_v62 = vld [vmem:[#allocation7 + $0xa0] ss:$36 sps:$4 sm:$0xff]   ;;  %v5790_v55 = vld [vmem:[#allocation7 + $0x454] ss:$36 sps:$4 sm:$0xff]   ;;  %v5779_v56 = vld [vmem:[#allocation7 + $0x448] ss:$36 sps:$4 sm:$0xff]  }
  0x7f   :  { %1458 = vmatprep.subr.bf16.mxu0 %v5638_v63  ;;  %1564 = vmatprep.subr.bf16.mxu1 %v5640_v0  ;;  %v5710_v63 = vld [vmem:[#allocation7 + $0xa8] ss:$36 sps:$4 sm:$0xff]  }
  0x80   :  { %v5709_v0 = vld [vmem:[#allocation7 + $0xec] ss:$36 sps:$4 sm:$0xff]  }
  0x82   :  { %1459 = vmatpush1.bf16.msra.mxu0 %v5642_v1  ;;  %1565 = vmatpush1.bf16.msra.mxu1 %v5643_v2  ;;  %v5718_v1 = vld [vmem:[#allocation7 + $0xf4] ss:$36 sps:$4 sm:$0xff]   ;;  %v5707_v2 = vld [vmem:[#allocation7 + $0xe8] ss:$36 sps:$4 sm:$0xff]  }
  0x83   :  { %1481 = vmatprep.subr.bf16.mxu0 %v5646_v3  ;;  %1587 = vmatprep.subr.bf16.mxu1 %v5649_v6  ;;  %v5716_v3 = vld [vmem:[#allocation7 + $0xf0] ss:$36 sps:$4 sm:$0xff]  }
  0x84   :  { %v5713_v6 = vld [vmem:[#allocation7 + $0x130] ss:$36 sps:$4 sm:$0xff]  }
  0x85   :  { %1461 = vmatmul.mubr.bf16.vlgmr.msra.gmra.mrb[0].mxu0 %v6258_v9  ;;  %1567 = vmatmul.mubr.bf16.vlgmr.msra.gmra.mrb[0].mxu1 %v6258_v9 }
  0x86   :  { %1482 = vmatpush1.bf16.msra.mxu0 %v5644_v7  ;;  %1588 = vmatpush1.bf16.msra.mxu1 %v5647_v8  ;;  %v5722_v7 = vld [vmem:[#allocation7 + $0x138] ss:$36 sps:$4 sm:$0xff]  }
  0x87   :  { %1483 = vmatprep.subr.bf16.mxu0 %v5652_v12  ;;  %1589 = vmatprep.subr.bf16.mxu1 %v5655_v13  ;;  %v5721_v8 = vld [vmem:[#allocation7 + $0x17c] ss:$36 sps:$4 sm:$0xff]   ;;  %v5727_v13 = vld [vmem:[#allocation7 + $0x1c4] ss:$36 sps:$4 sm:$0xff]  }
  0x88   :  { %1470 = vmatprep.mubr.bf16.mxu0 %v6260_v15  ;;  %1576 = vmatprep.mubr.bf16.mxu1 %v6260_v15  ;;  %v5728_v12 = vld [vmem:[#allocation7 + $0x180] ss:$36 sps:$4 sm:$0xff]  }
  0x8a   :  { %1484 = vmatpush1.bf16.msra.mxu0 %v5650_v14  ;;  %1590 = vmatpush1.bf16.msra.mxu1 %v5653_v16  ;;  %v5736_v14 = vld [vmem:[#allocation7 + $0x1cc] ss:$36 sps:$4 sm:$0xff]   ;;  %v5725_v16 = vld [vmem:[#allocation7 + $0x1c0] ss:$36 sps:$4 sm:$0xff]  }
  0x8b   :  { %1485 = vmatprep.subr.bf16.mxu0 %v5658_v17  ;;  %1591 = vmatprep.subr.bf16.mxu1 %v5661_v20  ;;  %v5734_v17 = vld [vmem:[#allocation7 + $0x1c8] ss:$36 sps:$4 sm:$0xff]  }
  0x8c   :  { %v5731_v20 = vld [vmem:[#allocation7 + $0x208] ss:$36 sps:$4 sm:$0xff]  }
  0x8d   :  { %1471 = vmatmul.mubr.bf16.gmra.mrb[4].mxu0 %v6266_v23  ;;  %1577 = vmatmul.mubr.bf16.gmra.mrb[4].mxu1 %v6266_v23 }
  0x8e   :  { %1486 = vmatpush1.bf16.msra.mxu0 %v5656_v21  ;;  %1592 = vmatpush1.bf16.msra.mxu1 %v5659_v22  ;;  %v5740_v21 = vld [vmem:[#allocation7 + $0x210] ss:$36 sps:$4 sm:$0xff]  }
  0x8f   :  { %1487 = vmatprep.subr.bf16.mxu0 %v5664_v24  ;;  %1593 = vmatprep.subr.bf16.mxu1 %v5667_v25  ;;  %v5739_v22 = vld [vmem:[#allocation7 + $0x254] ss:$36 sps:$4 sm:$0xff]   ;;  %v5748_v24 = vld [vmem:[#allocation7 + $0x25c] ss:$36 sps:$4 sm:$0xff]  }
  0x90   :  { %1513 = vmatprep.mubr.bf16.mxu0 %v6168_v30  ;;  %1619 = vmatprep.mubr.bf16.mxu1 %v6168_v30  ;;  %v5737_v25 = vld [vmem:[#allocation7 + $0x250] ss:$36 sps:$4 sm:$0xff]  }
  0x92   :  { %1488 = vmatpush1.bf16.msra.mxu0 %v5662_v26  ;;  %1594 = vmatpush1.bf16.msra.mxu1 %v5665_v27  ;;  %v5746_v26 = vld [vmem:[#allocation7 + $0x258] ss:$36 sps:$4 sm:$0xff]  }
  0x93   :  { %1489 = vmatprep.subr.bf16.mxu0 %v5670_v28  ;;  %1595 = vmatprep.subr.bf16.mxu1 %v5673_v29  ;;  %v5745_v27 = vld [vmem:[#allocation7 + $0x29c] ss:$36 sps:$4 sm:$0xff]   ;;  %v5754_v28 = vld [vmem:[#allocation7 + $0x2a4] ss:$36 sps:$4 sm:$0xff]  }
  0x94   :  { %v5743_v29 = vld [vmem:[#allocation7 + $0x298] ss:$36 sps:$4 sm:$0xff]  }
  0x96   :  { %1490 = vmatpush1.bf16.msra.mxu0 %v5668_v31  ;;  %1596 = vmatpush1.bf16.msra.mxu1 %v5671_v32  ;;  %v5751_v31 = vld [vmem:[#allocation7 + $0x2e4] ss:$36 sps:$4 sm:$0xff]  }
  0x97   :  { %1491 = vmatprep.subr.bf16.mxu0 %v5676_v33  ;;  %1597 = vmatprep.subr.bf16.mxu1 %v5679_v34  ;;  %v5752_v32 = vld [vmem:[#allocation7 + $0x2a0] ss:$36 sps:$4 sm:$0xff]   ;;  %v5760_v33 = vld [vmem:[#allocation7 + $0x2ec] ss:$36 sps:$4 sm:$0xff]  }
  0x98   :  { %v5749_v34 = vld [vmem:[#allocation7 + $0x2e0] ss:$36 sps:$4 sm:$0xff]  }
  0x9a   :  { %1492 = vmatpush1.bf16.msra.mxu0 %v5674_v35  ;;  %1598 = vmatpush1.bf16.msra.mxu1 %v5677_v36  ;;  %v5757_v35 = vld [vmem:[#allocation7 + $0x32c] ss:$36 sps:$4 sm:$0xff]  }
  0x9b   :  { %1493 = vmatprep.subr.bf16.mxu0 %v5682_v37  ;;  %1599 = vmatprep.subr.bf16.mxu1 %v5685_v38  ;;  %v5758_v36 = vld [vmem:[#allocation7 + $0x2e8] ss:$36 sps:$4 sm:$0xff]   ;;  %v5766_v37 = vld [vmem:[#allocation7 + $0x334] ss:$36 sps:$4 sm:$0xff]  }
  0x9c   :  { %v5755_v38 = vld [vmem:[#allocation7 + $0x328] ss:$36 sps:$4 sm:$0xff]  }
  0x9e   :  { %1494 = vmatpush1.bf16.msra.mxu0 %v5680_v39  ;;  %1600 = vmatpush1.bf16.msra.mxu1 %v5683_v40  ;;  %v5763_v39 = vld [vmem:[#allocation7 + $0x374] ss:$36 sps:$4 sm:$0xff]  }
  0x9f   :  { %1495 = vmatprep.subr.bf16.mxu0 %v5688_v41  ;;  %1601 = vmatprep.subr.bf16.mxu1 %v5691_v42  ;;  %v5764_v40 = vld [vmem:[#allocation7 + $0x330] ss:$36 sps:$4 sm:$0xff]   ;;  %v5772_v41 = vld [vmem:[#allocation7 + $0x37c] ss:$36 sps:$4 sm:$0xff]  }
  0xa0   :  { %v5761_v42 = vld [vmem:[#allocation7 + $0x370] ss:$36 sps:$4 sm:$0xff]  }
  0xa2   :  { %1496 = vmatpush1.bf16.msra.mxu0 %v5686_v43  ;;  %1602 = vmatpush1.bf16.msra.mxu1 %v5689_v44  ;;  %v5769_v43 = vld [vmem:[#allocation7 + $0x3bc] ss:$36 sps:$4 sm:$0xff]  }
  0xa3   :  { %1640 = vmatprep.subr.bf16.mxu0 %v5694_v47  ;;  %1746 = vmatprep.subr.bf16.mxu1 %v5700_v48  ;;  %v5770_v44 = vld [vmem:[#allocation7 + $0x378] ss:$36 sps:$4 sm:$0xff]   ;;  %v5775_v47 = vld [vmem:[#allocation7 + $0x404] ss:$36 sps:$4 sm:$0xff]  }
  0xa4   :  { %v5776_v48 = vld [vmem:[#allocation7 + $0x3c0] ss:$36 sps:$4 sm:$0xff]  }
  0xa5   :  { %1514 = vmatmul.mubr.bf16.vlgmr.msra.gmra.mrb[0].mxu0 %v6272_v49  ;;  %1620 = vmatmul.mubr.bf16.vlgmr.msra.gmra.mrb[0].mxu1 %v6272_v49 }
  0xa6   :  { %1523 = vmatprep.mubr.bf16.mxu0 %v6168_v30  ;;  %1629 = vmatprep.mubr.bf16.mxu1 %v6168_v30 }
  0xa7   :  { %1641 = vmatpush1.bf16.msra.mxu0 %v5692_v51  ;;  %1747 = vmatpush1.bf16.msra.mxu1 %v5698_v52  ;;  %v5784_v51 = vld [vmem:[#allocation7 + $0x40c] ss:$36 sps:$4 sm:$0xff]   ;;  %v5773_v52 = vld [vmem:[#allocation7 + $0x400] ss:$36 sps:$4 sm:$0xff]  }
  0xa8   :  { %1642 = vmatprep.subr.bf16.mxu0 %v5697_v53  ;;  %1748 = vmatprep.subr.bf16.mxu1 %v5706_v54  ;;  %v5781_v53 = vld [vmem:[#allocation7 + $0x44c] ss:$36 sps:$4 sm:$0xff]  }
  0xa9   :  { %v5782_v54 = vld [vmem:[#allocation7 + $0x408] ss:$36 sps:$4 sm:$0xff]  }
  0xab   :  { %1643 = vmatpush1.bf16.msra.mxu0 %v5695_v57  ;;  %1749 = vmatpush1.bf16.msra.mxu1 %v5704_v58  ;;  %v5788_v57 = vld [vmem:[#allocation7 + $0x450] ss:$36 sps:$4 sm:$0xff]  }
  0xac   :  { %1644 = vmatprep.subr.bf16.mxu0 %v5703_v59  ;;  %1750 = vmatprep.subr.bf16.mxu1 %v5712_v60  ;;  %v5787_v58 = vld [vmem:[#allocation7 + $0x494] ss:$36 sps:$4 sm:$0xff]   ;;  %v5796_v59 = vld [vmem:[#allocation7 + $0x49c] ss:$36 sps:$4 sm:$0xff]  }
  0xad   :  { %1524 = vmatmul.mubr.bf16.gmra.mrb[4].mxu0 %v6278_v61  ;;  %1630 = vmatmul.mubr.bf16.gmra.mrb[4].mxu1 %v6278_v61  ;;  %v5785_v60 = vld [vmem:[#allocation7 + $0x490] ss:$36 sps:$4 sm:$0xff]  }
  0xae   :  { %1672 = vmatprep.mubr.bf16.mxu0 %v6254_v50  ;;  %1778 = vmatprep.mubr.bf16.mxu1 %v6254_v50 }
  0xaf   :  { %1645 = vmatpush1.bf16.msra.mxu0 %v5701_v62  ;;  %1751 = vmatpush1.bf16.msra.mxu1 %v5710_v63  ;;  %v5794_v62 = vld [vmem:[#allocation7 + $0x498] ss:$36 sps:$4 sm:$0xff]  }
  0xb0   :  { %1646 = vmatprep.subr.bf16.mxu0 %v5709_v0  ;;  %1752 = vmatprep.subr.bf16.mxu1 %v5718_v1  ;;  %v5793_v63 = vld [vmem:[#allocation7 + $0x4dc] ss:$36 sps:$4 sm:$0xff]   ;;  %v5802_v0 = vld [vmem:[#allocation7 + $0x4e4] ss:$36 sps:$4 sm:$0xff]  }
  0xb1   :  { %v5791_v1 = vld [vmem:[#allocation7 + $0x4d8] ss:$36 sps:$4 sm:$0xff]  }
  0xb3   :  { %1647 = vmatpush1.bf16.msra.mxu0 %v5707_v2  ;;  %1753 = vmatpush1.bf16.msra.mxu1 %v5716_v3  ;;  %v5800_v2 = vld [vmem:[#allocation7 + $0x4e0] ss:$36 sps:$4 sm:$0xff]  }
  0xb4   :  { %1648 = vmatprep.subr.bf16.mxu0 %v5715_v4  ;;  %1754 = vmatprep.subr.bf16.mxu1 %v5724_v5  ;;  %v5799_v3 = vld [vmem:[#allocation7 + $0x524] ss:$36 sps:$4 sm:$0xff]   ;;  %v5808_v4 = vld [vmem:[#allocation7 + $0x52c] ss:$36 sps:$4 sm:$0xff]  }
  0xb5   :  { %v5797_v5 = vld [vmem:[#allocation7 + $0x520] ss:$36 sps:$4 sm:$0xff]  }
  0xb7   :  { %1649 = vmatpush1.bf16.msra.mxu0 %v5713_v6  ;;  %1755 = vmatpush1.bf16.msra.mxu1 %v5722_v7  ;;  %v5806_v6 = vld [vmem:[#allocation7 + $0x528] ss:$36 sps:$4 sm:$0xff]  }
  0xb8   :  { %1650 = vmatprep.subr.bf16.mxu0 %v5721_v8  ;;  %1756 = vmatprep.subr.bf16.mxu1 %v5730_v10  ;;  %v5805_v7 = vld [vmem:[#allocation7 + $0x56c] ss:$36 sps:$4 sm:$0xff]   ;;  %v5814_v8 = vld [vmem:[#allocation7 + $0x574] ss:$36 sps:$4 sm:$0xff]  }
  0xb9   :  { %v5803_v10 = vld [vmem:[#allocation7 + $0x568] ss:$36 sps:$4 sm:$0xff]  }
  0xbb   :  { %1651 = vmatpush1.bf16.msra.mxu0 %v5719_v11  ;;  %1757 = vmatpush1.bf16.msra.mxu1 %v5728_v12  ;;  %v5811_v11 = vld [vmem:[#allocation7 + $0x5b4] ss:$36 sps:$4 sm:$0xff]  }
  0xbc   :  { %1652 = vmatprep.subr.bf16.mxu0 %v5727_v13  ;;  %1758 = vmatprep.subr.bf16.mxu1 %v5736_v14  ;;  %v5812_v12 = vld [vmem:[#allocation7 + $0x570] ss:$36 sps:$4 sm:$0xff]   ;;  %v5820_v13 = vld [vmem:[#allocation7 + $0x5bc] ss:$36 sps:$4 sm:$0xff]  }
  0xbd   :  { %v5809_v14 = vld [vmem:[#allocation7 + $0x5b0] ss:$36 sps:$4 sm:$0xff]  }
  0xbf   :  { %1653 = vmatpush1.bf16.msra.mxu0 %v5725_v16  ;;  %1759 = vmatpush1.bf16.msra.mxu1 %v5734_v17  ;;  %v5818_v16 = vld [vmem:[#allocation7 + $0x5b8] ss:$36 sps:$4 sm:$0xff]  }
  0xc0   :  { %1654 = vmatprep.subr.bf16.mxu0 %v5733_v18  ;;  %1760 = vmatprep.subr.bf16.mxu1 %v5742_v19  ;;  %v5817_v17 = vld [vmem:[#allocation7 + $0x5fc] ss:$36 sps:$4 sm:$0xff]   ;;  %v5826_v18 = vld [vmem:[#allocation7 + $0x604] ss:$36 sps:$4 sm:$0xff]  }
  0xc1   :  { %v5815_v19 = vld [vmem:[#allocation7 + $0x5f8] ss:$36 sps:$4 sm:$0xff]  }
  0xc3   :  { %1655 = vmatpush1.bf16.msra.mxu0 %v5731_v20  ;;  %1761 = vmatpush1.bf16.msra.mxu1 %v5740_v21  ;;  %v5824_v20 = vld [vmem:[#allocation7 + $0x600] ss:$36 sps:$4 sm:$0xff]  }
  0xc4   :  { %1656 = vmatprep.subr.bf16.mxu0 %v5739_v22  ;;  %1762 = vmatprep.subr.bf16.mxu1 %v5748_v24  ;;  %v5823_v21 = vld [vmem:[#allocation7 + $0x644] ss:$36 sps:$4 sm:$0xff]   ;;  %v5832_v22 = vld [vmem:[#allocation7 + $0x64c] ss:$36 sps:$4 sm:$0xff]  }
  0xc5   :  { %v5821_v24 = vld [vmem:[#allocation7 + $0x640] ss:$36 sps:$4 sm:$0xff]  }
  0xc7   :  { %1657 = vmatpush1.bf16.msra.mxu0 %v5737_v25  ;;  %1763 = vmatpush1.bf16.msra.mxu1 %v5746_v26  ;;  %v5830_v25 = vld [vmem:[#allocation7 + $0x648] ss:$36 sps:$4 sm:$0xff]  }
  0xc8   :  { %1658 = vmatprep.subr.bf16.mxu0 %v5745_v27  ;;  %1764 = vmatprep.subr.bf16.mxu1 %v5754_v28  ;;  %v5829_v26 = vld [vmem:[#allocation7 + $0x68c] ss:$36 sps:$4 sm:$0xff]   ;;  %v5835_v27 = vld [vmem:[#allocation7 + $0x694] ss:$36 sps:$4 sm:$0xff]  }
  0xc9   :  { %v5827_v28 = vld [vmem:[#allocation7 + $0x688] ss:$36 sps:$4 sm:$0xff]  }
  0xcb   :  { %1659 = vmatpush1.bf16.msra.mxu0 %v5743_v29  ;;  %1765 = vmatpush1.bf16.msra.mxu1 %v5752_v32  ;;  %v5833_v29 = vld [vmem:[#allocation7 + $0x690] ss:$36 sps:$4 sm:$0xff]   ;;  %v5838_v32 = vld [vmem:[#allocation7 + $0x260] ss:$36 sps:$4 sm:$0xff]  }
  0xcc   :  { %1660 = vmatprep.subr.bf16.mxu0 %v5751_v31  ;;  %1766 = vmatprep.subr.bf16.mxu1 %v5760_v33  ;;  %v5836_v31 = vld [vmem:[#allocation7 + $0x4a0] ss:$36 sps:$4 sm:$0xff]  }
  0xcd   :  { %v5839_v33 = vld [vmem:[#allocation7 + $0x20] ss:$36 sps:$4 sm:$0xff]  }
  0xcf   :  { %1661 = vmatpush1.bf16.msra.mxu0 %v5749_v34  ;;  %1767 = vmatpush1.bf16.msra.mxu1 %v5758_v36  ;;  %v5837_v34 = vld [vmem:[#allocation7 + $0x4e8] ss:$36 sps:$4 sm:$0xff]  }
  0xd0   :  { %1662 = vmatprep.subr.bf16.mxu0 %v5757_v35  ;;  %1768 = vmatprep.subr.bf16.mxu1 %v5766_v37  ;;  %v5841_v35 = vld [vmem:[#allocation7 + $0x2a8] ss:$36 sps:$4 sm:$0xff]   ;;  %v5840_v37 = vld [vmem:[#allocation7 + $0x530] ss:$36 sps:$4 sm:$0xff]  }
  0xd1   :  { %v5842_v36 = vld [vmem:[#allocation7 + $0x68] ss:$36 sps:$4 sm:$0xff]  }
  0xd3   :  { %1663 = vmatpush1.bf16.msra.mxu0 %v5755_v38  ;;  %1769 = vmatpush1.bf16.msra.mxu1 %v5764_v40  ;;  %v5844_v38 = vld [vmem:[#allocation7 + $0x2f0] ss:$36 sps:$4 sm:$0xff]   ;;  %v5843_v40 = vld [vmem:[#allocation7 + $0x578] ss:$36 sps:$4 sm:$0xff]  }
  0xd4   :  { %1664 = vmatprep.subr.bf16.mxu0 %v5763_v39  ;;  %1770 = vmatprep.subr.bf16.mxu1 %v5772_v41  ;;  %v5845_v39 = vld [vmem:[#allocation7 + $0xb0] ss:$36 sps:$4 sm:$0xff]   ;;  %v5847_v41 = vld [vmem:[#allocation7 + $0x338] ss:$36 sps:$4 sm:$0xff]  }
  0xd7   :  { %1665 = vmatpush1.bf16.msra.mxu0 %v5761_v42  ;;  %1771 = vmatpush1.bf16.msra.mxu1 %v5770_v44  ;;  %v5848_v42 = vld [vmem:[#allocation7 + $0xf8] ss:$36 sps:$4 sm:$0xff]   ;;  %v5850_v44 = vld [vmem:[#allocation7 + $0x380] ss:$36 sps:$4 sm:$0xff]  }
  0xd8   :  { %1666 = vmatprep.subr.bf16.mxu0 %v5769_v43  ;;  %1772 = vmatprep.subr.bf16.mxu1 %v5778_v45  ;;  %v5846_v43 = vld [vmem:[#allocation7 + $0x5c0] ss:$36 sps:$4 sm:$0xff]  }
  0xd9   :  { %v5851_v45 = vld [vmem:[#allocation7 + $0x140] ss:$36 sps:$4 sm:$0xff]  }
  0xdb   :  { %1667 = vmatpush1.bf16.msra.mxu0 %v5767_v46  ;;  %1773 = vmatpush1.bf16.msra.mxu1 %v5776_v48  ;;  %v5849_v46 = vld [vmem:[#allocation7 + $0x608] ss:$36 sps:$4 sm:$0xff]  }
  0xdc   :  { %1668 = vmatprep.subr.bf16.mxu0 %v5775_v47  ;;  %1774 = vmatprep.subr.bf16.mxu1 %v5784_v51  ;;  %v5853_v47 = vld [vmem:[#allocation7 + $0x3c8] ss:$36 sps:$4 sm:$0xff]   ;;  %v5857_v51 = vld [vmem:[#allocation7 + $0x1d0] ss:$36 sps:$4 sm:$0xff]  }
  0xdd   :  { %v5854_v48 = vld [vmem:[#allocation7 + $0x188] ss:$36 sps:$4 sm:$0xff]  }
  0xdf   :  { %1669 = vmatpush1.bf16.msra.mxu0 %v5773_v52  ;;  %1775 = vmatpush1.bf16.msra.mxu1 %v5782_v54  ;;  %v5855_v52 = vld [vmem:[#allocation7 + $0x698] ss:$36 sps:$4 sm:$0xff]  }
  0xe0   :  { %1670 = vmatprep.subr.bf16.mxu0 %v5781_v53  ;;  %1776 = vmatprep.subr.bf16.mxu1 %v5790_v55  ;;  %v5858_v53 = vld [vmem:[#allocation7 + $0x458] ss:$36 sps:$4 sm:$0xff]   ;;  %v6169_v55 = vmov 0.0  }
  0xe1   :  { %v5859_v54 = vld [vmem:[#allocation7 + $0x218] ss:$36 sps:$4 sm:$0xff]  }
  0xe3   :  { %1671 = vmatpush1.bf16.msra.mxu0 %v5779_v56  ;;  %1777 = vmatpush1.bf16.msra.mxu1 %v5788_v57 }
  0xe4   :  { %1693 = vmatprep.subr.bf16.mxu0 %v5787_v58  ;;  %1799 = vmatprep.subr.bf16.mxu1 %v5796_v59 }
  0xe6   :  { %1673 = vmatmul.mubr.bf16.vlgmr.msra.gmra.mrb[8].mxu0 %v6258_v9  ;;  %1779 = vmatmul.mubr.bf16.vlgmr.msra.gmra.mrb[8].mxu1 %v6258_v9 }
  0xe7   :  { %1694 = vmatpush1.bf16.msra.mxu0 %v5785_v60  ;;  %1800 = vmatpush1.bf16.msra.mxu1 %v5794_v62 }
  0xe8   :  { %1695 = vmatprep.subr.bf16.mxu0 %v5793_v63  ;;  %1801 = vmatprep.subr.bf16.mxu1 %v5802_v0 }
  0xe9   :  { %1682 = vmatprep.mubr.bf16.mxu0 %v6260_v15  ;;  %1788 = vmatprep.mubr.bf16.mxu1 %v6260_v15 }
  0xeb   :  { %1696 = vmatpush1.bf16.msra.mxu0 %v5791_v1  ;;  %1802 = vmatpush1.bf16.msra.mxu1 %v5800_v2 }
  0xec   :  { %1697 = vmatprep.subr.bf16.mxu0 %v5799_v3  ;;  %1803 = vmatprep.subr.bf16.mxu1 %v5808_v4 }
  0xee   :  { %1683 = vmatmul.mubr.bf16.gmra.mrb[12].mxu0 %v6266_v23  ;;  %1789 = vmatmul.mubr.bf16.gmra.mrb[12].mxu1 %v6266_v23 }
  0xef   :  { %1698 = vmatpush1.bf16.msra.mxu0 %v5797_v5  ;;  %1804 = vmatpush1.bf16.msra.mxu1 %v5806_v6 }
  0xf0   :  { %1699 = vmatprep.subr.bf16.mxu0 %v5805_v7  ;;  %1805 = vmatprep.subr.bf16.mxu1 %v5814_v8 }
  0xf1   :  { %1725 = vmatprep.mubr.bf16.mxu0 %v6168_v30  ;;  %1831 = vmatprep.mubr.bf16.mxu1 %v6168_v30 }
  0xf3   :  { %1700 = vmatpush1.bf16.msra.mxu0 %v5803_v10  ;;  %1806 = vmatpush1.bf16.msra.mxu1 %v5812_v12 }
  0xf4   :  { %1701 = vmatprep.subr.bf16.mxu0 %v5811_v11  ;;  %1807 = vmatprep.subr.bf16.mxu1 %v5820_v13 }
  0xf7   :  { %1702 = vmatpush1.bf16.msra.mxu0 %v5809_v14  ;;  %1808 = vmatpush1.bf16.msra.mxu1 %v5818_v16 }
  0xf8   :  { %1703 = vmatprep.subr.bf16.mxu0 %v5817_v17  ;;  %1809 = vmatprep.subr.bf16.mxu1 %v5826_v18 }
  0xfb   :  { %1704 = vmatpush1.bf16.msra.mxu0 %v5815_v19  ;;  %1810 = vmatpush1.bf16.msra.mxu1 %v5824_v20 }
  0xfc   :  { %1705 = vmatprep.subr.bf16.mxu0 %v5823_v21  ;;  %1811 = vmatprep.subr.bf16.mxu1 %v5832_v22 }
  0xff   :  { %1706 = vmatpush1.bf16.msra.mxu0 %v5821_v24  ;;  %1812 = vmatpush1.bf16.msra.mxu1 %v5830_v25 }
 0x100   :  { %1707 = vmatprep.subr.bf16.mxu0 %v5829_v26  ;;  %1813 = vmatprep.subr.bf16.mxu1 %v5835_v27 }
 0x103   :  { %1708 = vmatpush1.bf16.msra.mxu0 %v5827_v28  ;;  %1814 = vmatpush1.bf16.msra.mxu1 %v5833_v29 }
 0x104   :  { %5193 = vmatprep.subr.bf16.mxu1 %v5836_v31  ;;  %5071 = vmatprep.subr.bf16.mxu0 %v5838_v32 }
 0x106   :  { %1726 = vmatmul.mubr.bf16.vlgmr.msra.gmra.mrb[8].mxu0 %v6272_v49  ;;  %1832 = vmatmul.mubr.bf16.vlgmr.msra.gmra.mrb[8].mxu1 %v6272_v49 }
 0x107   :  { %1735 = vmatprep.mubr.bf16.mxu0 %v6168_v30  ;;  %1841 = vmatprep.mubr.bf16.mxu1 %v6168_v30 }
 0x108   :  { %5194 = vmatpush3.bf16.msra.mxu1 %v5836_v31  ;;  %5072 = vmatpush3.bf16.msra.mxu0 %v5839_v33 }
 0x109   :  { %5195 = vmatprep.subr.bf16.mxu1 %v5837_v34  ;;  %5073 = vmatprep.subr.bf16.mxu0 %v5841_v35 }
 0x10c   :  { %5196 = vmatpush3.bf16.msra.mxu1 %v5837_v34  ;;  %5074 = vmatpush3.bf16.msra.mxu0 %v5842_v36 }
 0x10d   :  { %5197 = vmatprep.subr.bf16.mxu1 %v5840_v37  ;;  %5075 = vmatprep.subr.bf16.mxu0 %v5844_v38 }
 0x10e   :  { %1736 = vmatmul.mubr.bf16.gmra.mrb[12].mxu0 %v6278_v61  ;;  %1842 = vmatmul.mubr.bf16.gmra.mrb[12].mxu1 %v6278_v61 }
 0x10f   :  { %1884 = vmatprep.mubr.bf16.mxu0 %v6254_v50  ;;  %5209 = vmatprep.mubr.bf16.mxu1 %v6272_v49  ;;  %v5852_v50 = vld [vmem:[#allocation7 + $0x650] ss:$36 sps:$4 sm:$0xff]  }
 0x110   :  { %5198 = vmatpush3.bf16.msra.mxu1 %v5840_v37  ;;  %5076 = vmatpush3.bf16.msra.mxu0 %v5845_v39  ;;  %v5856_v49 = vld [vmem:[#allocation7 + $0x410] ss:$36 sps:$4 sm:$0xff]  }
 0x111   :  { %5199 = vmatprep.subr.bf16.mxu1 %v5843_v40  ;;  %5077 = vmatprep.subr.bf16.mxu0 %v5847_v41 }
 0x114   :  { %5200 = vmatpush3.bf16.msra.mxu1 %v5843_v40  ;;  %5078 = vmatpush3.bf16.msra.mxu0 %v5848_v42 }
 0x115   :  { %5201 = vmatprep.subr.bf16.mxu1 %v5846_v43  ;;  %5079 = vmatprep.subr.bf16.mxu0 %v5850_v44 }
 0x118   :  { %5202 = vmatpush3.bf16.msra.mxu1 %v5846_v43  ;;  %5080 = vmatpush3.bf16.msra.mxu0 %v5851_v45 }
 0x119   :  { %5203 = vmatprep.subr.bf16.mxu1 %v5849_v46  ;;  %5081 = vmatprep.subr.bf16.mxu0 %v5853_v47 }
 0x11c   :  { %5204 = vmatpush3.bf16.msra.mxu1 %v5849_v46  ;;  %5082 = vmatpush3.bf16.msra.mxu0 %v5854_v48 }
 0x11d   :  { %5205 = vmatprep.subr.bf16.mxu1 %v5852_v50  ;;  %5083 = vmatprep.subr.bf16.mxu0 %v5856_v49 }
 0x120   :  { %5206 = vmatpush3.bf16.msra.mxu1 %v5852_v50  ;;  %5084 = vmatpush3.bf16.msra.mxu0 %v5857_v51 }
 0x121   :  { %5207 = vmatprep.subr.bf16.mxu1 %v5855_v52  ;;  %5085 = vmatprep.subr.bf16.mxu0 %v5858_v53 }
 0x124   :  { %5208 = vmatpush3.bf16.msra.mxu1 %v5855_v52  ;;  %5086 = vmatpush3.bf16.msra.mxu0 %v5859_v54 }
 0x125   :  { %5213 = vmatprep.subr.bf16.mxu1 %v6169_v55  ;;  %5219 = vmatprep.subr.bf16.mxu0 %v6169_v55 }
 0x127   :  { %1885 = vmatmul.mubr.bf16.vlgmr.msra.gmra.mrb[16].mxu0 %v6258_v9  ;;  %5210 = vmatmul.mubr.bf16.vlgmr.msra.gmra.mrb[16].mxu1 %v6278_v61 }
 0x128   :  { %1892 = vmatprep.mubr.bf16.mxu0 %v6260_v15  ;;  %5215 = vmatprep.mubr.msk.bf16.mxu1 %vm6170_vm0, %v6169_v55 }
 0x12f   :  { %1893 = vmatmul.mubr.bf16.gmra.mrb[20].mxu0 %v6266_v23 }
 0x130   :  { %5221 = vmatprep.mubr.msk.bf16.mxu0 %vm6170_vm0, %v6169_v55 }
 0x178   :  { %v1515_v56 = vpop.f32.mrb[0].mxu0  ;;  %v1621_v57 = vpop.f32.mrb[0].mxu1 }
 0x179   :  { %v1517_v58 = vpop.f32.mrb[1].mxu0  ;;  %v1623_v59 = vpop.f32.mrb[1].mxu1 }
 0x17a   :  { %v1519_v60 = vpop.f32.mrb[2].mxu0  ;;  %v1625_v62 = vpop.f32.mrb[2].mxu1 }
 0x17b   :  { %v6310_v9 = vpack.c.bf16 %v1519_v60, %v1515_v56  ;;  %v6312_v61 = vpack.c.bf16 %v1625_v62, %v1621_v57  ;;  %v1521_v15 = vpop.f32.mrb[3].mxu0  ;;  %v1627_v63 = vpop.f32.mrb[3].mxu1 }
 0x17c   :  { %v6314_v0 = vpack.c.bf16 %v1521_v15, %v1517_v58  ;;  %v6316_v1 = vpack.c.bf16 %v1627_v63, %v1623_v59 }
 0x17e   :  { %v2003_v23 = vsel %vm1998_vm1, %v6316_v1, 0 }
 0x17f   :  { %5214 = vmatpush3.bf16.xpose.msra.mxu1 %v2003_v23 }
 0x180   :  { %v1525_v2 = vpop.f32.mrb[4].mxu0  ;;  %v1631_v3 = vpop.f32.mrb[4].mxu1  ;;  %5225 = vmatprep.subr.bf16.mxu1 %v6169_v55 }
 0x181   :  { %v1527_v4 = vpop.f32.mrb[5].mxu0  ;;  %v1633_v5 = vpop.f32.mrb[5].mxu1 }
 0x182   :  { %v1529_v6 = vpop.f32.mrb[6].mxu0  ;;  %v1635_v7 = vpop.f32.mrb[6].mxu1 }
 0x183   :  { %v6321_v8 = vpack.c.bf16 %v1529_v6, %v1525_v2  ;;  %v6323_v10 = vpack.c.bf16 %v1635_v7, %v1631_v3  ;;  %v1531_v11 = vpop.f32.mrb[7].mxu0  ;;  %v1637_v12 = vpop.f32.mrb[7].mxu1  ;;  %v1968_v3 = vlaneseq }
 0x184   :  { %v6325_v13 = vpack.c.bf16 %v1531_v11, %v1527_v4  ;;  %v6327_v14 = vpack.c.bf16 %v1637_v12, %v1633_v5  ;;  %v1971_v5 = vstv %s1970_s3  ;;  %v1977_v11 = vstv %s4949_s16 }
 0x185   :  { %v1969_v4 = vand.u32 127, %v1968_v3  ;;  %v6363_v7 = vshrl.u32 %v1968_v3, 7 }
 0x186   :  { %v2050_v16 = vsel %vm1998_vm1, %v6327_v14, 0  ;;  %5216 = vmatmul.mubr.msk.bf16.vlgmr.msra.gmra.mrb[20].mxu1 %vm1998_vm1, %v6310_v9 }
 0x187   :  { %5220 = vmatpush3.bf16.xpose.msra.mxu0 %v2050_v16  ;;  %5227 = vmatprep.mubr.msk.bf16.mxu1 %vm6170_vm0, %v6169_v55  ;;  %vm1972_vm2 = vcmp.lt.s32.totalorder %v1969_v4, %v1971_v5  ;;  %v6366_v12 = vsub.s32 0, %v6363_v7  ;;  %vm1978_vm4 = vcmp.lt.s32.totalorder %v1969_v4, %v1977_v11 }
 0x188   :  { %5231 = vmatprep.subr.bf16.mxu0 %v6169_v55  ;;  %v4948_v6 = vsel %vm1972_vm2, 1.0, %v6169_v55 }
 0x189   :  { %vm2097_vm3 = vcmp.gt.f32.partialorder %v4948_v6, 0.0 }
 0x18a   :  { %v2099_v16 = vsel %vm2097_vm3, 1, %v6168_v30 }
 0x18e   :  { %5222 = vmatmul.mubr.msk.bf16.vlgmr.msra.gmra.mrb[24].mxu0 %vm1998_vm1, %v6321_v8 }
 0x18f   :  { %5233 = vmatprep.mubr.msk.bf16.mxu0 %vm6170_vm0, %v6169_v55 }
 0x1d9   :  { %v1727_v17 = vpop.f32.mrb[8].mxu0  ;;  %v1833_v18 = vpop.f32.mrb[8].mxu1 }
 0x1da   :  { %v1729_v19 = vpop.f32.mrb[9].mxu0  ;;  %v1835_v20 = vpop.f32.mrb[9].mxu1 }
 0x1db   :  { %v1731_v21 = vpop.f32.mrb[10].mxu0  ;;  %v1837_v22 = vpop.f32.mrb[10].mxu1 }
 0x1dc   :  { %v6340_v24 = vpack.c.bf16 %v1731_v21, %v1727_v17  ;;  %v1733_v25 = vpop.f32.mrb[11].mxu0  ;;  %v6342_v26 = vpack.c.bf16 %v1837_v22, %v1833_v18  ;;  %v1839_v27 = vpop.f32.mrb[11].mxu1  ;;  %v4950_v17 = vsel %vm1978_vm4, 1.0, %v6169_v55  ;;  %v2104_v18 = vrot.slane %v2099_v16, %v6366_v12 }
 0x1dd   :  { %v6344_v28 = vpack.c.bf16 %v1733_v25, %v1729_v19  ;;  %v6346_v29 = vpack.c.bf16 %v1839_v27, %v1835_v20  ;;  %vm2098_vm5 = vcmp.gt.f32.partialorder %v4950_v17, 0.0 }
 0x1de   :  { %5226 = vmatpush3.bf16.msra.mxu1 %v6342_v26  ;;  %vm6371_vm6 = vcmp.eq.s32.totalorder %v2104_v18, 1  ;;  %v2100_v25 = vsel %vm2098_vm5, 1, %v6168_v30 }
 0x1e1   :  { %v1737_v31 = vpop.f32.mrb[12].mxu0  ;;  %v1843_v32 = vpop.f32.mrb[12].mxu1 }
 0x1e2   :  { %v1739_v33 = vpop.f32.mrb[13].mxu0  ;;  %v1845_v34 = vpop.f32.mrb[13].mxu1 }
 0x1e3   :  { %v1741_v35 = vpop.f32.mrb[14].mxu0  ;;  %v1847_v36 = vpop.f32.mrb[14].mxu1 }
 0x1e4   :  { %v6349_v37 = vpack.c.bf16 %v1741_v35, %v1737_v31  ;;  %v1743_v38 = vpop.f32.mrb[15].mxu0  ;;  %v6351_v39 = vpack.c.bf16 %v1847_v36, %v1843_v32  ;;  %v1849_v40 = vpop.f32.mrb[15].mxu1  ;;  %v2108_v35 = vrot.slane %v2100_v25, %v6366_v12  ;;  %v5869_v25 = vld [vmem:[#allocation9 + $0x8] ss:$12 sps:$4 sm:$0xff]  }
 0x1e5   :  { %v6353_v41 = vpack.c.bf16 %v1743_v38, %v1739_v33  ;;  %v6355_v42 = vpack.c.bf16 %v1849_v40, %v1845_v34 }
 0x1e6   :  { %5232 = vmatpush3.bf16.msra.mxu0 %v6351_v39  ;;  %vm6383_vm8 = vcmp.eq.s32.totalorder %v2108_v35, 1 }
 0x1e7   :  { %5237 = vmatprep.subr.bf16.mxu0 %v5869_v25 }
 0x1fa   :  { %v5087_v43 = vpop.f32.mrb[16].mxu0  ;;  %v5211_v44 = vpop.f32.mrb[16].mxu1 }
 0x1fb   :  { %v5088_v45 = vpop.f32.mrb[17].mxu0  ;;  %v1935_v46 = vpop.f32.mrb[17].mxu1 }
 0x1fc   :  { %v5089_v47 = vadd.f32 %v5088_v45, %v5087_v43  ;;  %v5090_v48 = vpop.f32.mrb[18].mxu0  ;;  %v5212_v50 = vpop.f32.mrb[18].mxu1 }
 0x1fd   :  { %v5091_v49 = vpop.f32.mrb[19].mxu0  ;;  %v1938_v51 = vpop.f32.mrb[19].mxu1 }
 0x1fe   :  { %v1936_v52 = vadd.f32 %v5089_v47, %v1935_v46  ;;  %v5092_v53 = vadd.f32 %v5091_v49, %v5090_v48 }
 0x200   :  { %v1939_v54 = vadd.f32 %v5092_v53, %v1938_v51 }
 0x202   :  { %v6358_v56 = vpack.c.bf16 %v1939_v54, %v1936_v52  ;;  %v5093_v57 = vpop.f32.mrb[20].mxu0 }
 0x203   :  { %v5094_v58 = vpop.f32.mrb[21].mxu0 }
 0x204   :  { %v5095_v59 = vadd.f32 %v5094_v58, %v5093_v57  ;;  %v5096_v60 = vpop.f32.mrb[22].mxu0 }
 0x205   :  { %v5097_v62 = vpop.f32.mrb[23].mxu0 }
 0x206   :  { %v1944_v15 = vadd.f32 %v5211_v44, %v5095_v59  ;;  %v5098_v63 = vadd.f32 %v5097_v62, %v5096_v60 }
 0x208   :  { %v1947_v23 = vadd.f32 %v5212_v50, %v5098_v63 }
 0x20a   :  { %v6360_v2 = vpack.c.bf16 %v1947_v23, %v1944_v15 }
 0x259   :  { %v2039_v19 = vpop.f32.mrb[20].mxu1 }
 0x25a   :  { %v2093_v21 = vmul.f32 0.125, %v2039_v19  ;;  %v5217_v22 = vpop.f32.mrb[21].mxu1 }
 0x25b   :  { %v2042_v27 = vpop.f32.mrb[22].mxu1  ;;  %v5862_v22 = vld [vmem:[#allocation9 + $0x4] ss:$12 sps:$4 sm:$0xff]  }
 0x25c   :  { %v2094_v31 = vmul.f32 0.125, %v2042_v27  ;;  %v5218_v32 = vpop.f32.mrb[23].mxu1  ;;  %v2111_v33 = vsel %vm6371_vm6, %v2093_v21, -1e+30  ;;  %2338 = vmatprep.subr.bf16.mxu1 %v5862_v22 }
 0x25d   :  { %v2116_v34 = vsel %vm2115_vm7, %v2111_v33, -inf }
 0x25e   :  { %2117 = vmax.xlane.f32.xlu0 %v2116_v34  ;;  %v2112_v36 = vsel %vm6371_vm6, %v2094_v31, -1e+30 }
 0x25f   :  { %v2119_v40 = vsel %vm2115_vm7, %v2112_v36, -inf }
 0x261   :  { %v2086_v38 = vpop.f32.mrb[24].mxu0 }
 0x262   :  { %v2095_v44 = vmul.f32 0.125, %v2086_v38  ;;  %2120 = vmax.xlane.f32.xlu0 %v2119_v40  ;;  %v5223_v45 = vpop.f32.mrb[25].mxu0  ;;  %v5865_v38 = vld [vmem:[#allocation9 + $0x1c] ss:$12 sps:$4 sm:$0xff]   ;;  %v5863_v40 = vld [vmem:[#allocation9 + $0x18] ss:$12 sps:$4 sm:$0xff]  }
 0x263   :  { %v2089_v46 = vpop.f32.mrb[26].mxu0 }
 0x264   :  { %v2096_v47 = vmul.f32 0.125, %v2089_v46  ;;  %v5224_v48 = vpop.f32.mrb[27].mxu0  ;;  %v2113_v50 = vsel %vm6383_vm8, %v2095_v44, -1e+30  ;;  %v5868_v44 = vld [vmem:[#allocation9 + $0x34] ss:$12 sps:$4 sm:$0xff]  }
 0x265   :  { %v2122_v49 = vsel %vm2115_vm7, %v2113_v50, -inf  ;;  %v5866_v48 = vld [vmem:[#allocation9 + $0x30] ss:$12 sps:$4 sm:$0xff]  }
 0x266   :  { %2123 = vmax.xlane.f32.xlu1 %v2122_v49  ;;  %v2114_v51 = vsel %vm6383_vm8, %v2096_v47, -1e+30  ;;  %v5872_v49 = vld [vmem:[#allocation9 + $0x4c] ss:$12 sps:$4 sm:$0xff]  }
 0x267   :  { %v2125_v52 = vsel %vm2115_vm7, %v2114_v51, -inf }
 0x26a   :  { %2126 = vmax.xlane.f32.xlu1 %v2125_v52  ;;  %v5870_v52 = vld [vmem:[#allocation9 + $0x48] ss:$12 sps:$4 sm:$0xff]  }
 0x2eb   :  { %v2118_v53 = vpop.xlane.xlu0 %2117 }
 0x2ec   :  { %v2128_v54 = vsub.f32 %v2111_v33, %v2118_v53  ;;  %v5874_v53 = vld [vmem:[#allocation9 + $0x38] ss:$12 sps:$4 sm:$0xff]  }
 0x2ee   :  { %v2132_v57 = vmul.f32 1.442695, %v2128_v54  ;;  %v5875_v54 = vld [vmem:[#allocation9 + $0x50] ss:$12 sps:$4 sm:$0xff]  }
 0x2ef   :  { %v2121_v58 = vpop.xlane.xlu0 %2120 }
 0x2f0   :  { %5956 = vpow2.f32 %v2132_v57  ;;  %v2129_v59 = vsub.f32 %v2112_v36, %v2121_v58 }
 0x2f2   :  { %v2134_v60 = vmul.f32 1.442695, %v2129_v59 }
 0x2f3   :  { %v2124_v62 = vpop.xlane.xlu1 %2123 }
 0x2f4   :  { %5958 = vpow2.f32 %v2134_v60  ;;  %v2130_v15 = vsub.f32 %v2113_v50, %v2124_v62 }
 0x2f6   :  { %v2136_v63 = vmul.f32 1.442695, %v2130_v15 }
 0x2f7   :  { %v2127_v23 = vpop.xlane.xlu1 %2126 }
 0x2f8   :  { %5960 = vpow2.f32 %v2136_v63  ;;  %v2131_v3 = vsub.f32 %v2114_v51, %v2127_v23  ;;  %v5873_v51 = vld [vmem:[#allocation9 + $0x20] ss:$12 sps:$4 sm:$0xff]  }
 0x2fa   :  { %v5957_v4 = vpop.eup %5956  ;;  %v2138_v5 = vmul.f32 1.442695, %v2131_v3 }
 0x2fb   :  { %v2140_v6 = vsel %vm2115_vm7, %v5957_v4, 0.0 }
 0x2fc   :  { %5962 = vpow2.f32 %v2138_v5  ;;  %2141 = vadd.xlane.f32.xlu0 %v2140_v6 }
 0x2fe   :  { %v5959_v11 = vpop.eup %5958 }
 0x2ff   :  { %v2143_v16 = vsel %vm2115_vm7, %v5959_v11, 0.0 }
 0x300   :  { %2144 = vadd.xlane.f32.xlu1 %v2143_v16 }
 0x302   :  { %v5961_v17 = vpop.eup %5960 }
 0x303   :  { %v2146_v18 = vsel %vm2115_vm7, %v5961_v17, 0.0 }
 0x304   :  { %2147 = vadd.xlane.f32.xlu0 %v2146_v18 }
 0x306   :  { %v5963_v19 = vpop.eup %5962 }
 0x307   :  { %v2149_v21 = vsel %vm2115_vm7, %v5963_v19, 0.0 }
 0x308   :  { %2150 = vadd.xlane.f32.xlu1 %v2149_v21 }
 0x319   :  { %2509 = vrot.lane.b32.xlu1 %v6327_v14, %s6171_s17 }
 0x31a   :  { %2456 = vrot.lane.b32.xlu0 %v6316_v1, %s6171_s17 }
 0x31d   :  { %2453 = vrot.lane.b32.xlu1 %v6310_v9, %s6171_s17  ;;  %v5860_v9 = vld [vmem:[#allocation9] ss:$12 sps:$4 sm:$0xff]  }
 0x321   :  { %2506 = vrot.lane.b32.xlu1 %v6321_v8, %s6171_s17 }
 0x389   :  { %v2142_v27 = vpop.xlane.xlu0 %2141 }
 0x38a   :  { %5964 = vrcp.f32 %v2142_v27 }
 0x38d   :  { %v2145_v31 = vpop.xlane.xlu1 %2144 }
 0x38e   :  { %5966 = vrcp.f32 %v2145_v31 }
 0x391   :  { %v2148_v32 = vpop.xlane.xlu0 %2147 }
 0x392   :  { %5968 = vrcp.f32 %v2148_v32 }
 0x394   :  { %v5965_v33 = vpop.eup %5964 }
 0x395   :  { %v2151_v14 = vpop.xlane.xlu1 %2150  ;;  %v2156_v34 = vmul.f32 %v5965_v33, %v5957_v4  ;;  %v2457_v4 = vpop.permute.xlu0 %2456 }
 0x396   :  { %5970 = vrcp.f32 %v2151_v14  ;;  %v2462_v16 = vsel %vm1998_vm1, %v2457_v4, 0 }
 0x398   :  { %v5967_v1 = vpop.eup %5966 }
 0x399   :  { %v2157_v35 = vmul.f32 %v5967_v1, %v5959_v11  ;;  %v2510_v59 = vpop.permute.xlu1 %2509 }
 0x39a   :  { %v2515_v63 = vsel %vm1998_vm1, %v2510_v59, 0 }
 0x39b   :  { %v2160_v36 = vpack.c.bf16 %v2157_v35, %v2156_v34 }
 0x39c   :  { %v5969_v8 = vpop.eup %5968 }
 0x39d   :  { %5228 = vmatmul.mubr.msk.bf16.vlgmr.msra.gmra.mrb[24].mxu1 %vm2115_vm7, %v2160_v36  ;;  %v2158_v46 = vmul.f32 %v5969_v8, %v5961_v17  ;;  %v2454_v17 = vpop.permute.xlu1 %2453 }
 0x39e   :  { %2339 = vmatpush1.bf16.msra.mxu1 %v5860_v9  ;;  %2370 = vmatprep.mubr.bf16.mxu1 %v6168_v30 }
 0x39f   :  { %2340 = vmatprep.subr.bf16.mxu1 %v5865_v38 }
 0x3a0   :  { %v5971_v45 = vpop.eup %5970 }
 0x3a1   :  { %v2159_v47 = vmul.f32 %v5971_v45, %v5963_v19  ;;  %v2507_v18 = vpop.permute.xlu1 %2506 }
 0x3a2   :  { %2341 = vmatpush1.bf16.msra.mxu1 %v5863_v40 }
 0x3a3   :  { %v2161_v50 = vpack.c.bf16 %v2159_v47, %v2158_v46  ;;  %2342 = vmatprep.subr.bf16.mxu1 %v5868_v44 }
 0x3a5   :  { %5234 = vmatmul.mubr.msk.bf16.vlgmr.msra.gmra.mrb[28].mxu0 %vm2115_vm7, %v2161_v50 }
 0x3a6   :  { %2343 = vmatpush1.bf16.msra.mxu1 %v5866_v48  ;;  %5238 = vmatpush3.bf16.msra.mxu0 %v5869_v25 }
 0x3a7   :  { %2344 = vmatprep.subr.bf16.mxu1 %v5872_v49  ;;  %5239 = vmatprep.subr.bf16.mxu0 %v5873_v51 }
 0x3aa   :  { %2345 = vmatpush1.bf16.msra.mxu1 %v5870_v52  ;;  %5240 = vmatpush3.bf16.msra.mxu0 %v5873_v51 }
 0x3ab   :  { %5241 = vmatprep.subr.bf16.mxu0 %v5874_v53  ;;  %5255 = vmatprep.subr.bf16.mxu1 %v6169_v55 }
 0x3ae   :  { %5242 = vmatpush3.bf16.msra.mxu0 %v5874_v53 }
 0x3af   :  { %5243 = vmatprep.subr.bf16.mxu0 %v5875_v54 }
 0x3b2   :  { %5244 = vmatpush3.bf16.msra.mxu0 %v5875_v54 }
 0x3b3   :  { %5249 = vmatprep.subr.bf16.mxu0 %v6169_v55 }
 0x470   :  { %v2199_v57 = vpop.f32.mrb[24].mxu1 }
 0x471   :  { %v5229_v58 = vpop.f32.mrb[25].mxu1 }
 0x472   :  { %v2202_v60 = vpop.f32.mrb[26].mxu1 }
 0x473   :  { %v2250_v62 = vpack.c.bf16 %v2202_v60, %v2199_v57  ;;  %v5230_v15 = vpop.f32.mrb[27].mxu1 }
 0x475   :  { %4967 = vmatmul.mubr.msk.bf16.vlgmr.msra.gmra.mrb[28].mxu1 %vm1998_vm1, %v2250_v62  ;;  %5245 = vmatprep.mubr.msk.bf16.mxu0 %vm1998_vm1, %v2250_v62 }
 0x476   :  { %5256 = vmatpush3.bf16.xpose.msra.mxu1 %v2515_v63  ;;  %2380 = vmatprep.mubr.bf16.mxu1 %v6168_v30 }
 0x477   :  { %5267 = vmatprep.subr.bf16.mxu1 %v6169_v55 }
 0x478   :  { %v2243_v23 = vpop.f32.mrb[28].mxu0 }
 0x479   :  { %v5235_v3 = vpop.f32.mrb[29].mxu0 }
 0x47a   :  { %v2246_v5 = vpop.f32.mrb[30].mxu0 }
 0x47b   :  { %v2251_v6 = vpack.c.bf16 %v2246_v5, %v2243_v23  ;;  %v5236_v11 = vpop.f32.mrb[31].mxu0 }
 0x47d   :  { %4968 = vmatmul.mubr.msk.bf16.gmra.mrb[32].mxu1 %vm1998_vm1, %v2251_v6  ;;  %5246 = vmatmul.mubr.msk.bf16.vlgmr.msra.gmra.mrb[32].mxu0 %vm1998_vm1, %v2251_v6 }
 0x47e   :  { %5250 = vmatpush3.bf16.xpose.msra.mxu0 %v2462_v16  ;;  %5251 = vmatprep.mubr.msk.bf16.mxu0 %vm6170_vm0, %v6169_v55 }
 0x47f   :  { %5257 = vmatprep.mubr.msk.bf16.mxu1 %vm6170_vm0, %v6169_v55  ;;  %5261 = vmatprep.subr.bf16.mxu0 %v6169_v55 }
 0x485   :  { %5252 = vmatmul.mubr.msk.bf16.vlgmr.msra.gmra.mrb[36].mxu0 %vm1998_vm1, %v2454_v17  ;;  %5258 = vmatmul.mubr.msk.bf16.vlgmr.msra.gmra.mrb[36].mxu1 %vm1998_vm1, %v2507_v18  ;;  %v5879_v18 = vld [vmem:[#allocation9 + $0x68] ss:$12 sps:$4 sm:$0xff]  }
 0x486   :  { %5263 = vmatprep.mubr.msk.bf16.mxu0 %vm6170_vm0, %v6169_v55  ;;  %5269 = vmatprep.mubr.msk.bf16.mxu1 %vm6170_vm0, %v6169_v55 }
 0x558   :  { %v2498_v19 = vpop.f32.mrb[36].mxu0  ;;  %v2551_v21 = vpop.f32.mrb[36].mxu1 }
 0x559   :  { %v2558_v22 = vmul.f32 0.125, %v2498_v19  ;;  %v2560_v25 = vmul.f32 0.125, %v2551_v21  ;;  %v5253_v27 = vpop.f32.mrb[37].mxu0  ;;  %v5259_v31 = vpop.f32.mrb[37].mxu1 }
 0x55a   :  { %v2501_v32 = vpop.f32.mrb[38].mxu0  ;;  %v2554_v14 = vpop.f32.mrb[38].mxu1 }
 0x55b   :  { %v2559_v33 = vmul.f32 0.125, %v2501_v32  ;;  %v5254_v1 = vpop.f32.mrb[39].mxu0  ;;  %v5260_v34 = vpop.f32.mrb[39].mxu1  ;;  %v2562_v35 = vsel %vm6371_vm6, %v2558_v22, -1e+30  ;;  %v2561_v36 = vmul.f32 0.125, %v2554_v14 }
 0x55c   :  { %v2566_v9 = vsel %vm2115_vm7, %v2562_v35, -inf  ;;  %v2564_v8 = vsel %vm6383_vm8, %v2560_v25, -1e+30  ;;  %v5878_v22 = vld [vmem:[#allocation9 + $0x64] ss:$12 sps:$4 sm:$0xff]  }
 0x55d   :  { %2567 = vmax.xlane.f32.xlu0 %v2566_v9  ;;  %v2563_v38 = vsel %vm6371_vm6, %v2559_v33, -1e+30  ;;  %v2572_v44 = vsel %vm2115_vm7, %v2564_v8, -inf  ;;  %v2565_v45 = vsel %vm6383_vm8, %v2561_v36, -1e+30 }
 0x55e   :  { %v2569_v40 = vsel %vm2115_vm7, %v2563_v38, -inf  ;;  %v2575_v46 = vsel %vm2115_vm7, %v2565_v45, -inf  ;;  %v5883_v14 = vld [vmem:[#allocation9 + $0x80] ss:$12 sps:$4 sm:$0xff]   ;;  %v5887_v9 = vld [vmem:[#allocation9 + $0x98] ss:$12 sps:$4 sm:$0xff]  }
 0x55f   :  { %2570 = vmax.xlane.f32.xlu1 %v2569_v40  ;;  %v5876_v36 = vld [vmem:[#allocation9 + $0x60] ss:$12 sps:$4 sm:$0xff]   ;;  %v5880_v40 = vld [vmem:[#allocation9 + $0x78] ss:$12 sps:$4 sm:$0xff]  }
 0x561   :  { %2573 = vmax.xlane.f32.xlu0 %v2572_v44  ;;  %v5886_v44 = vld [vmem:[#allocation9 + $0x94] ss:$12 sps:$4 sm:$0xff]  }
 0x565   :  { %2576 = vmax.xlane.f32.xlu0 %v2575_v46  ;;  %v5890_v46 = vld [vmem:[#allocation9 + $0xac] ss:$12 sps:$4 sm:$0xff]  }
 0x5ea   :  { %v2568_v47 = vpop.xlane.xlu0 %2567 }
 0x5eb   :  { %v2578_v48 = vsub.f32 %v2562_v35, %v2568_v47  ;;  %v5888_v47 = vld [vmem:[#allocation9 + $0xa8] ss:$12 sps:$4 sm:$0xff]  }
 0x5ec   :  { %v2571_v50 = vpop.xlane.xlu1 %2570 }
 0x5ed   :  { %v2582_v49 = vmul.f32 1.442695, %v2578_v48  ;;  %v2579_v51 = vsub.f32 %v2563_v38, %v2571_v50  ;;  %v5891_v48 = vld [vmem:[#allocation9 + $0xb0] ss:$12 sps:$4 sm:$0xff]  }
 0x5ee   :  { %v2574_v52 = vpop.xlane.xlu0 %2573 }
 0x5ef   :  { %5972 = vpow2.f32 %v2582_v49  ;;  %v2584_v53 = vmul.f32 1.442695, %v2579_v51  ;;  %v2580_v54 = vsub.f32 %v2564_v8, %v2574_v52  ;;  %v5882_v8 = vld [vmem:[#allocation9 + $0x7c] ss:$12 sps:$4 sm:$0xff]  }
 0x5f1   :  { %5974 = vpow2.f32 %v2584_v53  ;;  %v2586_v57 = vmul.f32 1.442695, %v2580_v54 }
 0x5f2   :  { %v2577_v58 = vpop.xlane.xlu0 %2576 }
 0x5f3   :  { %5976 = vpow2.f32 %v2586_v57  ;;  %v2581_v59 = vsub.f32 %v2565_v45, %v2577_v58  ;;  %v5884_v45 = vld [vmem:[#allocation9 + $0x90] ss:$12 sps:$4 sm:$0xff]  }
 0x5f5   :  { %v2588_v60 = vmul.f32 1.442695, %v2581_v59 }
 0x5f7   :  { %5978 = vpow2.f32 %v2588_v60 }
 0x5f9   :  { %v5973_v62 = vpop.eup %5972 }
 0x5fa   :  { %v2590_v15 = vsel %vm2115_vm7, %v5973_v62, 0.0 }
 0x5fb   :  { %v5975_v63 = vpop.eup %5974  ;;  %2591 = vadd.xlane.f32.xlu0 %v2590_v15  ;;  %v2961_v15 = vsel %vm1998_vm1, %v6349_v37, 0 }
 0x5fc   :  { %v2593_v23 = vsel %vm2115_vm7, %v5975_v63, 0.0 }
 0x5fd   :  { %v5977_v3 = vpop.eup %5976  ;;  %2594 = vadd.xlane.f32.xlu1 %v2593_v23 }
 0x5fe   :  { %v2596_v4 = vsel %vm2115_vm7, %v5977_v3, 0.0 }
 0x5ff   :  { %2597 = vadd.xlane.f32.xlu0 %v2596_v4 }
 0x601   :  { %v5979_v5 = vpop.eup %5978 }
 0x602   :  { %v2599_v6 = vsel %vm2115_vm7, %v5979_v5, 0.0 }
 0x603   :  { %2600 = vadd.xlane.f32.xlu1 %v2599_v6 }
 0x614   :  { %2661 = vrot.lane.b32.xlu1 %v6351_v39, %s6171_s17 }
 0x615   :  { %2613 = vrot.lane.b32.xlu0 %v6342_v26, %s6171_s17 }
 0x688   :  { %v2592_v11 = vpop.xlane.xlu0 %2591 }
 0x689   :  { %5980 = vrcp.f32 %v2592_v11 }
 0x68a   :  { %v2595_v16 = vpop.xlane.xlu1 %2594 }
 0x68b   :  { %5982 = vrcp.f32 %v2595_v16 }
 0x68c   :  { %v2598_v17 = vpop.xlane.xlu0 %2597 }
 0x68d   :  { %5984 = vrcp.f32 %v2598_v17 }
 0x690   :  { %v2614_v19 = vpop.permute.xlu0 %2613  ;;  %v2601_v21 = vpop.xlane.xlu1 %2600 }
 0x691   :  { %5986 = vrcp.f32 %v2601_v21  ;;  %5262 = vmatpush3.bf16.msra.mxu0 %v2614_v19 }
 0x692   :  { %5273 = vmatprep.subr.bf16.mxu0 %v5879_v18 }
 0x693   :  { %v5981_v25 = vpop.eup %5980 }
 0x694   :  { %v2662_v27 = vpop.permute.xlu1 %2661  ;;  %v2606_v39 = vmul.f32 %v5981_v25, %v5973_v62  ;;  %v2914_v62 = vsel %vm1998_vm1, %v6340_v24, 0 }
 0x695   :  { %v5983_v31 = vpop.eup %5982  ;;  %5268 = vmatpush3.bf16.msra.mxu1 %v2662_v27 }
 0x696   :  { %v2607_v32 = vmul.f32 %v5983_v31, %v5975_v63  ;;  %2796 = vmatprep.subr.bf16.mxu1 %v5878_v22 }
 0x697   :  { %v5985_v33 = vpop.eup %5984 }
 0x698   :  { %v2610_v26 = vpack.c.bf16 %v2607_v32, %v2606_v39  ;;  %v2608_v34 = vmul.f32 %v5985_v33, %v5977_v3 }
 0x69a   :  { %5264 = vmatmul.mubr.msk.bf16.vlgmr.msra.gmra.mrb[40].mxu0 %vm2115_vm7, %v2610_v26 }
 0x69b   :  { %v5987_v1 = vpop.eup %5986  ;;  %5274 = vmatpush3.bf16.msra.mxu0 %v5879_v18 }
 0x69c   :  { %v2609_v35 = vmul.f32 %v5987_v1, %v5979_v5  ;;  %5275 = vmatprep.subr.bf16.mxu0 %v5883_v14 }
 0x69e   :  { %v2611_v38 = vpack.c.bf16 %v2609_v35, %v2608_v34 }
 0x69f   :  { %5276 = vmatpush3.bf16.msra.mxu0 %v5883_v14 }
 0x6a0   :  { %5270 = vmatmul.mubr.msk.bf16.vlgmr.msra.gmra.mrb[40].mxu1 %vm2115_vm7, %v2611_v38  ;;  %5277 = vmatprep.subr.bf16.mxu0 %v5887_v9 }
 0x6a1   :  { %2797 = vmatpush1.bf16.msra.mxu1 %v5876_v36  ;;  %2828 = vmatprep.mubr.bf16.mxu1 %v6168_v30 }
 0x6a2   :  { %2798 = vmatprep.subr.bf16.mxu1 %v5882_v8 }
 0x6a3   :  { %5278 = vmatpush3.bf16.msra.mxu0 %v5887_v9 }
 0x6a4   :  { %5279 = vmatprep.subr.bf16.mxu0 %v5891_v48 }
 0x6a5   :  { %2799 = vmatpush1.bf16.msra.mxu1 %v5880_v40 }
 0x6a6   :  { %2800 = vmatprep.subr.bf16.mxu1 %v5886_v44 }
 0x6a7   :  { %5280 = vmatpush3.bf16.msra.mxu0 %v5891_v48 }
 0x6a8   :  { %5285 = vmatprep.subr.bf16.mxu0 %v6169_v55 }
 0x6a9   :  { %2801 = vmatpush1.bf16.msra.mxu1 %v5884_v45 }
 0x6aa   :  { %2802 = vmatprep.subr.bf16.mxu1 %v5890_v46 }
 0x6ad   :  { %2803 = vmatpush1.bf16.msra.mxu1 %v5888_v47 }
 0x6ae   :  { %5297 = vmatprep.subr.bf16.mxu1 %v6169_v55 }
 0x76d   :  { %v2653_v50 = vpop.f32.mrb[40].mxu0 }
 0x76e   :  { %v5265_v49 = vpop.f32.mrb[41].mxu0 }
 0x76f   :  { %v2656_v51 = vpop.f32.mrb[42].mxu0 }
 0x770   :  { %v2708_v52 = vpack.c.bf16 %v2656_v51, %v2653_v50  ;;  %v5266_v53 = vpop.f32.mrb[43].mxu0 }
 0x772   :  { %4987 = vmatmul.mubr.msk.bf16.vlgmr.msra.gmra.mrb[28].mxu1 %vm1998_vm1, %v2708_v52  ;;  %5281 = vmatprep.mubr.msk.bf16.mxu0 %vm1998_vm1, %v2708_v52 }
 0x773   :  { %5298 = vmatpush3.bf16.msra.mxu1 %v6346_v29  ;;  %v2701_v54 = vpop.f32.mrb[40].mxu1  ;;  %2838 = vmatprep.mubr.bf16.mxu1 %v6168_v30 }
 0x774   :  { %v5271_v57 = vpop.f32.mrb[41].mxu1 }
 0x775   :  { %v2704_v58 = vpop.f32.mrb[42].mxu1  ;;  %v5894_v57 = vld [vmem:[#allocation9 + $0xc4] ss:$12 sps:$4 sm:$0xff]  }
 0x776   :  { %v2709_v59 = vpack.c.bf16 %v2704_v58, %v2701_v54  ;;  %v5272_v60 = vpop.f32.mrb[43].mxu1  ;;  %3234 = vmatprep.subr.bf16.mxu1 %v5894_v57  ;;  %v5901_v58 = vld [vmem:[#allocation9 + $0xc8] ss:$12 sps:$4 sm:$0xff]  }
 0x778   :  { %5282 = vmatmul.mubr.msk.bf16.vlgmr.msra.gmra.mrb[32].mxu0 %vm1998_vm1, %v2709_v59 }
 0x779   :  { %5286 = vmatpush3.bf16.xpose.msra.mxu0 %v2914_v62  ;;  %5287 = vmatprep.mubr.msk.bf16.mxu0 %vm6170_vm0, %v6169_v55 }
 0x77a   :  { %4988 = vmatmul.mubr.msk.bf16.gmra.mrb[32].mxu1 %vm1998_vm1, %v2709_v59  ;;  %5291 = vmatprep.subr.bf16.mxu0 %v6169_v55 }
 0x77b   :  { %5299 = vmatprep.mubr.msk.bf16.mxu1 %vm6170_vm0, %v6169_v55 }
 0x780   :  { %5288 = vmatmul.mubr.msk.bf16.vlgmr.msra.gmra.mrb[44].mxu0 %vm1998_vm1, %v6314_v0 }
 0x781   :  { %5292 = vmatpush3.bf16.xpose.msra.mxu0 %v2961_v15  ;;  %5293 = vmatprep.mubr.msk.bf16.mxu0 %vm6170_vm0, %v6169_v55 }
 0x782   :  { %5303 = vmatprep.subr.bf16.mxu0 %v6169_v55 }
 0x788   :  { %5294 = vmatmul.mubr.msk.bf16.vlgmr.msra.gmra.mrb[48].mxu0 %vm1998_vm1, %v6325_v13 }
 0x789   :  { %5304 = vmatpush3.bf16.msra.mxu0 %v6355_v42  ;;  %5305 = vmatprep.mubr.msk.bf16.mxu0 %vm6170_vm0, %v6169_v55 }
 0x78a   :  { %5309 = vmatprep.subr.bf16.mxu0 %v5901_v58 }
 0x853   :  { %v2950_v63 = vpop.f32.mrb[44].mxu0 }
 0x854   :  { %v3004_v23 = vmul.f32 0.125, %v2950_v63  ;;  %v5289_v3 = vpop.f32.mrb[45].mxu0 }
 0x855   :  { %v2953_v4 = vpop.f32.mrb[46].mxu0 }
 0x856   :  { %v3005_v5 = vmul.f32 0.125, %v2953_v4  ;;  %v5290_v6 = vpop.f32.mrb[47].mxu0  ;;  %v3008_v11 = vsel %vm6371_vm6, %v3004_v23, -1e+30  ;;  %v5897_v4 = vld [vmem:[#allocation9 + $0xdc] ss:$12 sps:$4 sm:$0xff]  }
 0x857   :  { %v3012_v16 = vsel %vm2115_vm7, %v3008_v11, -inf  ;;  %v5900_v6 = vld [vmem:[#allocation9 + $0xf4] ss:$12 sps:$4 sm:$0xff]  }
 0x858   :  { %3013 = vmax.xlane.f32.xlu1 %v3012_v16  ;;  %v3009_v17 = vsel %vm6371_vm6, %v3005_v5, -1e+30  ;;  %v5895_v5 = vld [vmem:[#allocation9 + $0xd8] ss:$12 sps:$4 sm:$0xff]  }
 0x859   :  { %v3015_v18 = vsel %vm2115_vm7, %v3009_v17, -inf }
 0x85a   :  { %3016 = vmax.xlane.f32.xlu0 %v3015_v18  ;;  %v5898_v18 = vld [vmem:[#allocation9 + $0xf0] ss:$12 sps:$4 sm:$0xff]  }
 0x85b   :  { %v2997_v19 = vpop.f32.mrb[48].mxu0 }
 0x85c   :  { %v3006_v21 = vmul.f32 0.125, %v2997_v19  ;;  %v5295_v22 = vpop.f32.mrb[49].mxu0 }
 0x85d   :  { %v3000_v25 = vpop.f32.mrb[50].mxu0  ;;  %v5905_v22 = vld [vmem:[#allocation9 + $0xe0] ss:$12 sps:$4 sm:$0xff]  }
 0x85e   :  { %v3007_v27 = vmul.f32 0.125, %v3000_v25  ;;  %v5296_v31 = vpop.f32.mrb[51].mxu0  ;;  %v3010_v39 = vsel %vm6383_vm8, %v3006_v21, -1e+30  ;;  %v5904_v21 = vld [vmem:[#allocation9 + $0x10c] ss:$12 sps:$4 sm:$0xff]  }
 0x85f   :  { %v3018_v32 = vsel %vm2115_vm7, %v3010_v39, -inf  ;;  %v5902_v25 = vld [vmem:[#allocation9 + $0x108] ss:$12 sps:$4 sm:$0xff]   ;;  %v5907_v31 = vld [vmem:[#allocation9 + $0x110] ss:$12 sps:$4 sm:$0xff]  }
 0x860   :  { %3019 = vmax.xlane.f32.xlu0 %v3018_v32  ;;  %v3011_v26 = vsel %vm6383_vm8, %v3007_v27, -1e+30  ;;  %v5906_v27 = vld [vmem:[#allocation9 + $0xf8] ss:$12 sps:$4 sm:$0xff]  }
 0x861   :  { %v3021_v14 = vsel %vm2115_vm7, %v3011_v26, -inf }
 0x862   :  { %3022 = vmax.xlane.f32.xlu1 %v3021_v14 }
 0x8e5   :  { %v3014_v33 = vpop.xlane.xlu1 %3013 }
 0x8e6   :  { %v3024_v1 = vsub.f32 %v3008_v11, %v3014_v33 }
 0x8e7   :  { %v3017_v34 = vpop.xlane.xlu0 %3016 }
 0x8e8   :  { %v3028_v35 = vmul.f32 1.442695, %v3024_v1  ;;  %v3025_v9 = vsub.f32 %v3009_v17, %v3017_v34 }
 0x8ea   :  { %5988 = vpow2.f32 %v3028_v35  ;;  %v3030_v36 = vmul.f32 1.442695, %v3025_v9 }
 0x8ec   :  { %5990 = vpow2.f32 %v3030_v36 }
 0x8ed   :  { %v3020_v38 = vpop.xlane.xlu0 %3019 }
 0x8ee   :  { %v3026_v8 = vsub.f32 %v3010_v39, %v3020_v38 }
 0x8ef   :  { %v3023_v40 = vpop.xlane.xlu1 %3022 }
 0x8f0   :  { %v3032_v44 = vmul.f32 1.442695, %v3026_v8  ;;  %v3027_v45 = vsub.f32 %v3011_v26, %v3023_v40 }
 0x8f2   :  { %5992 = vpow2.f32 %v3032_v44  ;;  %v3034_v46 = vmul.f32 1.442695, %v3027_v45 }
 0x8f4   :  { %v5989_v47 = vpop.eup %5988  ;;  %5994 = vpow2.f32 %v3034_v46 }
 0x8f5   :  { %v3036_v48 = vsel %vm2115_vm7, %v5989_v47, 0.0 }
 0x8f6   :  { %v5991_v50 = vpop.eup %5990  ;;  %3037 = vadd.xlane.f32.xlu0 %v3036_v48 }
 0x8f7   :  { %v3039_v49 = vsel %vm2115_vm7, %v5991_v50, 0.0 }
 0x8f8   :  { %3040 = vadd.xlane.f32.xlu1 %v3039_v49 }
 0x8fc   :  { %v5993_v51 = vpop.eup %5992 }
 0x8fd   :  { %v3042_v52 = vsel %vm2115_vm7, %v5993_v51, 0.0 }
 0x8fe   :  { %v5995_v53 = vpop.eup %5994  ;;  %3043 = vadd.xlane.f32.xlu0 %v3042_v52 }
 0x8ff   :  { %v3045_v54 = vsel %vm2115_vm7, %v5995_v53, 0.0 }
 0x900   :  { %3046 = vadd.xlane.f32.xlu1 %v3045_v54 }
 0x911   :  { %3405 = vrot.lane.b32.xlu1 %v6349_v37, %s6171_s17 }
 0x914   :  { %3352 = vrot.lane.b32.xlu0 %v6340_v24, %s6171_s17 }
 0x915   :  { %3349 = vrot.lane.b32.xlu1 %v6314_v0, %s6171_s17  ;;  %v5892_v0 = vld [vmem:[#allocation9 + $0xc0] ss:$12 sps:$4 sm:$0xff]  }
 0x919   :  { %3402 = vrot.lane.b32.xlu1 %v6325_v13, %s6171_s17 }
 0x983   :  { %v3038_v59 = vpop.xlane.xlu0 %3037 }
 0x984   :  { %5996 = vrcp.f32 %v3038_v59 }
 0x985   :  { %v3041_v60 = vpop.xlane.xlu1 %3040 }
 0x986   :  { %5998 = vrcp.f32 %v3041_v60 }
 0x98b   :  { %v3044_v62 = vpop.xlane.xlu0 %3043 }
 0x98c   :  { %6000 = vrcp.f32 %v3044_v62 }
 0x98d   :  { %v3047_v37 = vpop.xlane.xlu1 %3046 }
 0x98e   :  { %v5997_v15 = vpop.eup %5996  ;;  %6002 = vrcp.f32 %v3047_v37 }
 0x98f   :  { %v3052_v63 = vmul.f32 %v5997_v15, %v5989_v47  ;;  %v3353_v36 = vpop.permute.xlu0 %3352 }
 0x990   :  { %v5999_v24 = vpop.eup %5998  ;;  %v3358_v44 = vsel %vm1998_vm1, %v3353_v36, 0  ;;  %v5911_v36 = vld [vmem:[#allocation9 + $0x128] ss:$12 sps:$4 sm:$0xff]  }
 0x991   :  { %v3053_v23 = vmul.f32 %v5999_v24, %v5991_v50  ;;  %v3406_v26 = vpop.permute.xlu1 %3405 }
 0x992   :  { %v3411_v34 = vsel %vm1998_vm1, %v3406_v26, 0 }
 0x993   :  { %v3056_v3 = vpack.c.bf16 %v3053_v23, %v3052_v63 }
 0x995   :  { %5300 = vmatmul.mubr.msk.bf16.vlgmr.msra.gmra.mrb[44].mxu1 %vm2115_vm7, %v3056_v3  ;;  %v3350_v45 = vpop.permute.xlu1 %3349 }
 0x996   :  { %v6001_v13 = vpop.eup %6000  ;;  %3235 = vmatpush1.bf16.msra.mxu1 %v5892_v0  ;;  %3266 = vmatprep.mubr.bf16.mxu1 %v6168_v30 }
 0x997   :  { %3236 = vmatprep.subr.bf16.mxu1 %v5897_v4  ;;  %v3054_v16 = vmul.f32 %v6001_v13, %v5993_v51 }
 0x998   :  { %v6003_v11 = vpop.eup %6002 }
 0x999   :  { %v3055_v17 = vmul.f32 %v6003_v11, %v5995_v53  ;;  %v3403_v46 = vpop.permute.xlu1 %3402 }
 0x99a   :  { %3237 = vmatpush1.bf16.msra.mxu1 %v5895_v5 }
 0x99b   :  { %v3057_v19 = vpack.c.bf16 %v3055_v17, %v3054_v16  ;;  %3238 = vmatprep.subr.bf16.mxu1 %v5900_v6 }
 0x99d   :  { %5306 = vmatmul.mubr.msk.bf16.vlgmr.msra.gmra.mrb[52].mxu0 %vm2115_vm7, %v3057_v19 }
 0x99e   :  { %3239 = vmatpush1.bf16.msra.mxu1 %v5898_v18  ;;  %5310 = vmatpush3.bf16.msra.mxu0 %v5901_v58 }
 0x99f   :  { %3240 = vmatprep.subr.bf16.mxu1 %v5904_v21  ;;  %5311 = vmatprep.subr.bf16.mxu0 %v5905_v22 }
 0x9a2   :  { %3241 = vmatpush1.bf16.msra.mxu1 %v5902_v25  ;;  %5312 = vmatpush3.bf16.msra.mxu0 %v5905_v22 }
 0x9a3   :  { %5313 = vmatprep.subr.bf16.mxu0 %v5906_v27  ;;  %5327 = vmatprep.subr.bf16.mxu1 %v6169_v55 }
 0x9a6   :  { %5314 = vmatpush3.bf16.msra.mxu0 %v5906_v27 }
 0x9a7   :  { %5315 = vmatprep.subr.bf16.mxu0 %v5907_v31 }
 0x9aa   :  { %5316 = vmatpush3.bf16.msra.mxu0 %v5907_v31 }
 0x9ab   :  { %5321 = vmatprep.subr.bf16.mxu0 %v6169_v55 }
 0xa68   :  { %v3095_v39 = vpop.f32.mrb[44].mxu1 }
 0xa69   :  { %v5301_v32 = vpop.f32.mrb[45].mxu1 }
 0xa6a   :  { %v3098_v14 = vpop.f32.mrb[46].mxu1 }
 0xa6b   :  { %v3146_v33 = vpack.c.bf16 %v3098_v14, %v3095_v39  ;;  %v5302_v1 = vpop.f32.mrb[47].mxu1 }
 0xa6d   :  { %5007 = vmatmul.mubr.msk.bf16.vlgmr.msra.gmra.mrb[28].mxu1 %vm1998_vm1, %v3146_v33  ;;  %5317 = vmatprep.mubr.msk.bf16.mxu0 %vm1998_vm1, %v3146_v33 }
 0xa6e   :  { %5328 = vmatpush3.bf16.xpose.msra.mxu1 %v3411_v34  ;;  %3276 = vmatprep.mubr.bf16.mxu1 %v6168_v30 }
 0xa6f   :  { %5339 = vmatprep.subr.bf16.mxu1 %v6169_v55 }
 0xa70   :  { %v3139_v35 = vpop.f32.mrb[52].mxu0 }
 0xa71   :  { %v5307_v9 = vpop.f32.mrb[53].mxu0 }
 0xa72   :  { %v3142_v38 = vpop.f32.mrb[54].mxu0 }
 0xa73   :  { %v3147_v8 = vpack.c.bf16 %v3142_v38, %v3139_v35  ;;  %v5308_v40 = vpop.f32.mrb[55].mxu0 }
 0xa74   :  { %v5910_v40 = vld [vmem:[#allocation9 + $0x124] ss:$12 sps:$4 sm:$0xff]  }
 0xa75   :  { %5008 = vmatmul.mubr.msk.bf16.gmra.mrb[32].mxu1 %vm1998_vm1, %v3147_v8  ;;  %5318 = vmatmul.mubr.msk.bf16.vlgmr.msra.gmra.mrb[32].mxu0 %vm1998_vm1, %v3147_v8 }
 0xa76   :  { %5322 = vmatpush3.bf16.xpose.msra.mxu0 %v3358_v44  ;;  %5323 = vmatprep.mubr.msk.bf16.mxu0 %vm6170_vm0, %v6169_v55 }
 0xa77   :  { %5329 = vmatprep.mubr.msk.bf16.mxu1 %vm6170_vm0, %v6169_v55  ;;  %5333 = vmatprep.subr.bf16.mxu0 %v6169_v55 }
 0xa7d   :  { %5324 = vmatmul.mubr.msk.bf16.vlgmr.msra.gmra.mrb[56].mxu0 %vm1998_vm1, %v3350_v45  ;;  %5330 = vmatmul.mubr.msk.bf16.vlgmr.msra.gmra.mrb[48].mxu1 %vm1998_vm1, %v3403_v46 }
 0xa7e   :  { %5335 = vmatprep.mubr.msk.bf16.mxu0 %vm6170_vm0, %v6169_v55  ;;  %5341 = vmatprep.mubr.msk.bf16.mxu1 %vm6170_vm0, %v6169_v55 }
 0xb50   :  { %v3394_v47 = vpop.f32.mrb[56].mxu0  ;;  %v3447_v48 = vpop.f32.mrb[48].mxu1 }
 0xb51   :  { %v3454_v50 = vmul.f32 0.125, %v3394_v47  ;;  %v3456_v49 = vmul.f32 0.125, %v3447_v48  ;;  %v5325_v51 = vpop.f32.mrb[57].mxu0  ;;  %v5331_v52 = vpop.f32.mrb[49].mxu1  ;;  %v5915_v48 = vld [vmem:[#allocation9 + $0x140] ss:$12 sps:$4 sm:$0xff]  }
 0xb52   :  { %v3397_v53 = vpop.f32.mrb[58].mxu0  ;;  %v3450_v54 = vpop.f32.mrb[50].mxu1 }
 0xb53   :  { %v3455_v57 = vmul.f32 0.125, %v3397_v53  ;;  %v5326_v58 = vpop.f32.mrb[59].mxu0  ;;  %v5332_v59 = vpop.f32.mrb[51].mxu1  ;;  %v3458_v60 = vsel %vm6371_vm6, %v3454_v50, -1e+30  ;;  %v3457_v37 = vmul.f32 0.125, %v3450_v54 }
 0xb54   :  { %v3462_v62 = vsel %vm2115_vm7, %v3458_v60, -inf  ;;  %v3460_v24 = vsel %vm6383_vm8, %v3456_v49, -1e+30  ;;  %v5919_v53 = vld [vmem:[#allocation9 + $0x158] ss:$12 sps:$4 sm:$0xff]  }
 0xb55   :  { %3463 = vmax.xlane.f32.xlu0 %v3462_v62  ;;  %v3459_v15 = vsel %vm6371_vm6, %v3455_v57, -1e+30  ;;  %v3468_v23 = vsel %vm2115_vm7, %v3460_v24, -inf  ;;  %v3461_v0 = vsel %vm6383_vm8, %v3457_v37, -1e+30 }
 0xb56   :  { %v3465_v63 = vsel %vm2115_vm7, %v3459_v15, -inf  ;;  %v3471_v3 = vsel %vm2115_vm7, %v3461_v0, -inf  ;;  %v5908_v54 = vld [vmem:[#allocation9 + $0x120] ss:$12 sps:$4 sm:$0xff]   ;;  %v5914_v58 = vld [vmem:[#allocation9 + $0x13c] ss:$12 sps:$4 sm:$0xff]  }
 0xb57   :  { %3466 = vmax.xlane.f32.xlu1 %v3465_v63  ;;  %v5912_v59 = vld [vmem:[#allocation9 + $0x138] ss:$12 sps:$4 sm:$0xff]   ;;  %v5916_v62 = vld [vmem:[#allocation9 + $0x150] ss:$12 sps:$4 sm:$0xff]  }
 0xb58   :  { %v5922_v37 = vld [vmem:[#allocation9 + $0x16c] ss:$12 sps:$4 sm:$0xff]  }
 0xb59   :  { %3469 = vmax.xlane.f32.xlu0 %v3468_v23 }
 0xb5d   :  { %3472 = vmax.xlane.f32.xlu0 %v3471_v3 }
 0xbe2   :  { %v3464_v4 = vpop.xlane.xlu0 %3463 }
 0xbe3   :  { %v3474_v13 = vsub.f32 %v3458_v60, %v3464_v4  ;;  %v5918_v60 = vld [vmem:[#allocation9 + $0x154] ss:$12 sps:$4 sm:$0xff]  }
 0xbe4   :  { %v3467_v5 = vpop.xlane.xlu1 %3466 }
 0xbe5   :  { %v3478_v6 = vmul.f32 1.442695, %v3474_v13  ;;  %v3475_v11 = vsub.f32 %v3459_v15, %v3467_v5  ;;  %v5920_v15 = vld [vmem:[#allocation9 + $0x168] ss:$12 sps:$4 sm:$0xff]  }
 0xbe6   :  { %v3470_v16 = vpop.xlane.xlu0 %3469 }
 0xbe7   :  { %6004 = vpow2.f32 %v3478_v6  ;;  %v3480_v17 = vmul.f32 1.442695, %v3475_v11  ;;  %v3476_v18 = vsub.f32 %v3460_v24, %v3470_v16  ;;  %v5923_v24 = vld [vmem:[#allocation9 + $0x170] ss:$12 sps:$4 sm:$0xff]  }
 0xbe9   :  { %6006 = vpow2.f32 %v3480_v17  ;;  %v3482_v19 = vmul.f32 1.442695, %v3476_v18  ;;  %v3810_v17 = vsel %vm1998_vm1, %v6344_v28, 0  ;;  %v3857_v18 = vsel %vm1998_vm1, %v6353_v41, 0 }
 0xbea   :  { %v3473_v21 = vpop.xlane.xlu0 %3472 }
 0xbeb   :  { %6008 = vpow2.f32 %v3482_v19  ;;  %v3477_v22 = vsub.f32 %v3461_v0, %v3473_v21 }
 0xbed   :  { %v3484_v25 = vmul.f32 1.442695, %v3477_v22 }
 0xbef   :  { %6010 = vpow2.f32 %v3484_v25 }
 0xbf1   :  { %v6005_v27 = vpop.eup %6004 }
 0xbf2   :  { %v3486_v31 = vsel %vm2115_vm7, %v6005_v27, 0.0 }
 0xbf3   :  { %v6007_v39 = vpop.eup %6006  ;;  %3487 = vadd.xlane.f32.xlu0 %v3486_v31 }
 0xbf4   :  { %v3489_v32 = vsel %vm2115_vm7, %v6007_v39, 0.0 }
 0xbf5   :  { %v6009_v26 = vpop.eup %6008  ;;  %3490 = vadd.xlane.f32.xlu1 %v3489_v32 }
 0xbf6   :  { %v3492_v14 = vsel %vm2115_vm7, %v6009_v26, 0.0 }
 0xbf7   :  { %3493 = vadd.xlane.f32.xlu0 %v3492_v14 }
 0xbf9   :  { %v6011_v33 = vpop.eup %6010 }
 0xbfa   :  { %v3495_v1 = vsel %vm2115_vm7, %v6011_v33, 0.0 }
 0xbfb   :  { %3496 = vadd.xlane.f32.xlu1 %v3495_v1 }
 0xc0c   :  { %3557 = vrot.lane.b32.xlu1 %v6355_v42, %s6171_s17 }
 0xc0d   :  { %3509 = vrot.lane.b32.xlu0 %v6346_v29, %s6171_s17 }
 0xc80   :  { %v3488_v34 = vpop.xlane.xlu0 %3487 }
 0xc81   :  { %6012 = vrcp.f32 %v3488_v34 }
 0xc82   :  { %v3491_v35 = vpop.xlane.xlu1 %3490 }
 0xc83   :  { %6014 = vrcp.f32 %v3491_v35 }
 0xc84   :  { %v3494_v9 = vpop.xlane.xlu0 %3493 }
 0xc85   :  { %6016 = vrcp.f32 %v3494_v9 }
 0xc88   :  { %v3510_v38 = vpop.permute.xlu0 %3509  ;;  %v3497_v8 = vpop.xlane.xlu1 %3496 }
 0xc89   :  { %6018 = vrcp.f32 %v3497_v8  ;;  %5334 = vmatpush3.bf16.msra.mxu0 %v3510_v38 }
 0xc8a   :  { %5345 = vmatprep.subr.bf16.mxu0 %v5911_v36 }
 0xc8b   :  { %v6013_v44 = vpop.eup %6012 }
 0xc8c   :  { %v3558_v45 = vpop.permute.xlu1 %3557  ;;  %v3502_v42 = vmul.f32 %v6013_v44, %v6005_v27 }
 0xc8d   :  { %v6015_v46 = vpop.eup %6014  ;;  %5340 = vmatpush3.bf16.msra.mxu1 %v3558_v45 }
 0xc8e   :  { %v3503_v47 = vmul.f32 %v6015_v46, %v6007_v39  ;;  %3692 = vmatprep.subr.bf16.mxu1 %v5910_v40 }
 0xc8f   :  { %v6017_v50 = vpop.eup %6016 }
 0xc90   :  { %v3506_v29 = vpack.c.bf16 %v3503_v47, %v3502_v42  ;;  %v3504_v51 = vmul.f32 %v6017_v50, %v6009_v26 }
 0xc92   :  { %5336 = vmatmul.mubr.msk.bf16.vlgmr.msra.gmra.mrb[60].mxu0 %vm2115_vm7, %v3506_v29 }
 0xc93   :  { %v6019_v49 = vpop.eup %6018  ;;  %5346 = vmatpush3.bf16.msra.mxu0 %v5911_v36 }
 0xc94   :  { %v3505_v52 = vmul.f32 %v6019_v49, %v6011_v33  ;;  %5347 = vmatprep.subr.bf16.mxu0 %v5915_v48 }
 0xc96   :  { %v3507_v57 = vpack.c.bf16 %v3505_v52, %v3504_v51 }
 0xc97   :  { %5348 = vmatpush3.bf16.msra.mxu0 %v5915_v48 }
 0xc98   :  { %5342 = vmatmul.mubr.msk.bf16.vlgmr.msra.gmra.mrb[52].mxu1 %vm2115_vm7, %v3507_v57  ;;  %5349 = vmatprep.subr.bf16.mxu0 %v5919_v53 }
 0xc99   :  { %3693 = vmatpush1.bf16.msra.mxu1 %v5908_v54  ;;  %3724 = vmatprep.mubr.bf16.mxu1 %v6168_v30 }
 0xc9a   :  { %3694 = vmatprep.subr.bf16.mxu1 %v5914_v58 }
 0xc9b   :  { %5350 = vmatpush3.bf16.msra.mxu0 %v5919_v53 }
 0xc9c   :  { %5351 = vmatprep.subr.bf16.mxu0 %v5923_v24 }
 0xc9d   :  { %3695 = vmatpush1.bf16.msra.mxu1 %v5912_v59 }
 0xc9e   :  { %3696 = vmatprep.subr.bf16.mxu1 %v5918_v60 }
 0xc9f   :  { %5352 = vmatpush3.bf16.msra.mxu0 %v5923_v24 }
 0xca0   :  { %5357 = vmatprep.subr.bf16.mxu0 %v6169_v55 }
 0xca1   :  { %3697 = vmatpush1.bf16.msra.mxu1 %v5916_v62 }
 0xca2   :  { %3698 = vmatprep.subr.bf16.mxu1 %v5922_v37 }
 0xca5   :  { %3699 = vmatpush1.bf16.msra.mxu1 %v5920_v15 }
 0xca6   :  { %5369 = vmatprep.subr.bf16.mxu1 %v6169_v55 }
 0xd65   :  { %v3549_v63 = vpop.f32.mrb[60].mxu0 }
 0xd66   :  { %v5337_v23 = vpop.f32.mrb[61].mxu0 }
 0xd67   :  { %v3552_v0 = vpop.f32.mrb[62].mxu0  ;;  %v5933_v23 = vld [vmem:[#allocation9 + $0x188] ss:$12 sps:$4 sm:$0xff]  }
 0xd68   :  { %v3604_v3 = vpack.c.bf16 %v3552_v0, %v3549_v63  ;;  %v5338_v4 = vpop.f32.mrb[63].mxu0  ;;  %v5926_v63 = vld [vmem:[#allocation9 + $0x184] ss:$12 sps:$4 sm:$0xff]  }
 0xd6a   :  { %5027 = vmatmul.mubr.msk.bf16.vlgmr.msra.gmra.mrb[28].mxu1 %vm1998_vm1, %v3604_v3  ;;  %5353 = vmatprep.mubr.msk.bf16.mxu0 %vm1998_vm1, %v3604_v3 }
 0xd6b   :  { %5370 = vmatpush3.bf16.msra.mxu1 %v6358_v56  ;;  %v3597_v13 = vpop.f32.mrb[52].mxu1  ;;  %3734 = vmatprep.mubr.bf16.mxu1 %v6168_v30 }
 0xd6c   :  { %v5343_v5 = vpop.f32.mrb[53].mxu1  ;;  %4130 = vmatprep.subr.bf16.mxu1 %v5926_v63 }
 0xd6d   :  { %v3600_v6 = vpop.f32.mrb[54].mxu1 }
 0xd6e   :  { %v3605_v11 = vpack.c.bf16 %v3600_v6, %v3597_v13  ;;  %v5344_v16 = vpop.f32.mrb[55].mxu1 }
 0xd6f   :  { %v5929_v16 = vld [vmem:[#allocation9 + $0x19c] ss:$12 sps:$4 sm:$0xff]  }
 0xd70   :  { %5354 = vmatmul.mubr.msk.bf16.vlgmr.msra.gmra.mrb[32].mxu0 %vm1998_vm1, %v3605_v11 }
 0xd71   :  { %5358 = vmatpush3.bf16.xpose.msra.mxu0 %v3810_v17  ;;  %5359 = vmatprep.mubr.msk.bf16.mxu0 %vm6170_vm0, %v6169_v55  ;;  %v5927_v17 = vld [vmem:[#allocation9 + $0x198] ss:$12 sps:$4 sm:$0xff]  }
 0xd72   :  { %5028 = vmatmul.mubr.msk.bf16.gmra.mrb[32].mxu1 %vm1998_vm1, %v3605_v11  ;;  %5363 = vmatprep.subr.bf16.mxu0 %v6169_v55 }
 0xd73   :  { %5371 = vmatprep.mubr.msk.bf16.mxu1 %vm6170_vm0, %v6169_v55 }
 0xd78   :  { %5360 = vmatmul.mubr.msk.bf16.vlgmr.msra.gmra.mrb[64].mxu0 %vm1998_vm1, %v6312_v61 }
 0xd79   :  { %5364 = vmatpush3.bf16.xpose.msra.mxu0 %v3857_v18  ;;  %5365 = vmatprep.mubr.msk.bf16.mxu0 %vm6170_vm0, %v6169_v55  ;;  %v5932_v18 = vld [vmem:[#allocation9 + $0x1b4] ss:$12 sps:$4 sm:$0xff]  }
 0xd7a   :  { %5375 = vmatprep.subr.bf16.mxu0 %v6169_v55 }
 0xd80   :  { %5366 = vmatmul.mubr.msk.bf16.vlgmr.msra.gmra.mrb[68].mxu0 %vm1998_vm1, %v6323_v10 }
 0xd81   :  { %5376 = vmatpush3.bf16.msra.mxu0 %v6360_v2  ;;  %5377 = vmatprep.mubr.msk.bf16.mxu0 %vm6170_vm0, %v6169_v55 }
 0xd82   :  { %5381 = vmatprep.subr.bf16.mxu0 %v5933_v23 }
 0xe4b   :  { %v3846_v19 = vpop.f32.mrb[64].mxu0 }
 0xe4c   :  { %v3900_v21 = vmul.f32 0.125, %v3846_v19  ;;  %v5361_v22 = vpop.f32.mrb[65].mxu0 }
 0xe4d   :  { %v3849_v25 = vpop.f32.mrb[66].mxu0 }
 0xe4e   :  { %v3901_v27 = vmul.f32 0.125, %v3849_v25  ;;  %v5362_v31 = vpop.f32.mrb[67].mxu0  ;;  %v3904_v39 = vsel %vm6371_vm6, %v3900_v21, -1e+30  ;;  %v5930_v25 = vld [vmem:[#allocation9 + $0x1b0] ss:$12 sps:$4 sm:$0xff]  }
 0xe4f   :  { %v3908_v32 = vsel %vm2115_vm7, %v3904_v39, -inf  ;;  %v5936_v31 = vld [vmem:[#allocation9 + $0x1cc] ss:$12 sps:$4 sm:$0xff]  }
 0xe50   :  { %3909 = vmax.xlane.f32.xlu1 %v3908_v32  ;;  %v3905_v26 = vsel %vm6371_vm6, %v3901_v27, -1e+30  ;;  %v5934_v32 = vld [vmem:[#allocation9 + $0x1c8] ss:$12 sps:$4 sm:$0xff]  }
 0xe51   :  { %v3911_v14 = vsel %vm2115_vm7, %v3905_v26, -inf }
 0xe52   :  { %3912 = vmax.xlane.f32.xlu0 %v3911_v14  ;;  %v5939_v14 = vld [vmem:[#allocation9 + $0x1d0] ss:$12 sps:$4 sm:$0xff]  }
 0xe53   :  { %v3893_v33 = vpop.f32.mrb[68].mxu0 }
 0xe54   :  { %v3902_v1 = vmul.f32 0.125, %v3893_v33  ;;  %v5367_v34 = vpop.f32.mrb[69].mxu0 }
 0xe55   :  { %v3896_v35 = vpop.f32.mrb[70].mxu0 }
 0xe56   :  { %v3903_v9 = vmul.f32 0.125, %v3896_v35  ;;  %v5368_v36 = vpop.f32.mrb[71].mxu0  ;;  %v3906_v38 = vsel %vm6383_vm8, %v3902_v1, -1e+30 }
 0xe57   :  { %v3914_v8 = vsel %vm2115_vm7, %v3906_v38, -inf }
 0xe58   :  { %3915 = vmax.xlane.f32.xlu0 %v3914_v8  ;;  %v3907_v40 = vsel %vm6383_vm8, %v3903_v9, -1e+30 }
 0xe59   :  { %v3917_v44 = vsel %vm2115_vm7, %v3907_v40, -inf }
 0xe5a   :  { %3918 = vmax.xlane.f32.xlu1 %v3917_v44 }
 0xedd   :  { %v3910_v45 = vpop.xlane.xlu1 %3909 }
 0xede   :  { %v3920_v46 = vsub.f32 %v3904_v39, %v3910_v45  ;;  %v5937_v39 = vld [vmem:[#allocation9 + $0x1a0] ss:$12 sps:$4 sm:$0xff]  }
 0xedf   :  { %v3913_v42 = vpop.xlane.xlu0 %3912 }
 0xee0   :  { %v3924_v47 = vmul.f32 1.442695, %v3920_v46  ;;  %v3921_v29 = vsub.f32 %v3905_v26, %v3913_v42  ;;  %v5938_v26 = vld [vmem:[#allocation9 + $0x1b8] ss:$12 sps:$4 sm:$0xff]  }
 0xee2   :  { %6020 = vpow2.f32 %v3924_v47  ;;  %v3926_v48 = vmul.f32 1.442695, %v3921_v29 }
 0xee4   :  { %6022 = vpow2.f32 %v3926_v48 }
 0xee5   :  { %v3916_v50 = vpop.xlane.xlu0 %3915 }
 0xee6   :  { %v3922_v49 = vsub.f32 %v3906_v38, %v3916_v50 }
 0xee7   :  { %v3919_v51 = vpop.xlane.xlu1 %3918 }
 0xee8   :  { %v3928_v52 = vmul.f32 1.442695, %v3922_v49  ;;  %v3923_v53 = vsub.f32 %v3907_v40, %v3919_v51 }
 0xeea   :  { %6024 = vpow2.f32 %v3928_v52  ;;  %v3930_v54 = vmul.f32 1.442695, %v3923_v53 }
 0xeec   :  { %v6021_v57 = vpop.eup %6020  ;;  %6026 = vpow2.f32 %v3930_v54 }
 0xeed   :  { %v3932_v58 = vsel %vm2115_vm7, %v6021_v57, 0.0 }
 0xeee   :  { %v6023_v59 = vpop.eup %6022  ;;  %3933 = vadd.xlane.f32.xlu0 %v3932_v58 }
 0xeef   :  { %v3935_v60 = vsel %vm2115_vm7, %v6023_v59, 0.0 }
 0xef0   :  { %3936 = vadd.xlane.f32.xlu1 %v3935_v60 }
 0xef4   :  { %v6025_v62 = vpop.eup %6024 }
 0xef5   :  { %v3938_v37 = vsel %vm2115_vm7, %v6025_v62, 0.0 }
 0xef6   :  { %v6027_v15 = vpop.eup %6026  ;;  %3939 = vadd.xlane.f32.xlu0 %v3938_v37 }
 0xef7   :  { %v3941_v24 = vsel %vm2115_vm7, %v6027_v15, 0.0 }
 0xef8   :  { %3942 = vadd.xlane.f32.xlu1 %v3941_v24 }
 0xf09   :  { %4245 = vrot.lane.b32.xlu1 %v6312_v61, %s6171_s17 }
 0xf0c   :  { %4248 = vrot.lane.b32.xlu0 %v6344_v28, %s6171_s17 }
 0xf0d   :  { %4301 = vrot.lane.b32.xlu1 %v6353_v41, %s6171_s17  ;;  %v5924_v41 = vld [vmem:[#allocation9 + $0x180] ss:$12 sps:$4 sm:$0xff]  }
 0xf11   :  { %4298 = vrot.lane.b32.xlu1 %v6323_v10, %s6171_s17 }
 0xf7b   :  { %v3934_v0 = vpop.xlane.xlu0 %3933 }
 0xf7c   :  { %6028 = vrcp.f32 %v3934_v0 }
 0xf7d   :  { %v3937_v3 = vpop.xlane.xlu1 %3936 }
 0xf7e   :  { %6030 = vrcp.f32 %v3937_v3 }
 0xf83   :  { %v3940_v4 = vpop.xlane.xlu0 %3939 }
 0xf84   :  { %6032 = vrcp.f32 %v3940_v4 }
 0xf85   :  { %v3943_v61 = vpop.xlane.xlu1 %3942 }
 0xf86   :  { %v6029_v13 = vpop.eup %6028  ;;  %6034 = vrcp.f32 %v3943_v61 }
 0xf87   :  { %v3948_v5 = vmul.f32 %v6029_v13, %v6021_v57  ;;  %v4249_v45 = vpop.permute.xlu0 %4248 }
 0xf88   :  { %v6031_v28 = vpop.eup %6030  ;;  %v4254_v29 = vsel %vm1998_vm1, %v4249_v45, 0 }
 0xf89   :  { %v3949_v6 = vmul.f32 %v6031_v28, %v6023_v59  ;;  %v4246_v33 = vpop.permute.xlu1 %4245 }
 0xf8b   :  { %v3952_v11 = vpack.c.bf16 %v3949_v6, %v3948_v5 }
 0xf8d   :  { %5372 = vmatmul.mubr.msk.bf16.vlgmr.msra.gmra.mrb[56].mxu1 %vm2115_vm7, %v3952_v11  ;;  %v4302_v35 = vpop.permute.xlu1 %4301 }
 0xf8e   :  { %v6033_v10 = vpop.eup %6032  ;;  %4131 = vmatpush1.bf16.msra.mxu1 %v5924_v41  ;;  %4162 = vmatprep.mubr.bf16.mxu1 %v6168_v30  ;;  %v4307_v8 = vsel %vm1998_vm1, %v4302_v35, 0  ;;  %v5942_v35 = vld [vmem:[#allocation9 + $0x1e4] ss:$12 sps:$4 sm:$0xff]  }
 0xf8f   :  { %4132 = vmatprep.subr.bf16.mxu1 %v5929_v16  ;;  %v3950_v21 = vmul.f32 %v6033_v10, %v6025_v62 }
 0xf90   :  { %v6035_v19 = vpop.eup %6034 }
 0xf91   :  { %v3951_v22 = vmul.f32 %v6035_v19, %v6027_v15  ;;  %v4299_v48 = vpop.permute.xlu1 %4298 }
 0xf92   :  { %4133 = vmatpush1.bf16.msra.mxu1 %v5927_v17 }
 0xf93   :  { %v3953_v27 = vpack.c.bf16 %v3951_v22, %v3950_v21  ;;  %4134 = vmatprep.subr.bf16.mxu1 %v5932_v18 }
 0xf95   :  { %5378 = vmatmul.mubr.msk.bf16.vlgmr.msra.gmra.mrb[72].mxu0 %vm2115_vm7, %v3953_v27 }
 0xf96   :  { %4135 = vmatpush1.bf16.msra.mxu1 %v5930_v25  ;;  %5382 = vmatpush3.bf16.msra.mxu0 %v5933_v23 }
 0xf97   :  { %4136 = vmatprep.subr.bf16.mxu1 %v5936_v31  ;;  %5383 = vmatprep.subr.bf16.mxu0 %v5937_v39 }
 0xf9a   :  { %4137 = vmatpush1.bf16.msra.mxu1 %v5934_v32  ;;  %5384 = vmatpush3.bf16.msra.mxu0 %v5937_v39 }
 0xf9b   :  { %5385 = vmatprep.subr.bf16.mxu0 %v5938_v26  ;;  %5399 = vmatprep.subr.bf16.mxu1 %v6169_v55 }
 0xf9e   :  { %5386 = vmatpush3.bf16.msra.mxu0 %v5938_v26 }
 0xf9f   :  { %5387 = vmatprep.subr.bf16.mxu0 %v5939_v14 }
 0xfa2   :  { %5388 = vmatpush3.bf16.msra.mxu0 %v5939_v14 }
 0xfa3   :  { %5393 = vmatprep.subr.bf16.mxu0 %v6169_v55 }
0x1060   :  { %v3991_v1 = vpop.f32.mrb[56].mxu1 }
0x1061   :  { %v5373_v34 = vpop.f32.mrb[57].mxu1 }
0x1062   :  { %v3994_v9 = vpop.f32.mrb[58].mxu1 }
0x1063   :  { %v4042_v36 = vpack.c.bf16 %v3994_v9, %v3991_v1  ;;  %v5374_v38 = vpop.f32.mrb[59].mxu1 }
0x1065   :  { %5047 = vmatmul.mubr.msk.bf16.vlgmr.msra.gmra.mrb[28].mxu1 %vm1998_vm1, %v4042_v36  ;;  %5389 = vmatprep.mubr.msk.bf16.mxu0 %vm1998_vm1, %v4042_v36 }
0x1066   :  { %5400 = vmatpush3.bf16.xpose.msra.mxu1 %v4307_v8  ;;  %4172 = vmatprep.mubr.bf16.mxu1 %v6168_v30 }
0x1067   :  { %5411 = vmatprep.subr.bf16.mxu1 %v6169_v55 }
0x1068   :  { %v4035_v40 = vpop.f32.mrb[72].mxu0 }
0x1069   :  { %v5379_v44 = vpop.f32.mrb[73].mxu0 }
0x106a   :  { %v4038_v46 = vpop.f32.mrb[74].mxu0 }
0x106b   :  { %v4043_v42 = vpack.c.bf16 %v4038_v46, %v4035_v40  ;;  %v5380_v47 = vpop.f32.mrb[75].mxu0  ;;  %v5950_v40 = vld [vmem:[#allocation9 + $0x200] ss:$12 sps:$4 sm:$0xff]  }
0x106c   :  { %v5940_v47 = vld [vmem:[#allocation9 + $0x1e0] ss:$12 sps:$4 sm:$0xff]  }
0x106d   :  { %5048 = vmatmul.mubr.msk.bf16.gmra.mrb[32].mxu1 %vm1998_vm1, %v4043_v42  ;;  %5390 = vmatmul.mubr.msk.bf16.vlgmr.msra.gmra.mrb[32].mxu0 %vm1998_vm1, %v4043_v42 }
0x106e   :  { %5394 = vmatpush3.bf16.xpose.msra.mxu0 %v4254_v29  ;;  %5395 = vmatprep.mubr.msk.bf16.mxu0 %vm6170_vm0, %v6169_v55 }
0x106f   :  { %5401 = vmatprep.mubr.msk.bf16.mxu1 %vm6170_vm0, %v6169_v55  ;;  %5405 = vmatprep.subr.bf16.mxu0 %v6169_v55 }
0x1075   :  { %5396 = vmatmul.mubr.msk.bf16.vlgmr.msra.gmra.mrb[76].mxu0 %vm1998_vm1, %v4246_v33  ;;  %5402 = vmatmul.mubr.msk.bf16.vlgmr.msra.gmra.mrb[60].mxu1 %vm1998_vm1, %v4299_v48  ;;  %v5946_v33 = vld [vmem:[#allocation9 + $0x1e8] ss:$12 sps:$4 sm:$0xff]  }
0x1076   :  { %5407 = vmatprep.mubr.msk.bf16.mxu0 %vm6170_vm0, %v6169_v55  ;;  %5413 = vmatprep.mubr.msk.bf16.mxu1 %vm6170_vm0, %v6169_v55  ;;  %v5945_v48 = vld [vmem:[#allocation9 + $0x1fc] ss:$12 sps:$4 sm:$0xff]  }
0x1148   :  { %v4290_v50 = vpop.f32.mrb[76].mxu0  ;;  %v4343_v49 = vpop.f32.mrb[60].mxu1 }
0x1149   :  { %v4350_v51 = vmul.f32 0.125, %v4290_v50  ;;  %v4352_v52 = vmul.f32 0.125, %v4343_v49  ;;  %v5397_v53 = vpop.f32.mrb[77].mxu0  ;;  %v5403_v54 = vpop.f32.mrb[61].mxu1  ;;  %v5943_v50 = vld [vmem:[#allocation9 + $0x1f8] ss:$12 sps:$4 sm:$0xff]  }
0x114a   :  { %v4293_v57 = vpop.f32.mrb[78].mxu0  ;;  %v4346_v58 = vpop.f32.mrb[62].mxu1  ;;  %v5949_v49 = vld [vmem:[#allocation9 + $0x214] ss:$12 sps:$4 sm:$0xff]   ;;  %v5954_v54 = vld [vmem:[#allocation9 + $0x218] ss:$12 sps:$4 sm:$0xff]  }
0x114b   :  { %v4351_v59 = vmul.f32 0.125, %v4293_v57  ;;  %v5398_v60 = vpop.f32.mrb[79].mxu0  ;;  %v5404_v62 = vpop.f32.mrb[63].mxu1  ;;  %v4354_v37 = vsel %vm6371_vm6, %v4350_v51, -1e+30  ;;  %v4353_v24 = vmul.f32 0.125, %v4346_v58 }
0x114c   :  { %v4358_v15 = vsel %vm2115_vm7, %v4354_v37, -inf  ;;  %v4356_v63 = vsel %vm6383_vm8, %v4352_v52, -1e+30  ;;  %v5947_v51 = vld [vmem:[#allocation9 + $0x210] ss:$12 sps:$4 sm:$0xff]  }
0x114d   :  { %4359 = vmax.xlane.f32.xlu0 %v4358_v15  ;;  %v4355_v55 = vsel %vm6371_vm6, %v4351_v59, -1e+30  ;;  %v4364_v0 = vsel %vm2115_vm7, %v4356_v63, -inf  ;;  %v4357_v3 = vsel %vm6383_vm8, %v4353_v24, -1e+30 }
0x114e   :  { %v4361_v23 = vsel %vm2115_vm7, %v4355_v55, -inf  ;;  %v4367_v4 = vsel %vm2115_vm7, %v4357_v3, -inf  ;;  %v5953_v52 = vld [vmem:[#allocation9 + $0x22c] ss:$12 sps:$4 sm:$0xff]   ;;  %v5951_v53 = vld [vmem:[#allocation9 + $0x228] ss:$12 sps:$4 sm:$0xff]  }
0x114f   :  { %4362 = vmax.xlane.f32.xlu1 %v4361_v23  ;;  %v5955_v57 = vld [vmem:[#allocation9 + $0x230] ss:$12 sps:$4 sm:$0xff]  }
0x1151   :  { %4365 = vmax.xlane.f32.xlu0 %v4364_v0  ;;  %v1981_v0 = vld [vmem:[%s6678_s4] sm:$0x7]  ;;  %s6172_s4 = smov [#allocation10]  }
0x1152   :  { %s4719_s20 = sshll.u32 %s6172_s4, 4  ;;  %s4720_s20 = int_to_ptr.vmem [resolvable:$true] %s4719_s20 }
0x1153   :  { %s6128_s21 = scalar_lea.vmem %s4720_s20, 1536  ;;  %p6133_p0 = scmp.lt.s32.totalorder %s4720_s20, %s4720_s20 }
0x1154   :  { %p6129_p13 = scmp.ne.s32.totalorder %s4720_s20, %s6128_s21  ;;  %p6134_p1 = scmp.lt.s32.totalorder %s6128_s21, %s6128_s21 }
0x1155   :  { %4368 = vmax.xlane.f32.xlu0 %v4367_v4  ;;  %v1986_v4 = vrot.slane %v1981_v0, %v6366_v12 }
0x1156   :  { %p6135_p2 = por %p6134_p1, %p6133_p0 }
0x1158   :  { %p6136_p3 = pnand %p6135_p2, %p6129_p13 }
0x11da   :  { %v4360_v61 = vpop.xlane.xlu0 %4359 }
0x11db   :  { %v4370_v13 = vsub.f32 %v4354_v37, %v4360_v61 }
0x11dc   :  { %v4363_v28 = vpop.xlane.xlu1 %4362 }
0x11dd   :  { %v4374_v20 = vmul.f32 1.442695, %v4370_v13  ;;  %v4371_v5 = vsub.f32 %v4355_v55, %v4363_v28  ;;  %v1993_v13 = vsub.s32 2, %v6363_v7 }
0x11de   :  { %v4366_v6 = vpop.xlane.xlu0 %4365 }
0x11df   :  { %6036 = vpow2.f32 %v4374_v20  ;;  %v4376_v41 = vmul.f32 1.442695, %v4371_v5  ;;  %v4372_v11 = vsub.f32 %v4356_v63, %v4366_v6 }
0x11e1   :  { %6038 = vpow2.f32 %v4376_v41  ;;  %v4378_v16 = vmul.f32 1.442695, %v4372_v11 }
0x11e2   :  { %v4369_v10 = vpop.xlane.xlu0 %4368 }
0x11e3   :  { %6040 = vpow2.f32 %v4378_v16  ;;  %v4373_v17 = vsub.f32 %v4357_v3, %v4369_v10  ;;  %v1989_v3 = vsub.s32 1, %v6363_v7  ;;  %v1994_v16 = vrot.slane %v1981_v0, %v1993_v13 }
0x11e5   :  { %v4380_v18 = vmul.f32 1.442695, %v4373_v17  ;;  %v1990_v61 = vrot.slane %v1981_v0, %v1989_v3 }
0x11e7   :  { %6042 = vpow2.f32 %v4380_v18 }
0x11e9   :  { %v6037_v43 = vpop.eup %6036 }
0x11ea   :  { %v4382_v19 = vsel %vm2115_vm7, %v6037_v43, 0.0 }
0x11eb   :  { %v6039_v21 = vpop.eup %6038  ;;  %4383 = vadd.xlane.f32.xlu0 %v4382_v19 }
0x11ec   :  { %v4385_v22 = vsel %vm2115_vm7, %v6039_v21, 0.0 }
0x11ed   :  { %v6041_v25 = vpop.eup %6040  ;;  %4386 = vadd.xlane.f32.xlu1 %v4385_v22 }
0x11ee   :  { %v4388_v27 = vsel %vm2115_vm7, %v6041_v25, 0.0 }
0x11ef   :  { %4389 = vadd.xlane.f32.xlu0 %v4388_v27 }
0x11f1   :  { %v6043_v31 = vpop.eup %6042 }
0x11f2   :  { %v4391_v39 = vsel %vm2115_vm7, %v6043_v31, 0.0 }
0x11f3   :  { %4392 = vadd.xlane.f32.xlu1 %v4391_v39 }
0x1204   :  { %4453 = vrot.lane.b32.xlu1 %v6360_v2, %s6171_s17 }
0x1205   :  { %4405 = vrot.lane.b32.xlu0 %v6358_v56, %s6171_s17 }
0x1278   :  { %v4384_v32 = vpop.xlane.xlu0 %4383 }
0x1279   :  { %6044 = vrcp.f32 %v4384_v32 }
0x127a   :  { %v4387_v26 = vpop.xlane.xlu1 %4386 }
0x127b   :  { %6046 = vrcp.f32 %v4387_v26 }
0x127c   :  { %v4390_v14 = vpop.xlane.xlu0 %4389 }
0x127d   :  { %6048 = vrcp.f32 %v4390_v14 }
0x1280   :  { %v4393_v1 = vpop.xlane.xlu1 %4392  ;;  %v4406_v34 = vpop.permute.xlu0 %4405 }
0x1281   :  { %6050 = vrcp.f32 %v4393_v1  ;;  %5406 = vmatpush3.bf16.msra.mxu0 %v4406_v34 }
0x1282   :  { %5417 = vmatprep.subr.bf16.mxu0 %v5946_v33 }
0x1283   :  { %v6045_v9 = vpop.eup %6044 }
0x1284   :  { %v4454_v36 = vpop.permute.xlu1 %4453  ;;  %v4398_v2 = vmul.f32 %v6045_v9, %v6037_v43 }
0x1285   :  { %v6047_v38 = vpop.eup %6046  ;;  %5412 = vmatpush3.bf16.msra.mxu1 %v4454_v36 }
0x1286   :  { %v4399_v8 = vmul.f32 %v6047_v38, %v6039_v21  ;;  %4588 = vmatprep.subr.bf16.mxu1 %v5942_v35 }
0x1287   :  { %v6049_v44 = vpop.eup %6048 }
0x1288   :  { %v4402_v56 = vpack.c.bf16 %v4399_v8, %v4398_v2  ;;  %v4400_v46 = vmul.f32 %v6049_v44, %v6041_v25 }
0x128a   :  { %5408 = vmatmul.mubr.msk.bf16.vlgmr.msra.gmra.mrb[80].mxu0 %vm2115_vm7, %v4402_v56 }
0x128b   :  { %v6051_v45 = vpop.eup %6050  ;;  %5418 = vmatpush3.bf16.msra.mxu0 %v5946_v33 }
0x128c   :  { %v4401_v42 = vmul.f32 %v6051_v45, %v6043_v31  ;;  %5419 = vmatprep.subr.bf16.mxu0 %v5950_v40 }
0x128e   :  { %v4403_v29 = vpack.c.bf16 %v4401_v42, %v4400_v46 }
0x128f   :  { %5420 = vmatpush3.bf16.msra.mxu0 %v5950_v40 }
0x1290   :  { %5414 = vmatmul.mubr.msk.bf16.vlgmr.msra.gmra.mrb[64].mxu1 %vm2115_vm7, %v4403_v29  ;;  %5421 = vmatprep.subr.bf16.mxu0 %v5954_v54 }
0x1291   :  { %4589 = vmatpush1.bf16.msra.mxu1 %v5940_v47  ;;  %4620 = vmatprep.mubr.bf16.mxu1 %v6168_v30 }
0x1292   :  { %4590 = vmatprep.subr.bf16.mxu1 %v5945_v48 }
0x1293   :  { %5422 = vmatpush3.bf16.msra.mxu0 %v5954_v54 }
0x1294   :  { %5423 = vmatprep.subr.bf16.mxu0 %v5955_v57 }
0x1295   :  { %4591 = vmatpush1.bf16.msra.mxu1 %v5943_v50 }
0x1296   :  { %4592 = vmatprep.subr.bf16.mxu1 %v5949_v49 }
0x1297   :  { %5424 = vmatpush3.bf16.msra.mxu0 %v5955_v57 }
0x1299   :  { %4593 = vmatpush1.bf16.msra.mxu1 %v5947_v51 }
0x129a   :  { %4594 = vmatprep.subr.bf16.mxu1 %v5953_v52 }
0x129d   :  { %4595 = vmatpush1.bf16.msra.mxu1 %v5951_v53 }
0x135d   :  { %v4445_v58 = vpop.f32.mrb[80].mxu0 }
0x135e   :  { %v5409_v59 = vpop.f32.mrb[81].mxu0 }
0x135f   :  { %v4448_v60 = vpop.f32.mrb[82].mxu0 }
0x1360   :  { %v4500_v62 = vpack.c.bf16 %v4448_v60, %v4445_v58  ;;  %v5410_v37 = vpop.f32.mrb[83].mxu0 }
0x1362   :  { %5067 = vmatmul.mubr.msk.bf16.vlgmr.msra.gmra.mrb[28].mxu1 %vm1998_vm1, %v4500_v62  ;;  %5425 = vmatprep.mubr.msk.bf16.mxu0 %vm1998_vm1, %v4500_v62 }
0x1363   :  { %v4493_v15 = vpop.f32.mrb[64].mxu1  ;;  %4630 = vmatprep.mubr.bf16.mxu1 %v6168_v30 }
0x1364   :  { %v5415_v24 = vpop.f32.mrb[65].mxu1 }
0x1365   :  { %v4496_v55 = vpop.f32.mrb[66].mxu1 }
0x1366   :  { %v4501_v63 = vpack.c.bf16 %v4496_v55, %v4493_v15  ;;  %v5416_v23 = vpop.f32.mrb[67].mxu1 }
0x1368   :  { %5426 = vmatmul.mubr.msk.bf16.vlgmr.msra.gmra.mrb[32].mxu0 %vm1998_vm1, %v4501_v63 }
0x136a   :  { %5068 = vmatmul.mubr.msk.bf16.gmra.mrb[32].mxu1 %vm1998_vm1, %v4501_v63 }
0x1435   :  { %v4622_v30 = vpop.f32.mrb[28].mxu1 }
0x1436   :  { %v5429_v28 = vadd.f32 %v4622_v30, %v1986_v4  ;;  %v4624_v20 = vpop.f32.mrb[29].mxu1 }
0x1437   :  { %v5430_v5 = vadd.f32 %v4624_v20, %v1990_v61  ;;  %v4626_v6 = vpop.f32.mrb[30].mxu1 }
0x1438   :  { %4702 = vst [vmem:[#allocation10] sm:$0xff] %v5429_v28  ;;  %v5431_v41 = vadd.f32 %v4626_v6, %v1986_v4  ;;  %v4628_v11 = vpop.f32.mrb[31].mxu1 }
0x1439   :  { %4703 = vst [vmem:[#allocation10 + $0x8] sm:$0xff] %v5430_v5  ;;  %v5432_v10 = vadd.f32 %v4628_v11, %v1990_v61 }
0x143a   :  { %4705 = vst [vmem:[#allocation10 + $0x18] sm:$0xff] %v5431_v41 }
0x143b   :  { %4706 = vst [vmem:[#allocation10 + $0x20] sm:$0xff] %v5432_v10  ;;  %v5427_v17 = vpop.f32.mrb[32].mxu0 }
0x143c   :  { %v5437_v18 = vadd.f32 %v5427_v17, %v1994_v16  ;;  %v4675_v43 = vpop.f32.mrb[33].mxu0 }
0x143d   :  { %v5438_v12 = vadd.f32 %v4675_v43, %v1994_v16  ;;  %v4632_v19 = vpop.f32.mrb[32].mxu1  ;;  %v5428_v21 = vpop.f32.mrb[34].mxu0 }
0x143e   :  { %4710 = vst [vmem:[#allocation10 + $0x40] sm:$0xff] %v5437_v18  ;;  %v5433_v7 = vadd.f32 %v4632_v19, %v1986_v4  ;;  %v5439_v22 = vadd.f32 %v5428_v21, %v1994_v16  ;;  %v4634_v25 = vpop.f32.mrb[33].mxu1  ;;  %v4678_v27 = vpop.f32.mrb[35].mxu0 }
0x143f   :  { %4704 = vst [vmem:[#allocation10 + $0x10] sm:$0xff] %v5438_v12  ;;  %v5434_v31 = vadd.f32 %v4634_v25, %v1990_v61  ;;  %v5440_v39 = vadd.f32 %v4678_v27, %v1994_v16  ;;  %v4636_v32 = vpop.f32.mrb[34].mxu1 }
0x1440   :  { %4708 = vst [vmem:[#allocation10 + $0x30] sm:$0xff] %v5433_v7  ;;  %4713 = vst [vmem:[#allocation10 + $0x58] sm:$0xff] %v5439_v22  ;;  %v5435_v26 = vadd.f32 %v4636_v32, %v1986_v4  ;;  %v4638_v14 = vpop.f32.mrb[35].mxu1 }
0x1441   :  { %4709 = vst [vmem:[#allocation10 + $0x38] sm:$0xff] %v5434_v31  ;;  %4707 = vst [vmem:[#allocation10 + $0x28] sm:$0xff] %v5440_v39  ;;  %v5436_v33 = vadd.f32 %v4638_v14, %v1990_v61 }
0x1442   :  { %4711 = vst [vmem:[#allocation10 + $0x48] sm:$0xff] %v5435_v26 }
0x1443   :  { %4712 = vst [vmem:[#allocation10 + $0x50] sm:$0xff] %v5436_v33 }
0x1444   :  { %6139 = shalt.err (!%p6136_p3)
}
0x1445   :  { %s6140_s24 = scalar_lea.hbm %s6679_s5, 1536 }
0x1446   :  { %p6141_p4 = scmp.ne.s32.totalorder %s6679_s5, %s6140_s24  ;;  %p6144_p5 = scmp.lt.u32.totalorder %s6140_s24, %s6679_s5 }
0x1448   :  { %p6146_p6 = pnand %p6144_p5, %p6141_p4 }
0x144a   :  { %6149 = shalt.err (!%p6146_p6)
}
0x144b   :  { %4725 = dma.vmem_to_hbm [thread:$0]  %s4720_s20, 1536, %s6679_s5, [#allocation6], %s6163_s2, %s6163_s2, %s6164_s26  }
0x144c   :  { %6156 = dma.done.wait [#allocation6], 1536  }
0x144d   :  { %6157 = vsyncadd [#allocation6], 4294965760 }
0x144e   :  { %4729 = vsyncpa [#allocation5], 1 }
0x144f   :  { %4730 = vsyncpa [#allocation8], 1 }
0x1450   :  { %4731 = vsyncpa [#allocation6], 1 }

// kernel: tpu_custom_call.1
= control target key start
LH: loop header
LB: loop body
LE: loop exit
PB: predicated region body
PF: predicated region fallthrough
CT: control target
= control target key end

     0   :  { %s6674_s0 = inlined_call_operand.hbm [shape: s32[2], index: 0, kind: input, shape index: {}]   ;;  %s6675_s1 = inlined_call_operand.hbm [shape: f32[2,16,384], index: 1, kind: input, shape index: {}]   ;;  %s6676_s2 = inlined_call_operand.hbm [shape: bf16[384,1152], index: 2, kind: input, shape index: {}]   ;;  %s6677_s3 = inlined_call_operand.hbm [shape: bf16[384,384], index: 3, kind: input, shape index: {}]   ;;  %s6678_s4 = inlined_call_operand.vmem [shape: f32[1,384], index: 4, kind: input, shape index: {}]   ;;  %s6679_s5 = inlined_call_operand.hbm [shape: f32[2,16,384], index: 5, kind: output, shape index: {}]  }
   0x1   :  { %s6052_s20 = scalar_lea.hbm %s6674_s0, 16 }
   0x2   :  { %p6053_p0 = scmp.ne.s32.totalorder %s6674_s0, %s6052_s20  ;;  %p6056_p1 = scmp.lt.u32.totalorder %s6052_s20, %s6674_s0 }
   0x4   :  { %p6058_p2 = pnand %p6056_p1, %p6053_p0 }
   0x6   :  { %6061 = shalt.err (!%p6058_p2)  }
   0x7   :  { %s6158_s25 = smov [#allocation3]  }
   0x8   :  { %11 = dma.hbm_to_smem %s6674_s0, 16, %s6158_s25, [#allocation2] }
   0x9   :  { %6150 = dma.done.wait [#allocation2], 16 }
   0xa   :  { %6151 = vsyncadd [#allocation2], 4294967280 }
   0xb   :  { %13 = sfence }
   0xc   :  { %14 = vsyncpa [#allocation5], 0 }
   0xd   :  { %15 = vsyncpa [#allocation8], 0 }
   0xe   :  { %16 = vsyncpa [#allocation6], 0  ;;  %s6159_s28 = smov [#allocation7]   ;;  %s6062_s7 = scalar_lea.hbm %s6676_s2, 27648 }
   0xf   :  { %s34_s29 = sshll.u32 %s6159_s28, 4  ;;  %p6063_p3 = scmp.ne.s32.totalorder %s6676_s2, %s6062_s7  ;;  %s35_s29 = int_to_ptr.vmem [resolvable:$true] %s34_s29 }
  0x10   :  { %p6066_p4 = scmp.lt.u32.totalorder %s6062_s7, %s6676_s2 }
  0x12   :  { %p6068_p5 = pnand %p6066_p4, %p6063_p3 }
  0x14   :  { %6071 = shalt.err (!%p6068_p5)
}
  0x15   :  { %s6072_s0 = scalar_lea.vmem %s35_s29, 27648  ;;  %p6077_p7 = scmp.lt.s32.totalorder %s35_s29, %s35_s29 }
  0x16   :  { %p6073_p6 = scmp.ne.s32.totalorder %s35_s29, %s6072_s0  ;;  %p6078_p8 = scmp.lt.s32.totalorder %s6072_s0, %s6072_s0 }
  0x18   :  { %p6079_p9 = por %p6078_p8, %p6077_p7 }
  0x1a   :  { %p6080_p10 = pnand %p6079_p9, %p6073_p6 }
  0x1c   :  { %6083 = shalt.err (!%p6080_p10)
}
  0x1d   :  { %s6160_s12 = smov 576   ;;  %s6161_s13 = smov 36  }
  0x1e   :  { %40 = dma.hbm_to_vmem [thread:$0]  %s6676_s2, 27648, %s35_s29, [#allocation8], %s6160_s12, %s6160_s12, %s6161_s13  }
  0x1f   :  { %s6162_s16 = smov [#allocation4]   ;;  %s6084_s20 = scalar_lea.hbm %s6675_s1, 1536 }
  0x20   :  { %s22_s17 = sshll.u32 %s6162_s16, 4  ;;  %p6085_p11 = scmp.ne.s32.totalorder %s6675_s1, %s6084_s20  ;;  %s23_s17 = int_to_ptr.vmem [resolvable:$true] %s22_s17 }
  0x21   :  { %p6088_p12 = scmp.lt.u32.totalorder %s6084_s20, %s6675_s1 }
  0x23   :  { %p6090_p13 = pnand %p6088_p12, %p6085_p11 }
  0x25   :  { %6093 = shalt.err (!%p6090_p13)
}
  0x26   :  { %s6094_s25 = scalar_lea.vmem %s23_s17, 1536  ;;  %p6099_p1 = scmp.lt.s32.totalorder %s23_s17, %s23_s17 }
  0x27   :  { %p6095_p0 = scmp.ne.s32.totalorder %s23_s17, %s6094_s25  ;;  %p6100_p2 = scmp.lt.s32.totalorder %s6094_s25, %s6094_s25 }
  0x29   :  { %p6101_p3 = por %p6100_p2, %p6099_p1 }
  0x2b   :  { %p6102_p4 = pnand %p6101_p3, %p6095_p0 }
  0x2d   :  { %6105 = shalt.err (!%p6102_p4)
}
  0x2e   :  { %s6163_s2 = smov 384   ;;  %s6164_s26 = smov 24  }
  0x2f   :  { %28 = dma.hbm_to_vmem [thread:$0]  %s6675_s1, 1536, %s23_s17, [#allocation5], %s6163_s2, %s6163_s2, %s6164_s26  }
  0x30   :  { %s6165_s29 = smov [#allocation9]   ;;  %s6106_s8 = scalar_lea.hbm %s6677_s3, 9216 }
  0x31   :  { %s46_s30 = sshll.u32 %s6165_s29, 4  ;;  %p6107_p5 = scmp.ne.s32.totalorder %s6677_s3, %s6106_s8  ;;  %s47_s30 = int_to_ptr.vmem [resolvable:$true] %s46_s30 }
  0x32   :  { %p6110_p6 = scmp.lt.u32.totalorder %s6106_s8, %s6677_s3 }
  0x34   :  { %p6112_p7 = pnand %p6110_p6, %p6107_p5 }
  0x36   :  { %6115 = shalt.err (!%p6112_p7)
}
  0x37   :  { %s6116_s12 = scalar_lea.vmem %s47_s30, 9216  ;;  %p6121_p9 = scmp.lt.s32.totalorder %s47_s30, %s47_s30 }
  0x38   :  { %p6117_p8 = scmp.ne.s32.totalorder %s47_s30, %s6116_s12  ;;  %p6122_p10 = scmp.lt.s32.totalorder %s6116_s12, %s6116_s12 }
  0x3a   :  { %p6123_p11 = por %p6122_p10, %p6121_p9 }
  0x3c   :  { %p6124_p12 = pnand %p6123_p11, %p6117_p8 }
  0x3e   :  { %6127 = shalt.err (!%p6124_p12)
}
  0x3f   :  { %s6166_s1 = smov 192   ;;  %s6167_s13 = smov 12  }
  0x40   :  { %52 = dma.hbm_to_vmem [thread:$0]  %s6677_s3, 9216, %s47_s30, [#allocation8], %s6166_s1, %s6166_s1, %s6167_s13  }
  0x41   :  { %6152 = dma.done.wait [#allocation5], 1536  }
  0x42   :  { %6153 = vsyncadd [#allocation5], 4294965760 }
  0x43   :  { %6154 = dma.done.wait [#allocation8], 36864  }
  0x44   :  { %6155 = vsyncadd [#allocation8], 4294930432  ;;  %v5548_v0 = vld [vmem:[#allocation7 + $0x4] ss:$36 sps:$4 sm:$0xff]   ;;  %v5550_v1 = vld [vmem:[#allocation7 + $0xc] ss:$36 sps:$4 sm:$0xff]  }
  0x45   :  { %1428 = vmatprep.subr.bf16.mxu0 %v5548_v0  ;;  %v5552_v2 = vld [vmem:[#allocation7] ss:$36 sps:$4 sm:$0xff]   ;;  %v5553_v3 = vld [vmem:[#allocation7 + $0x8] ss:$36 sps:$4 sm:$0xff]   ;;  %1534 = vmatprep.subr.bf16.mxu1 %v5550_v1  ;;  %v5556_v5 = vld [vmem:[#allocation7 + $0x54] ss:$36 sps:$4 sm:$0xff]  }
  0x46   :  { %v5554_v4 = vld [vmem:[#allocation7 + $0x4c] ss:$36 sps:$4 sm:$0xff]   ;;  %1429 = vmatpush1.bf16.msra.mxu0 %v5552_v2  ;;  %1535 = vmatpush1.bf16.msra.mxu1 %v5553_v3  ;;  %v5560_v8 = vld [vmem:[#allocation7 + $0x94] ss:$36 sps:$4 sm:$0xff]   ;;  %v5562_v9 = vld [vmem:[#allocation7 + $0x9c] ss:$36 sps:$4 sm:$0xff]  }
  0x47   :  { %v5558_v6 = vld [vmem:[#allocation7 + $0x48] ss:$36 sps:$4 sm:$0xff]   ;;  %1430 = vmatprep.subr.bf16.mxu0 %v5554_v4  ;;  %v5559_v7 = vld [vmem:[#allocation7 + $0x50] ss:$36 sps:$4 sm:$0xff]   ;;  %1536 = vmatprep.subr.bf16.mxu1 %v5556_v5  ;;  %v5565_v11 = vld [vmem:[#allocation7 + $0x98] ss:$36 sps:$4 sm:$0xff]  }
  0x48   :  { %v5564_v10 = vld [vmem:[#allocation7 + $0x90] ss:$36 sps:$4 sm:$0xff]   ;;  %v5566_v12 = vld [vmem:[#allocation7 + $0xdc] ss:$36 sps:$4 sm:$0xff]   ;;  %v5568_v13 = vld [vmem:[#allocation7 + $0xe4] ss:$36 sps:$4 sm:$0xff]  }
  0x49   :  { %v5570_v14 = vld [vmem:[#allocation7 + $0xd8] ss:$36 sps:$4 sm:$0xff]   ;;  %v5571_v15 = vld [vmem:[#allocation7 + $0xe0] ss:$36 sps:$4 sm:$0xff]   ;;  %v5574_v17 = vld [vmem:[#allocation7 + $0x12c] ss:$36 sps:$4 sm:$0xff]  }
  0x4a   :  { %1431 = vmatpush1.bf16.msra.mxu0 %v5558_v6  ;;  %1537 = vmatpush1.bf16.msra.mxu1 %v5559_v7  ;;  %v5572_v16 = vld [vmem:[#allocation7 + $0x124] ss:$36 sps:$4 sm:$0xff]   ;;  %v5578_v20 = vld [vmem:[#allocation7 + $0x16c] ss:$36 sps:$4 sm:$0xff]   ;;  %v5580_v21 = vld [vmem:[#allocation7 + $0x174] ss:$36 sps:$4 sm:$0xff]  }
  0x4b   :  { %1432 = vmatprep.subr.bf16.mxu0 %v5560_v8  ;;  %1538 = vmatprep.subr.bf16.mxu1 %v5562_v9  ;;  %v5576_v18 = vld [vmem:[#allocation7 + $0x120] ss:$36 sps:$4 sm:$0xff]   ;;  %v5577_v19 = vld [vmem:[#allocation7 + $0x128] ss:$36 sps:$4 sm:$0xff]   ;;  %v5583_v23 = vld [vmem:[#allocation7 + $0x170] ss:$36 sps:$4 sm:$0xff]  }
  0x4c   :  { %v5582_v22 = vld [vmem:[#allocation7 + $0x168] ss:$36 sps:$4 sm:$0xff]   ;;  %v5584_v24 = vld [vmem:[#allocation7 + $0x1b4] ss:$36 sps:$4 sm:$0xff]   ;;  %v5586_v25 = vld [vmem:[#allocation7 + $0x1bc] ss:$36 sps:$4 sm:$0xff]  }
  0x4d   :  { %v5588_v26 = vld [vmem:[#allocation7 + $0x1b0] ss:$36 sps:$4 sm:$0xff]   ;;  %v5589_v27 = vld [vmem:[#allocation7 + $0x1b8] ss:$36 sps:$4 sm:$0xff]   ;;  %v5592_v29 = vld [vmem:[#allocation7 + $0x204] ss:$36 sps:$4 sm:$0xff]  }
  0x4e   :  { %1433 = vmatpush1.bf16.msra.mxu0 %v5564_v10  ;;  %1539 = vmatpush1.bf16.msra.mxu1 %v5565_v11  ;;  %v5590_v28 = vld [vmem:[#allocation7 + $0x1fc] ss:$36 sps:$4 sm:$0xff]   ;;  %v5596_v32 = vld [vmem:[#allocation7 + $0x244] ss:$36 sps:$4 sm:$0xff]   ;;  %v5598_v33 = vld [vmem:[#allocation7 + $0x24c] ss:$36 sps:$4 sm:$0xff]  }
  0x4f   :  { %1434 = vmatprep.subr.bf16.mxu0 %v5566_v12  ;;  %1540 = vmatprep.subr.bf16.mxu1 %v5568_v13  ;;  %v5594_v30 = vld [vmem:[#allocation7 + $0x1f8] ss:$36 sps:$4 sm:$0xff]   ;;  %v5595_v31 = vld [vmem:[#allocation7 + $0x200] ss:$36 sps:$4 sm:$0xff]   ;;  %v5601_v35 = vld [vmem:[#allocation7 + $0x248] ss:$36 sps:$4 sm:$0xff]  }
  0x50   :  { %v5600_v34 = vld [vmem:[#allocation7 + $0x240] ss:$36 sps:$4 sm:$0xff]   ;;  %v5602_v36 = vld [vmem:[#allocation7 + $0x28c] ss:$36 sps:$4 sm:$0xff]   ;;  %v5604_v37 = vld [vmem:[#allocation7 + $0x294] ss:$36 sps:$4 sm:$0xff]  }
  0x51   :  { %v5606_v38 = vld [vmem:[#allocation7 + $0x288] ss:$36 sps:$4 sm:$0xff]   ;;  %v5607_v39 = vld [vmem:[#allocation7 + $0x290] ss:$36 sps:$4 sm:$0xff]   ;;  %v5610_v41 = vld [vmem:[#allocation7 + $0x2dc] ss:$36 sps:$4 sm:$0xff]  }
  0x52   :  { %1435 = vmatpush1.bf16.msra.mxu0 %v5570_v14  ;;  %1541 = vmatpush1.bf16.msra.mxu1 %v5571_v15  ;;  %v5608_v40 = vld [vmem:[#allocation7 + $0x2d4] ss:$36 sps:$4 sm:$0xff]   ;;  %v5614_v44 = vld [vmem:[#allocation7 + $0x31c] ss:$36 sps:$4 sm:$0xff]   ;;  %v5616_v45 = vld [vmem:[#allocation7 + $0x324] ss:$36 sps:$4 sm:$0xff]  }
  0x53   :  { %1436 = vmatprep.subr.bf16.mxu0 %v5572_v16  ;;  %1542 = vmatprep.subr.bf16.mxu1 %v5574_v17  ;;  %v5612_v42 = vld [vmem:[#allocation7 + $0x2d0] ss:$36 sps:$4 sm:$0xff]   ;;  %v5613_v43 = vld [vmem:[#allocation7 + $0x2d8] ss:$36 sps:$4 sm:$0xff]   ;;  %v67_v46 = vld [vmem:[#allocation4 + $0x8] sm:$0xff]  ;;  %vm6170_vm0 = vmmov 0  }
  0x54   :  { %v70_v47 = vld [vmem:[#allocation4 + $0x20] sm:$0xff]  ;;  %v5618_v48 = vld [vmem:[#allocation7 + $0x318] ss:$36 sps:$4 sm:$0xff]   ;;  %v5622_v52 = vld [vmem:[#allocation7 + $0x36c] ss:$36 sps:$4 sm:$0xff]   ;;  %vm1998_vm1 = vcmask 523264  }
  0x55   :  { %v5619_v49 = vld [vmem:[#allocation7 + $0x320] ss:$36 sps:$4 sm:$0xff]   ;;  %v6254_v50 = vpack.c.bf16 %v70_v47, %v67_v46  ;;  %v5625_v54 = vld [vmem:[#allocation7 + $0x368] ss:$36 sps:$4 sm:$0xff]   ;;  %v5628_v56 = vld [vmem:[#allocation7 + $0x3b4] ss:$36 sps:$4 sm:$0xff]  }
  0x56   :  { %1437 = vmatpush1.bf16.msra.mxu0 %v5576_v18  ;;  %1543 = vmatpush1.bf16.msra.mxu1 %v5577_v19  ;;  %v5620_v51 = vld [vmem:[#allocation7 + $0x364] ss:$36 sps:$4 sm:$0xff]   ;;  %v5626_v55 = vld [vmem:[#allocation7 + $0x3ac] ss:$36 sps:$4 sm:$0xff]   ;;  %v5632_v59 = vld [vmem:[#allocation7 + $0x3f4] ss:$36 sps:$4 sm:$0xff]  }
  0x57   :  { %1438 = vmatprep.subr.bf16.mxu0 %v5578_v20  ;;  %1544 = vmatprep.subr.bf16.mxu1 %v5580_v21  ;;  %v5624_v53 = vld [vmem:[#allocation7 + $0x360] ss:$36 sps:$4 sm:$0xff]   ;;  %v5630_v57 = vld [vmem:[#allocation7 + $0x3a8] ss:$36 sps:$4 sm:$0xff]   ;;  %v5631_v58 = vld [vmem:[#allocation7 + $0x3b0] ss:$36 sps:$4 sm:$0xff]  }
  0x58   :  { %1460 = vmatprep.mubr.bf16.mxu0 %v6254_v50  ;;  %1566 = vmatprep.mubr.bf16.mxu1 %v6254_v50  ;;  %v5634_v60 = vld [vmem:[#allocation7 + $0x3fc] ss:$36 sps:$4 sm:$0xff]   ;;  %v5636_v61 = vld [vmem:[#allocation7 + $0x3f0] ss:$36 sps:$4 sm:$0xff]   ;;  %v5640_v0 = vld [vmem:[#allocation7 + $0x444] ss:$36 sps:$4 sm:$0xff]  }
  0x59   :  { %v5637_v62 = vld [vmem:[#allocation7 + $0x3f8] ss:$36 sps:$4 sm:$0xff]   ;;  %v5643_v2 = vld [vmem:[#allocation7 + $0x440] ss:$36 sps:$4 sm:$0xff]   ;;  %v5649_v6 = vld [vmem:[#allocation7 + $0x48c] ss:$36 sps:$4 sm:$0xff]  }
  0x5a   :  { %1439 = vmatpush1.bf16.msra.mxu0 %v5582_v22  ;;  %1545 = vmatpush1.bf16.msra.mxu1 %v5583_v23  ;;  %v5638_v63 = vld [vmem:[#allocation7 + $0x43c] ss:$36 sps:$4 sm:$0xff]   ;;  %v5646_v3 = vld [vmem:[#allocation7 + $0x484] ss:$36 sps:$4 sm:$0xff]   ;;  %v76_v11 = vld [vmem:[#allocation4 + $0x50] sm:$0xff]  ;;  %s1970_s3 = sld [smem:[#allocation3]] }
  0x5b   :  { %1440 = vmatprep.subr.bf16.mxu0 %v5584_v24  ;;  %1546 = vmatprep.subr.bf16.mxu1 %v5586_v25  ;;  %v5642_v1 = vld [vmem:[#allocation7 + $0x438] ss:$36 sps:$4 sm:$0xff]   ;;  %v66_v4 = vld [vmem:[#allocation4] sm:$0xff]  ;;  %v5647_v8 = vld [vmem:[#allocation7 + $0x488] ss:$36 sps:$4 sm:$0xff]   ;;  %s4949_s16 = sld [smem:[#allocation3 + $0x1]] }
  0x5c   :  { %v69_v5 = vld [vmem:[#allocation4 + $0x18] sm:$0xff]  ;;  %v5644_v7 = vld [vmem:[#allocation7 + $0x480] ss:$36 sps:$4 sm:$0xff]   ;;  %v5652_v12 = vld [vmem:[#allocation7 + $0x4cc] ss:$36 sps:$4 sm:$0xff]   ;;  %vm2115_vm7 = vcmask 130048  }
  0x5d   :  { %v6258_v9 = vpack.c.bf16 %v69_v5, %v66_v4  ;;  %v73_v10 = vld [vmem:[#allocation4 + $0x38] sm:$0xff]  ;;  %v5650_v14 = vld [vmem:[#allocation7 + $0x4c8] ss:$36 sps:$4 sm:$0xff]   ;;  %v5653_v16 = vld [vmem:[#allocation7 + $0x4d0] ss:$36 sps:$4 sm:$0xff]   ;;  %s6171_s17 = smov 64  }
  0x5e   :  { %1441 = vmatpush1.bf16.msra.mxu0 %v5588_v26  ;;  %1547 = vmatpush1.bf16.msra.mxu1 %v5589_v27  ;;  %v5655_v13 = vld [vmem:[#allocation7 + $0x4d4] ss:$36 sps:$4 sm:$0xff]   ;;  %v6260_v15 = vpack.c.bf16 %v76_v11, %v73_v10  ;;  %v75_v19 = vld [vmem:[#allocation4 + $0x48] sm:$0xff]  ;;  %v5661_v20 = vld [vmem:[#allocation7 + $0x51c] ss:$36 sps:$4 sm:$0xff]  }
  0x5f   :  { %1442 = vmatprep.subr.bf16.mxu0 %v5590_v28  ;;  %1548 = vmatprep.subr.bf16.mxu1 %v5592_v29  ;;  %v5658_v17 = vld [vmem:[#allocation7 + $0x514] ss:$36 sps:$4 sm:$0xff]   ;;  %v5664_v24 = vld [vmem:[#allocation7 + $0x55c] ss:$36 sps:$4 sm:$0xff]   ;;  %v5667_v25 = vld [vmem:[#allocation7 + $0x564] ss:$36 sps:$4 sm:$0xff]  }
  0x60   :  { %v72_v18 = vld [vmem:[#allocation4 + $0x30] sm:$0xff]  ;;  %v5659_v22 = vld [vmem:[#allocation7 + $0x518] ss:$36 sps:$4 sm:$0xff]   ;;  %v5665_v27 = vld [vmem:[#allocation7 + $0x560] ss:$36 sps:$4 sm:$0xff]  }
  0x61   :  { %v5656_v21 = vld [vmem:[#allocation7 + $0x510] ss:$36 sps:$4 sm:$0xff]   ;;  %v6266_v23 = vpack.c.bf16 %v75_v19, %v72_v18  ;;  %v5662_v26 = vld [vmem:[#allocation7 + $0x558] ss:$36 sps:$4 sm:$0xff]   ;;  %v5670_v28 = vld [vmem:[#allocation7 + $0x5a4] ss:$36 sps:$4 sm:$0xff]  }
  0x62   :  { %1443 = vmatpush1.bf16.msra.mxu0 %v5594_v30  ;;  %1549 = vmatpush1.bf16.msra.mxu1 %v5595_v31  ;;  %v5673_v29 = vld [vmem:[#allocation7 + $0x5ac] ss:$36 sps:$4 sm:$0xff]   ;;  %v6168_v30 = vmov 0   ;;  %v5668_v31 = vld [vmem:[#allocation7 + $0x5a0] ss:$36 sps:$4 sm:$0xff]  }
  0x63   :  { %1444 = vmatprep.subr.bf16.mxu0 %v5596_v32  ;;  %1550 = vmatprep.subr.bf16.mxu1 %v5598_v33  ;;  %v5671_v32 = vld [vmem:[#allocation7 + $0x5a8] ss:$36 sps:$4 sm:$0xff]   ;;  %v5694_v47 = vld [vmem:[#allocation7 + $0x14] ss:$36 sps:$4 sm:$0xff]   ;;  %v5724_v5 = vld [vmem:[#allocation7 + $0x13c] ss:$36 sps:$4 sm:$0xff]  }
  0x64   :  { %v5676_v33 = vld [vmem:[#allocation7 + $0x5ec] ss:$36 sps:$4 sm:$0xff]   ;;  %v5715_v4 = vld [vmem:[#allocation7 + $0x134] ss:$36 sps:$4 sm:$0xff]   ;;  %v5730_v10 = vld [vmem:[#allocation7 + $0x184] ss:$36 sps:$4 sm:$0xff]  }
  0x65   :  { %v71_v46 = vld [vmem:[#allocation4 + $0x28] sm:$0xff]  ;;  %v5719_v11 = vld [vmem:[#allocation7 + $0x178] ss:$36 sps:$4 sm:$0xff]  }
  0x66   :  { %1445 = vmatpush1.bf16.msra.mxu0 %v5600_v34  ;;  %1551 = vmatpush1.bf16.msra.mxu1 %v5601_v35  ;;  %v5679_v34 = vld [vmem:[#allocation7 + $0x5f4] ss:$36 sps:$4 sm:$0xff]   ;;  %v5674_v35 = vld [vmem:[#allocation7 + $0x5e8] ss:$36 sps:$4 sm:$0xff]  }
  0x67   :  { %1446 = vmatprep.subr.bf16.mxu0 %v5602_v36  ;;  %1552 = vmatprep.subr.bf16.mxu1 %v5604_v37  ;;  %v5677_v36 = vld [vmem:[#allocation7 + $0x5f0] ss:$36 sps:$4 sm:$0xff]  }
  0x68   :  { %v5682_v37 = vld [vmem:[#allocation7 + $0x634] ss:$36 sps:$4 sm:$0xff]   ;;  %v5733_v18 = vld [vmem:[#allocation7 + $0x20c] ss:$36 sps:$4 sm:$0xff]  }
  0x69   :  { %v5742_v19 = vld [vmem:[#allocation7 + $0x214] ss:$36 sps:$4 sm:$0xff]  }
  0x6a   :  { %1447 = vmatpush1.bf16.msra.mxu0 %v5606_v38  ;;  %1553 = vmatpush1.bf16.msra.mxu1 %v5607_v39  ;;  %v5685_v38 = vld [vmem:[#allocation7 + $0x63c] ss:$36 sps:$4 sm:$0xff]   ;;  %v5680_v39 = vld [vmem:[#allocation7 + $0x630] ss:$36 sps:$4 sm:$0xff]  }
  0x6b   :  { %1448 = vmatprep.subr.bf16.mxu0 %v5608_v40  ;;  %1554 = vmatprep.subr.bf16.mxu1 %v5610_v41  ;;  %v5683_v40 = vld [vmem:[#allocation7 + $0x638] ss:$36 sps:$4 sm:$0xff]  }
  0x6c   :  { %v5688_v41 = vld [vmem:[#allocation7 + $0x67c] ss:$36 sps:$4 sm:$0xff]  }
  0x6e   :  { %1449 = vmatpush1.bf16.msra.mxu0 %v5612_v42  ;;  %1555 = vmatpush1.bf16.msra.mxu1 %v5613_v43  ;;  %v5691_v42 = vld [vmem:[#allocation7 + $0x684] ss:$36 sps:$4 sm:$0xff]   ;;  %v5686_v43 = vld [vmem:[#allocation7 + $0x678] ss:$36 sps:$4 sm:$0xff]  }
  0x6f   :  { %1450 = vmatprep.subr.bf16.mxu0 %v5614_v44  ;;  %1556 = vmatprep.subr.bf16.mxu1 %v5616_v45  ;;  %v5689_v44 = vld [vmem:[#allocation7 + $0x680] ss:$36 sps:$4 sm:$0xff]   ;;  %v68_v45 = vld [vmem:[#allocation4 + $0x10] sm:$0xff] }
  0x72   :  { %1451 = vmatpush1.bf16.msra.mxu0 %v5618_v48  ;;  %1557 = vmatpush1.bf16.msra.mxu1 %v5619_v49  ;;  %v5700_v48 = vld [vmem:[#allocation7 + $0x1c] ss:$36 sps:$4 sm:$0xff]   ;;  %v6272_v49 = vpack.c.bf16 %v71_v46, %v68_v45  ;;  %v5778_v45 = vld [vmem:[#allocation7 + $0x3c4] ss:$36 sps:$4 sm:$0xff]  }
  0x73   :  { %1452 = vmatprep.subr.bf16.mxu0 %v5620_v51  ;;  %1558 = vmatprep.subr.bf16.mxu1 %v5622_v52  ;;  %v5692_v51 = vld [vmem:[#allocation7 + $0x10] ss:$36 sps:$4 sm:$0xff]   ;;  %v5698_v52 = vld [vmem:[#allocation7 + $0x18] ss:$36 sps:$4 sm:$0xff]  }
  0x74   :  { %v5767_v46 = vld [vmem:[#allocation7 + $0x3b8] ss:$36 sps:$4 sm:$0xff]  }
  0x76   :  { %1453 = vmatpush1.bf16.msra.mxu0 %v5624_v53  ;;  %1559 = vmatpush1.bf16.msra.mxu1 %v5625_v54  ;;  %v5697_v53 = vld [vmem:[#allocation7 + $0x5c] ss:$36 sps:$4 sm:$0xff]   ;;  %v5706_v54 = vld [vmem:[#allocation7 + $0x64] ss:$36 sps:$4 sm:$0xff]  }
  0x77   :  { %1454 = vmatprep.subr.bf16.mxu0 %v5626_v55  ;;  %1560 = vmatprep.subr.bf16.mxu1 %v5628_v56  ;;  %v74_v55 = vld [vmem:[#allocation4 + $0x40] sm:$0xff]  ;;  %v77_v56 = vld [vmem:[#allocation4 + $0x58] sm:$0xff] }
  0x7a   :  { %1455 = vmatpush1.bf16.msra.mxu0 %v5630_v57  ;;  %1561 = vmatpush1.bf16.msra.mxu1 %v5631_v58  ;;  %v5695_v57 = vld [vmem:[#allocation7 + $0x58] ss:$36 sps:$4 sm:$0xff]   ;;  %v5704_v58 = vld [vmem:[#allocation7 + $0x60] ss:$36 sps:$4 sm:$0xff]  }
  0x7b   :  { %1456 = vmatprep.subr.bf16.mxu0 %v5632_v59  ;;  %1562 = vmatprep.subr.bf16.mxu1 %v5634_v60  ;;  %v5703_v59 = vld [vmem:[#allocation7 + $0xa4] ss:$36 sps:$4 sm:$0xff]   ;;  %v5712_v60 = vld [vmem:[#allocation7 + $0xac] ss:$36 sps:$4 sm:$0xff]  }
  0x7e   :  { %1457 = vmatpush1.bf16.msra.mxu0 %v5636_v61  ;;  %1563 = vmatpush1.bf16.msra.mxu1 %v5637_v62  ;;  %v6278_v61 = vpack.c.bf16 %v77_v56, %v74_v55  ;;  %v5701_v62 = vld [vmem:[#allocation7 + $0xa0] ss:$36 sps:$4 sm:$0xff]   ;;  %v5790_v55 = vld [vmem:[#allocation7 + $0x454] ss:$36 sps:$4 sm:$0xff]   ;;  %v5779_v56 = vld [vmem:[#allocation7 + $0x448] ss:$36 sps:$4 sm:$0xff]  }
  0x7f   :  { %1458 = vmatprep.subr.bf16.mxu0 %v5638_v63  ;;  %1564 = vmatprep.subr.bf16.mxu1 %v5640_v0  ;;  %v5710_v63 = vld [vmem:[#allocation7 + $0xa8] ss:$36 sps:$4 sm:$0xff]  }
  0x80   :  { %v5709_v0 = vld [vmem:[#allocation7 + $0xec] ss:$36 sps:$4 sm:$0xff]  }
  0x82   :  { %1459 = vmatpush1.bf16.msra.mxu0 %v5642_v1  ;;  %1565 = vmatpush1.bf16.msra.mxu1 %v5643_v2  ;;  %v5718_v1 = vld [vmem:[#allocation7 + $0xf4] ss:$36 sps:$4 sm:$0xff]   ;;  %v5707_v2 = vld [vmem:[#allocation7 + $0xe8] ss:$36 sps:$4 sm:$0xff]  }
  0x83   :  { %1481 = vmatprep.subr.bf16.mxu0 %v5646_v3  ;;  %1587 = vmatprep.subr.bf16.mxu1 %v5649_v6  ;;  %v5716_v3 = vld [vmem:[#allocation7 + $0xf0] ss:$36 sps:$4 sm:$0xff]  }
  0x84   :  { %v5713_v6 = vld [vmem:[#allocation7 + $0x130] ss:$36 sps:$4 sm:$0xff]  }
  0x85   :  { %1461 = vmatmul.mubr.bf16.vlgmr.msra.gmra.mrb[0].mxu0 %v6258_v9  ;;  %1567 = vmatmul.mubr.bf16.vlgmr.msra.gmra.mrb[0].mxu1 %v6258_v9 }
  0x86   :  { %1482 = vmatpush1.bf16.msra.mxu0 %v5644_v7  ;;  %1588 = vmatpush1.bf16.msra.mxu1 %v5647_v8  ;;  %v5722_v7 = vld [vmem:[#allocation7 + $0x138] ss:$36 sps:$4 sm:$0xff]  }
  0x87   :  { %1483 = vmatprep.subr.bf16.mxu0 %v5652_v12  ;;  %1589 = vmatprep.subr.bf16.mxu1 %v5655_v13  ;;  %v5721_v8 = vld [vmem:[#allocation7 + $0x17c] ss:$36 sps:$4 sm:$0xff]   ;;  %v5727_v13 = vld [vmem:[#allocation7 + $0x1c4] ss:$36 sps:$4 sm:$0xff]  }
  0x88   :  { %1470 = vmatprep.mubr.bf16.mxu0 %v6260_v15  ;;  %1576 = vmatprep.mubr.bf16.mxu1 %v6260_v15  ;;  %v5728_v12 = vld [vmem:[#allocation7 + $0x180] ss:$36 sps:$4 sm:$0xff]  }
  0x8a   :  { %1484 = vmatpush1.bf16.msra.mxu0 %v5650_v14  ;;  %1590 = vmatpush1.bf16.msra.mxu1 %v5653_v16  ;;  %v5736_v14 = vld [vmem:[#allocation7 + $0x1cc] ss:$36 sps:$4 sm:$0xff]   ;;  %v5725_v16 = vld [vmem:[#allocation7 + $0x1c0] ss:$36 sps:$4 sm:$0xff]  }
  0x8b   :  { %1485 = vmatprep.subr.bf16.mxu0 %v5658_v17  ;;  %1591 = vmatprep.subr.bf16.mxu1 %v5661_v20  ;;  %v5734_v17 = vld [vmem:[#allocation7 + $0x1c8] ss:$36 sps:$4 sm:$0xff]  }
  0x8c   :  { %v5731_v20 = vld [vmem:[#allocation7 + $0x208] ss:$36 sps:$4 sm:$0xff]  }
  0x8d   :  { %1471 = vmatmul.mubr.bf16.gmra.mrb[4].mxu0 %v6266_v23  ;;  %1577 = vmatmul.mubr.bf16.gmra.mrb[4].mxu1 %v6266_v23 }
  0x8e   :  { %1486 = vmatpush1.bf16.msra.mxu0 %v5656_v21  ;;  %1592 = vmatpush1.bf16.msra.mxu1 %v5659_v22  ;;  %v5740_v21 = vld [vmem:[#allocation7 + $0x210] ss:$36 sps:$4 sm:$0xff]  }
  0x8f   :  { %1487 = vmatprep.subr.bf16.mxu0 %v5664_v24  ;;  %1593 = vmatprep.subr.bf16.mxu1 %v5667_v25  ;;  %v5739_v22 = vld [vmem:[#allocation7 + $0x254] ss:$36 sps:$4 sm:$0xff]   ;;  %v5748_v24 = vld [vmem:[#allocation7 + $0x25c] ss:$36 sps:$4 sm:$0xff]  }
  0x90   :  { %1513 = vmatprep.mubr.bf16.mxu0 %v6168_v30  ;;  %1619 = vmatprep.mubr.bf16.mxu1 %v6168_v30  ;;  %v5737_v25 = vld [vmem:[#allocation7 + $0x250] ss:$36 sps:$4 sm:$0xff]  }
  0x92   :  { %1488 = vmatpush1.bf16.msra.mxu0 %v5662_v26  ;;  %1594 = vmatpush1.bf16.msra.mxu1 %v5665_v27  ;;  %v5746_v26 = vld [vmem:[#allocation7 + $0x258] ss:$36 sps:$4 sm:$0xff]  }
  0x93   :  { %1489 = vmatprep.subr.bf16.mxu0 %v5670_v28  ;;  %1595 = vmatprep.subr.bf16.mxu1 %v5673_v29  ;;  %v5745_v27 = vld [vmem:[#allocation7 + $0x29c] ss:$36 sps:$4 sm:$0xff]   ;;  %v5754_v28 = vld [vmem:[#allocation7 + $0x2a4] ss:$36 sps:$4 sm:$0xff]  }
  0x94   :  { %v5743_v29 = vld [vmem:[#allocation7 + $0x298] ss:$36 sps:$4 sm:$0xff]  }
  0x96   :  { %1490 = vmatpush1.bf16.msra.mxu0 %v5668_v31  ;;  %1596 = vmatpush1.bf16.msra.mxu1 %v5671_v32  ;;  %v5751_v31 = vld [vmem:[#allocation7 + $0x2e4] ss:$36 sps:$4 sm:$0xff]  }
  0x97   :  { %1491 = vmatprep.subr.bf16.mxu0 %v5676_v33  ;;  %1597 = vmatprep.subr.bf16.mxu1 %v5679_v34  ;;  %v5752_v32 = vld [vmem:[#allocation7 + $0x2a0] ss:$36 sps:$4 sm:$0xff]   ;;  %v5760_v33 = vld [vmem:[#allocation7 + $0x2ec] ss:$36 sps:$4 sm:$0xff]  }
  0x98   :  { %v5749_v34 = vld [vmem:[#allocation7 + $0x2e0] ss:$36 sps:$4 sm:$0xff]  }
  0x9a   :  { %1492 = vmatpush1.bf16.msra.mxu0 %v5674_v35  ;;  %1598 = vmatpush1.bf16.msra.mxu1 %v5677_v36  ;;  %v5757_v35 = vld [vmem:[#allocation7 + $0x32c] ss:$36 sps:$4 sm:$0xff]  }
  0x9b   :  { %1493 = vmatprep.subr.bf16.mxu0 %v5682_v37  ;;  %1599 = vmatprep.subr.bf16.mxu1 %v5685_v38  ;;  %v5758_v36 = vld [vmem:[#allocation7 + $0x2e8] ss:$36 sps:$4 sm:$0xff]   ;;  %v5766_v37 = vld [vmem:[#allocation7 + $0x334] ss:$36 sps:$4 sm:$0xff]  }
  0x9c   :  { %v5755_v38 = vld [vmem:[#allocation7 + $0x328] ss:$36 sps:$4 sm:$0xff]  }
  0x9e   :  { %1494 = vmatpush1.bf16.msra.mxu0 %v5680_v39  ;;  %1600 = vmatpush1.bf16.msra.mxu1 %v5683_v40  ;;  %v5763_v39 = vld [vmem:[#allocation7 + $0x374] ss:$36 sps:$4 sm:$0xff]  }
  0x9f   :  { %1495 = vmatprep.subr.bf16.mxu0 %v5688_v41  ;;  %1601 = vmatprep.subr.bf16.mxu1 %v5691_v42  ;;  %v5764_v40 = vld [vmem:[#allocation7 + $0x330] ss:$36 sps:$4 sm:$0xff]   ;;  %v5772_v41 = vld [vmem:[#allocation7 + $0x37c] ss:$36 sps:$4 sm:$0xff]  }
  0xa0   :  { %v5761_v42 = vld [vmem:[#allocation7 + $0x370] ss:$36 sps:$4 sm:$0xff]  }
  0xa2   :  { %1496 = vmatpush1.bf16.msra.mxu0 %v5686_v43  ;;  %1602 = vmatpush1.bf16.msra.mxu1 %v5689_v44  ;;  %v5769_v43 = vld [vmem:[#allocation7 + $0x3bc] ss:$36 sps:$4 sm:$0xff]  }
  0xa3   :  { %1640 = vmatprep.subr.bf16.mxu0 %v5694_v47  ;;  %1746 = vmatprep.subr.bf16.mxu1 %v5700_v48  ;;  %v5770_v44 = vld [vmem:[#allocation7 + $0x378] ss:$36 sps:$4 sm:$0xff]   ;;  %v5775_v47 = vld [vmem:[#allocation7 + $0x404] ss:$36 sps:$4 sm:$0xff]  }
  0xa4   :  { %v5776_v48 = vld [vmem:[#allocation7 + $0x3c0] ss:$36 sps:$4 sm:$0xff]  }
  0xa5   :  { %1514 = vmatmul.mubr.bf16.vlgmr.msra.gmra.mrb[0].mxu0 %v6272_v49  ;;  %1620 = vmatmul.mubr.bf16.vlgmr.msra.gmra.mrb[0].mxu1 %v6272_v49 }
  0xa6   :  { %1523 = vmatprep.mubr.bf16.mxu0 %v6168_v30  ;;  %1629 = vmatprep.mubr.bf16.mxu1 %v6168_v30 }
  0xa7   :  { %1641 = vmatpush1.bf16.msra.mxu0 %v5692_v51  ;;  %1747 = vmatpush1.bf16.msra.mxu1 %v5698_v52  ;;  %v5784_v51 = vld [vmem:[#allocation7 + $0x40c] ss:$36 sps:$4 sm:$0xff]   ;;  %v5773_v52 = vld [vmem:[#allocation7 + $0x400] ss:$36 sps:$4 sm:$0xff]  }
  0xa8   :  { %1642 = vmatprep.subr.bf16.mxu0 %v5697_v53  ;;  %1748 = vmatprep.subr.bf16.mxu1 %v5706_v54  ;;  %v5781_v53 = vld [vmem:[#allocation7 + $0x44c] ss:$36 sps:$4 sm:$0xff]  }
  0xa9   :  { %v5782_v54 = vld [vmem:[#allocation7 + $0x408] ss:$36 sps:$4 sm:$0xff]  }
  0xab   :  { %1643 = vmatpush1.bf16.msra.mxu0 %v5695_v57  ;;  %1749 = vmatpush1.bf16.msra.mxu1 %v5704_v58  ;;  %v5788_v57 = vld [vmem:[#allocation7 + $0x450] ss:$36 sps:$4 sm:$0xff]  }
  0xac   :  { %1644 = vmatprep.subr.bf16.mxu0 %v5703_v59  ;;  %1750 = vmatprep.subr.bf16.mxu1 %v5712_v60  ;;  %v5787_v58 = vld [vmem:[#allocation7 + $0x494] ss:$36 sps:$4 sm:$0xff]   ;;  %v5796_v59 = vld [vmem:[#allocation7 + $0x49c] ss:$36 sps:$4 sm:$0xff]  }
  0xad   :  { %1524 = vmatmul.mubr.bf16.gmra.mrb[4].mxu0 %v6278_v61  ;;  %1630 = vmatmul.mubr.bf16.gmra.mrb[4].mxu1 %v6278_v61  ;;  %v5785_v60 = vld [vmem:[#allocation7 + $0x490] ss:$36 sps:$4 sm:$0xff]  }
  0xae   :  { %1672 = vmatprep.mubr.bf16.mxu0 %v6254_v50  ;;  %1778 = vmatprep.mubr.bf16.mxu1 %v6254_v50 }
  0xaf   :  { %1645 = vmatpush1.bf16.msra.mxu0 %v5701_v62  ;;  %1751 = vmatpush1.bf16.msra.mxu1 %v5710_v63  ;;  %v5794_v62 = vld [vmem:[#allocation7 + $0x498] ss:$36 sps:$4 sm:$0xff]  }
  0xb0   :  { %1646 = vmatprep.subr.bf16.mxu0 %v5709_v0  ;;  %1752 = vmatprep.subr.bf16.mxu1 %v5718_v1  ;;  %v5793_v63 = vld [vmem:[#allocation7 + $0x4dc] ss:$36 sps:$4 sm:$0xff]   ;;  %v5802_v0 = vld [vmem:[#allocation7 + $0x4e4] ss:$36 sps:$4 sm:$0xff]  }
  0xb1   :  { %v5791_v1 = vld [vmem:[#allocation7 + $0x4d8] ss:$36 sps:$4 sm:$0xff]  }
  0xb3   :  { %1647 = vmatpush1.bf16.msra.mxu0 %v5707_v2  ;;  %1753 = vmatpush1.bf16.msra.mxu1 %v5716_v3  ;;  %v5800_v2 = vld [vmem:[#allocation7 + $0x4e0] ss:$36 sps:$4 sm:$0xff]  }
  0xb4   :  { %1648 = vmatprep.subr.bf16.mxu0 %v5715_v4  ;;  %1754 = vmatprep.subr.bf16.mxu1 %v5724_v5  ;;  %v5799_v3 = vld [vmem:[#allocation7 + $0x524] ss:$36 sps:$4 sm:$0xff]   ;;  %v5808_v4 = vld [vmem:[#allocation7 + $0x52c] ss:$36 sps:$4 sm:$0xff]  }
  0xb5   :  { %v5797_v5 = vld [vmem:[#allocation7 + $0x520] ss:$36 sps:$4 sm:$0xff]  }
  0xb7   :  { %1649 = vmatpush1.bf16.msra.mxu0 %v5713_v6  ;;  %1755 = vmatpush1.bf16.msra.mxu1 %v5722_v7  ;;  %v5806_v6 = vld [vmem:[#allocation7 + $0x528] ss:$36 sps:$4 sm:$0xff]  }
  0xb8   :  { %1650 = vmatprep.subr.bf16.mxu0 %v5721_v8  ;;  %1756 = vmatprep.subr.bf16.mxu1 %v5730_v10  ;;  %v5805_v7 = vld [vmem:[#allocation7 + $0x56c] ss:$36 sps:$4 sm:$0xff]   ;;  %v5814_v8 = vld [vmem:[#allocation7 + $0x574] ss:$36 sps:$4 sm:$0xff]  }
  0xb9   :  { %v5803_v10 = vld [vmem:[#allocation7 + $0x568] ss:$36 sps:$4 sm:$0xff]  }
  0xbb   :  { %1651 = vmatpush1.bf16.msra.mxu0 %v5719_v11  ;;  %1757 = vmatpush1.bf16.msra.mxu1 %v5728_v12  ;;  %v5811_v11 = vld [vmem:[#allocation7 + $0x5b4] ss:$36 sps:$4 sm:$0xff]  }
  0xbc   :  { %1652 = vmatprep.subr.bf16.mxu0 %v5727_v13  ;;  %1758 = vmatprep.subr.bf16.mxu1 %v5736_v14  ;;  %v5812_v12 = vld [vmem:[#allocation7 + $0x570] ss:$36 sps:$4 sm:$0xff]   ;;  %v5820_v13 = vld [vmem:[#allocation7 + $0x5bc] ss:$36 sps:$4 sm:$0xff]  }
  0xbd   :  { %v5809_v14 = vld [vmem:[#allocation7 + $0x5b0] ss:$36 sps:$4 sm:$0xff]  }
  0xbf   :  { %1653 = vmatpush1.bf16.msra.mxu0 %v5725_v16  ;;  %1759 = vmatpush1.bf16.msra.mxu1 %v5734_v17  ;;  %v5818_v16 = vld [vmem:[#allocation7 + $0x5b8] ss:$36 sps:$4 sm:$0xff]  }
  0xc0   :  { %1654 = vmatprep.subr.bf16.mxu0 %v5733_v18  ;;  %1760 = vmatprep.subr.bf16.mxu1 %v5742_v19  ;;  %v5817_v17 = vld [vmem:[#allocation7 + $0x5fc] ss:$36 sps:$4 sm:$0xff]   ;;  %v5826_v18 = vld [vmem:[#allocation7 + $0x604] ss:$36 sps:$4 sm:$0xff]  }
  0xc1   :  { %v5815_v19 = vld [vmem:[#allocation7 + $0x5f8] ss:$36 sps:$4 sm:$0xff]  }
  0xc3   :  { %1655 = vmatpush1.bf16.msra.mxu0 %v5731_v20  ;;  %1761 = vmatpush1.bf16.msra.mxu1 %v5740_v21  ;;  %v5824_v20 = vld [vmem:[#allocation7 + $0x600] ss:$36 sps:$4 sm:$0xff]  }
  0xc4   :  { %1656 = vmatprep.subr.bf16.mxu0 %v5739_v22  ;;  %1762 = vmatprep.subr.bf16.mxu1 %v5748_v24  ;;  %v5823_v21 = vld [vmem:[#allocation7 + $0x644] ss:$36 sps:$4 sm:$0xff]   ;;  %v5832_v22 = vld [vmem:[#allocation7 + $0x64c] ss:$36 sps:$4 sm:$0xff]  }
  0xc5   :  { %v5821_v24 = vld [vmem:[#allocation7 + $0x640] ss:$36 sps:$4 sm:$0xff]  }
  0xc7   :  { %1657 = vmatpush1.bf16.msra.mxu0 %v5737_v25  ;;  %1763 = vmatpush1.bf16.msra.mxu1 %v5746_v26  ;;  %v5830_v25 = vld [vmem:[#allocation7 + $0x648] ss:$36 sps:$4 sm:$0xff]  }
  0xc8   :  { %1658 = vmatprep.subr.bf16.mxu0 %v5745_v27  ;;  %1764 = vmatprep.subr.bf16.mxu1 %v5754_v28  ;;  %v5829_v26 = vld [vmem:[#allocation7 + $0x68c] ss:$36 sps:$4 sm:$0xff]   ;;  %v5835_v27 = vld [vmem:[#allocation7 + $0x694] ss:$36 sps:$4 sm:$0xff]  }
  0xc9   :  { %v5827_v28 = vld [vmem:[#allocation7 + $0x688] ss:$36 sps:$4 sm:$0xff]  }
  0xcb   :  { %1659 = vmatpush1.bf16.msra.mxu0 %v5743_v29  ;;  %1765 = vmatpush1.bf16.msra.mxu1 %v5752_v32  ;;  %v5833_v29 = vld [vmem:[#allocation7 + $0x690] ss:$36 sps:$4 sm:$0xff]   ;;  %v5838_v32 = vld [vmem:[#allocation7 + $0x260] ss:$36 sps:$4 sm:$0xff]  }
  0xcc   :  { %1660 = vmatprep.subr.bf16.mxu0 %v5751_v31  ;;  %1766 = vmatprep.subr.bf16.mxu1 %v5760_v33  ;;  %v5836_v31 = vld [vmem:[#allocation7 + $0x4a0] ss:$36 sps:$4 sm:$0xff]  }
  0xcd   :  { %v5839_v33 = vld [vmem:[#allocation7 + $0x20] ss:$36 sps:$4 sm:$0xff]  }
  0xcf   :  { %1661 = vmatpush1.bf16.msra.mxu0 %v5749_v34  ;;  %1767 = vmatpush1.bf16.msra.mxu1 %v5758_v36  ;;  %v5837_v34 = vld [vmem:[#allocation7 + $0x4e8] ss:$36 sps:$4 sm:$0xff]  }
  0xd0   :  { %1662 = vmatprep.subr.bf16.mxu0 %v5757_v35  ;;  %1768 = vmatprep.subr.bf16.mxu1 %v5766_v37  ;;  %v5841_v35 = vld [vmem:[#allocation7 + $0x2a8] ss:$36 sps:$4 sm:$0xff]   ;;  %v5840_v37 = vld [vmem:[#allocation7 + $0x530] ss:$36 sps:$4 sm:$0xff]  }
  0xd1   :  { %v5842_v36 = vld [vmem:[#allocation7 + $0x68] ss:$36 sps:$4 sm:$0xff]  }
  0xd3   :  { %1663 = vmatpush1.bf16.msra.mxu0 %v5755_v38  ;;  %1769 = vmatpush1.bf16.msra.mxu1 %v5764_v40  ;;  %v5844_v38 = vld [vmem:[#allocation7 + $0x2f0] ss:$36 sps:$4 sm:$0xff]   ;;  %v5843_v40 = vld [vmem:[#allocation7 + $0x578] ss:$36 sps:$4 sm:$0xff]  }
  0xd4   :  { %1664 = vmatprep.subr.bf16.mxu0 %v5763_v39  ;;  %1770 = vmatprep.subr.bf16.mxu1 %v5772_v41  ;;  %v5845_v39 = vld [vmem:[#allocation7 + $0xb0] ss:$36 sps:$4 sm:$0xff]   ;;  %v5847_v41 = vld [vmem:[#allocation7 + $0x338] ss:$36 sps:$4 sm:$0xff]  }
  0xd7   :  { %1665 = vmatpush1.bf16.msra.mxu0 %v5761_v42  ;;  %1771 = vmatpush1.bf16.msra.mxu1 %v5770_v44  ;;  %v5848_v42 = vld [vmem:[#allocation7 + $0xf8] ss:$36 sps:$4 sm:$0xff]   ;;  %v5850_v44 = vld [vmem:[#allocation7 + $0x380] ss:$36 sps:$4 sm:$0xff]  }
  0xd8   :  { %1666 = vmatprep.subr.bf16.mxu0 %v5769_v43  ;;  %1772 = vmatprep.subr.bf16.mxu1 %v5778_v45  ;;  %v5846_v43 = vld [vmem:[#allocation7 + $0x5c0] ss:$36 sps:$4 sm:$0xff]  }
  0xd9   :  { %v5851_v45 = vld [vmem:[#allocation7 + $0x140] ss:$36 sps:$4 sm:$0xff]  }
  0xdb   :  { %1667 = vmatpush1.bf16.msra.mxu0 %v5767_v46  ;;  %1773 = vmatpush1.bf16.msra.mxu1 %v5776_v48  ;;  %v5849_v46 = vld [vmem:[#allocation7 + $0x608] ss:$36 sps:$4 sm:$0xff]  }
  0xdc   :  { %1668 = vmatprep.subr.bf16.mxu0 %v5775_v47  ;;  %1774 = vmatprep.subr.bf16.mxu1 %v5784_v51  ;;  %v5853_v47 = vld [vmem:[#allocation7 + $0x3c8] ss:$36 sps:$4 sm:$0xff]   ;;  %v5857_v51 = vld [vmem:[#allocation7 + $0x1d0] ss:$36 sps:$4 sm:$0xff]  }
  0xdd   :  { %v5854_v48 = vld [vmem:[#allocation7 + $0x188] ss:$36 sps:$4 sm:$0xff]  }
  0xdf   :  { %1669 = vmatpush1.bf16.msra.mxu0 %v5773_v52  ;;  %1775 = vmatpush1.bf16.msra.mxu1 %v5782_v54  ;;  %v5855_v52 = vld [vmem:[#allocation7 + $0x698] ss:$36 sps:$4 sm:$0xff]  }
  0xe0   :  { %1670 = vmatprep.subr.bf16.mxu0 %v5781_v53  ;;  %1776 = vmatprep.subr.bf16.mxu1 %v5790_v55  ;;  %v5858_v53 = vld [vmem:[#allocation7 + $0x458] ss:$36 sps:$4 sm:$0xff]   ;;  %v6169_v55 = vmov 0.0  }
  0xe1   :  { %v5859_v54 = vld [vmem:[#allocation7 + $0x218] ss:$36 sps:$4 sm:$0xff]  }
  0xe3   :  { %1671 = vmatpush1.bf16.msra.mxu0 %v5779_v56  ;;  %1777 = vmatpush1.bf16.msra.mxu1 %v5788_v57 }
  0xe4   :  { %1693 = vmatprep.subr.bf16.mxu0 %v5787_v58  ;;  %1799 = vmatprep.subr.bf16.mxu1 %v5796_v59 }
  0xe6   :  { %1673 = vmatmul.mubr.bf16.vlgmr.msra.gmra.mrb[8].mxu0 %v6258_v9  ;;  %1779 = vmatmul.mubr.bf16.vlgmr.msra.gmra.mrb[8].mxu1 %v6258_v9 }
  0xe7   :  { %1694 = vmatpush1.bf16.msra.mxu0 %v5785_v60  ;;  %1800 = vmatpush1.bf16.msra.mxu1 %v5794_v62 }
  0xe8   :  { %1695 = vmatprep.subr.bf16.mxu0 %v5793_v63  ;;  %1801 = vmatprep.subr.bf16.mxu1 %v5802_v0 }
  0xe9   :  { %1682 = vmatprep.mubr.bf16.mxu0 %v6260_v15  ;;  %1788 = vmatprep.mubr.bf16.mxu1 %v6260_v15 }
  0xeb   :  { %1696 = vmatpush1.bf16.msra.mxu0 %v5791_v1  ;;  %1802 = vmatpush1.bf16.msra.mxu1 %v5800_v2 }
  0xec   :  { %1697 = vmatprep.subr.bf16.mxu0 %v5799_v3  ;;  %1803 = vmatprep.subr.bf16.mxu1 %v5808_v4 }
  0xee   :  { %1683 = vmatmul.mubr.bf16.gmra.mrb[12].mxu0 %v6266_v23  ;;  %1789 = vmatmul.mubr.bf16.gmra.mrb[12].mxu1 %v6266_v23 }
  0xef   :  { %1698 = vmatpush1.bf16.msra.mxu0 %v5797_v5  ;;  %1804 = vmatpush1.bf16.msra.mxu1 %v5806_v6 }
  0xf0   :  { %1699 = vmatprep.subr.bf16.mxu0 %v5805_v7  ;;  %1805 = vmatprep.subr.bf16.mxu1 %v5814_v8 }
  0xf1   :  { %1725 = vmatprep.mubr.bf16.mxu0 %v6168_v30  ;;  %1831 = vmatprep.mubr.bf16.mxu1 %v6168_v30 }
  0xf3   :  { %1700 = vmatpush1.bf16.msra.mxu0 %v5803_v10  ;;  %1806 = vmatpush1.bf16.msra.mxu1 %v5812_v12 }
  0xf4   :  { %1701 = vmatprep.subr.bf16.mxu0 %v5811_v11  ;;  %1807 = vmatprep.subr.bf16.mxu1 %v5820_v13 }
  0xf7   :  { %1702 = vmatpush1.bf16.msra.mxu0 %v5809_v14  ;;  %1808 = vmatpush1.bf16.msra.mxu1 %v5818_v16 }
  0xf8   :  { %1703 = vmatprep.subr.bf16.mxu0 %v5817_v17  ;;  %1809 = vmatprep.subr.bf16.mxu1 %v5826_v18 }
  0xfb   :  { %1704 = vmatpush1.bf16.msra.mxu0 %v5815_v19  ;;  %1810 = vmatpush1.bf16.msra.mxu1 %v5824_v20 }
  0xfc   :  { %1705 = vmatprep.subr.bf16.mxu0 %v5823_v21  ;;  %1811 = vmatprep.subr.bf16.mxu1 %v5832_v22 }
  0xff   :  { %1706 = vmatpush1.bf16.msra.mxu0 %v5821_v24  ;;  %1812 = vmatpush1.bf16.msra.mxu1 %v5830_v25 }
 0x100   :  { %1707 = vmatprep.subr.bf16.mxu0 %v5829_v26  ;;  %1813 = vmatprep.subr.bf16.mxu1 %v5835_v27 }
 0x103   :  { %1708 = vmatpush1.bf16.msra.mxu0 %v5827_v28  ;;  %1814 = vmatpush1.bf16.msra.mxu1 %v5833_v29 }
 0x104   :  { %5193 = vmatprep.subr.bf16.mxu1 %v5836_v31  ;;  %5071 = vmatprep.subr.bf16.mxu0 %v5838_v32 }
 0x106   :  { %1726 = vmatmul.mubr.bf16.vlgmr.msra.gmra.mrb[8].mxu0 %v6272_v49  ;;  %1832 = vmatmul.mubr.bf16.vlgmr.msra.gmra.mrb[8].mxu1 %v6272_v49 }
 0x107   :  { %1735 = vmatprep.mubr.bf16.mxu0 %v6168_v30  ;;  %1841 = vmatprep.mubr.bf16.mxu1 %v6168_v30 }
 0x108   :  { %5194 = vmatpush3.bf16.msra.mxu1 %v5836_v31  ;;  %5072 = vmatpush3.bf16.msra.mxu0 %v5839_v33 }
 0x109   :  { %5195 = vmatprep.subr.bf16.mxu1 %v5837_v34  ;;  %5073 = vmatprep.subr.bf16.mxu0 %v5841_v35 }
 0x10c   :  { %5196 = vmatpush3.bf16.msra.mxu1 %v5837_v34  ;;  %5074 = vmatpush3.bf16.msra.mxu0 %v5842_v36 }
 0x10d   :  { %5197 = vmatprep.subr.bf16.mxu1 %v5840_v37  ;;  %5075 = vmatprep.subr.bf16.mxu0 %v5844_v38 }
 0x10e   :  { %1736 = vmatmul.mubr.bf16.gmra.mrb[12].mxu0 %v6278_v61  ;;  %1842 = vmatmul.mubr.bf16.gmra.mrb[12].mxu1 %v6278_v61 }
 0x10f   :  { %1884 = vmatprep.mubr.bf16.mxu0 %v6254_v50  ;;  %5209 = vmatprep.mubr.bf16.mxu1 %v6272_v49  ;;  %v5852_v50 = vld [vmem:[#allocation7 + $0x650] ss:$36 sps:$4 sm:$0xff]  }
 0x110   :  { %5198 = vmatpush3.bf16.msra.mxu1 %v5840_v37  ;;  %5076 = vmatpush3.bf16.msra.mxu0 %v5845_v39  ;;  %v5856_v49 = vld [vmem:[#allocation7 + $0x410] ss:$36 sps:$4 sm:$0xff]  }
 0x111   :  { %5199 = vmatprep.subr.bf16.mxu1 %v5843_v40  ;;  %5077 = vmatprep.subr.bf16.mxu0 %v5847_v41 }
 0x114   :  { %5200 = vmatpush3.bf16.msra.mxu1 %v5843_v40  ;;  %5078 = vmatpush3.bf16.msra.mxu0 %v5848_v42 }
 0x115   :  { %5201 = vmatprep.subr.bf16.mxu1 %v5846_v43  ;;  %5079 = vmatprep.subr.bf16.mxu0 %v5850_v44 }
 0x118   :  { %5202 = vmatpush3.bf16.msra.mxu1 %v5846_v43  ;;  %5080 = vmatpush3.bf16.msra.mxu0 %v5851_v45 }
 0x119   :  { %5203 = vmatprep.subr.bf16.mxu1 %v5849_v46  ;;  %5081 = vmatprep.subr.bf16.mxu0 %v5853_v47 }
 0x11c   :  { %5204 = vmatpush3.bf16.msra.mxu1 %v5849_v46  ;;  %5082 = vmatpush3.bf16.msra.mxu0 %v5854_v48 }
 0x11d   :  { %5205 = vmatprep.subr.bf16.mxu1 %v5852_v50  ;;  %5083 = vmatprep.subr.bf16.mxu0 %v5856_v49 }
 0x120   :  { %5206 = vmatpush3.bf16.msra.mxu1 %v5852_v50  ;;  %5084 = vmatpush3.bf16.msra.mxu0 %v5857_v51 }
 0x121   :  { %5207 = vmatprep.subr.bf16.mxu1 %v5855_v52  ;;  %5085 = vmatprep.subr.bf16.mxu0 %v5858_v53 }
 0x124   :  { %5208 = vmatpush3.bf16.msra.mxu1 %v5855_v52  ;;  %5086 = vmatpush3.bf16.msra.mxu0 %v5859_v54 }
 0x125   :  { %5213 = vmatprep.subr.bf16.mxu1 %v6169_v55  ;;  %5219 = vmatprep.subr.bf16.mxu0 %v6169_v55 }
 0x127   :  { %1885 = vmatmul.mubr.bf16.vlgmr.msra.gmra.mrb[16].mxu0 %v6258_v9  ;;  %5210 = vmatmul.mubr.bf16.vlgmr.msra.gmra.mrb[16].mxu1 %v6278_v61 }
 0x128   :  { %1892 = vmatprep.mubr.bf16.mxu0 %v6260_v15  ;;  %5215 = vmatprep.mubr.msk.bf16.mxu1 %vm6170_vm0, %v6169_v55 }
 0x12f   :  { %1893 = vmatmul.mubr.bf16.gmra.mrb[20].mxu0 %v6266_v23 }
 0x130   :  { %5221 = vmatprep.mubr.msk.bf16.mxu0 %vm6170_vm0, %v6169_v55 }
 0x178   :  { %v1515_v56 = vpop.f32.mrb[0].mxu0  ;;  %v1621_v57 = vpop.f32.mrb[0].mxu1 }
 0x179   :  { %v1517_v58 = vpop.f32.mrb[1].mxu0  ;;  %v1623_v59 = vpop.f32.mrb[1].mxu1 }
 0x17a   :  { %v1519_v60 = vpop.f32.mrb[2].mxu0  ;;  %v1625_v62 = vpop.f32.mrb[2].mxu1 }
 0x17b   :  { %v6310_v9 = vpack.c.bf16 %v1519_v60, %v1515_v56  ;;  %v6312_v61 = vpack.c.bf16 %v1625_v62, %v1621_v57  ;;  %v1521_v15 = vpop.f32.mrb[3].mxu0  ;;  %v1627_v63 = vpop.f32.mrb[3].mxu1 }
 0x17c   :  { %v6314_v0 = vpack.c.bf16 %v1521_v15, %v1517_v58  ;;  %v6316_v1 = vpack.c.bf16 %v1627_v63, %v1623_v59 }
 0x17e   :  { %v2003_v23 = vsel %vm1998_vm1, %v6316_v1, 0 }
 0x17f   :  { %5214 = vmatpush3.bf16.xpose.msra.mxu1 %v2003_v23 }
 0x180   :  { %v1525_v2 = vpop.f32.mrb[4].mxu0  ;;  %v1631_v3 = vpop.f32.mrb[4].mxu1  ;;  %5225 = vmatprep.subr.bf16.mxu1 %v6169_v55 }
 0x181   :  { %v1527_v4 = vpop.f32.mrb[5].mxu0  ;;  %v1633_v5 = vpop.f32.mrb[5].mxu1 }
 0x182   :  { %v1529_v6 = vpop.f32.mrb[6].mxu0  ;;  %v1635_v7 = vpop.f32.mrb[6].mxu1 }
 0x183   :  { %v6321_v8 = vpack.c.bf16 %v1529_v6, %v1525_v2  ;;  %v6323_v10 = vpack.c.bf16 %v1635_v7, %v1631_v3  ;;  %v1531_v11 = vpop.f32.mrb[7].mxu0  ;;  %v1637_v12 = vpop.f32.mrb[7].mxu1  ;;  %v1968_v3 = vlaneseq }
 0x184   :  { %v6325_v13 = vpack.c.bf16 %v1531_v11, %v1527_v4  ;;  %v6327_v14 = vpack.c.bf16 %v1637_v12, %v1633_v5  ;;  %v1971_v5 = vstv %s1970_s3  ;;  %v1977_v11 = vstv %s4949_s16 }
 0x185   :  { %v1969_v4 = vand.u32 127, %v1968_v3  ;;  %v6363_v7 = vshrl.u32 %v1968_v3, 7 }
 0x186   :  { %v2050_v16 = vsel %vm1998_vm1, %v6327_v14, 0  ;;  %5216 = vmatmul.mubr.msk.bf16.vlgmr.msra.gmra.mrb[20].mxu1 %vm1998_vm1, %v6310_v9 }
 0x187   :  { %5220 = vmatpush3.bf16.xpose.msra.mxu0 %v2050_v16  ;;  %5227 = vmatprep.mubr.msk.bf16.mxu1 %vm6170_vm0, %v6169_v55  ;;  %vm1972_vm2 = vcmp.lt.s32.totalorder %v1969_v4, %v1971_v5  ;;  %v6366_v12 = vsub.s32 0, %v6363_v7  ;;  %vm1978_vm4 = vcmp.lt.s32.totalorder %v1969_v4, %v1977_v11 }
 0x188   :  { %5231 = vmatprep.subr.bf16.mxu0 %v6169_v55  ;;  %v4948_v6 = vsel %vm1972_vm2, 1.0, %v6169_v55 }
 0x189   :  { %vm2097_vm3 = vcmp.gt.f32.partialorder %v4948_v6, 0.0 }
 0x18a   :  { %v2099_v16 = vsel %vm2097_vm3, 1, %v6168_v30 }
 0x18e   :  { %5222 = vmatmul.mubr.msk.bf16.vlgmr.msra.gmra.mrb[24].mxu0 %vm1998_vm1, %v6321_v8 }
 0x18f   :  { %5233 = vmatprep.mubr.msk.bf16.mxu0 %vm6170_vm0, %v6169_v55 }
 0x1d9   :  { %v1727_v17 = vpop.f32.mrb[8].mxu0  ;;  %v1833_v18 = vpop.f32.mrb[8].mxu1 }
 0x1da   :  { %v1729_v19 = vpop.f32.mrb[9].mxu0  ;;  %v1835_v20 = vpop.f32.mrb[9].mxu1 }
 0x1db   :  { %v1731_v21 = vpop.f32.mrb[10].mxu0  ;;  %v1837_v22 = vpop.f32.mrb[10].mxu1 }
 0x1dc   :  { %v6340_v24 = vpack.c.bf16 %v1731_v21, %v1727_v17  ;;  %v1733_v25 = vpop.f32.mrb[11].mxu0  ;;  %v6342_v26 = vpack.c.bf16 %v1837_v22, %v1833_v18  ;;  %v1839_v27 = vpop.f32.mrb[11].mxu1  ;;  %v4950_v17 = vsel %vm1978_vm4, 1.0, %v6169_v55  ;;  %v2104_v18 = vrot.slane %v2099_v16, %v6366_v12 }
 0x1dd   :  { %v6344_v28 = vpack.c.bf16 %v1733_v25, %v1729_v19  ;;  %v6346_v29 = vpack.c.bf16 %v1839_v27, %v1835_v20  ;;  %vm2098_vm5 = vcmp.gt.f32.partialorder %v4950_v17, 0.0 }
 0x1de   :  { %5226 = vmatpush3.bf16.msra.mxu1 %v6342_v26  ;;  %vm6371_vm6 = vcmp.eq.s32.totalorder %v2104_v18, 1  ;;  %v2100_v25 = vsel %vm2098_vm5, 1, %v6168_v30 }
 0x1e1   :  { %v1737_v31 = vpop.f32.mrb[12].mxu0  ;;  %v1843_v32 = vpop.f32.mrb[12].mxu1 }
 0x1e2   :  { %v1739_v33 = vpop.f32.mrb[13].mxu0  ;;  %v1845_v34 = vpop.f32.mrb[13].mxu1 }
 0x1e3   :  { %v1741_v35 = vpop.f32.mrb[14].mxu0  ;;  %v1847_v36 = vpop.f32.mrb[14].mxu1 }
 0x1e4   :  { %v6349_v37 = vpack.c.bf16 %v1741_v35, %v1737_v31  ;;  %v1743_v38 = vpop.f32.mrb[15].mxu0  ;;  %v6351_v39 = vpack.c.bf16 %v1847_v36, %v1843_v32  ;;  %v1849_v40 = vpop.f32.mrb[15].mxu1  ;;  %v2108_v35 = vrot.slane %v2100_v25, %v6366_v12  ;;  %v5869_v25 = vld [vmem:[#allocation9 + $0x8] ss:$12 sps:$4 sm:$0xff]  }
 0x1e5   :  { %v6353_v41 = vpack.c.bf16 %v1743_v38, %v1739_v33  ;;  %v6355_v42 = vpack.c.bf16 %v1849_v40, %v1845_v34 }
 0x1e6   :  { %5232 = vmatpush3.bf16.msra.mxu0 %v6351_v39  ;;  %vm6383_vm8 = vcmp.eq.s32.totalorder %v2108_v35, 1 }
 0x1e7   :  { %5237 = vmatprep.subr.bf16.mxu0 %v5869_v25 }
 0x1fa   :  { %v5087_v43 = vpop.f32.mrb[16].mxu0  ;;  %v5211_v44 = vpop.f32.mrb[16].mxu1 }
 0x1fb   :  { %v5088_v45 = vpop.f32.mrb[17].mxu0  ;;  %v1935_v46 = vpop.f32.mrb[17].mxu1 }
 0x1fc   :  { %v5089_v47 = vadd.f32 %v5088_v45, %v5087_v43  ;;  %v5090_v48 = vpop.f32.mrb[18].mxu0  ;;  %v5212_v50 = vpop.f32.mrb[18].mxu1 }
 0x1fd   :  { %v5091_v49 = vpop.f32.mrb[19].mxu0  ;;  %v1938_v51 = vpop.f32.mrb[19].mxu1 }
 0x1fe   :  { %v1936_v52 = vadd.f32 %v5089_v47, %v1935_v46  ;;  %v5092_v53 = vadd.f32 %v5091_v49, %v5090_v48 }
 0x200   :  { %v1939_v54 = vadd.f32 %v5092_v53, %v1938_v51 }
 0x202   :  { %v6358_v56 = vpack.c.bf16 %v1939_v54, %v1936_v52  ;;  %v5093_v57 = vpop.f32.mrb[20].mxu0 }
 0x203   :  { %v5094_v58 = vpop.f32.mrb[21].mxu0 }
 0x204   :  { %v5095_v59 = vadd.f32 %v5094_v58, %v5093_v57  ;;  %v5096_v60 = vpop.f32.mrb[22].mxu0 }
 0x205   :  { %v5097_v62 = vpop.f32.mrb[23].mxu0 }
 0x206   :  { %v1944_v15 = vadd.f32 %v5211_v44, %v5095_v59  ;;  %v5098_v63 = vadd.f32 %v5097_v62, %v5096_v60 }
 0x208   :  { %v1947_v23 = vadd.f32 %v5212_v50, %v5098_v63 }
 0x20a   :  { %v6360_v2 = vpack.c.bf16 %v1947_v23, %v1944_v15 }
 0x259   :  { %v2039_v19 = vpop.f32.mrb[20].mxu1 }
 0x25a   :  { %v2093_v21 = vmul.f32 0.125, %v2039_v19  ;;  %v5217_v22 = vpop.f32.mrb[21].mxu1 }
 0x25b   :  { %v2042_v27 = vpop.f32.mrb[22].mxu1  ;;  %v5862_v22 = vld [vmem:[#allocation9 + $0x4] ss:$12 sps:$4 sm:$0xff]  }
 0x25c   :  { %v2094_v31 = vmul.f32 0.125, %v2042_v27  ;;  %v5218_v32 = vpop.f32.mrb[23].mxu1  ;;  %v2111_v33 = vsel %vm6371_vm6, %v2093_v21, -1e+30  ;;  %2338 = vmatprep.subr.bf16.mxu1 %v5862_v22 }
 0x25d   :  { %v2116_v34 = vsel %vm2115_vm7, %v2111_v33, -inf }
 0x25e   :  { %2117 = vmax.xlane.f32.xlu0 %v2116_v34  ;;  %v2112_v36 = vsel %vm6371_vm6, %v2094_v31, -1e+30 }
 0x25f   :  { %v2119_v40 = vsel %vm2115_vm7, %v2112_v36, -inf }
 0x261   :  { %v2086_v38 = vpop.f32.mrb[24].mxu0 }
 0x262   :  { %v2095_v44 = vmul.f32 0.125, %v2086_v38  ;;  %2120 = vmax.xlane.f32.xlu0 %v2119_v40  ;;  %v5223_v45 = vpop.f32.mrb[25].mxu0  ;;  %v5865_v38 = vld [vmem:[#allocation9 + $0x1c] ss:$12 sps:$4 sm:$0xff]   ;;  %v5863_v40 = vld [vmem:[#allocation9 + $0x18] ss:$12 sps:$4 sm:$0xff]  }
 0x263   :  { %v2089_v46 = vpop.f32.mrb[26].mxu0 }
 0x264   :  { %v2096_v47 = vmul.f32 0.125, %v2089_v46  ;;  %v5224_v48 = vpop.f32.mrb[27].mxu0  ;;  %v2113_v50 = vsel %vm6383_vm8, %v2095_v44, -1e+30  ;;  %v5868_v44 = vld [vmem:[#allocation9 + $0x34] ss:$12 sps:$4 sm:$0xff]  }
 0x265   :  { %v2122_v49 = vsel %vm2115_vm7, %v2113_v50, -inf  ;;  %v5866_v48 = vld [vmem:[#allocation9 + $0x30] ss:$12 sps:$4 sm:$0xff]  }
 0x266   :  { %2123 = vmax.xlane.f32.xlu1 %v2122_v49  ;;  %v2114_v51 = vsel %vm6383_vm8, %v2096_v47, -1e+30  ;;  %v5872_v49 = vld [vmem:[#allocation9 + $0x4c] ss:$12 sps:$4 sm:$0xff]  }
 0x267   :  { %v2125_v52 = vsel %vm2115_vm7, %v2114_v51, -inf }
 0x26a   :  { %2126 = vmax.xlane.f32.xlu1 %v2125_v52  ;;  %v5870_v52 = vld [vmem:[#allocation9 + $0x48] ss:$12 sps:$4 sm:$0xff]  }
 0x2eb   :  { %v2118_v53 = vpop.xlane.xlu0 %2117 }
 0x2ec   :  { %v2128_v54 = vsub.f32 %v2111_v33, %v2118_v53  ;;  %v5874_v53 = vld [vmem:[#allocation9 + $0x38] ss:$12 sps:$4 sm:$0xff]  }
 0x2ee   :  { %v2132_v57 = vmul.f32 1.442695, %v2128_v54  ;;  %v5875_v54 = vld [vmem:[#allocation9 + $0x50] ss:$12 sps:$4 sm:$0xff]  }
 0x2ef   :  { %v2121_v58 = vpop.xlane.xlu0 %2120 }
 0x2f0   :  { %5956 = vpow2.f32 %v2132_v57  ;;  %v2129_v59 = vsub.f32 %v2112_v36, %v2121_v58 }
 0x2f2   :  { %v2134_v60 = vmul.f32 1.442695, %v2129_v59 }
 0x2f3   :  { %v2124_v62 = vpop.xlane.xlu1 %2123 }
 0x2f4   :  { %5958 = vpow2.f32 %v2134_v60  ;;  %v2130_v15 = vsub.f32 %v2113_v50, %v2124_v62 }
 0x2f6   :  { %v2136_v63 = vmul.f32 1.442695, %v2130_v15 }
 0x2f7   :  { %v2127_v23 = vpop.xlane.xlu1 %2126 }
 0x2f8   :  { %5960 = vpow2.f32 %v2136_v63  ;;  %v2131_v3 = vsub.f32 %v2114_v51, %v2127_v23  ;;  %v5873_v51 = vld [vmem:[#allocation9 + $0x20] ss:$12 sps:$4 sm:$0xff]  }
 0x2fa   :  { %v5957_v4 = vpop.eup %5956  ;;  %v2138_v5 = vmul.f32 1.442695, %v2131_v3 }
 0x2fb   :  { %v2140_v6 = vsel %vm2115_vm7, %v5957_v4, 0.0 }
 0x2fc   :  { %5962 = vpow2.f32 %v2138_v5  ;;  %2141 = vadd.xlane.f32.xlu0 %v2140_v6 }
 0x2fe   :  { %v5959_v11 = vpop.eup %5958 }
 0x2ff   :  { %v2143_v16 = vsel %vm2115_vm7, %v5959_v11, 0.0 }
 0x300   :  { %2144 = vadd.xlane.f32.xlu1 %v2143_v16 }
 0x302   :  { %v5961_v17 = vpop.eup %5960 }
 0x303   :  { %v2146_v18 = vsel %vm2115_vm7, %v5961_v17, 0.0 }
 0x304   :  { %2147 = vadd.xlane.f32.xlu0 %v2146_v18 }
 0x306   :  { %v5963_v19 = vpop.eup %5962 }
 0x307   :  { %v2149_v21 = vsel %vm2115_vm7, %v5963_v19, 0.0 }
 0x308   :  { %2150 = vadd.xlane.f32.xlu1 %v2149_v21 }
 0x319   :  { %2509 = vrot.lane.b32.xlu1 %v6327_v14, %s6171_s17 }
 0x31a   :  { %2456 = vrot.lane.b32.xlu0 %v6316_v1, %s6171_s17 }
 0x31d   :  { %2453 = vrot.lane.b32.xlu1 %v6310_v9, %s6171_s17  ;;  %v5860_v9 = vld [vmem:[#allocation9] ss:$12 sps:$4 sm:$0xff]  }
 0x321   :  { %2506 = vrot.lane.b32.xlu1 %v6321_v8, %s6171_s17 }
 0x389   :  { %v2142_v27 = vpop.xlane.xlu0 %2141 }
 0x38a   :  { %5964 = vrcp.f32 %v2142_v27 }
 0x38d   :  { %v2145_v31 = vpop.xlane.xlu1 %2144 }
 0x38e   :  { %5966 = vrcp.f32 %v2145_v31 }
 0x391   :  { %v2148_v32 = vpop.xlane.xlu0 %2147 }
 0x392   :  { %5968 = vrcp.f32 %v2148_v32 }
 0x394   :  { %v5965_v33 = vpop.eup %5964 }
 0x395   :  { %v2151_v14 = vpop.xlane.xlu1 %2150  ;;  %v2156_v34 = vmul.f32 %v5965_v33, %v5957_v4  ;;  %v2457_v4 = vpop.permute.xlu0 %2456 }
 0x396   :  { %5970 = vrcp.f32 %v2151_v14  ;;  %v2462_v16 = vsel %vm1998_vm1, %v2457_v4, 0 }
 0x398   :  { %v5967_v1 = vpop.eup %5966 }
 0x399   :  { %v2157_v35 = vmul.f32 %v5967_v1, %v5959_v11  ;;  %v2510_v59 = vpop.permute.xlu1 %2509 }
 0x39a   :  { %v2515_v63 = vsel %vm1998_vm1, %v2510_v59, 0 }
 0x39b   :  { %v2160_v36 = vpack.c.bf16 %v2157_v35, %v2156_v34 }
 0x39c   :  { %v5969_v8 = vpop.eup %5968 }
 0x39d   :  { %5228 = vmatmul.mubr.msk.bf16.vlgmr.msra.gmra.mrb[24].mxu1 %vm2115_vm7, %v2160_v36  ;;  %v2158_v46 = vmul.f32 %v5969_v8, %v5961_v17  ;;  %v2454_v17 = vpop.permute.xlu1 %2453 }
 0x39e   :  { %2339 = vmatpush1.bf16.msra.mxu1 %v5860_v9  ;;  %2370 = vmatprep.mubr.bf16.mxu1 %v6168_v30 }
 0x39f   :  { %2340 = vmatprep.subr.bf16.mxu1 %v5865_v38 }
 0x3a0   :  { %v5971_v45 = vpop.eup %5970 }
 0x3a1   :  { %v2159_v47 = vmul.f32 %v5971_v45, %v5963_v19  ;;  %v2507_v18 = vpop.permute.xlu1 %2506 }
 0x3a2   :  { %2341 = vmatpush1.bf16.msra.mxu1 %v5863_v40 }
 0x3a3   :  { %v2161_v50 = vpack.c.bf16 %v2159_v47, %v2158_v46  ;;  %2342 = vmatprep.subr.bf16.mxu1 %v5868_v44 }
 0x3a5   :  { %5234 = vmatmul.mubr.msk.bf16.vlgmr.msra.gmra.mrb[28].mxu0 %vm2115_vm7, %v2161_v50 }
 0x3a6   :  { %2343 = vmatpush1.bf16.msra.mxu1 %v5866_v48  ;;  %5238 = vmatpush3.bf16.msra.mxu0 %v5869_v25 }
 0x3a7   :  { %2344 = vmatprep.subr.bf16.mxu1 %v5872_v49  ;;  %5239 = vmatprep.subr.bf16.mxu0 %v5873_v51 }
 0x3aa   :  { %2345 = vmatpush1.bf16.msra.mxu1 %v5870_v52  ;;  %5240 = vmatpush3.bf16.msra.mxu0 %v5873_v51 }
 0x3ab   :  { %5241 = vmatprep.subr.bf16.mxu0 %v5874_v53  ;;  %5255 = vmatprep.subr.bf16.mxu1 %v6169_v55 }
 0x3ae   :  { %5242 = vmatpush3.bf16.msra.mxu0 %v5874_v53 }
 0x3af   :  { %5243 = vmatprep.subr.bf16.mxu0 %v5875_v54 }
 0x3b2   :  { %5244 = vmatpush3.bf16.msra.mxu0 %v5875_v54 }
 0x3b3   :  { %5249 = vmatprep.subr.bf16.mxu0 %v6169_v55 }
 0x470   :  { %v2199_v57 = vpop.f32.mrb[24].mxu1 }
 0x471   :  { %v5229_v58 = vpop.f32.mrb[25].mxu1 }
 0x472   :  { %v2202_v60 = vpop.f32.mrb[26].mxu1 }
 0x473   :  { %v2250_v62 = vpack.c.bf16 %v2202_v60, %v2199_v57  ;;  %v5230_v15 = vpop.f32.mrb[27].mxu1 }
 0x475   :  { %4967 = vmatmul.mubr.msk.bf16.vlgmr.msra.gmra.mrb[28].mxu1 %vm1998_vm1, %v2250_v62  ;;  %5245 = vmatprep.mubr.msk.bf16.mxu0 %vm1998_vm1, %v2250_v62 }
 0x476   :  { %5256 = vmatpush3.bf16.xpose.msra.mxu1 %v2515_v63  ;;  %2380 = vmatprep.mubr.bf16.mxu1 %v6168_v30 }
 0x477   :  { %5267 = vmatprep.subr.bf16.mxu1 %v6169_v55 }
 0x478   :  { %v2243_v23 = vpop.f32.mrb[28].mxu0 }
 0x479   :  { %v5235_v3 = vpop.f32.mrb[29].mxu0 }
 0x47a   :  { %v2246_v5 = vpop.f32.mrb[30].mxu0 }
 0x47b   :  { %v2251_v6 = vpack.c.bf16 %v2246_v5, %v2243_v23  ;;  %v5236_v11 = vpop.f32.mrb[31].mxu0 }
 0x47d   :  { %4968 = vmatmul.mubr.msk.bf16.gmra.mrb[32].mxu1 %vm1998_vm1, %v2251_v6  ;;  %5246 = vmatmul.mubr.msk.bf16.vlgmr.msra.gmra.mrb[32].mxu0 %vm1998_vm1, %v2251_v6 }
 0x47e   :  { %5250 = vmatpush3.bf16.xpose.msra.mxu0 %v2462_v16  ;;  %5251 = vmatprep.mubr.msk.bf16.mxu0 %vm6170_vm0, %v6169_v55 }
 0x47f   :  { %5257 = vmatprep.mubr.msk.bf16.mxu1 %vm6170_vm0, %v6169_v55  ;;  %5261 = vmatprep.subr.bf16.mxu0 %v6169_v55 }
 0x485   :  { %5252 = vmatmul.mubr.msk.bf16.vlgmr.msra.gmra.mrb[36].mxu0 %vm1998_vm1, %v2454_v17  ;;  %5258 = vmatmul.mubr.msk.bf16.vlgmr.msra.gmra.mrb[36].mxu1 %vm1998_vm1, %v2507_v18  ;;  %v5879_v18 = vld [vmem:[#allocation9 + $0x68] ss:$12 sps:$4 sm:$0xff]  }
 0x486   :  { %5263 = vmatprep.mubr.msk.bf16.mxu0 %vm6170_vm0, %v6169_v55  ;;  %5269 = vmatprep.mubr.msk.bf16.mxu1 %vm6170_vm0, %v6169_v55 }
 0x558   :  { %v2498_v19 = vpop.f32.mrb[36].mxu0  ;;  %v2551_v21 = vpop.f32.mrb[36].mxu1 }
 0x559   :  { %v2558_v22 = vmul.f32 0.125, %v2498_v19  ;;  %v2560_v25 = vmul.f32 0.125, %v2551_v21  ;;  %v5253_v27 = vpop.f32.mrb[37].mxu0  ;;  %v5259_v31 = vpop.f32.mrb[37].mxu1 }
 0x55a   :  { %v2501_v32 = vpop.f32.mrb[38].mxu0  ;;  %v2554_v14 = vpop.f32.mrb[38].mxu1 }
 0x55b   :  { %v2559_v33 = vmul.f32 0.125, %v2501_v32  ;;  %v5254_v1 = vpop.f32.mrb[39].mxu0  ;;  %v5260_v34 = vpop.f32.mrb[39].mxu1  ;;  %v2562_v35 = vsel %vm6371_vm6, %v2558_v22, -1e+30  ;;  %v2561_v36 = vmul.f32 0.125, %v2554_v14 }
 0x55c   :  { %v2566_v9 = vsel %vm2115_vm7, %v2562_v35, -inf  ;;  %v2564_v8 = vsel %vm6383_vm8, %v2560_v25, -1e+30  ;;  %v5878_v22 = vld [vmem:[#allocation9 + $0x64] ss:$12 sps:$4 sm:$0xff]  }
 0x55d   :  { %2567 = vmax.xlane.f32.xlu0 %v2566_v9  ;;  %v2563_v38 = vsel %vm6371_vm6, %v2559_v33, -1e+30  ;;  %v2572_v44 = vsel %vm2115_vm7, %v2564_v8, -inf  ;;  %v2565_v45 = vsel %vm6383_vm8, %v2561_v36, -1e+30 }
 0x55e   :  { %v2569_v40 = vsel %vm2115_vm7, %v2563_v38, -inf  ;;  %v2575_v46 = vsel %vm2115_vm7, %v2565_v45, -inf  ;;  %v5883_v14 = vld [vmem:[#allocation9 + $0x80] ss:$12 sps:$4 sm:$0xff]   ;;  %v5887_v9 = vld [vmem:[#allocation9 + $0x98] ss:$12 sps:$4 sm:$0xff]  }
 0x55f   :  { %2570 = vmax.xlane.f32.xlu1 %v2569_v40  ;;  %v5876_v36 = vld [vmem:[#allocation9 + $0x60] ss:$12 sps:$4 sm:$0xff]   ;;  %v5880_v40 = vld [vmem:[#allocation9 + $0x78] ss:$12 sps:$4 sm:$0xff]  }
 0x561   :  { %2573 = vmax.xlane.f32.xlu0 %v2572_v44  ;;  %v5886_v44 = vld [vmem:[#allocation9 + $0x94] ss:$12 sps:$4 sm:$0xff]  }
 0x565   :  { %2576 = vmax.xlane.f32.xlu0 %v2575_v46  ;;  %v5890_v46 = vld [vmem:[#allocation9 + $0xac] ss:$12 sps:$4 sm:$0xff]  }
 0x5ea   :  { %v2568_v47 = vpop.xlane.xlu0 %2567 }
 0x5eb   :  { %v2578_v48 = vsub.f32 %v2562_v35, %v2568_v47  ;;  %v5888_v47 = vld [vmem:[#allocation9 + $0xa8] ss:$12 sps:$4 sm:$0xff]  }
 0x5ec   :  { %v2571_v50 = vpop.xlane.xlu1 %2570 }
 0x5ed   :  { %v2582_v49 = vmul.f32 1.442695, %v2578_v48  ;;  %v2579_v51 = vsub.f32 %v2563_v38, %v2571_v50  ;;  %v5891_v48 = vld [vmem:[#allocation9 + $0xb0] ss:$12 sps:$4 sm:$0xff]  }
 0x5ee   :  { %v2574_v52 = vpop.xlane.xlu0 %2573 }
 0x5ef   :  { %5972 = vpow2.f32 %v2582_v49  ;;  %v2584_v53 = vmul.f32 1.442695, %v2579_v51  ;;  %v2580_v54 = vsub.f32 %v2564_v8, %v2574_v52  ;;  %v5882_v8 = vld [vmem:[#allocation9 + $0x7c] ss:$12 sps:$4 sm:$0xff]  }
 0x5f1   :  { %5974 = vpow2.f32 %v2584_v53  ;;  %v2586_v57 = vmul.f32 1.442695, %v2580_v54 }
 0x5f2   :  { %v2577_v58 = vpop.xlane.xlu0 %2576 }
 0x5f3   :  { %5976 = vpow2.f32 %v2586_v57  ;;  %v2581_v59 = vsub.f32 %v2565_v45, %v2577_v58  ;;  %v5884_v45 = vld [vmem:[#allocation9 + $0x90] ss:$12 sps:$4 sm:$0xff]  }
 0x5f5   :  { %v2588_v60 = vmul.f32 1.442695, %v2581_v59 }
 0x5f7   :  { %5978 = vpow2.f32 %v2588_v60 }
 0x5f9   :  { %v5973_v62 = vpop.eup %5972 }
 0x5fa   :  { %v2590_v15 = vsel %vm2115_vm7, %v5973_v62, 0.0 }
 0x5fb   :  { %v5975_v63 = vpop.eup %5974  ;;  %2591 = vadd.xlane.f32.xlu0 %v2590_v15  ;;  %v2961_v15 = vsel %vm1998_vm1, %v6349_v37, 0 }
 0x5fc   :  { %v2593_v23 = vsel %vm2115_vm7, %v5975_v63, 0.0 }
 0x5fd   :  { %v5977_v3 = vpop.eup %5976  ;;  %2594 = vadd.xlane.f32.xlu1 %v2593_v23 }
 0x5fe   :  { %v2596_v4 = vsel %vm2115_vm7, %v5977_v3, 0.0 }
 0x5ff   :  { %2597 = vadd.xlane.f32.xlu0 %v2596_v4 }
 0x601   :  { %v5979_v5 = vpop.eup %5978 }
 0x602   :  { %v2599_v6 = vsel %vm2115_vm7, %v5979_v5, 0.0 }
 0x603   :  { %2600 = vadd.xlane.f32.xlu1 %v2599_v6 }
 0x614   :  { %2661 = vrot.lane.b32.xlu1 %v6351_v39, %s6171_s17 }
 0x615   :  { %2613 = vrot.lane.b32.xlu0 %v6342_v26, %s6171_s17 }
 0x688   :  { %v2592_v11 = vpop.xlane.xlu0 %2591 }
 0x689   :  { %5980 = vrcp.f32 %v2592_v11 }
 0x68a   :  { %v2595_v16 = vpop.xlane.xlu1 %2594 }
 0x68b   :  { %5982 = vrcp.f32 %v2595_v16 }
 0x68c   :  { %v2598_v17 = vpop.xlane.xlu0 %2597 }
 0x68d   :  { %5984 = vrcp.f32 %v2598_v17 }
 0x690   :  { %v2614_v19 = vpop.permute.xlu0 %2613  ;;  %v2601_v21 = vpop.xlane.xlu1 %2600 }
 0x691   :  { %5986 = vrcp.f32 %v2601_v21  ;;  %5262 = vmatpush3.bf16.msra.mxu0 %v2614_v19 }
 0x692   :  { %5273 = vmatprep.subr.bf16.mxu0 %v5879_v18 }
 0x693   :  { %v5981_v25 = vpop.eup %5980 }
 0x694   :  { %v2662_v27 = vpop.permute.xlu1 %2661  ;;  %v2606_v39 = vmul.f32 %v5981_v25, %v5973_v62  ;;  %v2914_v62 = vsel %vm1998_vm1, %v6340_v24, 0 }
 0x695   :  { %v5983_v31 = vpop.eup %5982  ;;  %5268 = vmatpush3.bf16.msra.mxu1 %v2662_v27 }
 0x696   :  { %v2607_v32 = vmul.f32 %v5983_v31, %v5975_v63  ;;  %2796 = vmatprep.subr.bf16.mxu1 %v5878_v22 }
 0x697   :  { %v5985_v33 = vpop.eup %5984 }
 0x698   :  { %v2610_v26 = vpack.c.bf16 %v2607_v32, %v2606_v39  ;;  %v2608_v34 = vmul.f32 %v5985_v33, %v5977_v3 }
 0x69a   :  { %5264 = vmatmul.mubr.msk.bf16.vlgmr.msra.gmra.mrb[40].mxu0 %vm2115_vm7, %v2610_v26 }
 0x69b   :  { %v5987_v1 = vpop.eup %5986  ;;  %5274 = vmatpush3.bf16.msra.mxu0 %v5879_v18 }
 0x69c   :  { %v2609_v35 = vmul.f32 %v5987_v1, %v5979_v5  ;;  %5275 = vmatprep.subr.bf16.mxu0 %v5883_v14 }
 0x69e   :  { %v2611_v38 = vpack.c.bf16 %v2609_v35, %v2608_v34 }
 0x69f   :  { %5276 = vmatpush3.bf16.msra.mxu0 %v5883_v14 }
 0x6a0   :  { %5270 = vmatmul.mubr.msk.bf16.vlgmr.msra.gmra.mrb[40].mxu1 %vm2115_vm7, %v2611_v38  ;;  %5277 = vmatprep.subr.bf16.mxu0 %v5887_v9 }
 0x6a1   :  { %2797 = vmatpush1.bf16.msra.mxu1 %v5876_v36  ;;  %2828 = vmatprep.mubr.bf16.mxu1 %v6168_v30 }
 0x6a2   :  { %2798 = vmatprep.subr.bf16.mxu1 %v5882_v8 }
 0x6a3   :  { %5278 = vmatpush3.bf16.msra.mxu0 %v5887_v9 }
 0x6a4   :  { %5279 = vmatprep.subr.bf16.mxu0 %v5891_v48 }
 0x6a5   :  { %2799 = vmatpush1.bf16.msra.mxu1 %v5880_v40 }
 0x6a6   :  { %2800 = vmatprep.subr.bf16.mxu1 %v5886_v44 }
 0x6a7   :  { %5280 = vmatpush3.bf16.msra.mxu0 %v5891_v48 }
 0x6a8   :  { %5285 = vmatprep.subr.bf16.mxu0 %v6169_v55 }
 0x6a9   :  { %2801 = vmatpush1.bf16.msra.mxu1 %v5884_v45 }
 0x6aa   :  { %2802 = vmatprep.subr.bf16.mxu1 %v5890_v46 }
 0x6ad   :  { %2803 = vmatpush1.bf16.msra.mxu1 %v5888_v47 }
 0x6ae   :  { %5297 = vmatprep.subr.bf16.mxu1 %v6169_v55 }
 0x76d   :  { %v2653_v50 = vpop.f32.mrb[40].mxu0 }
 0x76e   :  { %v5265_v49 = vpop.f32.mrb[41].mxu0 }
 0x76f   :  { %v2656_v51 = vpop.f32.mrb[42].mxu0 }
 0x770   :  { %v2708_v52 = vpack.c.bf16 %v2656_v51, %v2653_v50  ;;  %v5266_v53 = vpop.f32.mrb[43].mxu0 }
 0x772   :  { %4987 = vmatmul.mubr.msk.bf16.vlgmr.msra.gmra.mrb[28].mxu1 %vm1998_vm1, %v2708_v52  ;;  %5281 = vmatprep.mubr.msk.bf16.mxu0 %vm1998_vm1, %v2708_v52 }
 0x773   :  { %5298 = vmatpush3.bf16.msra.mxu1 %v6346_v29  ;;  %v2701_v54 = vpop.f32.mrb[40].mxu1  ;;  %2838 = vmatprep.mubr.bf16.mxu1 %v6168_v30 }
 0x774   :  { %v5271_v57 = vpop.f32.mrb[41].mxu1 }
 0x775   :  { %v2704_v58 = vpop.f32.mrb[42].mxu1  ;;  %v5894_v57 = vld [vmem:[#allocation9 + $0xc4] ss:$12 sps:$4 sm:$0xff]  }
 0x776   :  { %v2709_v59 = vpack.c.bf16 %v2704_v58, %v2701_v54  ;;  %v5272_v60 = vpop.f32.mrb[43].mxu1  ;;  %3234 = vmatprep.subr.bf16.mxu1 %v5894_v57  ;;  %v5901_v58 = vld [vmem:[#allocation9 + $0xc8] ss:$12 sps:$4 sm:$0xff]  }
 0x778   :  { %5282 = vmatmul.mubr.msk.bf16.vlgmr.msra.gmra.mrb[32].mxu0 %vm1998_vm1, %v2709_v59 }
 0x779   :  { %5286 = vmatpush3.bf16.xpose.msra.mxu0 %v2914_v62  ;;  %5287 = vmatprep.mubr.msk.bf16.mxu0 %vm6170_vm0, %v6169_v55 }
 0x77a   :  { %4988 = vmatmul.mubr.msk.bf16.gmra.mrb[32].mxu1 %vm1998_vm1, %v2709_v59  ;;  %5291 = vmatprep.subr.bf16.mxu0 %v6169_v55 }
 0x77b   :  { %5299 = vmatprep.mubr.msk.bf16.mxu1 %vm6170_vm0, %v6169_v55 }
 0x780   :  { %5288 = vmatmul.mubr.msk.bf16.vlgmr.msra.gmra.mrb[44].mxu0 %vm1998_vm1, %v6314_v0 }
 0x781   :  { %5292 = vmatpush3.bf16.xpose.msra.mxu0 %v2961_v15  ;;  %5293 = vmatprep.mubr.msk.bf16.mxu0 %vm6170_vm0, %v6169_v55 }
 0x782   :  { %5303 = vmatprep.subr.bf16.mxu0 %v6169_v55 }
 0x788   :  { %5294 = vmatmul.mubr.msk.bf16.vlgmr.msra.gmra.mrb[48].mxu0 %vm1998_vm1, %v6325_v13 }
 0x789   :  { %5304 = vmatpush3.bf16.msra.mxu0 %v6355_v42  ;;  %5305 = vmatprep.mubr.msk.bf16.mxu0 %vm6170_vm0, %v6169_v55 }
 0x78a   :  { %5309 = vmatprep.subr.bf16.mxu0 %v5901_v58 }
 0x853   :  { %v2950_v63 = vpop.f32.mrb[44].mxu0 }
 0x854   :  { %v3004_v23 = vmul.f32 0.125, %v2950_v63  ;;  %v5289_v3 = vpop.f32.mrb[45].mxu0 }
 0x855   :  { %v2953_v4 = vpop.f32.mrb[46].mxu0 }
 0x856   :  { %v3005_v5 = vmul.f32 0.125, %v2953_v4  ;;  %v5290_v6 = vpop.f32.mrb[47].mxu0  ;;  %v3008_v11 = vsel %vm6371_vm6, %v3004_v23, -1e+30  ;;  %v5897_v4 = vld [vmem:[#allocation9 + $0xdc] ss:$12 sps:$4 sm:$0xff]  }
 0x857   :  { %v3012_v16 = vsel %vm2115_vm7, %v3008_v11, -inf  ;;  %v5900_v6 = vld [vmem:[#allocation9 + $0xf4] ss:$12 sps:$4 sm:$0xff]  }
 0x858   :  { %3013 = vmax.xlane.f32.xlu1 %v3012_v16  ;;  %v3009_v17 = vsel %vm6371_vm6, %v3005_v5, -1e+30  ;;  %v5895_v5 = vld [vmem:[#allocation9 + $0xd8] ss:$12 sps:$4 sm:$0xff]  }
 0x859   :  { %v3015_v18 = vsel %vm2115_vm7, %v3009_v17, -inf }
 0x85a   :  { %3016 = vmax.xlane.f32.xlu0 %v3015_v18  ;;  %v5898_v18 = vld [vmem:[#allocation9 + $0xf0] ss:$12 sps:$4 sm:$0xff]  }
 0x85b   :  { %v2997_v19 = vpop.f32.mrb[48].mxu0 }
 0x85c   :  { %v3006_v21 = vmul.f32 0.125, %v2997_v19  ;;  %v5295_v22 = vpop.f32.mrb[49].mxu0 }
 0x85d   :  { %v3000_v25 = vpop.f32.mrb[50].mxu0  ;;  %v5905_v22 = vld [vmem:[#allocation9 + $0xe0] ss:$12 sps:$4 sm:$0xff]  }
 0x85e   :  { %v3007_v27 = vmul.f32 0.125, %v3000_v25  ;;  %v5296_v31 = vpop.f32.mrb[51].mxu0  ;;  %v3010_v39 = vsel %vm6383_vm8, %v3006_v21, -1e+30  ;;  %v5904_v21 = vld [vmem:[#allocation9 + $0x10c] ss:$12 sps:$4 sm:$0xff]  }
 0x85f   :  { %v3018_v32 = vsel %vm2115_vm7, %v3010_v39, -inf  ;;  %v5902_v25 = vld [vmem:[#allocation9 + $0x108] ss:$12 sps:$4 sm:$0xff]   ;;  %v5907_v31 = vld [vmem:[#allocation9 + $0x110] ss:$12 sps:$4 sm:$0xff]  }
 0x860   :  { %3019 = vmax.xlane.f32.xlu0 %v3018_v32  ;;  %v3011_v26 = vsel %vm6383_vm8, %v3007_v27, -1e+30  ;;  %v5906_v27 = vld [vmem:[#allocation9 + $0xf8] ss:$12 sps:$4 sm:$0xff]  }
 0x861   :  { %v3021_v14 = vsel %vm2115_vm7, %v3011_v26, -inf }
 0x862   :  { %3022 = vmax.xlane.f32.xlu1 %v3021_v14 }
 0x8e5   :  { %v3014_v33 = vpop.xlane.xlu1 %3013 }
 0x8e6   :  { %v3024_v1 = vsub.f32 %v3008_v11, %v3014_v33 }
 0x8e7   :  { %v3017_v34 = vpop.xlane.xlu0 %3016 }
 0x8e8   :  { %v3028_v35 = vmul.f32 1.442695, %v3024_v1  ;;  %v3025_v9 = vsub.f32 %v3009_v17, %v3017_v34 }
 0x8ea   :  { %5988 = vpow2.f32 %v3028_v35  ;;  %v3030_v36 = vmul.f32 1.442695, %v3025_v9 }
 0x8ec   :  { %5990 = vpow2.f32 %v3030_v36 }
 0x8ed   :  { %v3020_v38 = vpop.xlane.xlu0 %3019 }
 0x8ee   :  { %v3026_v8 = vsub.f32 %v3010_v39, %v3020_v38 }
 0x8ef   :  { %v3023_v40 = vpop.xlane.xlu1 %3022 }
 0x8f0   :  { %v3032_v44 = vmul.f32 1.442695, %v3026_v8  ;;  %v3027_v45 = vsub.f32 %v3011_v26, %v3023_v40 }
 0x8f2   :  { %5992 = vpow2.f32 %v3032_v44  ;;  %v3034_v46 = vmul.f32 1.442695, %v3027_v45 }
 0x8f4   :  { %v5989_v47 = vpop.eup %5988  ;;  %5994 = vpow2.f32 %v3034_v46 }
 0x8f5   :  { %v3036_v48 = vsel %vm2115_vm7, %v5989_v47, 0.0 }
 0x8f6   :  { %v5991_v50 = vpop.eup %5990  ;;  %3037 = vadd.xlane.f32.xlu0 %v3036_v48 }
 0x8f7   :  { %v3039_v49 = vsel %vm2115_vm7, %v5991_v50, 0.0 }
 0x8f8   :  { %3040 = vadd.xlane.f32.xlu1 %v3039_v49 }
 0x8fc   :  { %v5993_v51 = vpop.eup %5992 }
 0x8fd   :  { %v3042_v52 = vsel %vm2115_vm7, %v5993_v51, 0.0 }
 0x8fe   :  { %v5995_v53 = vpop.eup %5994  ;;  %3043 = vadd.xlane.f32.xlu0 %v3042_v52 }
 0x8ff   :  { %v3045_v54 = vsel %vm2115_vm7, %v5995_v53, 0.0 }
 0x900   :  { %3046 = vadd.xlane.f32.xlu1 %v3045_v54 }
 0x911   :  { %3405 = vrot.lane.b32.xlu1 %v6349_v37, %s6171_s17 }
 0x914   :  { %3352 = vrot.lane.b32.xlu0 %v6340_v24, %s6171_s17 }
 0x915   :  { %3349 = vrot.lane.b32.xlu1 %v6314_v0, %s6171_s17  ;;  %v5892_v0 = vld [vmem:[#allocation9 + $0xc0] ss:$12 sps:$4 sm:$0xff]  }
 0x919   :  { %3402 = vrot.lane.b32.xlu1 %v6325_v13, %s6171_s17 }
 0x983   :  { %v3038_v59 = vpop.xlane.xlu0 %3037 }
 0x984   :  { %5996 = vrcp.f32 %v3038_v59 }
 0x985   :  { %v3041_v60 = vpop.xlane.xlu1 %3040 }
 0x986   :  { %5998 = vrcp.f32 %v3041_v60 }
 0x98b   :  { %v3044_v62 = vpop.xlane.xlu0 %3043 }
 0x98c   :  { %6000 = vrcp.f32 %v3044_v62 }
 0x98d   :  { %v3047_v37 = vpop.xlane.xlu1 %3046 }
 0x98e   :  { %v5997_v15 = vpop.eup %5996  ;;  %6002 = vrcp.f32 %v3047_v37 }
 0x98f   :  { %v3052_v63 = vmul.f32 %v5997_v15, %v5989_v47  ;;  %v3353_v36 = vpop.permute.xlu0 %3352 }
 0x990   :  { %v5999_v24 = vpop.eup %5998  ;;  %v3358_v44 = vsel %vm1998_vm1, %v3353_v36, 0  ;;  %v5911_v36 = vld [vmem:[#allocation9 + $0x128] ss:$12 sps:$4 sm:$0xff]  }
 0x991   :  { %v3053_v23 = vmul.f32 %v5999_v24, %v5991_v50  ;;  %v3406_v26 = vpop.permute.xlu1 %3405 }
 0x992   :  { %v3411_v34 = vsel %vm1998_vm1, %v3406_v26, 0 }
 0x993   :  { %v3056_v3 = vpack.c.bf16 %v3053_v23, %v3052_v63 }
 0x995   :  { %5300 = vmatmul.mubr.msk.bf16.vlgmr.msra.gmra.mrb[44].mxu1 %vm2115_vm7, %v3056_v3  ;;  %v3350_v45 = vpop.permute.xlu1 %3349 }
 0x996   :  { %v6001_v13 = vpop.eup %6000  ;;  %3235 = vmatpush1.bf16.msra.mxu1 %v5892_v0  ;;  %3266 = vmatprep.mubr.bf16.mxu1 %v6168_v30 }
 0x997   :  { %3236 = vmatprep.subr.bf16.mxu1 %v5897_v4  ;;  %v3054_v16 = vmul.f32 %v6001_v13, %v5993_v51 }
 0x998   :  { %v6003_v11 = vpop.eup %6002 }
 0x999   :  { %v3055_v17 = vmul.f32 %v6003_v11, %v5995_v53  ;;  %v3403_v46 = vpop.permute.xlu1 %3402 }
 0x99a   :  { %3237 = vmatpush1.bf16.msra.mxu1 %v5895_v5 }
 0x99b   :  { %v3057_v19 = vpack.c.bf16 %v3055_v17, %v3054_v16  ;;  %3238 = vmatprep.subr.bf16.mxu1 %v5900_v6 }
 0x99d   :  { %5306 = vmatmul.mubr.msk.bf16.vlgmr.msra.gmra.mrb[52].mxu0 %vm2115_vm7, %v3057_v19 }
 0x99e   :  { %3239 = vmatpush1.bf16.msra.mxu1 %v5898_v18  ;;  %5310 = vmatpush3.bf16.msra.mxu0 %v5901_v58 }
 0x99f   :  { %3240 = vmatprep.subr.bf16.mxu1 %v5904_v21  ;;  %5311 = vmatprep.subr.bf16.mxu0 %v5905_v22 }
 0x9a2   :  { %3241 = vmatpush1.bf16.msra.mxu1 %v5902_v25  ;;  %5312 = vmatpush3.bf16.msra.mxu0 %v5905_v22 }
 0x9a3   :  { %5313 = vmatprep.subr.bf16.mxu0 %v5906_v27  ;;  %5327 = vmatprep.subr.bf16.mxu1 %v6169_v55 }
 0x9a6   :  { %5314 = vmatpush3.bf16.msra.mxu0 %v5906_v27 }
 0x9a7   :  { %5315 = vmatprep.subr.bf16.mxu0 %v5907_v31 }
 0x9aa   :  { %5316 = vmatpush3.bf16.msra.mxu0 %v5907_v31 }
 0x9ab   :  { %5321 = vmatprep.subr.bf16.mxu0 %v6169_v55 }
 0xa68   :  { %v3095_v39 = vpop.f32.mrb[44].mxu1 }
 0xa69   :  { %v5301_v32 = vpop.f32.mrb[45].mxu1 }
 0xa6a   :  { %v3098_v14 = vpop.f32.mrb[46].mxu1 }
 0xa6b   :  { %v3146_v33 = vpack.c.bf16 %v3098_v14, %v3095_v39  ;;  %v5302_v1 = vpop.f32.mrb[47].mxu1 }
 0xa6d   :  { %5007 = vmatmul.mubr.msk.bf16.vlgmr.msra.gmra.mrb[28].mxu1 %vm1998_vm1, %v3146_v33  ;;  %5317 = vmatprep.mubr.msk.bf16.mxu0 %vm1998_vm1, %v3146_v33 }
 0xa6e   :  { %5328 = vmatpush3.bf16.xpose.msra.mxu1 %v3411_v34  ;;  %3276 = vmatprep.mubr.bf16.mxu1 %v6168_v30 }
 0xa6f   :  { %5339 = vmatprep.subr.bf16.mxu1 %v6169_v55 }
 0xa70   :  { %v3139_v35 = vpop.f32.mrb[52].mxu0 }
 0xa71   :  { %v5307_v9 = vpop.f32.mrb[53].mxu0 }
 0xa72   :  { %v3142_v38 = vpop.f32.mrb[54].mxu0 }
 0xa73   :  { %v3147_v8 = vpack.c.bf16 %v3142_v38, %v3139_v35  ;;  %v5308_v40 = vpop.f32.mrb[55].mxu0 }
 0xa74   :  { %v5910_v40 = vld [vmem:[#allocation9 + $0x124] ss:$12 sps:$4 sm:$0xff]  }
 0xa75   :  { %5008 = vmatmul.mubr.msk.bf16.gmra.mrb[32].mxu1 %vm1998_vm1, %v3147_v8  ;;  %5318 = vmatmul.mubr.msk.bf16.vlgmr.msra.gmra.mrb[32].mxu0 %vm1998_vm1, %v3147_v8 }
 0xa76   :  { %5322 = vmatpush3.bf16.xpose.msra.mxu0 %v3358_v44  ;;  %5323 = vmatprep.mubr.msk.bf16.mxu0 %vm6170_vm0, %v6169_v55 }
 0xa77   :  { %5329 = vmatprep.mubr.msk.bf16.mxu1 %vm6170_vm0, %v6169_v55  ;;  %5333 = vmatprep.subr.bf16.mxu0 %v6169_v55 }
 0xa7d   :  { %5324 = vmatmul.mubr.msk.bf16.vlgmr.msra.gmra.mrb[56].mxu0 %vm1998_vm1, %v3350_v45  ;;  %5330 = vmatmul.mubr.msk.bf16.vlgmr.msra.gmra.mrb[48].mxu1 %vm1998_vm1, %v3403_v46 }
 0xa7e   :  { %5335 = vmatprep.mubr.msk.bf16.mxu0 %vm6170_vm0, %v6169_v55  ;;  %5341 = vmatprep.mubr.msk.bf16.mxu1 %vm6170_vm0, %v6169_v55 }
 0xb50   :  { %v3394_v47 = vpop.f32.mrb[56].mxu0  ;;  %v3447_v48 = vpop.f32.mrb[48].mxu1 }
 0xb51   :  { %v3454_v50 = vmul.f32 0.125, %v3394_v47  ;;  %v3456_v49 = vmul.f32 0.125, %v3447_v48  ;;  %v5325_v51 = vpop.f32.mrb[57].mxu0  ;;  %v5331_v52 = vpop.f32.mrb[49].mxu1  ;;  %v5915_v48 = vld [vmem:[#allocation9 + $0x140] ss:$12 sps:$4 sm:$0xff]  }
 0xb52   :  { %v3397_v53 = vpop.f32.mrb[58].mxu0  ;;  %v3450_v54 = vpop.f32.mrb[50].mxu1 }
 0xb53   :  { %v3455_v57 = vmul.f32 0.125, %v3397_v53  ;;  %v5326_v58 = vpop.f32.mrb[59].mxu0  ;;  %v5332_v59 = vpop.f32.mrb[51].mxu1  ;;  %v3458_v60 = vsel %vm6371_vm6, %v3454_v50, -1e+30  ;;  %v3457_v37 = vmul.f32 0.125, %v3450_v54 }
 0xb54   :  { %v3462_v62 = vsel %vm2115_vm7, %v3458_v60, -inf  ;;  %v3460_v24 = vsel %vm6383_vm8, %v3456_v49, -1e+30  ;;  %v5919_v53 = vld [vmem:[#allocation9 + $0x158] ss:$12 sps:$4 sm:$0xff]  }
 0xb55   :  { %3463 = vmax.xlane.f32.xlu0 %v3462_v62  ;;  %v3459_v15 = vsel %vm6371_vm6, %v3455_v57, -1e+30  ;;  %v3468_v23 = vsel %vm2115_vm7, %v3460_v24, -inf  ;;  %v3461_v0 = vsel %vm6383_vm8, %v3457_v37, -1e+30 }
 0xb56   :  { %v3465_v63 = vsel %vm2115_vm7, %v3459_v15, -inf  ;;  %v3471_v3 = vsel %vm2115_vm7, %v3461_v0, -inf  ;;  %v5908_v54 = vld [vmem:[#allocation9 + $0x120] ss:$12 sps:$4 sm:$0xff]   ;;  %v5914_v58 = vld [vmem:[#allocation9 + $0x13c] ss:$12 sps:$4 sm:$0xff]  }
 0xb57   :  { %3466 = vmax.xlane.f32.xlu1 %v3465_v63  ;;  %v5912_v59 = vld [vmem:[#allocation9 + $0x138] ss:$12 sps:$4 sm:$0xff]   ;;  %v5916_v62 = vld [vmem:[#allocation9 + $0x150] ss:$12 sps:$4 sm:$0xff]  }
 0xb58   :  { %v5922_v37 = vld [vmem:[#allocation9 + $0x16c] ss:$12 sps:$4 sm:$0xff]  }
 0xb59   :  { %3469 = vmax.xlane.f32.xlu0 %v3468_v23 }
 0xb5d   :  { %3472 = vmax.xlane.f32.xlu0 %v3471_v3 }
 0xbe2   :  { %v3464_v4 = vpop.xlane.xlu0 %3463 }
 0xbe3   :  { %v3474_v13 = vsub.f32 %v3458_v60, %v3464_v4  ;;  %v5918_v60 = vld [vmem:[#allocation9 + $0x154] ss:$12 sps:$4 sm:$0xff]  }
 0xbe4   :  { %v3467_v5 = vpop.xlane.xlu1 %3466 }
 0xbe5   :  { %v3478_v6 = vmul.f32 1.442695, %v3474_v13  ;;  %v3475_v11 = vsub.f32 %v3459_v15, %v3467_v5  ;;  %v5920_v15 = vld [vmem:[#allocation9 + $0x168] ss:$12 sps:$4 sm:$0xff]  }
 0xbe6   :  { %v3470_v16 = vpop.xlane.xlu0 %3469 }
 0xbe7   :  { %6004 = vpow2.f32 %v3478_v6  ;;  %v3480_v17 = vmul.f32 1.442695, %v3475_v11  ;;  %v3476_v18 = vsub.f32 %v3460_v24, %v3470_v16  ;;  %v5923_v24 = vld [vmem:[#allocation9 + $0x170] ss:$12 sps:$4 sm:$0xff]  }
 0xbe9   :  { %6006 = vpow2.f32 %v3480_v17  ;;  %v3482_v19 = vmul.f32 1.442695, %v3476_v18  ;;  %v3810_v17 = vsel %vm1998_vm1, %v6344_v28, 0  ;;  %v3857_v18 = vsel %vm1998_vm1, %v6353_v41, 0 }
 0xbea   :  { %v3473_v21 = vpop.xlane.xlu0 %3472 }
 0xbeb   :  { %6008 = vpow2.f32 %v3482_v19  ;;  %v3477_v22 = vsub.f32 %v3461_v0, %v3473_v21 }
 0xbed   :  { %v3484_v25 = vmul.f32 1.442695, %v3477_v22 }
 0xbef   :  { %6010 = vpow2.f32 %v3484_v25 }
 0xbf1   :  { %v6005_v27 = vpop.eup %6004 }
 0xbf2   :  { %v3486_v31 = vsel %vm2115_vm7, %v6005_v27, 0.0 }
 0xbf3   :  { %v6007_v39 = vpop.eup %6006  ;;  %3487 = vadd.xlane.f32.xlu0 %v3486_v31 }
 0xbf4   :  { %v3489_v32 = vsel %vm2115_vm7, %v6007_v39, 0.0 }
 0xbf5   :  { %v6009_v26 = vpop.eup %6008  ;;  %3490 = vadd.xlane.f32.xlu1 %v3489_v32 }
 0xbf6   :  { %v3492_v14 = vsel %vm2115_vm7, %v6009_v26, 0.0 }
 0xbf7   :  { %3493 = vadd.xlane.f32.xlu0 %v3492_v14 }
 0xbf9   :  { %v6011_v33 = vpop.eup %6010 }
 0xbfa   :  { %v3495_v1 = vsel %vm2115_vm7, %v6011_v33, 0.0 }
 0xbfb   :  { %3496 = vadd.xlane.f32.xlu1 %v3495_v1 }
 0xc0c   :  { %3557 = vrot.lane.b32.xlu1 %v6355_v42, %s6171_s17 }
 0xc0d   :  { %3509 = vrot.lane.b32.xlu0 %v6346_v29, %s6171_s17 }
 0xc80   :  { %v3488_v34 = vpop.xlane.xlu0 %3487 }
 0xc81   :  { %6012 = vrcp.f32 %v3488_v34 }
 0xc82   :  { %v3491_v35 = vpop.xlane.xlu1 %3490 }
 0xc83   :  { %6014 = vrcp.f32 %v3491_v35 }
 0xc84   :  { %v3494_v9 = vpop.xlane.xlu0 %3493 }
 0xc85   :  { %6016 = vrcp.f32 %v3494_v9 }
 0xc88   :  { %v3510_v38 = vpop.permute.xlu0 %3509  ;;  %v3497_v8 = vpop.xlane.xlu1 %3496 }
 0xc89   :  { %6018 = vrcp.f32 %v3497_v8  ;;  %5334 = vmatpush3.bf16.msra.mxu0 %v3510_v38 }
 0xc8a   :  { %5345 = vmatprep.subr.bf16.mxu0 %v5911_v36 }
 0xc8b   :  { %v6013_v44 = vpop.eup %6012 }
 0xc8c   :  { %v3558_v45 = vpop.permute.xlu1 %3557  ;;  %v3502_v42 = vmul.f32 %v6013_v44, %v6005_v27 }
 0xc8d   :  { %v6015_v46 = vpop.eup %6014  ;;  %5340 = vmatpush3.bf16.msra.mxu1 %v3558_v45 }
 0xc8e   :  { %v3503_v47 = vmul.f32 %v6015_v46, %v6007_v39  ;;  %3692 = vmatprep.subr.bf16.mxu1 %v5910_v40 }
 0xc8f   :  { %v6017_v50 = vpop.eup %6016 }
 0xc90   :  { %v3506_v29 = vpack.c.bf16 %v3503_v47, %v3502_v42  ;;  %v3504_v51 = vmul.f32 %v6017_v50, %v6009_v26 }
 0xc92   :  { %5336 = vmatmul.mubr.msk.bf16.vlgmr.msra.gmra.mrb[60].mxu0 %vm2115_vm7, %v3506_v29 }
 0xc93   :  { %v6019_v49 = vpop.eup %6018  ;;  %5346 = vmatpush3.bf16.msra.mxu0 %v5911_v36 }
 0xc94   :  { %v3505_v52 = vmul.f32 %v6019_v49, %v6011_v33  ;;  %5347 = vmatprep.subr.bf16.mxu0 %v5915_v48 }
 0xc96   :  { %v3507_v57 = vpack.c.bf16 %v3505_v52, %v3504_v51 }
 0xc97   :  { %5348 = vmatpush3.bf16.msra.mxu0 %v5915_v48 }
 0xc98   :  { %5342 = vmatmul.mubr.msk.bf16.vlgmr.msra.gmra.mrb[52].mxu1 %vm2115_vm7, %v3507_v57  ;;  %5349 = vmatprep.subr.bf16.mxu0 %v5919_v53 }
 0xc99   :  { %3693 = vmatpush1.bf16.msra.mxu1 %v5908_v54  ;;  %3724 = vmatprep.mubr.bf16.mxu1 %v6168_v30 }
 0xc9a   :  { %3694 = vmatprep.subr.bf16.mxu1 %v5914_v58 }
 0xc9b   :  { %5350 = vmatpush3.bf16.msra.mxu0 %v5919_v53 }
 0xc9c   :  { %5351 = vmatprep.subr.bf16.mxu0 %v5923_v24 }
 0xc9d   :  { %3695 = vmatpush1.bf16.msra.mxu1 %v5912_v59 }
 0xc9e   :  { %3696 = vmatprep.subr.bf16.mxu1 %v5918_v60 }
 0xc9f   :  { %5352 = vmatpush3.bf16.msra.mxu0 %v5923_v24 }
 0xca0   :  { %5357 = vmatprep.subr.bf16.mxu0 %v6169_v55 }
 0xca1   :  { %3697 = vmatpush1.bf16.msra.mxu1 %v5916_v62 }
 0xca2   :  { %3698 = vmatprep.subr.bf16.mxu1 %v5922_v37 }
 0xca5   :  { %3699 = vmatpush1.bf16.msra.mxu1 %v5920_v15 }
 0xca6   :  { %5369 = vmatprep.subr.bf16.mxu1 %v6169_v55 }
 0xd65   :  { %v3549_v63 = vpop.f32.mrb[60].mxu0 }
 0xd66   :  { %v5337_v23 = vpop.f32.mrb[61].mxu0 }
 0xd67   :  { %v3552_v0 = vpop.f32.mrb[62].mxu0  ;;  %v5933_v23 = vld [vmem:[#allocation9 + $0x188] ss:$12 sps:$4 sm:$0xff]  }
 0xd68   :  { %v3604_v3 = vpack.c.bf16 %v3552_v0, %v3549_v63  ;;  %v5338_v4 = vpop.f32.mrb[63].mxu0  ;;  %v5926_v63 = vld [vmem:[#allocation9 + $0x184] ss:$12 sps:$4 sm:$0xff]  }
 0xd6a   :  { %5027 = vmatmul.mubr.msk.bf16.vlgmr.msra.gmra.mrb[28].mxu1 %vm1998_vm1, %v3604_v3  ;;  %5353 = vmatprep.mubr.msk.bf16.mxu0 %vm1998_vm1, %v3604_v3 }
 0xd6b   :  { %5370 = vmatpush3.bf16.msra.mxu1 %v6358_v56  ;;  %v3597_v13 = vpop.f32.mrb[52].mxu1  ;;  %3734 = vmatprep.mubr.bf16.mxu1 %v6168_v30 }
 0xd6c   :  { %v5343_v5 = vpop.f32.mrb[53].mxu1  ;;  %4130 = vmatprep.subr.bf16.mxu1 %v5926_v63 }
 0xd6d   :  { %v3600_v6 = vpop.f32.mrb[54].mxu1 }
 0xd6e   :  { %v3605_v11 = vpack.c.bf16 %v3600_v6, %v3597_v13  ;;  %v5344_v16 = vpop.f32.mrb[55].mxu1 }
 0xd6f   :  { %v5929_v16 = vld [vmem:[#allocation9 + $0x19c] ss:$12 sps:$4 sm:$0xff]  }
 0xd70   :  { %5354 = vmatmul.mubr.msk.bf16.vlgmr.msra.gmra.mrb[32].mxu0 %vm1998_vm1, %v3605_v11 }
 0xd71   :  { %5358 = vmatpush3.bf16.xpose.msra.mxu0 %v3810_v17  ;;  %5359 = vmatprep.mubr.msk.bf16.mxu0 %vm6170_vm0, %v6169_v55  ;;  %v5927_v17 = vld [vmem:[#allocation9 + $0x198] ss:$12 sps:$4 sm:$0xff]  }
 0xd72   :  { %5028 = vmatmul.mubr.msk.bf16.gmra.mrb[32].mxu1 %vm1998_vm1, %v3605_v11  ;;  %5363 = vmatprep.subr.bf16.mxu0 %v6169_v55 }
 0xd73   :  { %5371 = vmatprep.mubr.msk.bf16.mxu1 %vm6170_vm0, %v6169_v55 }
 0xd78   :  { %5360 = vmatmul.mubr.msk.bf16.vlgmr.msra.gmra.mrb[64].mxu0 %vm1998_vm1, %v6312_v61 }
 0xd79   :  { %5364 = vmatpush3.bf16.xpose.msra.mxu0 %v3857_v18  ;;  %5365 = vmatprep.mubr.msk.bf16.mxu0 %vm6170_vm0, %v6169_v55  ;;  %v5932_v18 = vld [vmem:[#allocation9 + $0x1b4] ss:$12 sps:$4 sm:$0xff]  }
 0xd7a   :  { %5375 = vmatprep.subr.bf16.mxu0 %v6169_v55 }
 0xd80   :  { %5366 = vmatmul.mubr.msk.bf16.vlgmr.msra.gmra.mrb[68].mxu0 %vm1998_vm1, %v6323_v10 }
 0xd81   :  { %5376 = vmatpush3.bf16.msra.mxu0 %v6360_v2  ;;  %5377 = vmatprep.mubr.msk.bf16.mxu0 %vm6170_vm0, %v6169_v55 }
 0xd82   :  { %5381 = vmatprep.subr.bf16.mxu0 %v5933_v23 }
 0xe4b   :  { %v3846_v19 = vpop.f32.mrb[64].mxu0 }
 0xe4c   :  { %v3900_v21 = vmul.f32 0.125, %v3846_v19  ;;  %v5361_v22 = vpop.f32.mrb[65].mxu0 }
 0xe4d   :  { %v3849_v25 = vpop.f32.mrb[66].mxu0 }
 0xe4e   :  { %v3901_v27 = vmul.f32 0.125, %v3849_v25  ;;  %v5362_v31 = vpop.f32.mrb[67].mxu0  ;;  %v3904_v39 = vsel %vm6371_vm6, %v3900_v21, -1e+30  ;;  %v5930_v25 = vld [vmem:[#allocation9 + $0x1b0] ss:$12 sps:$4 sm:$0xff]  }
 0xe4f   :  { %v3908_v32 = vsel %vm2115_vm7, %v3904_v39, -inf  ;;  %v5936_v31 = vld [vmem:[#allocation9 + $0x1cc] ss:$12 sps:$4 sm:$0xff]  }
 0xe50   :  { %3909 = vmax.xlane.f32.xlu1 %v3908_v32  ;;  %v3905_v26 = vsel %vm6371_vm6, %v3901_v27, -1e+30  ;;  %v5934_v32 = vld [vmem:[#allocation9 + $0x1c8] ss:$12 sps:$4 sm:$0xff]  }
 0xe51   :  { %v3911_v14 = vsel %vm2115_vm7, %v3905_v26, -inf }
 0xe52   :  { %3912 = vmax.xlane.f32.xlu0 %v3911_v14  ;;  %v5939_v14 = vld [vmem:[#allocation9 + $0x1d0] ss:$12 sps:$4 sm:$0xff]  }
 0xe53   :  { %v3893_v33 = vpop.f32.mrb[68].mxu0 }
 0xe54   :  { %v3902_v1 = vmul.f32 0.125, %v3893_v33  ;;  %v5367_v34 = vpop.f32.mrb[69].mxu0 }
 0xe55   :  { %v3896_v35 = vpop.f32.mrb[70].mxu0 }
 0xe56   :  { %v3903_v9 = vmul.f32 0.125, %v3896_v35  ;;  %v5368_v36 = vpop.f32.mrb[71].mxu0  ;;  %v3906_v38 = vsel %vm6383_vm8, %v3902_v1, -1e+30 }
 0xe57   :  { %v3914_v8 = vsel %vm2115_vm7, %v3906_v38, -inf }
 0xe58   :  { %3915 = vmax.xlane.f32.xlu0 %v3914_v8  ;;  %v3907_v40 = vsel %vm6383_vm8, %v3903_v9, -1e+30 }
 0xe59   :  { %v3917_v44 = vsel %vm2115_vm7, %v3907_v40, -inf }
 0xe5a   :  { %3918 = vmax.xlane.f32.xlu1 %v3917_v44 }
 0xedd   :  { %v3910_v45 = vpop.xlane.xlu1 %3909 }
 0xede   :  { %v3920_v46 = vsub.f32 %v3904_v39, %v3910_v45  ;;  %v5937_v39 = vld [vmem:[#allocation9 + $0x1a0] ss:$12 sps:$4 sm:$0xff]  }
 0xedf   :  { %v3913_v42 = vpop.xlane.xlu0 %3912 }
 0xee0   :  { %v3924_v47 = vmul.f32 1.442695, %v3920_v46  ;;  %v3921_v29 = vsub.f32 %v3905_v26, %v3913_v42  ;;  %v5938_v26 = vld [vmem:[#allocation9 + $0x1b8] ss:$12 sps:$4 sm:$0xff]  }
 0xee2   :  { %6020 = vpow2.f32 %v3924_v47  ;;  %v3926_v48 = vmul.f32 1.442695, %v3921_v29 }
 0xee4   :  { %6022 = vpow2.f32 %v3926_v48 }
 0xee5   :  { %v3916_v50 = vpop.xlane.xlu0 %3915 }
 0xee6   :  { %v3922_v49 = vsub.f32 %v3906_v38, %v3916_v50 }
 0xee7   :  { %v3919_v51 = vpop.xlane.xlu1 %3918 }
 0xee8   :  { %v3928_v52 = vmul.f32 1.442695, %v3922_v49  ;;  %v3923_v53 = vsub.f32 %v3907_v40, %v3919_v51 }
 0xeea   :  { %6024 = vpow2.f32 %v3928_v52  ;;  %v3930_v54 = vmul.f32 1.442695, %v3923_v53 }
 0xeec   :  { %v6021_v57 = vpop.eup %6020  ;;  %6026 = vpow2.f32 %v3930_v54 }
 0xeed   :  { %v3932_v58 = vsel %vm2115_vm7, %v6021_v57, 0.0 }
 0xeee   :  { %v6023_v59 = vpop.eup %6022  ;;  %3933 = vadd.xlane.f32.xlu0 %v3932_v58 }
 0xeef   :  { %v3935_v60 = vsel %vm2115_vm7, %v6023_v59, 0.0 }
 0xef0   :  { %3936 = vadd.xlane.f32.xlu1 %v3935_v60 }
 0xef4   :  { %v6025_v62 = vpop.eup %6024 }
 0xef5   :  { %v3938_v37 = vsel %vm2115_vm7, %v6025_v62, 0.0 }
 0xef6   :  { %v6027_v15 = vpop.eup %6026  ;;  %3939 = vadd.xlane.f32.xlu0 %v3938_v37 }
 0xef7   :  { %v3941_v24 = vsel %vm2115_vm7, %v6027_v15, 0.0 }
 0xef8   :  { %3942 = vadd.xlane.f32.xlu1 %v3941_v24 }
 0xf09   :  { %4245 = vrot.lane.b32.xlu1 %v6312_v61, %s6171_s17 }
 0xf0c   :  { %4248 = vrot.lane.b32.xlu0 %v6344_v28, %s6171_s17 }
 0xf0d   :  { %4301 = vrot.lane.b32.xlu1 %v6353_v41, %s6171_s17  ;;  %v5924_v41 = vld [vmem:[#allocation9 + $0x180] ss:$12 sps:$4 sm:$0xff]  }
 0xf11   :  { %4298 = vrot.lane.b32.xlu1 %v6323_v10, %s6171_s17 }
 0xf7b   :  { %v3934_v0 = vpop.xlane.xlu0 %3933 }
 0xf7c   :  { %6028 = vrcp.f32 %v3934_v0 }
 0xf7d   :  { %v3937_v3 = vpop.xlane.xlu1 %3936 }
 0xf7e   :  { %6030 = vrcp.f32 %v3937_v3 }
 0xf83   :  { %v3940_v4 = vpop.xlane.xlu0 %3939 }
 0xf84   :  { %6032 = vrcp.f32 %v3940_v4 }
 0xf85   :  { %v3943_v61 = vpop.xlane.xlu1 %3942 }
 0xf86   :  { %v6029_v13 = vpop.eup %6028  ;;  %6034 = vrcp.f32 %v3943_v61 }
 0xf87   :  { %v3948_v5 = vmul.f32 %v6029_v13, %v6021_v57  ;;  %v4249_v45 = vpop.permute.xlu0 %4248 }
 0xf88   :  { %v6031_v28 = vpop.eup %6030  ;;  %v4254_v29 = vsel %vm1998_vm1, %v4249_v45, 0 }
 0xf89   :  { %v3949_v6 = vmul.f32 %v6031_v28, %v6023_v59  ;;  %v4246_v33 = vpop.permute.xlu1 %4245 }
 0xf8b   :  { %v3952_v11 = vpack.c.bf16 %v3949_v6, %v3948_v5 }
 0xf8d   :  { %5372 = vmatmul.mubr.msk.bf16.vlgmr.msra.gmra.mrb[56].mxu1 %vm2115_vm7, %v3952_v11  ;;  %v4302_v35 = vpop.permute.xlu1 %4301 }
 0xf8e   :  { %v6033_v10 = vpop.eup %6032  ;;  %4131 = vmatpush1.bf16.msra.mxu1 %v5924_v41  ;;  %4162 = vmatprep.mubr.bf16.mxu1 %v6168_v30  ;;  %v4307_v8 = vsel %vm1998_vm1, %v4302_v35, 0  ;;  %v5942_v35 = vld [vmem:[#allocation9 + $0x1e4] ss:$12 sps:$4 sm:$0xff]  }
 0xf8f   :  { %4132 = vmatprep.subr.bf16.mxu1 %v5929_v16  ;;  %v3950_v21 = vmul.f32 %v6033_v10, %v6025_v62 }
 0xf90   :  { %v6035_v19 = vpop.eup %6034 }
 0xf91   :  { %v3951_v22 = vmul.f32 %v6035_v19, %v6027_v15  ;;  %v4299_v48 = vpop.permute.xlu1 %4298 }
 0xf92   :  { %4133 = vmatpush1.bf16.msra.mxu1 %v5927_v17 }
 0xf93   :  { %v3953_v27 = vpack.c.bf16 %v3951_v22, %v3950_v21  ;;  %4134 = vmatprep.subr.bf16.mxu1 %v5932_v18 }
 0xf95   :  { %5378 = vmatmul.mubr.msk.bf16.vlgmr.msra.gmra.mrb[72].mxu0 %vm2115_vm7, %v3953_v27 }
 0xf96   :  { %4135 = vmatpush1.bf16.msra.mxu1 %v5930_v25  ;;  %5382 = vmatpush3.bf16.msra.mxu0 %v5933_v23 }
 0xf97   :  { %4136 = vmatprep.subr.bf16.mxu1 %v5936_v31  ;;  %5383 = vmatprep.subr.bf16.mxu0 %v5937_v39 }
 0xf9a   :  { %4137 = vmatpush1.bf16.msra.mxu1 %v5934_v32  ;;  %5384 = vmatpush3.bf16.msra.mxu0 %v5937_v39 }
 0xf9b   :  { %5385 = vmatprep.subr.bf16.mxu0 %v5938_v26  ;;  %5399 = vmatprep.subr.bf16.mxu1 %v6169_v55 }
 0xf9e   :  { %5386 = vmatpush3.bf16.msra.mxu0 %v5938_v26 }
 0xf9f   :  { %5387 = vmatprep.subr.bf16.mxu0 %v5939_v14 }
 0xfa2   :  { %5388 = vmatpush3.bf16.msra.mxu0 %v5939_v14 }
 0xfa3   :  { %5393 = vmatprep.subr.bf16.mxu0 %v6169_v55 }
0x1060   :  { %v3991_v1 = vpop.f32.mrb[56].mxu1 }
0x1061   :  { %v5373_v34 = vpop.f32.mrb[57].mxu1 }
0x1062   :  { %v3994_v9 = vpop.f32.mrb[58].mxu1 }
0x1063   :  { %v4042_v36 = vpack.c.bf16 %v3994_v9, %v3991_v1  ;;  %v5374_v38 = vpop.f32.mrb[59].mxu1 }
0x1065   :  { %5047 = vmatmul.mubr.msk.bf16.vlgmr.msra.gmra.mrb[28].mxu1 %vm1998_vm1, %v4042_v36  ;;  %5389 = vmatprep.mubr.msk.bf16.mxu0 %vm1998_vm1, %v4042_v36 }
0x1066   :  { %5400 = vmatpush3.bf16.xpose.msra.mxu1 %v4307_v8  ;;  %4172 = vmatprep.mubr.bf16.mxu1 %v6168_v30 }
0x1067   :  { %5411 = vmatprep.subr.bf16.mxu1 %v6169_v55 }
0x1068   :  { %v4035_v40 = vpop.f32.mrb[72].mxu0 }
0x1069   :  { %v5379_v44 = vpop.f32.mrb[73].mxu0 }
0x106a   :  { %v4038_v46 = vpop.f32.mrb[74].mxu0 }
0x106b   :  { %v4043_v42 = vpack.c.bf16 %v4038_v46, %v4035_v40  ;;  %v5380_v47 = vpop.f32.mrb[75].mxu0  ;;  %v5950_v40 = vld [vmem:[#allocation9 + $0x200] ss:$12 sps:$4 sm:$0xff]  }
0x106c   :  { %v5940_v47 = vld [vmem:[#allocation9 + $0x1e0] ss:$12 sps:$4 sm:$0xff]  }
0x106d   :  { %5048 = vmatmul.mubr.msk.bf16.gmra.mrb[32].mxu1 %vm1998_vm1, %v4043_v42  ;;  %5390 = vmatmul.mubr.msk.bf16.vlgmr.msra.gmra.mrb[32].mxu0 %vm1998_vm1, %v4043_v42 }
0x106e   :  { %5394 = vmatpush3.bf16.xpose.msra.mxu0 %v4254_v29  ;;  %5395 = vmatprep.mubr.msk.bf16.mxu0 %vm6170_vm0, %v6169_v55 }
0x106f   :  { %5401 = vmatprep.mubr.msk.bf16.mxu1 %vm6170_vm0, %v6169_v55  ;;  %5405 = vmatprep.subr.bf16.mxu0 %v6169_v55 }
0x1075   :  { %5396 = vmatmul.mubr.msk.bf16.vlgmr.msra.gmra.mrb[76].mxu0 %vm1998_vm1, %v4246_v33  ;;  %5402 = vmatmul.mubr.msk.bf16.vlgmr.msra.gmra.mrb[60].mxu1 %vm1998_vm1, %v4299_v48  ;;  %v5946_v33 = vld [vmem:[#allocation9 + $0x1e8] ss:$12 sps:$4 sm:$0xff]  }
0x1076   :  { %5407 = vmatprep.mubr.msk.bf16.mxu0 %vm6170_vm0, %v6169_v55  ;;  %5413 = vmatprep.mubr.msk.bf16.mxu1 %vm6170_vm0, %v6169_v55  ;;  %v5945_v48 = vld [vmem:[#allocation9 + $0x1fc] ss:$12 sps:$4 sm:$0xff]  }
0x1148   :  { %v4290_v50 = vpop.f32.mrb[76].mxu0  ;;  %v4343_v49 = vpop.f32.mrb[60].mxu1 }
0x1149   :  { %v4350_v51 = vmul.f32 0.125, %v4290_v50  ;;  %v4352_v52 = vmul.f32 0.125, %v4343_v49  ;;  %v5397_v53 = vpop.f32.mrb[77].mxu0  ;;  %v5403_v54 = vpop.f32.mrb[61].mxu1  ;;  %v5943_v50 = vld [vmem:[#allocation9 + $0x1f8] ss:$12 sps:$4 sm:$0xff]  }
0x114a   :  { %v4293_v57 = vpop.f32.mrb[78].mxu0  ;;  %v4346_v58 = vpop.f32.mrb[62].mxu1  ;;  %v5949_v49 = vld [vmem:[#allocation9 + $0x214] ss:$12 sps:$4 sm:$0xff]   ;;  %v5954_v54 = vld [vmem:[#allocation9 + $0x218] ss:$12 sps:$4 sm:$0xff]  }
0x114b   :  { %v4351_v59 = vmul.f32 0.125, %v4293_v57  ;;  %v5398_v60 = vpop.f32.mrb[79].mxu0  ;;  %v5404_v62 = vpop.f32.mrb[63].mxu1  ;;  %v4354_v37 = vsel %vm6371_vm6, %v4350_v51, -1e+30  ;;  %v4353_v24 = vmul.f32 0.125, %v4346_v58 }
0x114c   :  { %v4358_v15 = vsel %vm2115_vm7, %v4354_v37, -inf  ;;  %v4356_v63 = vsel %vm6383_vm8, %v4352_v52, -1e+30  ;;  %v5947_v51 = vld [vmem:[#allocation9 + $0x210] ss:$12 sps:$4 sm:$0xff]  }
0x114d   :  { %4359 = vmax.xlane.f32.xlu0 %v4358_v15  ;;  %v4355_v55 = vsel %vm6371_vm6, %v4351_v59, -1e+30  ;;  %v4364_v0 = vsel %vm2115_vm7, %v4356_v63, -inf  ;;  %v4357_v3 = vsel %vm6383_vm8, %v4353_v24, -1e+30 }
0x114e   :  { %v4361_v23 = vsel %vm2115_vm7, %v4355_v55, -inf  ;;  %v4367_v4 = vsel %vm2115_vm7, %v4357_v3, -inf  ;;  %v5953_v52 = vld [vmem:[#allocation9 + $0x22c] ss:$12 sps:$4 sm:$0xff]   ;;  %v5951_v53 = vld [vmem:[#allocation9 + $0x228] ss:$12 sps:$4 sm:$0xff]  }
0x114f   :  { %4362 = vmax.xlane.f32.xlu1 %v4361_v23  ;;  %v5955_v57 = vld [vmem:[#allocation9 + $0x230] ss:$12 sps:$4 sm:$0xff]  }
0x1151   :  { %4365 = vmax.xlane.f32.xlu0 %v4364_v0  ;;  %v1981_v0 = vld [vmem:[%s6678_s4] sm:$0x7]  ;;  %s6172_s4 = smov [#allocation10]  }
0x1152   :  { %s4719_s20 = sshll.u32 %s6172_s4, 4  ;;  %s4720_s20 = int_to_ptr.vmem [resolvable:$true] %s4719_s20 }
0x1153   :  { %s6128_s21 = scalar_lea.vmem %s4720_s20, 1536  ;;  %p6133_p0 = scmp.lt.s32.totalorder %s4720_s20, %s4720_s20 }
0x1154   :  { %p6129_p13 = scmp.ne.s32.totalorder %s4720_s20, %s6128_s21  ;;  %p6134_p1 = scmp.lt.s32.totalorder %s6128_s21, %s6128_s21 }
0x1155   :  { %4368 = vmax.xlane.f32.xlu0 %v4367_v4  ;;  %v1986_v4 = vrot.slane %v1981_v0, %v6366_v12 }
0x1156   :  { %p6135_p2 = por %p6134_p1, %p6133_p0 }
0x1158   :  { %p6136_p3 = pnand %p6135_p2, %p6129_p13 }
0x11da   :  { %v4360_v61 = vpop.xlane.xlu0 %4359 }
0x11db   :  { %v4370_v13 = vsub.f32 %v4354_v37, %v4360_v61 }
0x11dc   :  { %v4363_v28 = vpop.xlane.xlu1 %4362 }
0x11dd   :  { %v4374_v20 = vmul.f32 1.442695, %v4370_v13  ;;  %v4371_v5 = vsub.f32 %v4355_v55, %v4363_v28  ;;  %v1993_v13 = vsub.s32 2, %v6363_v7 }
0x11de   :  { %v4366_v6 = vpop.xlane.xlu0 %4365 }
0x11df   :  { %6036 = vpow2.f32 %v4374_v20  ;;  %v4376_v41 = vmul.f32 1.442695, %v4371_v5  ;;  %v4372_v11 = vsub.f32 %v4356_v63, %v4366_v6 }
0x11e1   :  { %6038 = vpow2.f32 %v4376_v41  ;;  %v4378_v16 = vmul.f32 1.442695, %v4372_v11 }
0x11e2   :  { %v4369_v10 = vpop.xlane.xlu0 %4368 }
0x11e3   :  { %6040 = vpow2.f32 %v4378_v16  ;;  %v4373_v17 = vsub.f32 %v4357_v3, %v4369_v10  ;;  %v1989_v3 = vsub.s32 1, %v6363_v7  ;;  %v1994_v16 = vrot.slane %v1981_v0, %v1993_v13 }
0x11e5   :  { %v4380_v18 = vmul.f32 1.442695, %v4373_v17  ;;  %v1990_v61 = vrot.slane %v1981_v0, %v1989_v3 }
0x11e7   :  { %6042 = vpow2.f32 %v4380_v18 }
0x11e9   :  { %v6037_v43 = vpop.eup %6036 }
0x11ea   :  { %v4382_v19 = vsel %vm2115_vm7, %v6037_v43, 0.0 }
0x11eb   :  { %v6039_v21 = vpop.eup %6038  ;;  %4383 = vadd.xlane.f32.xlu0 %v4382_v19 }
0x11ec   :  { %v4385_v22 = vsel %vm2115_vm7, %v6039_v21, 0.0 }
0x11ed   :  { %v6041_v25 = vpop.eup %6040  ;;  %4386 = vadd.xlane.f32.xlu1 %v4385_v22 }
0x11ee   :  { %v4388_v27 = vsel %vm2115_vm7, %v6041_v25, 0.0 }
0x11ef   :  { %4389 = vadd.xlane.f32.xlu0 %v4388_v27 }
0x11f1   :  { %v6043_v31 = vpop.eup %6042 }
0x11f2   :  { %v4391_v39 = vsel %vm2115_vm7, %v6043_v31, 0.0 }
0x11f3   :  { %4392 = vadd.xlane.f32.xlu1 %v4391_v39 }
0x1204   :  { %4453 = vrot.lane.b32.xlu1 %v6360_v2, %s6171_s17 }
0x1205   :  { %4405 = vrot.lane.b32.xlu0 %v6358_v56, %s6171_s17 }
0x1278   :  { %v4384_v32 = vpop.xlane.xlu0 %4383 }
0x1279   :  { %6044 = vrcp.f32 %v4384_v32 }
0x127a   :  { %v4387_v26 = vpop.xlane.xlu1 %4386 }
0x127b   :  { %6046 = vrcp.f32 %v4387_v26 }
0x127c   :  { %v4390_v14 = vpop.xlane.xlu0 %4389 }
0x127d   :  { %6048 = vrcp.f32 %v4390_v14 }
0x1280   :  { %v4393_v1 = vpop.xlane.xlu1 %4392  ;;  %v4406_v34 = vpop.permute.xlu0 %4405 }
0x1281   :  { %6050 = vrcp.f32 %v4393_v1  ;;  %5406 = vmatpush3.bf16.msra.mxu0 %v4406_v34 }
0x1282   :  { %5417 = vmatprep.subr.bf16.mxu0 %v5946_v33 }
0x1283   :  { %v6045_v9 = vpop.eup %6044 }
0x1284   :  { %v4454_v36 = vpop.permute.xlu1 %4453  ;;  %v4398_v2 = vmul.f32 %v6045_v9, %v6037_v43 }
0x1285   :  { %v6047_v38 = vpop.eup %6046  ;;  %5412 = vmatpush3.bf16.msra.mxu1 %v4454_v36 }
0x1286   :  { %v4399_v8 = vmul.f32 %v6047_v38, %v6039_v21  ;;  %4588 = vmatprep.subr.bf16.mxu1 %v5942_v35 }
0x1287   :  { %v6049_v44 = vpop.eup %6048 }
0x1288   :  { %v4402_v56 = vpack.c.bf16 %v4399_v8, %v4398_v2  ;;  %v4400_v46 = vmul.f32 %v6049_v44, %v6041_v25 }
0x128a   :  { %5408 = vmatmul.mubr.msk.bf16.vlgmr.msra.gmra.mrb[80].mxu0 %vm2115_vm7, %v4402_v56 }
0x128b   :  { %v6051_v45 = vpop.eup %6050  ;;  %5418 = vmatpush3.bf16.msra.mxu0 %v5946_v33 }
0x128c   :  { %v4401_v42 = vmul.f32 %v6051_v45, %v6043_v31  ;;  %5419 = vmatprep.subr.bf16.mxu0 %v5950_v40 }
0x128e   :  { %v4403_v29 = vpack.c.bf16 %v4401_v42, %v4400_v46 }
0x128f   :  { %5420 = vmatpush3.bf16.msra.mxu0 %v5950_v40 }
0x1290   :  { %5414 = vmatmul.mubr.msk.bf16.vlgmr.msra.gmra.mrb[64].mxu1 %vm2115_vm7, %v4403_v29  ;;  %5421 = vmatprep.subr.bf16.mxu0 %v5954_v54 }
0x1291   :  { %4589 = vmatpush1.bf16.msra.mxu1 %v5940_v47  ;;  %4620 = vmatprep.mubr.bf16.mxu1 %v6168_v30 }
0x1292   :  { %4590 = vmatprep.subr.bf16.mxu1 %v5945_v48 }
0x1293   :  { %5422 = vmatpush3.bf16.msra.mxu0 %v5954_v54 }
0x1294   :  { %5423 = vmatprep.subr.bf16.mxu0 %v5955_v57 }
0x1295   :  { %4591 = vmatpush1.bf16.msra.mxu1 %v5943_v50 }
0x1296   :  { %4592 = vmatprep.subr.bf16.mxu1 %v5949_v49 }
0x1297   :  { %5424 = vmatpush3.bf16.msra.mxu0 %v5955_v57 }
0x1299   :  { %4593 = vmatpush1.bf16.msra.mxu1 %v5947_v51 }
0x129a   :  { %4594 = vmatprep.subr.bf16.mxu1 %v5953_v52 }
0x129d   :  { %4595 = vmatpush1.bf16.msra.mxu1 %v5951_v53 }
0x135d   :  { %v4445_v58 = vpop.f32.mrb[80].mxu0 }
0x135e   :  { %v5409_v59 = vpop.f32.mrb[81].mxu0 }
0x135f   :  { %v4448_v60 = vpop.f32.mrb[82].mxu0 }
0x1360   :  { %v4500_v62 = vpack.c.bf16 %v4448_v60, %v4445_v58  ;;  %v5410_v37 = vpop.f32.mrb[83].mxu0 }
0x1362   :  { %5067 = vmatmul.mubr.msk.bf16.vlgmr.msra.gmra.mrb[28].mxu1 %vm1998_vm1, %v4500_v62  ;;  %5425 = vmatprep.mubr.msk.bf16.mxu0 %vm1998_vm1, %v4500_v62 }
0x1363   :  { %v4493_v15 = vpop.f32.mrb[64].mxu1  ;;  %4630 = vmatprep.mubr.bf16.mxu1 %v6168_v30 }
0x1364   :  { %v5415_v24 = vpop.f32.mrb[65].mxu1 }
0x1365   :  { %v4496_v55 = vpop.f32.mrb[66].mxu1 }
0x1366   :  { %v4501_v63 = vpack.c.bf16 %v4496_v55, %v4493_v15  ;;  %v5416_v23 = vpop.f32.mrb[67].mxu1 }
0x1368   :  { %5426 = vmatmul.mubr.msk.bf16.vlgmr.msra.gmra.mrb[32].mxu0 %vm1998_vm1, %v4501_v63 }
0x136a   :  { %5068 = vmatmul.mubr.msk.bf16.gmra.mrb[32].mxu1 %vm1998_vm1, %v4501_v63 }
0x1435   :  { %v4622_v30 = vpop.f32.mrb[28].mxu1 }
0x1436   :  { %v5429_v28 = vadd.f32 %v4622_v30, %v1986_v4  ;;  %v4624_v20 = vpop.f32.mrb[29].mxu1 }
0x1437   :  { %v5430_v5 = vadd.f32 %v4624_v20, %v1990_v61  ;;  %v4626_v6 = vpop.f32.mrb[30].mxu1 }
0x1438   :  { %4702 = vst [vmem:[#allocation10] sm:$0xff] %v5429_v28  ;;  %v5431_v41 = vadd.f32 %v4626_v6, %v1986_v4  ;;  %v4628_v11 = vpop.f32.mrb[31].mxu1 }
0x1439   :  { %4703 = vst [vmem:[#allocation10 + $0x8] sm:$0xff] %v5430_v5  ;;  %v5432_v10 = vadd.f32 %v4628_v11, %v1990_v61 }
0x143a   :  { %4705 = vst [vmem:[#allocation10 + $0x18] sm:$0xff] %v5431_v41 }
0x143b   :  { %4706 = vst [vmem:[#allocation10 + $0x20] sm:$0xff] %v5432_v10  ;;  %v5427_v17 = vpop.f32.mrb[32].mxu0 }
0x143c   :  { %v5437_v18 = vadd.f32 %v5427_v17, %v1994_v16  ;;  %v4675_v43 = vpop.f32.mrb[33].mxu0 }
0x143d   :  { %v5438_v12 = vadd.f32 %v4675_v43, %v1994_v16  ;;  %v4632_v19 = vpop.f32.mrb[32].mxu1  ;;  %v5428_v21 = vpop.f32.mrb[34].mxu0 }
0x143e   :  { %4710 = vst [vmem:[#allocation10 + $0x40] sm:$0xff] %v5437_v18  ;;  %v5433_v7 = vadd.f32 %v4632_v19, %v1986_v4  ;;  %v5439_v22 = vadd.f32 %v5428_v21, %v1994_v16  ;;  %v4634_v25 = vpop.f32.mrb[33].mxu1  ;;  %v4678_v27 = vpop.f32.mrb[35].mxu0 }
0x143f   :  { %4704 = vst [vmem:[#allocation10 + $0x10] sm:$0xff] %v5438_v12  ;;  %v5434_v31 = vadd.f32 %v4634_v25, %v1990_v61  ;;  %v5440_v39 = vadd.f32 %v4678_v27, %v1994_v16  ;;  %v4636_v32 = vpop.f32.mrb[34].mxu1 }
0x1440   :  { %4708 = vst [vmem:[#allocation10 + $0x30] sm:$0xff] %v5433_v7  ;;  %4713 = vst [vmem:[#allocation10 + $0x58] sm:$0xff] %v5439_v22  ;;  %v5435_v26 = vadd.f32 %v4636_v32, %v1986_v4  ;;  %v4638_v14 = vpop.f32.mrb[35].mxu1 }
0x1441   :  { %4709 = vst [vmem:[#allocation10 + $0x38] sm:$0xff] %v5434_v31  ;;  %4707 = vst [vmem:[#allocation10 + $0x28] sm:$0xff] %v5440_v39  ;;  %v5436_v33 = vadd.f32 %v4638_v14, %v1990_v61 }
0x1442   :  { %4711 = vst [vmem:[#allocation10 + $0x48] sm:$0xff] %v5435_v26 }
0x1443   :  { %4712 = vst [vmem:[#allocation10 + $0x50] sm:$0xff] %v5436_v33 }
0x1444   :  { %6139 = shalt.err (!%p6136_p3)
}
0x1445   :  { %s6140_s24 = scalar_lea.hbm %s6679_s5, 1536 }
0x1446   :  { %p6141_p4 = scmp.ne.s32.totalorder %s6679_s5, %s6140_s24  ;;  %p6144_p5 = scmp.lt.u32.totalorder %s6140_s24, %s6679_s5 }
0x1448   :  { %p6146_p6 = pnand %p6144_p5, %p6141_p4 }
0x144a   :  { %6149 = shalt.err (!%p6146_p6)
}
0x144b   :  { %4725 = dma.vmem_to_hbm [thread:$0]  %s4720_s20, 1536, %s6679_s5, [#allocation6], %s6163_s2, %s6163_s2, %s6164_s26  }
0x144c   :  { %6156 = dma.done.wait [#allocation6], 1536  }
0x144d   :  { %6157 = vsyncadd [#allocation6], 4294965760 }
0x144e   :  { %4729 = vsyncpa [#allocation5], 1 }
0x144f   :  { %4730 = vsyncpa [#allocation8], 1 }
0x1450   :  { %4731 = vsyncpa [#allocation6], 1 }

</bundles_post_ra>
